<compile_context>
chip_gen: v7x
topology: tpu7x:2x2x1
jax: 0.10.0
libtpu: 0.0.40
codegen_flags: <defaults>
</compile_context>

<pallas_src>
import functools

import jax
import jax.numpy as jnp
import numpy as np
from jax.experimental import pallas as pl
from jax.experimental.pallas import tpu as pltpu

EPS = 1e-5
CIN0 = 256     # module input channels
CMID = 128     # bottleneck mid channels
COUT = 512     # bottleneck output channels


def _round_up(x, m):
    return (x + m - 1) // m * m


def _vmem_limit_bytes():
    # 128 MiB parts (v5e/v6e) -> 96 MiB; 64 MiB parts (v7x) -> 48 MiB.
    try:
        info = pltpu.get_tpu_info()
        cap = int(getattr(info, "vmem_capacity_bytes", 64 * 1024 * 1024))
    except Exception:
        cap = 64 * 1024 * 1024
    return max(32 * 1024 * 1024, min(cap - 16 * 1024 * 1024, 96 * 1024 * 1024))


def _cparams():
    return pltpu.CompilerParams(dimension_semantics=("parallel",),
                                vmem_limit_bytes=_vmem_limit_bytes())


# ----------------------------------------------------------------------------
# Kernel 1: block 1 (1x1 -> 3x3 stride-2 -> 1x1, + 1x1-stride-2 projection)
# computed directly on the compact stride-2 output grid via phase planes.
# ----------------------------------------------------------------------------
def _block1_kernel(x_ref, pmask_ref, omask_ref, w1_ref, b1_ref, w1r_ref,
                   br_ref, w2_ref, b2_ref, w3_ref, b3_ref, o_ref, h1_ref,
                   *, rows, wp):
    # Zero the tail of each phase buffer once: tap reads for padding output
    # rows run up to rows + wp + 1.
    tail = h1_ref.shape[1] - rows
    for p in range(4):
        h1_ref[p, rows:, :] = jnp.zeros((tail, CMID), jnp.bfloat16)

    # conv1 (1x1) over the ee/eo/oe phase planes: one (3*rows, 256) matmul.
    h1_3 = jnp.dot(x_ref[0, :3 * rows, :], w1_ref[...],
                   preferred_element_type=jnp.float32) + b1_ref[...]
    m3 = pmask_ref[:3 * rows, :] > 0.0
    h1_3 = jnp.where(m3, jnp.maximum(h1_3, 0.0), 0.0).astype(jnp.bfloat16)
    for p in range(3):
        h1_ref[p, :rows, :] = h1_3[p * rows:(p + 1) * rows, :]

    # oo phase (the stride-2 centres): conv1 and the 1x1-stride-2 projection
    # fused into a single (256, 640)-wide matmul; x read/cast once.
    t = jnp.dot(x_ref[0, 3 * rows:, :], w1r_ref[...],
                preferred_element_type=jnp.float32)
    m_oo = pmask_ref[3 * rows:, :] > 0.0
    h1_oo = jnp.where(m_oo, jnp.maximum(t[:, :CMID] + b1_ref[...], 0.0), 0.0)
    h1_ref[3, :rows, :] = h1_oo.astype(jnp.bfloat16)
    res = t[:, CMID:] + br_ref[...]

    # conv2 (3x3, stride 2) as 9 accumulating tap matmuls on the compact grid.
    # Tap (ky,kx) lives in phase (ky%2, kx%2) at flat offset (ky//2)*wp+(kx//2).
    acc = jnp.zeros((rows, CMID), jnp.float32)
    for k in range(9):
        ky, kx = k // 3, k % 3
        p = (ky % 2) * 2 + (kx % 2)
        off = (ky // 2) * wp + (kx // 2)
        acc = acc + jnp.dot(h1_ref[p, off:off + rows, :], w2_ref[k],
                            preferred_element_type=jnp.float32)
    o2 = jnp.maximum(acc + b2_ref[...], 0.0).astype(jnp.bfloat16)

    # conv3 (1x1) + projection residual + ReLU; zero padding rows so the next
    # kernel starts from a clean slab; emit bf16 directly in its layout.
    o3 = jnp.dot(o2, w3_ref[...], preferred_element_type=jnp.float32) + b3_ref[...]
    out = jnp.maximum(o3 + res, 0.0)
    o_ref[0] = jnp.where(omask_ref[...] > 0.0, out, 0.0).astype(jnp.bfloat16)


# ----------------------------------------------------------------------------
# Kernel 2: blocks 2..4 (identity residuals) fused back-to-back.
# ----------------------------------------------------------------------------
def _blocks234_kernel(x_ref, mask_ref, w1s_ref, b1s_ref, w2s_ref, b2s_ref,
                      w3s_ref, b3s_ref, o_ref, h1_ref, *, rows, wp):
    guard = (h1_ref.shape[0] - rows) // 2
    zg = jnp.zeros((guard, CMID), jnp.bfloat16)
    h1_ref[:guard, :] = zg                       # zero halo guards once
    h1_ref[guard + rows:, :] = zg
    maskb = jnp.broadcast_to(mask_ref[...] > 0.0, (rows, CMID))   # hoisted

    act = x_ref[0].astype(jnp.float32)           # running activation, f32
    for j in range(3):                            # blocks 2..4, unrolled
        h1 = jnp.dot(act.astype(jnp.bfloat16), w1s_ref[j],
                     preferred_element_type=jnp.float32) + b1s_ref[j]
        h1_ref[guard:guard + rows, :] = jnp.where(
            maskb, jnp.maximum(h1, 0.0), 0.0).astype(jnp.bfloat16)
        # conv2 (3x3 stride 1): 9 accumulating tap matmuls from shifted views.
        acc = jnp.zeros((rows, CMID), jnp.float32)
        for k in range(9):
            ky, kx = k // 3, k % 3
            off = (ky - 1) * wp + (kx - 1)
            acc = acc + jnp.dot(h1_ref[guard + off:guard + off + rows, :],
                                w2s_ref[j, k],
                                preferred_element_type=jnp.float32)
        o2 = jnp.maximum(acc + b2s_ref[j], 0.0).astype(jnp.bfloat16)
        o3 = jnp.dot(o2, w3s_ref[j], preferred_element_type=jnp.float32) + b3s_ref[j]
        # NOTE: padding rows of `act` pick up garbage from wrapped tap reads;
        # benign because h1 is re-masked before every conv2 and the wrapper
        # drops padding positions from the final output.
        act = jnp.maximum(o3 + act, 0.0)          # identity residual + ReLU
    o_ref[0] = act


# ----------------------------------------------------------------------------
# pallas_call wrappers
# ----------------------------------------------------------------------------
def _block1_call(x_ph, pmask, omask, p, wp, rows):
    n = x_ph.shape[0]
    kern = functools.partial(_block1_kernel, rows=rows, wp=wp)
    return pl.pallas_call(
        kern,
        out_shape=jax.ShapeDtypeStruct((n, rows, COUT), jnp.bfloat16),
        grid=(n,),
        in_specs=[
            pl.BlockSpec((1, 4 * rows, CIN0), lambda i: (i, 0, 0)),   # phase slabs
            pl.BlockSpec((4 * rows, 1), lambda i: (0, 0)),            # phase mask
            pl.BlockSpec((rows, 1), lambda i: (0, 0)),                # out mask
            pl.BlockSpec((CIN0, CMID), lambda i: (0, 0)),             # w1
            pl.BlockSpec((1, CMID), lambda i: (0, 0)),                # b1
            pl.BlockSpec((CIN0, CMID + COUT), lambda i: (0, 0)),      # [w1|wr]
            pl.BlockSpec((1, COUT), lambda i: (0, 0)),                # br
            pl.BlockSpec((9, CMID, CMID), lambda i: (0, 0, 0)),       # w2 taps
            pl.BlockSpec((1, CMID), lambda i: (0, 0)),                # b2
            pl.BlockSpec((CMID, COUT), lambda i: (0, 0)),             # w3
            pl.BlockSpec((1, COUT), lambda i: (0, 0)),                # b3
        ],
        out_specs=pl.BlockSpec((1, rows, COUT), lambda i: (i, 0, 0)),
        scratch_shapes=[pltpu.VMEM((4, rows + wp + 8, CMID), jnp.bfloat16)],
        compiler_params=_cparams(),
    )(x_ph, pmask, omask, p["w1"], p["b1"], p["w1r"], p["br"],
      p["w2"], p["b2"], p["w3"], p["b3"])


def _blocks234_call(x_slab, mask, p, wp, rows):
    n = x_slab.shape[0]
    kern = functools.partial(_blocks234_kernel, rows=rows, wp=wp)
    return pl.pallas_call(
        kern,
        out_shape=jax.ShapeDtypeStruct((n, rows, COUT), jnp.float32),
        grid=(n,),
        in_specs=[
            pl.BlockSpec((1, rows, COUT), lambda i: (i, 0, 0)),
            pl.BlockSpec((rows, 1), lambda i: (0, 0)),
            pl.BlockSpec((3, COUT, CMID), lambda i: (0, 0, 0)),
            pl.BlockSpec((3, 1, CMID), lambda i: (0, 0, 0)),
            pl.BlockSpec((3, 9, CMID, CMID), lambda i: (0, 0, 0, 0)),
            pl.BlockSpec((3, 1, CMID), lambda i: (0, 0, 0)),
            pl.BlockSpec((3, CMID, COUT), lambda i: (0, 0, 0)),
            pl.BlockSpec((3, 1, COUT), lambda i: (0, 0, 0)),
        ],
        out_specs=pl.BlockSpec((1, rows, COUT), lambda i: (i, 0, 0)),
        scratch_shapes=[pltpu.VMEM((rows + 2 * (wp + 8), CMID), jnp.bfloat16)],
        compiler_params=_cparams(),
    )(x_slab, mask, p["w1"], p["b1"], p["w2"], p["b2"], p["w3"], p["b3"])


# ----------------------------------------------------------------------------
# JAX glue: phase-plane / padded-slab layouts, masks, forward
# ----------------------------------------------------------------------------
def _phase_slab(x, hout, wout, wp):
    """(N,H,W,256) -> (N, 4*rows, 256) bf16: the padded input split into its 4
    stride-2 phase planes, each laid out in the (hout+2, wp) output-slab
    geometry (plane value (r,c) stored at slab position (r+1, c+1))."""
    n, h, w, c = x.shape
    xp = jnp.pad(x, ((0, 0), (1, 1), (1, 1), (0, 0)))
    slabs = []
    for py in (0, 1):
        for px in (0, 1):
            plane = xp[:, py::2, px::2, :]                 # (n, hout+1, wout+1, c)
            plane = jnp.pad(plane, ((0, 0), (1, 0), (1, wp - wout - 2), (0, 0)))
            slabs.append(plane.reshape(n, (hout + 2) * wp, c))
    return jnp.concatenate(slabs, axis=1).astype(jnp.bfloat16)


def _phase_mask(hin, win, hout, wout, wp):
    m = np.zeros((4, hout + 2, wp), np.float32)
    for idx, (py, px) in enumerate(((0, 0), (0, 1), (1, 0), (1, 1))):
        for r in range(hout + 1):
            if not (1 <= 2 * r + py <= hin):
                continue
            for c in range(wout + 1):
                if 1 <= 2 * c + px <= win:
                    m[idx, r + 1, c + 1] = 1.0
    return jnp.asarray(m.reshape(4 * (hout + 2) * wp, 1))


def _interior_mask(hout, wout, wp):
    m = np.zeros((hout + 2, wp), np.float32)
    m[1:hout + 1, 1:wout + 1] = 1.0
    return jnp.asarray(m.reshape(-1, 1))


@jax.jit
def forward_nhwc(x, params):
    n, hin, win, cin = x.shape
    assert cin == CIN0 and hin % 2 == 0 and win % 2 == 0
    hout, wout = hin // 2, win // 2
    wp = _round_up(wout + 2, 8)          # sublane-aligned slab row width
    rows = (hout + 2) * wp               # stride-2 padded-slab row count

    x_ph = _phase_slab(x, hout, wout, wp)
    pmask = _phase_mask(hin, win, hout, wout, wp)
    omask = _interior_mask(hout, wout, wp)

    # block 1: stride-2 bottleneck + projection residual (bf16 slab output)
    o1 = _block1_call(x_ph, pmask, omask, params["blk1"], wp, rows)
    # blocks 2..4: identity residuals, fused in one kernel
    o = _blocks234_call(o1, omask, params["rest"], wp, rows)
    o = o.reshape(n, hout + 2, wp, COUT)[:, 1:hout + 1, 1:wout + 1, :]
    return o


def forward_nchw(x_nchw, params):
    x = jnp.transpose(x_nchw, (0, 2, 3, 1))
    return jnp.transpose(forward_nhwc(x, params), (0, 3, 1, 2))


# ----------------------------------------------------------------------------
# Parameters (folded eval-mode BN: bf16 weights, f32 shifts)
# ----------------------------------------------------------------------------
def _bn_fold(key, c):
    k1, k2, k3, k4 = jax.random.split(key, 4)
    gamma = 1.0 + 0.1 * jax.random.normal(k1, (c,), jnp.float32)
    beta = 0.1 * jax.random.normal(k2, (c,), jnp.float32)
    mean = 0.1 * jax.random.normal(k3, (c,), jnp.float32)
    var = jax.random.uniform(k4, (c,), jnp.float32, minval=0.5, maxval=1.5)
    scale = gamma / jnp.sqrt(var + EPS)
    shift = beta - mean * scale
    return scale, shift


def _folded_1x1(kw, kbn, cin, cout):
    w = jax.random.normal(kw, (cin, cout), jnp.float32) / np.sqrt(cin)
    scale, shift = _bn_fold(kbn, cout)
    return (w * scale[None, :]).astype(jnp.bfloat16), shift.reshape(1, cout)


def _folded_3x3(kw, kbn, cin, cout):
    w = jax.random.normal(kw, (3, 3, cin, cout), jnp.float32) / np.sqrt(9 * cin)
    scale, shift = _bn_fold(kbn, cout)
    wf = (w * scale[None, None, None, :]).reshape(9, cin, cout)
    return wf.astype(jnp.bfloat16), shift.reshape(1, cout)


def init_params(key):
    ks = iter(jax.random.split(key, 26))
    w1, b1 = _folded_1x1(next(ks), next(ks), CIN0, CMID)
    w2, b2 = _folded_3x3(next(ks), next(ks), CMID, CMID)
    w3, b3 = _folded_1x1(next(ks), next(ks), CMID, COUT)
    wr, br = _folded_1x1(next(ks), next(ks), CIN0, COUT)
    blk1 = dict(w1=w1, b1=b1, w2=w2, b2=b2, w3=w3, b3=b3, wr=wr, br=br,
                w1r=jnp.concatenate([w1, wr], axis=1))   # fused conv1|projection

    w1l, b1l, w2l, b2l, w3l, b3l = [], [], [], [], [], []
    for _ in range(3):                                    # Fx2, Fx3, Fx4
        a, b = _folded_1x1(next(ks), next(ks), COUT, CMID)
        w1l.append(a); b1l.append(b)
        a, b = _folded_3x3(next(ks), next(ks), CMID, CMID)
        w2l.append(a); b2l.append(b)
        a, b = _folded_1x1(next(ks), next(ks), CMID, COUT)
        w3l.append(a); b3l.append(b)
    rest = dict(w1=jnp.stack(w1l), b1=jnp.stack(b1l),
                w2=jnp.stack(w2l), b2=jnp.stack(b2l),
                w3=jnp.stack(w3l), b3=jnp.stack(b3l))
    return dict(blk1=blk1, rest=rest)


# ----------------------------------------------------------------------------
# Pure-JAX reference (same bf16-operand / f32-accumulate arithmetic)
# ----------------------------------------------------------------------------
def _conv_ref(x, w_hwio, stride, padding):
    xb = x.astype(jnp.bfloat16).astype(jnp.float32)
    return jax.lax.conv_general_dilated(
        xb, w_hwio.astype(jnp.float32), (stride, stride), padding,
        dimension_numbers=("NHWC", "HWIO", "NHWC"))


def _bottleneck_ref(x, w1, b1, w2, b2, w3, b3, stride, wr=None, br=None):
    h = jnp.maximum(_conv_ref(x, w1[None, None], 1, "VALID") + b1, 0.0)
    h = jnp.maximum(_conv_ref(h, w2.reshape(3, 3, w2.shape[1], w2.shape[2]),
                              stride, [(1, 1), (1, 1)]) + b2, 0.0)
    h = _conv_ref(h, w3[None, None], 1, "VALID") + b3
    res = x if wr is None else _conv_ref(x, wr[None, None], stride, "VALID") + br
    return jnp.maximum(h + res, 0.0)


def forward_ref_nhwc(x, params):
    p = params["blk1"]
    h = _bottleneck_ref(x, p["w1"], p["b1"], p["w2"], p["b2"], p["w3"], p["b3"],
                        stride=2, wr=p["wr"], br=p["br"])
    h = h.astype(jnp.bfloat16).astype(jnp.float32)   # bf16 handoff, as in kernel
    r = params["rest"]
    for j in range(3):
        h = _bottleneck_ref(h, r["w1"][j], r["b1"][j], r["w2"][j], r["b2"][j],
                            r["w3"][j], r["b3"][j], stride=1)
    return h


# ----------------------------------------------------------------------------
if __name__ == "__main__":
    key = jax.random.PRNGKey(0)
    kx, kp = jax.random.split(key)

    N, C, H, W = 2, 256, 8, 8            # module requires 256 input channels
    x_nchw = jax.random.normal(kx, (N, C, H, W), jnp.float32)
    params = init_params(kp)

    out = jax.block_until_ready(forward_nchw(x_nchw, params))
    assert out.shape == (N, COUT, H // 2, W // 2), out.shape

    ref = jnp.transpose(
        forward_ref_nhwc(jnp.transpose(x_nchw, (0, 2, 3, 1)), params),
        (0, 3, 1, 2))
    np.testing.assert_allclose(np.asarray(out), np.asarray(ref),
                               rtol=2e-2, atol=2e-2)
    print("KERNEL_OK")
</pallas_src>

<mosaic_0001>
module attributes {stable_mosaic.version = 11 : i64} {
  func.func @_block1_kernel(%arg0: i32, %arg1: memref<1x192x256xbf16, #tpu.memory_space<vmem>>, %arg2: memref<192x1xf32, #tpu.memory_space<vmem>>, %arg3: memref<48x1xf32, #tpu.memory_space<vmem>>, %arg4: memref<256x128xbf16, #tpu.memory_space<vmem>>, %arg5: memref<1x128xf32, #tpu.memory_space<vmem>>, %arg6: memref<256x640xbf16, #tpu.memory_space<vmem>>, %arg7: memref<1x512xf32, #tpu.memory_space<vmem>>, %arg8: memref<9x128x128xbf16, #tpu.memory_space<vmem>>, %arg9: memref<1x128xf32, #tpu.memory_space<vmem>>, %arg10: memref<128x512xbf16, #tpu.memory_space<vmem>>, %arg11: memref<1x512xf32, #tpu.memory_space<vmem>>, %arg12: memref<1x48x512xbf16, #tpu.memory_space<vmem>>, %arg13: memref<4x64x128xbf16, #tpu.memory_space<vmem>>) attributes {dimension_semantics = [#tpu.dimension_semantics<parallel>], iteration_bounds = array<i64: 2>, scalar_prefetch = 0 : i64, scratch_operands = 1 : i64, tpu.core_type = #tpu.core_type<tc>, window_params = [{transform_indices = @transform_0, window_bounds = array<i64: 1, 192, 256>}, {pipeline_mode = #tpu.pipeline_mode<synchronous>, transform_indices = @transform_1, window_bounds = array<i64: 192, 1>}, {pipeline_mode = #tpu.pipeline_mode<synchronous>, transform_indices = @transform_2, window_bounds = array<i64: 48, 1>}, {pipeline_mode = #tpu.pipeline_mode<synchronous>, transform_indices = @transform_3, window_bounds = array<i64: 256, 128>}, {pipeline_mode = #tpu.pipeline_mode<synchronous>, transform_indices = @transform_4, window_bounds = array<i64: 1, 128>}, {pipeline_mode = #tpu.pipeline_mode<synchronous>, transform_indices = @transform_5, window_bounds = array<i64: 256, 640>}, {pipeline_mode = #tpu.pipeline_mode<synchronous>, transform_indices = @transform_6, window_bounds = array<i64: 1, 512>}, {pipeline_mode = #tpu.pipeline_mode<synchronous>, transform_indices = @transform_7, window_bounds = array<i64: 9, 128, 128>}, {pipeline_mode = #tpu.pipeline_mode<synchronous>, transform_indices = @transform_8, window_bounds = array<i64: 1, 128>}, {pipeline_mode = #tpu.pipeline_mode<synchronous>, transform_indices = @transform_9, window_bounds = array<i64: 128, 512>}, {pipeline_mode = #tpu.pipeline_mode<synchronous>, transform_indices = @transform_10, window_bounds = array<i64: 1, 512>}, {transform_indices = @transform_11, window_bounds = array<i64: 1, 48, 512>}]} {
    %cst = arith.constant 0.000000e+00 : bf16
    %0 = vector.broadcast %cst : bf16 to vector<16x128xbf16>
    %c0 = arith.constant 0 : index
    %c48 = arith.constant 48 : index
    %c0_0 = arith.constant 0 : index
    %1 = vector.load %arg13[%c0, %c48, %c0_0] : memref<4x64x128xbf16, #tpu.memory_space<vmem>>, vector<1x16x128xbf16>
    %2 = vector.shape_cast %1 : vector<1x16x128xbf16> to vector<16x128xbf16>
    %3 = vector.shape_cast %0 : vector<16x128xbf16> to vector<1x16x128xbf16>
    tpu.vector_store %arg13[%c0, %c48, %c0_0], %3 {strides = array<i32>} : memref<4x64x128xbf16, #tpu.memory_space<vmem>>, vector<1x16x128xbf16>,
    %cst_1 = arith.constant 0.000000e+00 : bf16
    %4 = vector.broadcast %cst_1 : bf16 to vector<16x128xbf16>
    %c1 = arith.constant 1 : index
    %c48_2 = arith.constant 48 : index
    %c0_3 = arith.constant 0 : index
    %5 = vector.load %arg13[%c1, %c48_2, %c0_3] : memref<4x64x128xbf16, #tpu.memory_space<vmem>>, vector<1x16x128xbf16>
    %6 = vector.shape_cast %5 : vector<1x16x128xbf16> to vector<16x128xbf16>
    %7 = vector.shape_cast %4 : vector<16x128xbf16> to vector<1x16x128xbf16>
    tpu.vector_store %arg13[%c1, %c48_2, %c0_3], %7 {strides = array<i32>} : memref<4x64x128xbf16, #tpu.memory_space<vmem>>, vector<1x16x128xbf16>,
    %cst_4 = arith.constant 0.000000e+00 : bf16
    %8 = vector.broadcast %cst_4 : bf16 to vector<16x128xbf16>
    %c2 = arith.constant 2 : index
    %c48_5 = arith.constant 48 : index
    %c0_6 = arith.constant 0 : index
    %9 = vector.load %arg13[%c2, %c48_5, %c0_6] : memref<4x64x128xbf16, #tpu.memory_space<vmem>>, vector<1x16x128xbf16>
    %10 = vector.shape_cast %9 : vector<1x16x128xbf16> to vector<16x128xbf16>
    %11 = vector.shape_cast %8 : vector<16x128xbf16> to vector<1x16x128xbf16>
    tpu.vector_store %arg13[%c2, %c48_5, %c0_6], %11 {strides = array<i32>} : memref<4x64x128xbf16, #tpu.memory_space<vmem>>, vector<1x16x128xbf16>,
    %cst_7 = arith.constant 0.000000e+00 : bf16
    %12 = vector.broadcast %cst_7 : bf16 to vector<16x128xbf16>
    %c3 = arith.constant 3 : index
    %c48_8 = arith.constant 48 : index
    %c0_9 = arith.constant 0 : index
    %13 = vector.load %arg13[%c3, %c48_8, %c0_9] : memref<4x64x128xbf16, #tpu.memory_space<vmem>>, vector<1x16x128xbf16>
    %14 = vector.shape_cast %13 : vector<1x16x128xbf16> to vector<16x128xbf16>
    %15 = vector.shape_cast %12 : vector<16x128xbf16> to vector<1x16x128xbf16>
    tpu.vector_store %arg13[%c3, %c48_8, %c0_9], %15 {strides = array<i32>} : memref<4x64x128xbf16, #tpu.memory_space<vmem>>, vector<1x16x128xbf16>,
    %c0_10 = arith.constant 0 : index
    %c0_11 = arith.constant 0 : index
    %c0_12 = arith.constant 0 : index
    %16 = vector.load %arg1[%c0_10, %c0_11, %c0_12] : memref<1x192x256xbf16, #tpu.memory_space<vmem>>, vector<1x144x256xbf16>
    %17 = vector.shape_cast %16 : vector<1x144x256xbf16> to vector<144x256xbf16>
    %c0_13 = arith.constant 0 : index
    %c0_14 = arith.constant 0 : index
    %18 = vector.load %arg4[%c0_13, %c0_14] : memref<256x128xbf16, #tpu.memory_space<vmem>>, vector<256x128xbf16>
    %cst_15 = arith.constant dense<0.000000e+00> : vector<144x128xf32>
    %19 = tpu.matmul %17, %18, %cst_15 {dimension_numbers = #tpu.dot_dimension_numbers<[1], [0], [0], [1], [0, 0, 1, 1], [], []>} : vector<144x256xbf16>, vector<256x128xbf16>, vector<144x128xf32> -> vector<144x128xf32>
    %c0_16 = arith.constant 0 : index
    %c0_17 = arith.constant 0 : index
    %20 = vector.load %arg5[%c0_16, %c0_17] : memref<1x128xf32, #tpu.memory_space<vmem>>, vector<1x128xf32>
    %21 = vector.broadcast %20 : vector<1x128xf32> to vector<144x128xf32>
    %22 = arith.addf %19, %21 : vector<144x128xf32>
    %c0_18 = arith.constant 0 : index
    %c0_19 = arith.constant 0 : index
    %23 = vector.load %arg2[%c0_18, %c0_19] : memref<192x1xf32, #tpu.memory_space<vmem>>, vector<144x1xf32>
    %cst_20 = arith.constant 0.000000e+00 : f32
    %24 = vector.broadcast %cst_20 : f32 to vector<144x1xf32>
    %25 = arith.cmpf ogt, %23, %24 : vector<144x1xf32>
    %cst_21 = arith.constant 0.000000e+00 : f32
    %26 = vector.broadcast %cst_21 : f32 to vector<144x128xf32>
    %27 = arith.maximumf %22, %26 : vector<144x128xf32>
    %cst_22 = arith.constant 0.000000e+00 : f32
    %28 = vector.shape_cast %25 : vector<144x1xi1> to vector<144x1xi1>
    %29 = vector.broadcast %28 : vector<144x1xi1> to vector<144x128xi1>
    %30 = vector.broadcast %cst_22 : f32 to vector<144x128xf32>
    %31 = arith.select %29, %27, %30 : vector<144x128xi1>, vector<144x128xf32>
    %32 = arith.truncf %31 : vector<144x128xf32> to vector<144x128xbf16>
    %33 = vector.extract_strided_slice %32 {offsets = [0, 0], sizes = [48, 128], strides = [1, 1]} : vector<144x128xbf16> to vector<48x128xbf16>
    %c0_23 = arith.constant 0 : index
    %c0_24 = arith.constant 0 : index
    %c0_25 = arith.constant 0 : index
    %34 = vector.load %arg13[%c0_23, %c0_24, %c0_25] : memref<4x64x128xbf16, #tpu.memory_space<vmem>>, vector<1x48x128xbf16>
    %35 = vector.shape_cast %34 : vector<1x48x128xbf16> to vector<48x128xbf16>
    %36 = vector.shape_cast %33 : vector<48x128xbf16> to vector<1x48x128xbf16>
    tpu.vector_store %arg13[%c0_23, %c0_24, %c0_25], %36 {strides = array<i32>} : memref<4x64x128xbf16, #tpu.memory_space<vmem>>, vector<1x48x128xbf16>,
    %37 = vector.extract_strided_slice %32 {offsets = [48, 0], sizes = [48, 128], strides = [1, 1]} : vector<144x128xbf16> to vector<48x128xbf16>
    %c1_26 = arith.constant 1 : index
    %c0_27 = arith.constant 0 : index
    %c0_28 = arith.constant 0 : index
    %38 = vector.load %arg13[%c1_26, %c0_27, %c0_28] : memref<4x64x128xbf16, #tpu.memory_space<vmem>>, vector<1x48x128xbf16>
    %39 = vector.shape_cast %38 : vector<1x48x128xbf16> to vector<48x128xbf16>
    %40 = vector.shape_cast %37 : vector<48x128xbf16> to vector<1x48x128xbf16>
    tpu.vector_store %arg13[%c1_26, %c0_27, %c0_28], %40 {strides = array<i32>} : memref<4x64x128xbf16, #tpu.memory_space<vmem>>, vector<1x48x128xbf16>,
    %41 = vector.extract_strided_slice %32 {offsets = [96, 0], sizes = [48, 128], strides = [1, 1]} : vector<144x128xbf16> to vector<48x128xbf16>
    %c2_29 = arith.constant 2 : index
    %c0_30 = arith.constant 0 : index
    %c0_31 = arith.constant 0 : index
    %42 = vector.load %arg13[%c2_29, %c0_30, %c0_31] : memref<4x64x128xbf16, #tpu.memory_space<vmem>>, vector<1x48x128xbf16>
    %43 = vector.shape_cast %42 : vector<1x48x128xbf16> to vector<48x128xbf16>
    %44 = vector.shape_cast %41 : vector<48x128xbf16> to vector<1x48x128xbf16>
    tpu.vector_store %arg13[%c2_29, %c0_30, %c0_31], %44 {strides = array<i32>} : memref<4x64x128xbf16, #tpu.memory_space<vmem>>, vector<1x48x128xbf16>,
    %c0_32 = arith.constant 0 : index
    %c144 = arith.constant 144 : index
    %c0_33 = arith.constant 0 : index
    %45 = vector.load %arg1[%c0_32, %c144, %c0_33] : memref<1x192x256xbf16, #tpu.memory_space<vmem>>, vector<1x48x256xbf16>
    %46 = vector.shape_cast %45 : vector<1x48x256xbf16> to vector<48x256xbf16>
    %c0_34 = arith.constant 0 : index
    %c0_35 = arith.constant 0 : index
    %47 = vector.load %arg6[%c0_34, %c0_35] : memref<256x640xbf16, #tpu.memory_space<vmem>>, vector<256x640xbf16>
    %cst_36 = arith.constant dense<0.000000e+00> : vector<48x640xf32>
    %48 = tpu.matmul %46, %47, %cst_36 {dimension_numbers = #tpu.dot_dimension_numbers<[1], [0], [0], [1], [0, 0, 1, 1], [], []>} : vector<48x256xbf16>, vector<256x640xbf16>, vector<48x640xf32> -> vector<48x640xf32>
    %c144_37 = arith.constant 144 : index
    %c0_38 = arith.constant 0 : index
    %49 = vector.load %arg2[%c144_37, %c0_38] : memref<192x1xf32, #tpu.memory_space<vmem>>, vector<48x1xf32>
    %cst_39 = arith.constant 0.000000e+00 : f32
    %50 = vector.broadcast %cst_39 : f32 to vector<48x1xf32>
    %51 = arith.cmpf ogt, %49, %50 : vector<48x1xf32>
    %52 = vector.extract_strided_slice %48 {offsets = [0, 0], sizes = [48, 128], strides = [1, 1]} : vector<48x640xf32> to vector<48x128xf32>
    %c0_40 = arith.constant 0 : index
    %c0_41 = arith.constant 0 : index
    %53 = vector.load %arg5[%c0_40, %c0_41] : memref<1x128xf32, #tpu.memory_space<vmem>>, vector<1x128xf32>
    %54 = vector.broadcast %53 : vector<1x128xf32> to vector<48x128xf32>
    %55 = arith.addf %52, %54 : vector<48x128xf32>
    %cst_42 = arith.constant 0.000000e+00 : f32
    %56 = vector.broadcast %cst_42 : f32 to vector<48x128xf32>
    %57 = arith.maximumf %55, %56 : vector<48x128xf32>
    %cst_43 = arith.constant 0.000000e+00 : f32
    %58 = vector.shape_cast %51 : vector<48x1xi1> to vector<48x1xi1>
    %59 = vector.broadcast %58 : vector<48x1xi1> to vector<48x128xi1>
    %60 = vector.broadcast %cst_43 : f32 to vector<48x128xf32>
    %61 = arith.select %59, %57, %60 : vector<48x128xi1>, vector<48x128xf32>
    %62 = arith.truncf %61 : vector<48x128xf32> to vector<48x128xbf16>
    %c3_44 = arith.constant 3 : index
    %c0_45 = arith.constant 0 : index
    %c0_46 = arith.constant 0 : index
    %63 = vector.load %arg13[%c3_44, %c0_45, %c0_46] : memref<4x64x128xbf16, #tpu.memory_space<vmem>>, vector<1x48x128xbf16>
    %64 = vector.shape_cast %63 : vector<1x48x128xbf16> to vector<48x128xbf16>
    %65 = vector.shape_cast %62 : vector<48x128xbf16> to vector<1x48x128xbf16>
    tpu.vector_store %arg13[%c3_44, %c0_45, %c0_46], %65 {strides = array<i32>} : memref<4x64x128xbf16, #tpu.memory_space<vmem>>, vector<1x48x128xbf16>,
    %66 = vector.extract_strided_slice %48 {offsets = [0, 128], sizes = [48, 512], strides = [1, 1]} : vector<48x640xf32> to vector<48x512xf32>
    %c0_47 = arith.constant 0 : index
    %c0_48 = arith.constant 0 : index
    %67 = vector.load %arg7[%c0_47, %c0_48] : memref<1x512xf32, #tpu.memory_space<vmem>>, vector<1x512xf32>
    %68 = vector.broadcast %67 : vector<1x512xf32> to vector<48x512xf32>
    %69 = arith.addf %66, %68 : vector<48x512xf32>
    %cst_49 = arith.constant 0.000000e+00 : f32
    %70 = vector.broadcast %cst_49 : f32 to vector<48x128xf32>
    %c0_50 = arith.constant 0 : index
    %c0_51 = arith.constant 0 : index
    %c0_52 = arith.constant 0 : index
    %71 = vector.load %arg13[%c0_50, %c0_51, %c0_52] : memref<4x64x128xbf16, #tpu.memory_space<vmem>>, vector<1x48x128xbf16>
    %72 = vector.shape_cast %71 : vector<1x48x128xbf16> to vector<48x128xbf16>
    %c0_53 = arith.constant 0 : index
    %c0_54 = arith.constant 0 : index
    %c0_55 = arith.constant 0 : index
    %73 = vector.load %arg8[%c0_53, %c0_54, %c0_55] : memref<9x128x128xbf16, #tpu.memory_space<vmem>>, vector<1x128x128xbf16>
    %74 = vector.shape_cast %73 : vector<1x128x128xbf16> to vector<128x128xbf16>
    %cst_56 = arith.constant dense<0.000000e+00> : vector<48x128xf32>
    %75 = tpu.matmul %72, %74, %cst_56 {dimension_numbers = #tpu.dot_dimension_numbers<[1], [0], [0], [1], [0, 0, 1, 1], [], []>} : vector<48x128xbf16>, vector<128x128xbf16>, vector<48x128xf32> -> vector<48x128xf32>
    %76 = arith.addf %70, %75 : vector<48x128xf32>
    %c1_57 = arith.constant 1 : index
    %c0_58 = arith.constant 0 : index
    %c0_59 = arith.constant 0 : index
    %77 = vector.load %arg13[%c1_57, %c0_58, %c0_59] : memref<4x64x128xbf16, #tpu.memory_space<vmem>>, vector<1x48x128xbf16>
    %78 = vector.shape_cast %77 : vector<1x48x128xbf16> to vector<48x128xbf16>
    %c1_60 = arith.constant 1 : index
    %c0_61 = arith.constant 0 : index
    %c0_62 = arith.constant 0 : index
    %79 = vector.load %arg8[%c1_60, %c0_61, %c0_62] : memref<9x128x128xbf16, #tpu.memory_space<vmem>>, vector<1x128x128xbf16>
    %80 = vector.shape_cast %79 : vector<1x128x128xbf16> to vector<128x128xbf16>
    %cst_63 = arith.constant dense<0.000000e+00> : vector<48x128xf32>
    %81 = tpu.matmul %78, %80, %cst_63 {dimension_numbers = #tpu.dot_dimension_numbers<[1], [0], [0], [1], [0, 0, 1, 1], [], []>} : vector<48x128xbf16>, vector<128x128xbf16>, vector<48x128xf32> -> vector<48x128xf32>
    %82 = arith.addf %76, %81 : vector<48x128xf32>
    %c0_64 = arith.constant 0 : index
    %c1_65 = arith.constant 1 : index
    %c0_66 = arith.constant 0 : index
    %83 = vector.load %arg13[%c0_64, %c1_65, %c0_66] : memref<4x64x128xbf16, #tpu.memory_space<vmem>>, vector<1x48x128xbf16>
    %84 = vector.shape_cast %83 : vector<1x48x128xbf16> to vector<48x128xbf16>
    %c2_67 = arith.constant 2 : index
    %c0_68 = arith.constant 0 : index
    %c0_69 = arith.constant 0 : index
    %85 = vector.load %arg8[%c2_67, %c0_68, %c0_69] : memref<9x128x128xbf16, #tpu.memory_space<vmem>>, vector<1x128x128xbf16>
    %86 = vector.shape_cast %85 : vector<1x128x128xbf16> to vector<128x128xbf16>
    %cst_70 = arith.constant dense<0.000000e+00> : vector<48x128xf32>
    %87 = tpu.matmul %84, %86, %cst_70 {dimension_numbers = #tpu.dot_dimension_numbers<[1], [0], [0], [1], [0, 0, 1, 1], [], []>} : vector<48x128xbf16>, vector<128x128xbf16>, vector<48x128xf32> -> vector<48x128xf32>
    %88 = arith.addf %82, %87 : vector<48x128xf32>
    %c2_71 = arith.constant 2 : index
    %c0_72 = arith.constant 0 : index
    %c0_73 = arith.constant 0 : index
    %89 = vector.load %arg13[%c2_71, %c0_72, %c0_73] : memref<4x64x128xbf16, #tpu.memory_space<vmem>>, vector<1x48x128xbf16>
    %90 = vector.shape_cast %89 : vector<1x48x128xbf16> to vector<48x128xbf16>
    %c3_74 = arith.constant 3 : index
    %c0_75 = arith.constant 0 : index
    %c0_76 = arith.constant 0 : index
    %91 = vector.load %arg8[%c3_74, %c0_75, %c0_76] : memref<9x128x128xbf16, #tpu.memory_space<vmem>>, vector<1x128x128xbf16>
    %92 = vector.shape_cast %91 : vector<1x128x128xbf16> to vector<128x128xbf16>
    %cst_77 = arith.constant dense<0.000000e+00> : vector<48x128xf32>
    %93 = tpu.matmul %90, %92, %cst_77 {dimension_numbers = #tpu.dot_dimension_numbers<[1], [0], [0], [1], [0, 0, 1, 1], [], []>} : vector<48x128xbf16>, vector<128x128xbf16>, vector<48x128xf32> -> vector<48x128xf32>
    %94 = arith.addf %88, %93 : vector<48x128xf32>
    %c3_78 = arith.constant 3 : index
    %c0_79 = arith.constant 0 : index
    %c0_80 = arith.constant 0 : index
    %95 = vector.load %arg13[%c3_78, %c0_79, %c0_80] : memref<4x64x128xbf16, #tpu.memory_space<vmem>>, vector<1x48x128xbf16>
    %96 = vector.shape_cast %95 : vector<1x48x128xbf16> to vector<48x128xbf16>
    %c4 = arith.constant 4 : index
    %c0_81 = arith.constant 0 : index
    %c0_82 = arith.constant 0 : index
    %97 = vector.load %arg8[%c4, %c0_81, %c0_82] : memref<9x128x128xbf16, #tpu.memory_space<vmem>>, vector<1x128x128xbf16>
    %98 = vector.shape_cast %97 : vector<1x128x128xbf16> to vector<128x128xbf16>
    %cst_83 = arith.constant dense<0.000000e+00> : vector<48x128xf32>
    %99 = tpu.matmul %96, %98, %cst_83 {dimension_numbers = #tpu.dot_dimension_numbers<[1], [0], [0], [1], [0, 0, 1, 1], [], []>} : vector<48x128xbf16>, vector<128x128xbf16>, vector<48x128xf32> -> vector<48x128xf32>
    %100 = arith.addf %94, %99 : vector<48x128xf32>
    %c2_84 = arith.constant 2 : index
    %c1_85 = arith.constant 1 : index
    %c0_86 = arith.constant 0 : index
    %101 = vector.load %arg13[%c2_84, %c1_85, %c0_86] : memref<4x64x128xbf16, #tpu.memory_space<vmem>>, vector<1x48x128xbf16>
    %102 = vector.shape_cast %101 : vector<1x48x128xbf16> to vector<48x128xbf16>
    %c5 = arith.constant 5 : index
    %c0_87 = arith.constant 0 : index
    %c0_88 = arith.constant 0 : index
    %103 = vector.load %arg8[%c5, %c0_87, %c0_88] : memref<9x128x128xbf16, #tpu.memory_space<vmem>>, vector<1x128x128xbf16>
    %104 = vector.shape_cast %103 : vector<1x128x128xbf16> to vector<128x128xbf16>
    %cst_89 = arith.constant dense<0.000000e+00> : vector<48x128xf32>
    %105 = tpu.matmul %102, %104, %cst_89 {dimension_numbers = #tpu.dot_dimension_numbers<[1], [0], [0], [1], [0, 0, 1, 1], [], []>} : vector<48x128xbf16>, vector<128x128xbf16>, vector<48x128xf32> -> vector<48x128xf32>
    %106 = arith.addf %100, %105 : vector<48x128xf32>
    %c0_90 = arith.constant 0 : index
    %c8 = arith.constant 8 : index
    %c0_91 = arith.constant 0 : index
    %107 = vector.load %arg13[%c0_90, %c8, %c0_91] : memref<4x64x128xbf16, #tpu.memory_space<vmem>>, vector<1x48x128xbf16>
    %108 = vector.shape_cast %107 : vector<1x48x128xbf16> to vector<48x128xbf16>
    %c6 = arith.constant 6 : index
    %c0_92 = arith.constant 0 : index
    %c0_93 = arith.constant 0 : index
    %109 = vector.load %arg8[%c6, %c0_92, %c0_93] : memref<9x128x128xbf16, #tpu.memory_space<vmem>>, vector<1x128x128xbf16>
    %110 = vector.shape_cast %109 : vector<1x128x128xbf16> to vector<128x128xbf16>
    %cst_94 = arith.constant dense<0.000000e+00> : vector<48x128xf32>
    %111 = tpu.matmul %108, %110, %cst_94 {dimension_numbers = #tpu.dot_dimension_numbers<[1], [0], [0], [1], [0, 0, 1, 1], [], []>} : vector<48x128xbf16>, vector<128x128xbf16>, vector<48x128xf32> -> vector<48x128xf32>
    %112 = arith.addf %106, %111 : vector<48x128xf32>
    %c1_95 = arith.constant 1 : index
    %c8_96 = arith.constant 8 : index
    %c0_97 = arith.constant 0 : index
    %113 = vector.load %arg13[%c1_95, %c8_96, %c0_97] : memref<4x64x128xbf16, #tpu.memory_space<vmem>>, vector<1x48x128xbf16>
    %114 = vector.shape_cast %113 : vector<1x48x128xbf16> to vector<48x128xbf16>
    %c7 = arith.constant 7 : index
    %c0_98 = arith.constant 0 : index
    %c0_99 = arith.constant 0 : index
    %115 = vector.load %arg8[%c7, %c0_98, %c0_99] : memref<9x128x128xbf16, #tpu.memory_space<vmem>>, vector<1x128x128xbf16>
    %116 = vector.shape_cast %115 : vector<1x128x128xbf16> to vector<128x128xbf16>
    %cst_100 = arith.constant dense<0.000000e+00> : vector<48x128xf32>
    %117 = tpu.matmul %114, %116, %cst_100 {dimension_numbers = #tpu.dot_dimension_numbers<[1], [0], [0], [1], [0, 0, 1, 1], [], []>} : vector<48x128xbf16>, vector<128x128xbf16>, vector<48x128xf32> -> vector<48x128xf32>
    %118 = arith.addf %112, %117 : vector<48x128xf32>
    %c0_101 = arith.constant 0 : index
    %c9 = arith.constant 9 : index
    %c0_102 = arith.constant 0 : index
    %119 = vector.load %arg13[%c0_101, %c9, %c0_102] : memref<4x64x128xbf16, #tpu.memory_space<vmem>>, vector<1x48x128xbf16>
    %120 = vector.shape_cast %119 : vector<1x48x128xbf16> to vector<48x128xbf16>
    %c8_103 = arith.constant 8 : index
    %c0_104 = arith.constant 0 : index
    %c0_105 = arith.constant 0 : index
    %121 = vector.load %arg8[%c8_103, %c0_104, %c0_105] : memref<9x128x128xbf16, #tpu.memory_space<vmem>>, vector<1x128x128xbf16>
    %122 = vector.shape_cast %121 : vector<1x128x128xbf16> to vector<128x128xbf16>
    %cst_106 = arith.constant dense<0.000000e+00> : vector<48x128xf32>
    %123 = tpu.matmul %120, %122, %cst_106 {dimension_numbers = #tpu.dot_dimension_numbers<[1], [0], [0], [1], [0, 0, 1, 1], [], []>} : vector<48x128xbf16>, vector<128x128xbf16>, vector<48x128xf32> -> vector<48x128xf32>
    %124 = arith.addf %118, %123 : vector<48x128xf32>
    %c0_107 = arith.constant 0 : index
    %c0_108 = arith.constant 0 : index
    %125 = vector.load %arg9[%c0_107, %c0_108] : memref<1x128xf32, #tpu.memory_space<vmem>>, vector<1x128xf32>
    %126 = vector.broadcast %125 : vector<1x128xf32> to vector<48x128xf32>
    %127 = arith.addf %124, %126 : vector<48x128xf32>
    %cst_109 = arith.constant 0.000000e+00 : f32
    %128 = vector.broadcast %cst_109 : f32 to vector<48x128xf32>
    %129 = arith.maximumf %127, %128 : vector<48x128xf32>
    %130 = arith.truncf %129 : vector<48x128xf32> to vector<48x128xbf16>
    %c0_110 = arith.constant 0 : index
    %c0_111 = arith.constant 0 : index
    %131 = vector.load %arg10[%c0_110, %c0_111] : memref<128x512xbf16, #tpu.memory_space<vmem>>, vector<128x512xbf16>
    %cst_112 = arith.constant dense<0.000000e+00> : vector<48x512xf32>
    %132 = tpu.matmul %130, %131, %cst_112 {dimension_numbers = #tpu.dot_dimension_numbers<[1], [0], [0], [1], [0, 0, 1, 1], [], []>} : vector<48x128xbf16>, vector<128x512xbf16>, vector<48x512xf32> -> vector<48x512xf32>
    %c0_113 = arith.constant 0 : index
    %c0_114 = arith.constant 0 : index
    %133 = vector.load %arg11[%c0_113, %c0_114] : memref<1x512xf32, #tpu.memory_space<vmem>>, vector<1x512xf32>
    %134 = vector.broadcast %133 : vector<1x512xf32> to vector<48x512xf32>
    %135 = arith.addf %132, %134 : vector<48x512xf32>
    %136 = arith.addf %135, %69 : vector<48x512xf32>
    %cst_115 = arith.constant 0.000000e+00 : f32
    %137 = vector.broadcast %cst_115 : f32 to vector<48x512xf32>
    %138 = arith.maximumf %136, %137 : vector<48x512xf32>
    %c0_116 = arith.constant 0 : index
    %c0_117 = arith.constant 0 : index
    %139 = vector.load %arg3[%c0_116, %c0_117] : memref<48x1xf32, #tpu.memory_space<vmem>>, vector<48x1xf32>
    %cst_118 = arith.constant 0.000000e+00 : f32
    %140 = vector.broadcast %cst_118 : f32 to vector<48x1xf32>
    %141 = arith.cmpf ogt, %139, %140 : vector<48x1xf32>
    %cst_119 = arith.constant 0.000000e+00 : f32
    %142 = vector.shape_cast %141 : vector<48x1xi1> to vector<48x1xi1>
    %143 = vector.broadcast %142 : vector<48x1xi1> to vector<48x512xi1>
    %144 = vector.broadcast %cst_119 : f32 to vector<48x512xf32>
    %145 = arith.select %143, %138, %144 : vector<48x512xi1>, vector<48x512xf32>
    %146 = arith.truncf %145 : vector<48x512xf32> to vector<48x512xbf16>
    %c0_120 = arith.constant 0 : index
    %c0_121 = arith.constant 0 : index
    %c0_122 = arith.constant 0 : index
    %147 = vector.load %arg12[%c0_120, %c0_121, %c0_122] : memref<1x48x512xbf16, #tpu.memory_space<vmem>>, vector<1x48x512xbf16>
    %148 = vector.shape_cast %147 : vector<1x48x512xbf16> to vector<48x512xbf16>
    %149 = vector.shape_cast %146 : vector<48x512xbf16> to vector<1x48x512xbf16>
    tpu.vector_store %arg12[%c0_120, %c0_121, %c0_122], %149 {strides = array<i32>} : memref<1x48x512xbf16, #tpu.memory_space<vmem>>, vector<1x48x512xbf16>,
    return
  }
  func.func @transform_0(%arg0: i32) -> (i32, i32, i32) {
    %c0_i32 = arith.constant 0 : i32
    %c0_i32_0 = arith.constant 0 : i32
    %c0_i32_1 = arith.constant 0 : i32
    return %arg0, %c0_i32, %c0_i32_0 : i32, i32, i32
  }
  func.func @transform_1(%arg0: i32) -> (i32, i32) {
    %c0_i32 = arith.constant 0 : i32
    %c0_i32_0 = arith.constant 0 : i32
    %c0_i32_1 = arith.constant 0 : i32
    return %c0_i32, %c0_i32_0 : i32, i32
  }
  func.func @transform_2(%arg0: i32) -> (i32, i32) {
    %c0_i32 = arith.constant 0 : i32
    %c0_i32_0 = arith.constant 0 : i32
    %c0_i32_1 = arith.constant 0 : i32
    return %c0_i32, %c0_i32_0 : i32, i32
  }
  func.func @transform_3(%arg0: i32) -> (i32, i32) {
    %c0_i32 = arith.constant 0 : i32
    %c0_i32_0 = arith.constant 0 : i32
    %c0_i32_1 = arith.constant 0 : i32
    return %c0_i32, %c0_i32_0 : i32, i32
  }
  func.func @transform_4(%arg0: i32) -> (i32, i32) {
    %c0_i32 = arith.constant 0 : i32
    %c0_i32_0 = arith.constant 0 : i32
    %c0_i32_1 = arith.constant 0 : i32
    return %c0_i32, %c0_i32_0 : i32, i32
  }
  func.func @transform_5(%arg0: i32) -> (i32, i32) {
    %c0_i32 = arith.constant 0 : i32
    %c0_i32_0 = arith.constant 0 : i32
    %c0_i32_1 = arith.constant 0 : i32
    return %c0_i32, %c0_i32_0 : i32, i32
  }
  func.func @transform_6(%arg0: i32) -> (i32, i32) {
    %c0_i32 = arith.constant 0 : i32
    %c0_i32_0 = arith.constant 0 : i32
    %c0_i32_1 = arith.constant 0 : i32
    return %c0_i32, %c0_i32_0 : i32, i32
  }
  func.func @transform_7(%arg0: i32) -> (i32, i32, i32) {
    %c0_i32 = arith.constant 0 : i32
    %c0_i32_0 = arith.constant 0 : i32
    %c0_i32_1 = arith.constant 0 : i32
    %c0_i32_2 = arith.constant 0 : i32
    return %c0_i32, %c0_i32_0, %c0_i32_1 : i32, i32, i32
  }
  func.func @transform_8(%arg0: i32) -> (i32, i32) {
    %c0_i32 = arith.constant 0 : i32
    %c0_i32_0 = arith.constant 0 : i32
    %c0_i32_1 = arith.constant 0 : i32
    return %c0_i32, %c0_i32_0 : i32, i32
  }
  func.func @transform_9(%arg0: i32) -> (i32, i32) {
    %c0_i32 = arith.constant 0 : i32
    %c0_i32_0 = arith.constant 0 : i32
    %c0_i32_1 = arith.constant 0 : i32
    return %c0_i32, %c0_i32_0 : i32, i32
  }
  func.func @transform_10(%arg0: i32) -> (i32, i32) {
    %c0_i32 = arith.constant 0 : i32
    %c0_i32_0 = arith.constant 0 : i32
    %c0_i32_1 = arith.constant 0 : i32
    return %c0_i32, %c0_i32_0 : i32, i32
  }
  func.func @transform_11(%arg0: i32) -> (i32, i32, i32) {
    %c0_i32 = arith.constant 0 : i32
    %c0_i32_0 = arith.constant 0 : i32
    %c0_i32_1 = arith.constant 0 : i32
    return %arg0, %c0_i32, %c0_i32_0 : i32, i32, i32
  }
}

module attributes {stable_mosaic.version = 11 : i64} {
  func.func @_blocks234_kernel(%arg0: i32, %arg1: memref<1x48x512xbf16, #tpu.memory_space<vmem>>, %arg2: memref<48x1xf32, #tpu.memory_space<vmem>>, %arg3: memref<3x512x128xbf16, #tpu.memory_space<vmem>>, %arg4: memref<3x1x128xf32, #tpu.memory_space<vmem>>, %arg5: memref<3x9x128x128xbf16, #tpu.memory_space<vmem>>, %arg6: memref<3x1x128xf32, #tpu.memory_space<vmem>>, %arg7: memref<3x128x512xbf16, #tpu.memory_space<vmem>>, %arg8: memref<3x1x512xf32, #tpu.memory_space<vmem>>, %arg9: memref<1x48x512xf32, #tpu.memory_space<vmem>>, %arg10: memref<80x128xbf16, #tpu.memory_space<vmem>>) attributes {dimension_semantics = [#tpu.dimension_semantics<parallel>], iteration_bounds = array<i64: 2>, scalar_prefetch = 0 : i64, scratch_operands = 1 : i64, tpu.core_type = #tpu.core_type<tc>, window_params = [{transform_indices = @transform_0, window_bounds = array<i64: 1, 48, 512>}, {pipeline_mode = #tpu.pipeline_mode<synchronous>, transform_indices = @transform_1, window_bounds = array<i64: 48, 1>}, {pipeline_mode = #tpu.pipeline_mode<synchronous>, transform_indices = @transform_2, window_bounds = array<i64: 3, 512, 128>}, {pipeline_mode = #tpu.pipeline_mode<synchronous>, transform_indices = @transform_3, window_bounds = array<i64: 3, 1, 128>}, {pipeline_mode = #tpu.pipeline_mode<synchronous>, transform_indices = @transform_4, window_bounds = array<i64: 3, 9, 128, 128>}, {pipeline_mode = #tpu.pipeline_mode<synchronous>, transform_indices = @transform_5, window_bounds = array<i64: 3, 1, 128>}, {pipeline_mode = #tpu.pipeline_mode<synchronous>, transform_indices = @transform_6, window_bounds = array<i64: 3, 128, 512>}, {pipeline_mode = #tpu.pipeline_mode<synchronous>, transform_indices = @transform_7, window_bounds = array<i64: 3, 1, 512>}, {transform_indices = @transform_8, window_bounds = array<i64: 1, 48, 512>}]} {
    %cst = arith.constant 0.000000e+00 : bf16
    %0 = vector.broadcast %cst : bf16 to vector<16x128xbf16>
    %c0 = arith.constant 0 : index
    %c0_0 = arith.constant 0 : index
    %1 = vector.load %arg10[%c0, %c0_0] : memref<80x128xbf16, #tpu.memory_space<vmem>>, vector<16x128xbf16>
    tpu.vector_store %arg10[%c0, %c0_0], %0 {strides = array<i32>} : memref<80x128xbf16, #tpu.memory_space<vmem>>, vector<16x128xbf16>,
    %c64 = arith.constant 64 : index
    %c0_1 = arith.constant 0 : index
    %2 = vector.load %arg10[%c64, %c0_1] : memref<80x128xbf16, #tpu.memory_space<vmem>>, vector<16x128xbf16>
    tpu.vector_store %arg10[%c64, %c0_1], %0 {strides = array<i32>} : memref<80x128xbf16, #tpu.memory_space<vmem>>, vector<16x128xbf16>,
    %c0_2 = arith.constant 0 : index
    %c0_3 = arith.constant 0 : index
    %3 = vector.load %arg2[%c0_2, %c0_3] : memref<48x1xf32, #tpu.memory_space<vmem>>, vector<48x1xf32>
    %cst_4 = arith.constant 0.000000e+00 : f32
    %4 = vector.broadcast %cst_4 : f32 to vector<48x1xf32>
    %5 = arith.cmpf ogt, %3, %4 : vector<48x1xf32>
    %6 = vector.shape_cast %5 : vector<48x1xi1> to vector<48x1xi1>
    %7 = vector.broadcast %6 : vector<48x1xi1> to vector<48x128xi1>
    %c0_5 = arith.constant 0 : index
    %c0_6 = arith.constant 0 : index
    %c0_7 = arith.constant 0 : index
    %8 = vector.load %arg1[%c0_5, %c0_6, %c0_7] : memref<1x48x512xbf16, #tpu.memory_space<vmem>>, vector<1x48x512xbf16>
    %9 = vector.shape_cast %8 : vector<1x48x512xbf16> to vector<48x512xbf16>
    %10 = arith.extf %9 : vector<48x512xbf16> to vector<48x512xf32>
    %11 = arith.truncf %10 : vector<48x512xf32> to vector<48x512xbf16>
    %c0_8 = arith.constant 0 : index
    %c0_9 = arith.constant 0 : index
    %c0_10 = arith.constant 0 : index
    %12 = vector.load %arg3[%c0_8, %c0_9, %c0_10] : memref<3x512x128xbf16, #tpu.memory_space<vmem>>, vector<1x512x128xbf16>
    %13 = vector.shape_cast %12 : vector<1x512x128xbf16> to vector<512x128xbf16>
    %cst_11 = arith.constant dense<0.000000e+00> : vector<48x128xf32>
    %14 = tpu.matmul %11, %13, %cst_11 {dimension_numbers = #tpu.dot_dimension_numbers<[1], [0], [0], [1], [0, 0, 1, 1], [], []>} : vector<48x512xbf16>, vector<512x128xbf16>, vector<48x128xf32> -> vector<48x128xf32>
    %c0_12 = arith.constant 0 : index
    %c0_13 = arith.constant 0 : index
    %c0_14 = arith.constant 0 : index
    %15 = vector.load %arg4[%c0_12, %c0_13, %c0_14] : memref<3x1x128xf32, #tpu.memory_space<vmem>>, vector<1x1x128xf32>
    %16 = vector.shape_cast %15 : vector<1x1x128xf32> to vector<1x128xf32>
    %17 = vector.broadcast %16 : vector<1x128xf32> to vector<48x128xf32>
    %18 = arith.addf %14, %17 : vector<48x128xf32>
    %cst_15 = arith.constant 0.000000e+00 : f32
    %19 = vector.broadcast %cst_15 : f32 to vector<48x128xf32>
    %20 = arith.maximumf %18, %19 : vector<48x128xf32>
    %cst_16 = arith.constant 0.000000e+00 : f32
    %21 = vector.broadcast %cst_16 : f32 to vector<48x128xf32>
    %22 = arith.select %7, %20, %21 : vector<48x128xi1>, vector<48x128xf32>
    %23 = arith.truncf %22 : vector<48x128xf32> to vector<48x128xbf16>
    %c16 = arith.constant 16 : index
    %c0_17 = arith.constant 0 : index
    %24 = vector.load %arg10[%c16, %c0_17] : memref<80x128xbf16, #tpu.memory_space<vmem>>, vector<48x128xbf16>
    tpu.vector_store %arg10[%c16, %c0_17], %23 {strides = array<i32>} : memref<80x128xbf16, #tpu.memory_space<vmem>>, vector<48x128xbf16>,
    %cst_18 = arith.constant 0.000000e+00 : f32
    %25 = vector.broadcast %cst_18 : f32 to vector<48x128xf32>
    %c7 = arith.constant 7 : index
    %c0_19 = arith.constant 0 : index
    %26 = vector.load %arg10[%c7, %c0_19] : memref<80x128xbf16, #tpu.memory_space<vmem>>, vector<48x128xbf16>
    %c0_20 = arith.constant 0 : index
    %c0_21 = arith.constant 0 : index
    %c0_22 = arith.constant 0 : index
    %c0_23 = arith.constant 0 : index
    %27 = vector.load %arg5[%c0_20, %c0_21, %c0_22, %c0_23] : memref<3x9x128x128xbf16, #tpu.memory_space<vmem>>, vector<1x1x128x128xbf16>
    %28 = vector.shape_cast %27 : vector<1x1x128x128xbf16> to vector<128x128xbf16>
    %cst_24 = arith.constant dense<0.000000e+00> : vector<48x128xf32>
    %29 = tpu.matmul %26, %28, %cst_24 {dimension_numbers = #tpu.dot_dimension_numbers<[1], [0], [0], [1], [0, 0, 1, 1], [], []>} : vector<48x128xbf16>, vector<128x128xbf16>, vector<48x128xf32> -> vector<48x128xf32>
    %30 = arith.addf %25, %29 : vector<48x128xf32>
    %c8 = arith.constant 8 : index
    %c0_25 = arith.constant 0 : index
    %31 = vector.load %arg10[%c8, %c0_25] : memref<80x128xbf16, #tpu.memory_space<vmem>>, vector<48x128xbf16>
    %c0_26 = arith.constant 0 : index
    %c1 = arith.constant 1 : index
    %c0_27 = arith.constant 0 : index
    %c0_28 = arith.constant 0 : index
    %32 = vector.load %arg5[%c0_26, %c1, %c0_27, %c0_28] : memref<3x9x128x128xbf16, #tpu.memory_space<vmem>>, vector<1x1x128x128xbf16>
    %33 = vector.shape_cast %32 : vector<1x1x128x128xbf16> to vector<128x128xbf16>
    %cst_29 = arith.constant dense<0.000000e+00> : vector<48x128xf32>
    %34 = tpu.matmul %31, %33, %cst_29 {dimension_numbers = #tpu.dot_dimension_numbers<[1], [0], [0], [1], [0, 0, 1, 1], [], []>} : vector<48x128xbf16>, vector<128x128xbf16>, vector<48x128xf32> -> vector<48x128xf32>
    %35 = arith.addf %30, %34 : vector<48x128xf32>
    %c9 = arith.constant 9 : index
    %c0_30 = arith.constant 0 : index
    %36 = vector.load %arg10[%c9, %c0_30] : memref<80x128xbf16, #tpu.memory_space<vmem>>, vector<48x128xbf16>
    %c0_31 = arith.constant 0 : index
    %c2 = arith.constant 2 : index
    %c0_32 = arith.constant 0 : index
    %c0_33 = arith.constant 0 : index
    %37 = vector.load %arg5[%c0_31, %c2, %c0_32, %c0_33] : memref<3x9x128x128xbf16, #tpu.memory_space<vmem>>, vector<1x1x128x128xbf16>
    %38 = vector.shape_cast %37 : vector<1x1x128x128xbf16> to vector<128x128xbf16>
    %cst_34 = arith.constant dense<0.000000e+00> : vector<48x128xf32>
    %39 = tpu.matmul %36, %38, %cst_34 {dimension_numbers = #tpu.dot_dimension_numbers<[1], [0], [0], [1], [0, 0, 1, 1], [], []>} : vector<48x128xbf16>, vector<128x128xbf16>, vector<48x128xf32> -> vector<48x128xf32>
    %40 = arith.addf %35, %39 : vector<48x128xf32>
    %c15 = arith.constant 15 : index
    %c0_35 = arith.constant 0 : index
    %41 = vector.load %arg10[%c15, %c0_35] : memref<80x128xbf16, #tpu.memory_space<vmem>>, vector<48x128xbf16>
    %c0_36 = arith.constant 0 : index
    %c3 = arith.constant 3 : index
    %c0_37 = arith.constant 0 : index
    %c0_38 = arith.constant 0 : index
    %42 = vector.load %arg5[%c0_36, %c3, %c0_37, %c0_38] : memref<3x9x128x128xbf16, #tpu.memory_space<vmem>>, vector<1x1x128x128xbf16>
    %43 = vector.shape_cast %42 : vector<1x1x128x128xbf16> to vector<128x128xbf16>
    %cst_39 = arith.constant dense<0.000000e+00> : vector<48x128xf32>
    %44 = tpu.matmul %41, %43, %cst_39 {dimension_numbers = #tpu.dot_dimension_numbers<[1], [0], [0], [1], [0, 0, 1, 1], [], []>} : vector<48x128xbf16>, vector<128x128xbf16>, vector<48x128xf32> -> vector<48x128xf32>
    %45 = arith.addf %40, %44 : vector<48x128xf32>
    %c16_40 = arith.constant 16 : index
    %c0_41 = arith.constant 0 : index
    %46 = vector.load %arg10[%c16_40, %c0_41] : memref<80x128xbf16, #tpu.memory_space<vmem>>, vector<48x128xbf16>
    %c0_42 = arith.constant 0 : index
    %c4 = arith.constant 4 : index
    %c0_43 = arith.constant 0 : index
    %c0_44 = arith.constant 0 : index
    %47 = vector.load %arg5[%c0_42, %c4, %c0_43, %c0_44] : memref<3x9x128x128xbf16, #tpu.memory_space<vmem>>, vector<1x1x128x128xbf16>
    %48 = vector.shape_cast %47 : vector<1x1x128x128xbf16> to vector<128x128xbf16>
    %cst_45 = arith.constant dense<0.000000e+00> : vector<48x128xf32>
    %49 = tpu.matmul %46, %48, %cst_45 {dimension_numbers = #tpu.dot_dimension_numbers<[1], [0], [0], [1], [0, 0, 1, 1], [], []>} : vector<48x128xbf16>, vector<128x128xbf16>, vector<48x128xf32> -> vector<48x128xf32>
    %50 = arith.addf %45, %49 : vector<48x128xf32>
    %c17 = arith.constant 17 : index
    %c0_46 = arith.constant 0 : index
    %51 = vector.load %arg10[%c17, %c0_46] : memref<80x128xbf16, #tpu.memory_space<vmem>>, vector<48x128xbf16>
    %c0_47 = arith.constant 0 : index
    %c5 = arith.constant 5 : index
    %c0_48 = arith.constant 0 : index
    %c0_49 = arith.constant 0 : index
    %52 = vector.load %arg5[%c0_47, %c5, %c0_48, %c0_49] : memref<3x9x128x128xbf16, #tpu.memory_space<vmem>>, vector<1x1x128x128xbf16>
    %53 = vector.shape_cast %52 : vector<1x1x128x128xbf16> to vector<128x128xbf16>
    %cst_50 = arith.constant dense<0.000000e+00> : vector<48x128xf32>
    %54 = tpu.matmul %51, %53, %cst_50 {dimension_numbers = #tpu.dot_dimension_numbers<[1], [0], [0], [1], [0, 0, 1, 1], [], []>} : vector<48x128xbf16>, vector<128x128xbf16>, vector<48x128xf32> -> vector<48x128xf32>
    %55 = arith.addf %50, %54 : vector<48x128xf32>
    %c23 = arith.constant 23 : index
    %c0_51 = arith.constant 0 : index
    %56 = vector.load %arg10[%c23, %c0_51] : memref<80x128xbf16, #tpu.memory_space<vmem>>, vector<48x128xbf16>
    %c0_52 = arith.constant 0 : index
    %c6 = arith.constant 6 : index
    %c0_53 = arith.constant 0 : index
    %c0_54 = arith.constant 0 : index
    %57 = vector.load %arg5[%c0_52, %c6, %c0_53, %c0_54] : memref<3x9x128x128xbf16, #tpu.memory_space<vmem>>, vector<1x1x128x128xbf16>
    %58 = vector.shape_cast %57 : vector<1x1x128x128xbf16> to vector<128x128xbf16>
    %cst_55 = arith.constant dense<0.000000e+00> : vector<48x128xf32>
    %59 = tpu.matmul %56, %58, %cst_55 {dimension_numbers = #tpu.dot_dimension_numbers<[1], [0], [0], [1], [0, 0, 1, 1], [], []>} : vector<48x128xbf16>, vector<128x128xbf16>, vector<48x128xf32> -> vector<48x128xf32>
    %60 = arith.addf %55, %59 : vector<48x128xf32>
    %c24 = arith.constant 24 : index
    %c0_56 = arith.constant 0 : index
    %61 = vector.load %arg10[%c24, %c0_56] : memref<80x128xbf16, #tpu.memory_space<vmem>>, vector<48x128xbf16>
    %c0_57 = arith.constant 0 : index
    %c7_58 = arith.constant 7 : index
    %c0_59 = arith.constant 0 : index
    %c0_60 = arith.constant 0 : index
    %62 = vector.load %arg5[%c0_57, %c7_58, %c0_59, %c0_60] : memref<3x9x128x128xbf16, #tpu.memory_space<vmem>>, vector<1x1x128x128xbf16>
    %63 = vector.shape_cast %62 : vector<1x1x128x128xbf16> to vector<128x128xbf16>
    %cst_61 = arith.constant dense<0.000000e+00> : vector<48x128xf32>
    %64 = tpu.matmul %61, %63, %cst_61 {dimension_numbers = #tpu.dot_dimension_numbers<[1], [0], [0], [1], [0, 0, 1, 1], [], []>} : vector<48x128xbf16>, vector<128x128xbf16>, vector<48x128xf32> -> vector<48x128xf32>
    %65 = arith.addf %60, %64 : vector<48x128xf32>
    %c25 = arith.constant 25 : index
    %c0_62 = arith.constant 0 : index
    %66 = vector.load %arg10[%c25, %c0_62] : memref<80x128xbf16, #tpu.memory_space<vmem>>, vector<48x128xbf16>
    %c0_63 = arith.constant 0 : index
    %c8_64 = arith.constant 8 : index
    %c0_65 = arith.constant 0 : index
    %c0_66 = arith.constant 0 : index
    %67 = vector.load %arg5[%c0_63, %c8_64, %c0_65, %c0_66] : memref<3x9x128x128xbf16, #tpu.memory_space<vmem>>, vector<1x1x128x128xbf16>
    %68 = vector.shape_cast %67 : vector<1x1x128x128xbf16> to vector<128x128xbf16>
    %cst_67 = arith.constant dense<0.000000e+00> : vector<48x128xf32>
    %69 = tpu.matmul %66, %68, %cst_67 {dimension_numbers = #tpu.dot_dimension_numbers<[1], [0], [0], [1], [0, 0, 1, 1], [], []>} : vector<48x128xbf16>, vector<128x128xbf16>, vector<48x128xf32> -> vector<48x128xf32>
    %70 = arith.addf %65, %69 : vector<48x128xf32>
    %c0_68 = arith.constant 0 : index
    %c0_69 = arith.constant 0 : index
    %c0_70 = arith.constant 0 : index
    %71 = vector.load %arg6[%c0_68, %c0_69, %c0_70] : memref<3x1x128xf32, #tpu.memory_space<vmem>>, vector<1x1x128xf32>
    %72 = vector.shape_cast %71 : vector<1x1x128xf32> to vector<1x128xf32>
    %73 = vector.broadcast %72 : vector<1x128xf32> to vector<48x128xf32>
    %74 = arith.addf %70, %73 : vector<48x128xf32>
    %cst_71 = arith.constant 0.000000e+00 : f32
    %75 = vector.broadcast %cst_71 : f32 to vector<48x128xf32>
    %76 = arith.maximumf %74, %75 : vector<48x128xf32>
    %77 = arith.truncf %76 : vector<48x128xf32> to vector<48x128xbf16>
    %c0_72 = arith.constant 0 : index
    %c0_73 = arith.constant 0 : index
    %c0_74 = arith.constant 0 : index
    %78 = vector.load %arg7[%c0_72, %c0_73, %c0_74] : memref<3x128x512xbf16, #tpu.memory_space<vmem>>, vector<1x128x512xbf16>
    %79 = vector.shape_cast %78 : vector<1x128x512xbf16> to vector<128x512xbf16>
    %cst_75 = arith.constant dense<0.000000e+00> : vector<48x512xf32>
    %80 = tpu.matmul %77, %79, %cst_75 {dimension_numbers = #tpu.dot_dimension_numbers<[1], [0], [0], [1], [0, 0, 1, 1], [], []>} : vector<48x128xbf16>, vector<128x512xbf16>, vector<48x512xf32> -> vector<48x512xf32>
    %c0_76 = arith.constant 0 : index
    %c0_77 = arith.constant 0 : index
    %c0_78 = arith.constant 0 : index
    %81 = vector.load %arg8[%c0_76, %c0_77, %c0_78] : memref<3x1x512xf32, #tpu.memory_space<vmem>>, vector<1x1x512xf32>
    %82 = vector.shape_cast %81 : vector<1x1x512xf32> to vector<1x512xf32>
    %83 = vector.broadcast %82 : vector<1x512xf32> to vector<48x512xf32>
    %84 = arith.addf %80, %83 : vector<48x512xf32>
    %85 = arith.addf %84, %10 : vector<48x512xf32>
    %cst_79 = arith.constant 0.000000e+00 : f32
    %86 = vector.broadcast %cst_79 : f32 to vector<48x512xf32>
    %87 = arith.maximumf %85, %86 : vector<48x512xf32>
    %88 = arith.truncf %87 : vector<48x512xf32> to vector<48x512xbf16>
    %c1_80 = arith.constant 1 : index
    %c0_81 = arith.constant 0 : index
    %c0_82 = arith.constant 0 : index
    %89 = vector.load %arg3[%c1_80, %c0_81, %c0_82] : memref<3x512x128xbf16, #tpu.memory_space<vmem>>, vector<1x512x128xbf16>
    %90 = vector.shape_cast %89 : vector<1x512x128xbf16> to vector<512x128xbf16>
    %cst_83 = arith.constant dense<0.000000e+00> : vector<48x128xf32>
    %91 = tpu.matmul %88, %90, %cst_83 {dimension_numbers = #tpu.dot_dimension_numbers<[1], [0], [0], [1], [0, 0, 1, 1], [], []>} : vector<48x512xbf16>, vector<512x128xbf16>, vector<48x128xf32> -> vector<48x128xf32>
    %c1_84 = arith.constant 1 : index
    %c0_85 = arith.constant 0 : index
    %c0_86 = arith.constant 0 : index
    %92 = vector.load %arg4[%c1_84, %c0_85, %c0_86] : memref<3x1x128xf32, #tpu.memory_space<vmem>>, vector<1x1x128xf32>
    %93 = vector.shape_cast %92 : vector<1x1x128xf32> to vector<1x128xf32>
    %94 = vector.broadcast %93 : vector<1x128xf32> to vector<48x128xf32>
    %95 = arith.addf %91, %94 : vector<48x128xf32>
    %cst_87 = arith.constant 0.000000e+00 : f32
    %96 = vector.broadcast %cst_87 : f32 to vector<48x128xf32>
    %97 = arith.maximumf %95, %96 : vector<48x128xf32>
    %cst_88 = arith.constant 0.000000e+00 : f32
    %98 = vector.broadcast %cst_88 : f32 to vector<48x128xf32>
    %99 = arith.select %7, %97, %98 : vector<48x128xi1>, vector<48x128xf32>
    %100 = arith.truncf %99 : vector<48x128xf32> to vector<48x128xbf16>
    %c16_89 = arith.constant 16 : index
    %c0_90 = arith.constant 0 : index
    %101 = vector.load %arg10[%c16_89, %c0_90] : memref<80x128xbf16, #tpu.memory_space<vmem>>, vector<48x128xbf16>
    tpu.vector_store %arg10[%c16_89, %c0_90], %100 {strides = array<i32>} : memref<80x128xbf16, #tpu.memory_space<vmem>>, vector<48x128xbf16>,
    %cst_91 = arith.constant 0.000000e+00 : f32
    %102 = vector.broadcast %cst_91 : f32 to vector<48x128xf32>
    %c7_92 = arith.constant 7 : index
    %c0_93 = arith.constant 0 : index
    %103 = vector.load %arg10[%c7_92, %c0_93] : memref<80x128xbf16, #tpu.memory_space<vmem>>, vector<48x128xbf16>
    %c1_94 = arith.constant 1 : index
    %c0_95 = arith.constant 0 : index
    %c0_96 = arith.constant 0 : index
    %c0_97 = arith.constant 0 : index
    %104 = vector.load %arg5[%c1_94, %c0_95, %c0_96, %c0_97] : memref<3x9x128x128xbf16, #tpu.memory_space<vmem>>, vector<1x1x128x128xbf16>
    %105 = vector.shape_cast %104 : vector<1x1x128x128xbf16> to vector<128x128xbf16>
    %cst_98 = arith.constant dense<0.000000e+00> : vector<48x128xf32>
    %106 = tpu.matmul %103, %105, %cst_98 {dimension_numbers = #tpu.dot_dimension_numbers<[1], [0], [0], [1], [0, 0, 1, 1], [], []>} : vector<48x128xbf16>, vector<128x128xbf16>, vector<48x128xf32> -> vector<48x128xf32>
    %107 = arith.addf %102, %106 : vector<48x128xf32>
    %c8_99 = arith.constant 8 : index
    %c0_100 = arith.constant 0 : index
    %108 = vector.load %arg10[%c8_99, %c0_100] : memref<80x128xbf16, #tpu.memory_space<vmem>>, vector<48x128xbf16>
    %c1_101 = arith.constant 1 : index
    %c1_102 = arith.constant 1 : index
    %c0_103 = arith.constant 0 : index
    %c0_104 = arith.constant 0 : index
    %109 = vector.load %arg5[%c1_101, %c1_102, %c0_103, %c0_104] : memref<3x9x128x128xbf16, #tpu.memory_space<vmem>>, vector<1x1x128x128xbf16>
    %110 = vector.shape_cast %109 : vector<1x1x128x128xbf16> to vector<128x128xbf16>
    %cst_105 = arith.constant dense<0.000000e+00> : vector<48x128xf32>
    %111 = tpu.matmul %108, %110, %cst_105 {dimension_numbers = #tpu.dot_dimension_numbers<[1], [0], [0], [1], [0, 0, 1, 1], [], []>} : vector<48x128xbf16>, vector<128x128xbf16>, vector<48x128xf32> -> vector<48x128xf32>
    %112 = arith.addf %107, %111 : vector<48x128xf32>
    %c9_106 = arith.constant 9 : index
    %c0_107 = arith.constant 0 : index
    %113 = vector.load %arg10[%c9_106, %c0_107] : memref<80x128xbf16, #tpu.memory_space<vmem>>, vector<48x128xbf16>
    %c1_108 = arith.constant 1 : index
    %c2_109 = arith.constant 2 : index
    %c0_110 = arith.constant 0 : index
    %c0_111 = arith.constant 0 : index
    %114 = vector.load %arg5[%c1_108, %c2_109, %c0_110, %c0_111] : memref<3x9x128x128xbf16, #tpu.memory_space<vmem>>, vector<1x1x128x128xbf16>
    %115 = vector.shape_cast %114 : vector<1x1x128x128xbf16> to vector<128x128xbf16>
    %cst_112 = arith.constant dense<0.000000e+00> : vector<48x128xf32>
    %116 = tpu.matmul %113, %115, %cst_112 {dimension_numbers = #tpu.dot_dimension_numbers<[1], [0], [0], [1], [0, 0, 1, 1], [], []>} : vector<48x128xbf16>, vector<128x128xbf16>, vector<48x128xf32> -> vector<48x128xf32>
    %117 = arith.addf %112, %116 : vector<48x128xf32>
    %c15_113 = arith.constant 15 : index
    %c0_114 = arith.constant 0 : index
    %118 = vector.load %arg10[%c15_113, %c0_114] : memref<80x128xbf16, #tpu.memory_space<vmem>>, vector<48x128xbf16>
    %c1_115 = arith.constant 1 : index
    %c3_116 = arith.constant 3 : index
    %c0_117 = arith.constant 0 : index
    %c0_118 = arith.constant 0 : index
    %119 = vector.load %arg5[%c1_115, %c3_116, %c0_117, %c0_118] : memref<3x9x128x128xbf16, #tpu.memory_space<vmem>>, vector<1x1x128x128xbf16>
    %120 = vector.shape_cast %119 : vector<1x1x128x128xbf16> to vector<128x128xbf16>
    %cst_119 = arith.constant dense<0.000000e+00> : vector<48x128xf32>
    %121 = tpu.matmul %118, %120, %cst_119 {dimension_numbers = #tpu.dot_dimension_numbers<[1], [0], [0], [1], [0, 0, 1, 1], [], []>} : vector<48x128xbf16>, vector<128x128xbf16>, vector<48x128xf32> -> vector<48x128xf32>
    %122 = arith.addf %117, %121 : vector<48x128xf32>
    %c16_120 = arith.constant 16 : index
    %c0_121 = arith.constant 0 : index
    %123 = vector.load %arg10[%c16_120, %c0_121] : memref<80x128xbf16, #tpu.memory_space<vmem>>, vector<48x128xbf16>
    %c1_122 = arith.constant 1 : index
    %c4_123 = arith.constant 4 : index
    %c0_124 = arith.constant 0 : index
    %c0_125 = arith.constant 0 : index
    %124 = vector.load %arg5[%c1_122, %c4_123, %c0_124, %c0_125] : memref<3x9x128x128xbf16, #tpu.memory_space<vmem>>, vector<1x1x128x128xbf16>
    %125 = vector.shape_cast %124 : vector<1x1x128x128xbf16> to vector<128x128xbf16>
    %cst_126 = arith.constant dense<0.000000e+00> : vector<48x128xf32>
    %126 = tpu.matmul %123, %125, %cst_126 {dimension_numbers = #tpu.dot_dimension_numbers<[1], [0], [0], [1], [0, 0, 1, 1], [], []>} : vector<48x128xbf16>, vector<128x128xbf16>, vector<48x128xf32> -> vector<48x128xf32>
    %127 = arith.addf %122, %126 : vector<48x128xf32>
    %c17_127 = arith.constant 17 : index
    %c0_128 = arith.constant 0 : index
    %128 = vector.load %arg10[%c17_127, %c0_128] : memref<80x128xbf16, #tpu.memory_space<vmem>>, vector<48x128xbf16>
    %c1_129 = arith.constant 1 : index
    %c5_130 = arith.constant 5 : index
    %c0_131 = arith.constant 0 : index
    %c0_132 = arith.constant 0 : index
    %129 = vector.load %arg5[%c1_129, %c5_130, %c0_131, %c0_132] : memref<3x9x128x128xbf16, #tpu.memory_space<vmem>>, vector<1x1x128x128xbf16>
    %130 = vector.shape_cast %129 : vector<1x1x128x128xbf16> to vector<128x128xbf16>
    %cst_133 = arith.constant dense<0.000000e+00> : vector<48x128xf32>
    %131 = tpu.matmul %128, %130, %cst_133 {dimension_numbers = #tpu.dot_dimension_numbers<[1], [0], [0], [1], [0, 0, 1, 1], [], []>} : vector<48x128xbf16>, vector<128x128xbf16>, vector<48x128xf32> -> vector<48x128xf32>
    %132 = arith.addf %127, %131 : vector<48x128xf32>
    %c23_134 = arith.constant 23 : index
    %c0_135 = arith.constant 0 : index
    %133 = vector.load %arg10[%c23_134, %c0_135] : memref<80x128xbf16, #tpu.memory_space<vmem>>, vector<48x128xbf16>
    %c1_136 = arith.constant 1 : index
    %c6_137 = arith.constant 6 : index
    %c0_138 = arith.constant 0 : index
    %c0_139 = arith.constant 0 : index
    %134 = vector.load %arg5[%c1_136, %c6_137, %c0_138, %c0_139] : memref<3x9x128x128xbf16, #tpu.memory_space<vmem>>, vector<1x1x128x128xbf16>
    %135 = vector.shape_cast %134 : vector<1x1x128x128xbf16> to vector<128x128xbf16>
    %cst_140 = arith.constant dense<0.000000e+00> : vector<48x128xf32>
    %136 = tpu.matmul %133, %135, %cst_140 {dimension_numbers = #tpu.dot_dimension_numbers<[1], [0], [0], [1], [0, 0, 1, 1], [], []>} : vector<48x128xbf16>, vector<128x128xbf16>, vector<48x128xf32> -> vector<48x128xf32>
    %137 = arith.addf %132, %136 : vector<48x128xf32>
    %c24_141 = arith.constant 24 : index
    %c0_142 = arith.constant 0 : index
    %138 = vector.load %arg10[%c24_141, %c0_142] : memref<80x128xbf16, #tpu.memory_space<vmem>>, vector<48x128xbf16>
    %c1_143 = arith.constant 1 : index
    %c7_144 = arith.constant 7 : index
    %c0_145 = arith.constant 0 : index
    %c0_146 = arith.constant 0 : index
    %139 = vector.load %arg5[%c1_143, %c7_144, %c0_145, %c0_146] : memref<3x9x128x128xbf16, #tpu.memory_space<vmem>>, vector<1x1x128x128xbf16>
    %140 = vector.shape_cast %139 : vector<1x1x128x128xbf16> to vector<128x128xbf16>
    %cst_147 = arith.constant dense<0.000000e+00> : vector<48x128xf32>
    %141 = tpu.matmul %138, %140, %cst_147 {dimension_numbers = #tpu.dot_dimension_numbers<[1], [0], [0], [1], [0, 0, 1, 1], [], []>} : vector<48x128xbf16>, vector<128x128xbf16>, vector<48x128xf32> -> vector<48x128xf32>
    %142 = arith.addf %137, %141 : vector<48x128xf32>
    %c25_148 = arith.constant 25 : index
    %c0_149 = arith.constant 0 : index
    %143 = vector.load %arg10[%c25_148, %c0_149] : memref<80x128xbf16, #tpu.memory_space<vmem>>, vector<48x128xbf16>
    %c1_150 = arith.constant 1 : index
    %c8_151 = arith.constant 8 : index
    %c0_152 = arith.constant 0 : index
    %c0_153 = arith.constant 0 : index
    %144 = vector.load %arg5[%c1_150, %c8_151, %c0_152, %c0_153] : memref<3x9x128x128xbf16, #tpu.memory_space<vmem>>, vector<1x1x128x128xbf16>
    %145 = vector.shape_cast %144 : vector<1x1x128x128xbf16> to vector<128x128xbf16>
    %cst_154 = arith.constant dense<0.000000e+00> : vector<48x128xf32>
    %146 = tpu.matmul %143, %145, %cst_154 {dimension_numbers = #tpu.dot_dimension_numbers<[1], [0], [0], [1], [0, 0, 1, 1], [], []>} : vector<48x128xbf16>, vector<128x128xbf16>, vector<48x128xf32> -> vector<48x128xf32>
    %147 = arith.addf %142, %146 : vector<48x128xf32>
    %c1_155 = arith.constant 1 : index
    %c0_156 = arith.constant 0 : index
    %c0_157 = arith.constant 0 : index
    %148 = vector.load %arg6[%c1_155, %c0_156, %c0_157] : memref<3x1x128xf32, #tpu.memory_space<vmem>>, vector<1x1x128xf32>
    %149 = vector.shape_cast %148 : vector<1x1x128xf32> to vector<1x128xf32>
    %150 = vector.broadcast %149 : vector<1x128xf32> to vector<48x128xf32>
    %151 = arith.addf %147, %150 : vector<48x128xf32>
    %cst_158 = arith.constant 0.000000e+00 : f32
    %152 = vector.broadcast %cst_158 : f32 to vector<48x128xf32>
    %153 = arith.maximumf %151, %152 : vector<48x128xf32>
    %154 = arith.truncf %153 : vector<48x128xf32> to vector<48x128xbf16>
    %c1_159 = arith.constant 1 : index
    %c0_160 = arith.constant 0 : index
    %c0_161 = arith.constant 0 : index
    %155 = vector.load %arg7[%c1_159, %c0_160, %c0_161] : memref<3x128x512xbf16, #tpu.memory_space<vmem>>, vector<1x128x512xbf16>
    %156 = vector.shape_cast %155 : vector<1x128x512xbf16> to vector<128x512xbf16>
    %cst_162 = arith.constant dense<0.000000e+00> : vector<48x512xf32>
    %157 = tpu.matmul %154, %156, %cst_162 {dimension_numbers = #tpu.dot_dimension_numbers<[1], [0], [0], [1], [0, 0, 1, 1], [], []>} : vector<48x128xbf16>, vector<128x512xbf16>, vector<48x512xf32> -> vector<48x512xf32>
    %c1_163 = arith.constant 1 : index
    %c0_164 = arith.constant 0 : index
    %c0_165 = arith.constant 0 : index
    %158 = vector.load %arg8[%c1_163, %c0_164, %c0_165] : memref<3x1x512xf32, #tpu.memory_space<vmem>>, vector<1x1x512xf32>
    %159 = vector.shape_cast %158 : vector<1x1x512xf32> to vector<1x512xf32>
    %160 = vector.broadcast %159 : vector<1x512xf32> to vector<48x512xf32>
    %161 = arith.addf %157, %160 : vector<48x512xf32>
    %162 = arith.addf %161, %87 : vector<48x512xf32>
    %cst_166 = arith.constant 0.000000e+00 : f32
    %163 = vector.broadcast %cst_166 : f32 to vector<48x512xf32>
    %164 = arith.maximumf %162, %163 : vector<48x512xf32>
    %165 = arith.truncf %164 : vector<48x512xf32> to vector<48x512xbf16>
    %c2_167 = arith.constant 2 : index
    %c0_168 = arith.constant 0 : index
    %c0_169 = arith.constant 0 : index
    %166 = vector.load %arg3[%c2_167, %c0_168, %c0_169] : memref<3x512x128xbf16, #tpu.memory_space<vmem>>, vector<1x512x128xbf16>
    %167 = vector.shape_cast %166 : vector<1x512x128xbf16> to vector<512x128xbf16>
    %cst_170 = arith.constant dense<0.000000e+00> : vector<48x128xf32>
    %168 = tpu.matmul %165, %167, %cst_170 {dimension_numbers = #tpu.dot_dimension_numbers<[1], [0], [0], [1], [0, 0, 1, 1], [], []>} : vector<48x512xbf16>, vector<512x128xbf16>, vector<48x128xf32> -> vector<48x128xf32>
    %c2_171 = arith.constant 2 : index
    %c0_172 = arith.constant 0 : index
    %c0_173 = arith.constant 0 : index
    %169 = vector.load %arg4[%c2_171, %c0_172, %c0_173] : memref<3x1x128xf32, #tpu.memory_space<vmem>>, vector<1x1x128xf32>
    %170 = vector.shape_cast %169 : vector<1x1x128xf32> to vector<1x128xf32>
    %171 = vector.broadcast %170 : vector<1x128xf32> to vector<48x128xf32>
    %172 = arith.addf %168, %171 : vector<48x128xf32>
    %cst_174 = arith.constant 0.000000e+00 : f32
    %173 = vector.broadcast %cst_174 : f32 to vector<48x128xf32>
    %174 = arith.maximumf %172, %173 : vector<48x128xf32>
    %cst_175 = arith.constant 0.000000e+00 : f32
    %175 = vector.broadcast %cst_175 : f32 to vector<48x128xf32>
    %176 = arith.select %7, %174, %175 : vector<48x128xi1>, vector<48x128xf32>
    %177 = arith.truncf %176 : vector<48x128xf32> to vector<48x128xbf16>
    %c16_176 = arith.constant 16 : index
    %c0_177 = arith.constant 0 : index
    %178 = vector.load %arg10[%c16_176, %c0_177] : memref<80x128xbf16, #tpu.memory_space<vmem>>, vector<48x128xbf16>
    tpu.vector_store %arg10[%c16_176, %c0_177], %177 {strides = array<i32>} : memref<80x128xbf16, #tpu.memory_space<vmem>>, vector<48x128xbf16>,
    %cst_178 = arith.constant 0.000000e+00 : f32
    %179 = vector.broadcast %cst_178 : f32 to vector<48x128xf32>
    %c7_179 = arith.constant 7 : index
    %c0_180 = arith.constant 0 : index
    %180 = vector.load %arg10[%c7_179, %c0_180] : memref<80x128xbf16, #tpu.memory_space<vmem>>, vector<48x128xbf16>
    %c2_181 = arith.constant 2 : index
    %c0_182 = arith.constant 0 : index
    %c0_183 = arith.constant 0 : index
    %c0_184 = arith.constant 0 : index
    %181 = vector.load %arg5[%c2_181, %c0_182, %c0_183, %c0_184] : memref<3x9x128x128xbf16, #tpu.memory_space<vmem>>, vector<1x1x128x128xbf16>
    %182 = vector.shape_cast %181 : vector<1x1x128x128xbf16> to vector<128x128xbf16>
    %cst_185 = arith.constant dense<0.000000e+00> : vector<48x128xf32>
    %183 = tpu.matmul %180, %182, %cst_185 {dimension_numbers = #tpu.dot_dimension_numbers<[1], [0], [0], [1], [0, 0, 1, 1], [], []>} : vector<48x128xbf16>, vector<128x128xbf16>, vector<48x128xf32> -> vector<48x128xf32>
    %184 = arith.addf %179, %183 : vector<48x128xf32>
    %c8_186 = arith.constant 8 : index
    %c0_187 = arith.constant 0 : index
    %185 = vector.load %arg10[%c8_186, %c0_187] : memref<80x128xbf16, #tpu.memory_space<vmem>>, vector<48x128xbf16>
    %c2_188 = arith.constant 2 : index
    %c1_189 = arith.constant 1 : index
    %c0_190 = arith.constant 0 : index
    %c0_191 = arith.constant 0 : index
    %186 = vector.load %arg5[%c2_188, %c1_189, %c0_190, %c0_191] : memref<3x9x128x128xbf16, #tpu.memory_space<vmem>>, vector<1x1x128x128xbf16>
    %187 = vector.shape_cast %186 : vector<1x1x128x128xbf16> to vector<128x128xbf16>
    %cst_192 = arith.constant dense<0.000000e+00> : vector<48x128xf32>
    %188 = tpu.matmul %185, %187, %cst_192 {dimension_numbers = #tpu.dot_dimension_numbers<[1], [0], [0], [1], [0, 0, 1, 1], [], []>} : vector<48x128xbf16>, vector<128x128xbf16>, vector<48x128xf32> -> vector<48x128xf32>
    %189 = arith.addf %184, %188 : vector<48x128xf32>
    %c9_193 = arith.constant 9 : index
    %c0_194 = arith.constant 0 : index
    %190 = vector.load %arg10[%c9_193, %c0_194] : memref<80x128xbf16, #tpu.memory_space<vmem>>, vector<48x128xbf16>
    %c2_195 = arith.constant 2 : index
    %c2_196 = arith.constant 2 : index
    %c0_197 = arith.constant 0 : index
    %c0_198 = arith.constant 0 : index
    %191 = vector.load %arg5[%c2_195, %c2_196, %c0_197, %c0_198] : memref<3x9x128x128xbf16, #tpu.memory_space<vmem>>, vector<1x1x128x128xbf16>
    %192 = vector.shape_cast %191 : vector<1x1x128x128xbf16> to vector<128x128xbf16>
    %cst_199 = arith.constant dense<0.000000e+00> : vector<48x128xf32>
    %193 = tpu.matmul %190, %192, %cst_199 {dimension_numbers = #tpu.dot_dimension_numbers<[1], [0], [0], [1], [0, 0, 1, 1], [], []>} : vector<48x128xbf16>, vector<128x128xbf16>, vector<48x128xf32> -> vector<48x128xf32>
    %194 = arith.addf %189, %193 : vector<48x128xf32>
    %c15_200 = arith.constant 15 : index
    %c0_201 = arith.constant 0 : index
    %195 = vector.load %arg10[%c15_200, %c0_201] : memref<80x128xbf16, #tpu.memory_space<vmem>>, vector<48x128xbf16>
    %c2_202 = arith.constant 2 : index
    %c3_203 = arith.constant 3 : index
    %c0_204 = arith.constant 0 : index
    %c0_205 = arith.constant 0 : index
    %196 = vector.load %arg5[%c2_202, %c3_203, %c0_204, %c0_205] : memref<3x9x128x128xbf16, #tpu.memory_space<vmem>>, vector<1x1x128x128xbf16>
    %197 = vector.shape_cast %196 : vector<1x1x128x128xbf16> to vector<128x128xbf16>
    %cst_206 = arith.constant dense<0.000000e+00> : vector<48x128xf32>
    %198 = tpu.matmul %195, %197, %cst_206 {dimension_numbers = #tpu.dot_dimension_numbers<[1], [0], [0], [1], [0, 0, 1, 1], [], []>} : vector<48x128xbf16>, vector<128x128xbf16>, vector<48x128xf32> -> vector<48x128xf32>
    %199 = arith.addf %194, %198 : vector<48x128xf32>
    %c16_207 = arith.constant 16 : index
    %c0_208 = arith.constant 0 : index
    %200 = vector.load %arg10[%c16_207, %c0_208] : memref<80x128xbf16, #tpu.memory_space<vmem>>, vector<48x128xbf16>
    %c2_209 = arith.constant 2 : index
    %c4_210 = arith.constant 4 : index
    %c0_211 = arith.constant 0 : index
    %c0_212 = arith.constant 0 : index
    %201 = vector.load %arg5[%c2_209, %c4_210, %c0_211, %c0_212] : memref<3x9x128x128xbf16, #tpu.memory_space<vmem>>, vector<1x1x128x128xbf16>
    %202 = vector.shape_cast %201 : vector<1x1x128x128xbf16> to vector<128x128xbf16>
    %cst_213 = arith.constant dense<0.000000e+00> : vector<48x128xf32>
    %203 = tpu.matmul %200, %202, %cst_213 {dimension_numbers = #tpu.dot_dimension_numbers<[1], [0], [0], [1], [0, 0, 1, 1], [], []>} : vector<48x128xbf16>, vector<128x128xbf16>, vector<48x128xf32> -> vector<48x128xf32>
    %204 = arith.addf %199, %203 : vector<48x128xf32>
    %c17_214 = arith.constant 17 : index
    %c0_215 = arith.constant 0 : index
    %205 = vector.load %arg10[%c17_214, %c0_215] : memref<80x128xbf16, #tpu.memory_space<vmem>>, vector<48x128xbf16>
    %c2_216 = arith.constant 2 : index
    %c5_217 = arith.constant 5 : index
    %c0_218 = arith.constant 0 : index
    %c0_219 = arith.constant 0 : index
    %206 = vector.load %arg5[%c2_216, %c5_217, %c0_218, %c0_219] : memref<3x9x128x128xbf16, #tpu.memory_space<vmem>>, vector<1x1x128x128xbf16>
    %207 = vector.shape_cast %206 : vector<1x1x128x128xbf16> to vector<128x128xbf16>
    %cst_220 = arith.constant dense<0.000000e+00> : vector<48x128xf32>
    %208 = tpu.matmul %205, %207, %cst_220 {dimension_numbers = #tpu.dot_dimension_numbers<[1], [0], [0], [1], [0, 0, 1, 1], [], []>} : vector<48x128xbf16>, vector<128x128xbf16>, vector<48x128xf32> -> vector<48x128xf32>
    %209 = arith.addf %204, %208 : vector<48x128xf32>
    %c23_221 = arith.constant 23 : index
    %c0_222 = arith.constant 0 : index
    %210 = vector.load %arg10[%c23_221, %c0_222] : memref<80x128xbf16, #tpu.memory_space<vmem>>, vector<48x128xbf16>
    %c2_223 = arith.constant 2 : index
    %c6_224 = arith.constant 6 : index
    %c0_225 = arith.constant 0 : index
    %c0_226 = arith.constant 0 : index
    %211 = vector.load %arg5[%c2_223, %c6_224, %c0_225, %c0_226] : memref<3x9x128x128xbf16, #tpu.memory_space<vmem>>, vector<1x1x128x128xbf16>
    %212 = vector.shape_cast %211 : vector<1x1x128x128xbf16> to vector<128x128xbf16>
    %cst_227 = arith.constant dense<0.000000e+00> : vector<48x128xf32>
    %213 = tpu.matmul %210, %212, %cst_227 {dimension_numbers = #tpu.dot_dimension_numbers<[1], [0], [0], [1], [0, 0, 1, 1], [], []>} : vector<48x128xbf16>, vector<128x128xbf16>, vector<48x128xf32> -> vector<48x128xf32>
    %214 = arith.addf %209, %213 : vector<48x128xf32>
    %c24_228 = arith.constant 24 : index
    %c0_229 = arith.constant 0 : index
    %215 = vector.load %arg10[%c24_228, %c0_229] : memref<80x128xbf16, #tpu.memory_space<vmem>>, vector<48x128xbf16>
    %c2_230 = arith.constant 2 : index
    %c7_231 = arith.constant 7 : index
    %c0_232 = arith.constant 0 : index
    %c0_233 = arith.constant 0 : index
    %216 = vector.load %arg5[%c2_230, %c7_231, %c0_232, %c0_233] : memref<3x9x128x128xbf16, #tpu.memory_space<vmem>>, vector<1x1x128x128xbf16>
    %217 = vector.shape_cast %216 : vector<1x1x128x128xbf16> to vector<128x128xbf16>
    %cst_234 = arith.constant dense<0.000000e+00> : vector<48x128xf32>
    %218 = tpu.matmul %215, %217, %cst_234 {dimension_numbers = #tpu.dot_dimension_numbers<[1], [0], [0], [1], [0, 0, 1, 1], [], []>} : vector<48x128xbf16>, vector<128x128xbf16>, vector<48x128xf32> -> vector<48x128xf32>
    %219 = arith.addf %214, %218 : vector<48x128xf32>
    %c25_235 = arith.constant 25 : index
    %c0_236 = arith.constant 0 : index
    %220 = vector.load %arg10[%c25_235, %c0_236] : memref<80x128xbf16, #tpu.memory_space<vmem>>, vector<48x128xbf16>
    %c2_237 = arith.constant 2 : index
    %c8_238 = arith.constant 8 : index
    %c0_239 = arith.constant 0 : index
    %c0_240 = arith.constant 0 : index
    %221 = vector.load %arg5[%c2_237, %c8_238, %c0_239, %c0_240] : memref<3x9x128x128xbf16, #tpu.memory_space<vmem>>, vector<1x1x128x128xbf16>
    %222 = vector.shape_cast %221 : vector<1x1x128x128xbf16> to vector<128x128xbf16>
    %cst_241 = arith.constant dense<0.000000e+00> : vector<48x128xf32>
    %223 = tpu.matmul %220, %222, %cst_241 {dimension_numbers = #tpu.dot_dimension_numbers<[1], [0], [0], [1], [0, 0, 1, 1], [], []>} : vector<48x128xbf16>, vector<128x128xbf16>, vector<48x128xf32> -> vector<48x128xf32>
    %224 = arith.addf %219, %223 : vector<48x128xf32>
    %c2_242 = arith.constant 2 : index
    %c0_243 = arith.constant 0 : index
    %c0_244 = arith.constant 0 : index
    %225 = vector.load %arg6[%c2_242, %c0_243, %c0_244] : memref<3x1x128xf32, #tpu.memory_space<vmem>>, vector<1x1x128xf32>
    %226 = vector.shape_cast %225 : vector<1x1x128xf32> to vector<1x128xf32>
    %227 = vector.broadcast %226 : vector<1x128xf32> to vector<48x128xf32>
    %228 = arith.addf %224, %227 : vector<48x128xf32>
    %cst_245 = arith.constant 0.000000e+00 : f32
    %229 = vector.broadcast %cst_245 : f32 to vector<48x128xf32>
    %230 = arith.maximumf %228, %229 : vector<48x128xf32>
    %231 = arith.truncf %230 : vector<48x128xf32> to vector<48x128xbf16>
    %c2_246 = arith.constant 2 : index
    %c0_247 = arith.constant 0 : index
    %c0_248 = arith.constant 0 : index
    %232 = vector.load %arg7[%c2_246, %c0_247, %c0_248] : memref<3x128x512xbf16, #tpu.memory_space<vmem>>, vector<1x128x512xbf16>
    %233 = vector.shape_cast %232 : vector<1x128x512xbf16> to vector<128x512xbf16>
    %cst_249 = arith.constant dense<0.000000e+00> : vector<48x512xf32>
    %234 = tpu.matmul %231, %233, %cst_249 {dimension_numbers = #tpu.dot_dimension_numbers<[1], [0], [0], [1], [0, 0, 1, 1], [], []>} : vector<48x128xbf16>, vector<128x512xbf16>, vector<48x512xf32> -> vector<48x512xf32>
    %c2_250 = arith.constant 2 : index
    %c0_251 = arith.constant 0 : index
    %c0_252 = arith.constant 0 : index
    %235 = vector.load %arg8[%c2_250, %c0_251, %c0_252] : memref<3x1x512xf32, #tpu.memory_space<vmem>>, vector<1x1x512xf32>
    %236 = vector.shape_cast %235 : vector<1x1x512xf32> to vector<1x512xf32>
    %237 = vector.broadcast %236 : vector<1x512xf32> to vector<48x512xf32>
    %238 = arith.addf %234, %237 : vector<48x512xf32>
    %239 = arith.addf %238, %164 : vector<48x512xf32>
    %cst_253 = arith.constant 0.000000e+00 : f32
    %240 = vector.broadcast %cst_253 : f32 to vector<48x512xf32>
    %241 = arith.maximumf %239, %240 : vector<48x512xf32>
    %c0_254 = arith.constant 0 : index
    %c0_255 = arith.constant 0 : index
    %c0_256 = arith.constant 0 : index
    %242 = vector.load %arg9[%c0_254, %c0_255, %c0_256] : memref<1x48x512xf32, #tpu.memory_space<vmem>>, vector<1x48x512xf32>
    %243 = vector.shape_cast %242 : vector<1x48x512xf32> to vector<48x512xf32>
    %244 = vector.shape_cast %241 : vector<48x512xf32> to vector<1x48x512xf32>
    tpu.vector_store %arg9[%c0_254, %c0_255, %c0_256], %244 {strides = array<i32>} : memref<1x48x512xf32, #tpu.memory_space<vmem>>, vector<1x48x512xf32>,
    return
  }
  func.func @transform_0(%arg0: i32) -> (i32, i32, i32) {
    %c0_i32 = arith.constant 0 : i32
    %c0_i32_0 = arith.constant 0 : i32
    %c0_i32_1 = arith.constant 0 : i32
    return %arg0, %c0_i32, %c0_i32_0 : i32, i32, i32
  }
  func.func @transform_1(%arg0: i32) -> (i32, i32) {
    %c0_i32 = arith.constant 0 : i32
    %c0_i32_0 = arith.constant 0 : i32
    %c0_i32_1 = arith.constant 0 : i32
    return %c0_i32, %c0_i32_0 : i32, i32
  }
  func.func @transform_2(%arg0: i32) -> (i32, i32, i32) {
    %c0_i32 = arith.constant 0 : i32
    %c0_i32_0 = arith.constant 0 : i32
    %c0_i32_1 = arith.constant 0 : i32
    %c0_i32_2 = arith.constant 0 : i32
    return %c0_i32, %c0_i32_0, %c0_i32_1 : i32, i32, i32
  }
  func.func @transform_3(%arg0: i32) -> (i32, i32, i32) {
    %c0_i32 = arith.constant 0 : i32
    %c0_i32_0 = arith.constant 0 : i32
    %c0_i32_1 = arith.constant 0 : i32
    %c0_i32_2 = arith.constant 0 : i32
    return %c0_i32, %c0_i32_0, %c0_i32_1 : i32, i32, i32
  }
  func.func @transform_4(%arg0: i32) -> (i32, i32, i32, i32) {
    %c0_i32 = arith.constant 0 : i32
    %c0_i32_0 = arith.constant 0 : i32
    %c0_i32_1 = arith.constant 0 : i32
    %c0_i32_2 = arith.constant 0 : i32
    %c0_i32_3 = arith.constant 0 : i32
    return %c0_i32, %c0_i32_0, %c0_i32_1, %c0_i32_2 : i32, i32, i32, i32
  }
  func.func @transform_5(%arg0: i32) -> (i32, i32, i32) {
    %c0_i32 = arith.constant 0 : i32
    %c0_i32_0 = arith.constant 0 : i32
    %c0_i32_1 = arith.constant 0 : i32
    %c0_i32_2 = arith.constant 0 : i32
    return %c0_i32, %c0_i32_0, %c0_i32_1 : i32, i32, i32
  }
  func.func @transform_6(%arg0: i32) -> (i32, i32, i32) {
    %c0_i32 = arith.constant 0 : i32
    %c0_i32_0 = arith.constant 0 : i32
    %c0_i32_1 = arith.constant 0 : i32
    %c0_i32_2 = arith.constant 0 : i32
    return %c0_i32, %c0_i32_0, %c0_i32_1 : i32, i32, i32
  }
  func.func @transform_7(%arg0: i32) -> (i32, i32, i32) {
    %c0_i32 = arith.constant 0 : i32
    %c0_i32_0 = arith.constant 0 : i32
    %c0_i32_1 = arith.constant 0 : i32
    %c0_i32_2 = arith.constant 0 : i32
    return %c0_i32, %c0_i32_0, %c0_i32_1 : i32, i32, i32
  }
  func.func @transform_8(%arg0: i32) -> (i32, i32, i32) {
    %c0_i32 = arith.constant 0 : i32
    %c0_i32_0 = arith.constant 0 : i32
    %c0_i32_1 = arith.constant 0 : i32
    return %arg0, %c0_i32, %c0_i32_0 : i32, i32, i32
  }
}

</mosaic_0001>

<bundles_post_ra>
// kernel: forward_nhwc.2
= control target key start
LH: loop header
LB: loop body
LE: loop exit
PB: predicated region body
PF: predicated region fallthrough
CT: control target
= control target key end

     0   :  { %s4941_s17 = smov 0   ;;  %s6473_s0 = inlined_call_operand.vmem [shape: bf16[2,192,256], index: 0, kind: input, shape index: {}]   ;;  %s6474_s1 = inlined_call_operand.vmem [shape: f32[192,1], index: 1, kind: input, shape index: {}]   ;;  %s6475_s2 = inlined_call_operand.vmem [shape: f32[48,1], index: 2, kind: input, shape index: {}]   ;;  %s6476_s3 = inlined_call_operand.vmem [shape: bf16[256,128], index: 3, kind: input, shape index: {}]   ;;  %s6477_s4 = inlined_call_operand.vmem [shape: f32[1,128], index: 4, kind: input, shape index: {}]   ;;  %s6478_s5 = inlined_call_operand.vmem [shape: bf16[256,640], index: 5, kind: input, shape index: {}]   ;;  %s6479_s6 = inlined_call_operand.vmem [shape: f32[1,512], index: 6, kind: input, shape index: {}]   ;;  %s6480_s7 = inlined_call_operand.vmem [shape: bf16[9,128,128], index: 7, kind: input, shape index: {}]   ;;  %s6481_s8 = inlined_call_operand.vmem [shape: f32[1,128], index: 8, kind: input, shape index: {}]   ;;  %s6482_s9 = inlined_call_operand.vmem [shape: bf16[128,512], index: 9, kind: input, shape index: {}]   ;;  %s6483_s10 = inlined_call_operand.vmem [shape: f32[1,512], index: 10, kind: input, shape index: {}]   ;;  %s6484_s11 = inlined_call_operand.vmem [shape: bf16[2,48,512], index: 11, kind: output, shape index: {}]  }
   0x1 LB: > { %s3675_s18 = sadd.s32 4294967295, %s4876_s17   ;;  %p3679_p0 = scmp.ge.s32.totalorder %s4876_s17, 1  ;;  %s4876_s17 = sphi %s4941_s17, %s21_s17  }
   0x2   : > { %p337_p1 = scmp.lt.s32.totalorder %s4876_s17, 3 }
   0x4   : > { %p338_p2 = pnand %p3679_p0, %p337_p1 }
   0x6   : > { %341 = sbr.rel (%p338_p2) target bundleno = 901 (0x385), region = 64 }
   0xd   : > { %v4549_v0 = vld [vmem:[%s6476_s3 + $0x40] sm:$0xff]   ;;  %v4878_v3 = vmov 0   ;;  %v4554_v5 = vld [vmem:[%s6476_s3 + $0x48] sm:$0xff]   ;;  %v4559_v9 = vld [vmem:[%s6476_s3 + $0x50] sm:$0xff]   ;;  %p377_p3 = scmp.lt.s32.totalorder %s3675_s18, 1 }
   0xe   : > { %v4550_v1 = vld [vmem:[%s6478_s5 + $0x4] ss:$20 sps:$4 sm:$0xff]   ;;  %4063 = vmatprep.subr.bf16.mxu0 %v4549_v0  ;;  %4547 = vset.pattern.permute.xlu0 %v4878_v3  ;;  %388 = vst [vmem:[#allocation2 + $0x18] sm:$0xff] %v4878_v3  ;;  %390 = vst [vmem:[#allocation2 + $0x38] sm:$0xff] %v4878_v3  ;;  %v4553_v4 = vld [vmem:[%s6478_s5] ss:$20 sps:$4 sm:$0xff]  }
   0xf   : > { %v4552_v2 = vld [vmem:[%s6476_s3] sm:$0xff]   ;;  %392 = vst [vmem:[#allocation2 + $0x58] sm:$0xff] %v4878_v3  ;;  %1471 = vmatprep.subr.bf16.mxu1 %v4550_v1  ;;  %4548 = vset.pattern.permute.xlu1 %v4878_v3  ;;  %v4557_v7 = vld [vmem:[%s6476_s3 + $0x8] sm:$0xff]   ;;  %v4562_v11 = vld [vmem:[%s6476_s3 + $0x10] sm:$0xff]   ;;  %s6500_s18 = smov (!%p377_p3, %s3675_s18), 1 }
  0x10   : > { %4064 = vmatpush3.bf16.msra.mxu0 %v4552_v2  ;;  %1472 = vmatpush1.bf16.msra.mxu1 %v4553_v4  ;;  %v4555_v6 = vld [vmem:[%s6478_s5 + $0x2c] ss:$20 sps:$4 sm:$0xff]   ;;  %v4558_v8 = vld [vmem:[%s6478_s5 + $0x28] ss:$20 sps:$4 sm:$0xff]   ;;  %v4563_v12 = vld [vmem:[%s6478_s5 + $0x50] ss:$20 sps:$4 sm:$0xff]  }
  0x11   : > { %4065 = vmatprep.subr.bf16.mxu0 %v4554_v5  ;;  %1473 = vmatprep.subr.bf16.mxu1 %v4555_v6  ;;  %v4560_v10 = vld [vmem:[%s6478_s5 + $0x54] ss:$20 sps:$4 sm:$0xff]   ;;  %v4564_v13 = vld [vmem:[%s6476_s3 + $0x58] sm:$0xff]   ;;  %v4569_v17 = vld [vmem:[%s6476_s3 + $0x60] sm:$0xff]   ;;  %s4534_s12 = smul.u32 192, %s6500_s18 }
  0x12   : > { %v4565_v14 = vld [vmem:[%s6478_s5 + $0x7c] ss:$20 sps:$4 sm:$0xff]   ;;  %v4568_v16 = vld [vmem:[%s6478_s5 + $0x78] ss:$20 sps:$4 sm:$0xff]   ;;  %v4572_v19 = vld [vmem:[%s6476_s3 + $0x20] sm:$0xff]   ;;  %s4535_s23 = smul.u32 96, %s6500_s18 }
  0x13   : > { %v4567_v15 = vld [vmem:[%s6476_s3 + $0x18] sm:$0xff]   ;;  %v4573_v20 = vld [vmem:[%s6478_s5 + $0xa0] ss:$20 sps:$4 sm:$0xff]   ;;  %v4574_v21 = vld [vmem:[%s6476_s3 + $0x68] sm:$0xff]   ;;  %s5048_s27 = scalar_lea.vmem %s6473_s0, %s4534_s12 }
  0x14   : > { %4066 = vmatpush3.bf16.msra.mxu0 %v4557_v7  ;;  %1474 = vmatpush1.bf16.msra.mxu1 %v4558_v8  ;;  %v4570_v18 = vld [vmem:[%s6478_s5 + $0xa4] ss:$20 sps:$4 sm:$0xff]   ;;  %v4575_v22 = vld [vmem:[%s6478_s5 + $0xcc] ss:$20 sps:$4 sm:$0xff]   ;;  %v4578_v24 = vld [vmem:[%s6478_s5 + $0xc8] ss:$20 sps:$4 sm:$0xff]   ;;  %s6362_s24 = scalar_lea.vmem %s6484_s11, %s4535_s23 }
  0x15   : > { %4067 = vmatprep.subr.bf16.mxu0 %v4559_v9  ;;  %1475 = vmatprep.subr.bf16.mxu1 %v4560_v10  ;;  %v4577_v23 = vld [vmem:[%s6476_s3 + $0x28] sm:$0xff]   ;;  %v4579_v25 = vld [vmem:[%s6476_s3 + $0x70] sm:$0xff]   ;;  %v4584_v29 = vld [vmem:[%s6476_s3 + $0x78] sm:$0xff]  }
  0x16   : > { %v4580_v26 = vld [vmem:[%s6478_s5 + $0xf4] ss:$20 sps:$4 sm:$0xff]   ;;  %v4583_v28 = vld [vmem:[%s6478_s5 + $0xf0] ss:$20 sps:$4 sm:$0xff]   ;;  %v4587_v32 = vld [vmem:[%s6476_s3 + $0x38] sm:$0xff]  }
  0x17   : > { %v4582_v27 = vld [vmem:[%s6476_s3 + $0x30] sm:$0xff]   ;;  %v4591_v31 = vld [vmem:[%s5048_s27 + $0x4] ss:$8 sps:$4 sm:$0xff]   ;;  %v4589_v35 = vld [vmem:[%s5048_s27] ss:$8 sps:$4 sm:$0xff]  }
  0x18   : > { %4068 = vmatpush3.bf16.msra.mxu0 %v4562_v11  ;;  %1476 = vmatpush1.bf16.msra.mxu1 %v4563_v12  ;;  %v4585_v30 = vld [vmem:[%s6478_s5 + $0x11c] ss:$20 sps:$4 sm:$0xff]   ;;  %v4588_v33 = vld [vmem:[%s6478_s5 + $0x118] ss:$20 sps:$4 sm:$0xff]   ;;  %v4594_v37 = vld [vmem:[%s6478_s5 + $0x140] ss:$20 sps:$4 sm:$0xff]  }
  0x19   : > { %4069 = vmatprep.subr.bf16.mxu0 %v4564_v13  ;;  %1477 = vmatprep.subr.bf16.mxu1 %v4565_v14  ;;  %v4592_v34 = vld [vmem:[%s6478_s5 + $0x144] ss:$20 sps:$4 sm:$0xff]   ;;  %v4598_v36 = vld [vmem:[%s5048_s27 + $0x14] ss:$8 sps:$4 sm:$0xff]   ;;  %v4595_v38 = vld [vmem:[%s6478_s5 + $0x16c] ss:$20 sps:$4 sm:$0xff]  }
  0x1a   : > { %670 = vmatprep.mubr.bf16.mxu0 %v4591_v31  ;;  %v4597_v39 = vld [vmem:[%s6478_s5 + $0x168] ss:$20 sps:$4 sm:$0xff]   ;;  %v4600_v41 = vld [vmem:[%s5048_s27 + $0x10] ss:$8 sps:$4 sm:$0xff]   ;;  %v4607_v42 = vld [vmem:[%s5048_s27 + $0x24] ss:$8 sps:$4 sm:$0xff]  }
  0x1b   : > { %v4601_v40 = vld [vmem:[%s6478_s5 + $0x194] ss:$20 sps:$4 sm:$0xff]   ;;  %v4603_v43 = vld [vmem:[%s6478_s5 + $0x190] ss:$20 sps:$4 sm:$0xff]   ;;  %v4606_v46 = vld [vmem:[%s6478_s5 + $0x1b8] ss:$20 sps:$4 sm:$0xff]  }
  0x1c   : > { %4070 = vmatpush3.bf16.msra.mxu0 %v4567_v15  ;;  %1478 = vmatpush1.bf16.msra.mxu1 %v4568_v16  ;;  %v4604_v44 = vld [vmem:[%s6478_s5 + $0x1bc] ss:$20 sps:$4 sm:$0xff]   ;;  %v4610_v47 = vld [vmem:[%s6478_s5 + $0x1e4] ss:$20 sps:$4 sm:$0xff]   ;;  %v4609_v48 = vld [vmem:[%s5048_s27 + $0x20] ss:$8 sps:$4 sm:$0xff]  }
  0x1d   : > { %4071 = vmatprep.subr.bf16.mxu0 %v4569_v17  ;;  %1479 = vmatprep.subr.bf16.mxu1 %v4570_v18  ;;  %v5089_v45 = vld [vmem:[%s5048_s27 + $0x94] ss:$8 sps:$4 sm:$0xff]   ;;  %v4613_v51 = vld [vmem:[%s6478_s5 + $0x20c] ss:$20 sps:$4 sm:$0xff]   ;;  %v4618_v59 = vld [vmem:[%s5048_s27 + $0x30] ss:$8 sps:$4 sm:$0xff]  }
  0x1e   : > { %1503 = vmatprep.mubr.bf16.mxu1 %v5089_v45  ;;  %v4616_v49 = vld [vmem:[%s5048_s27 + $0x34] ss:$8 sps:$4 sm:$0xff]   ;;  %v751_v58 = vld [vmem:[%s6474_s1 + $0x40] sm:$0xff]  ;;  %v752_v61 = vld [vmem:[%s6474_s1 + $0x48] sm:$0xff] }
  0x1f   : > { %v4612_v50 = vld [vmem:[%s6478_s5 + $0x1e0] ss:$20 sps:$4 sm:$0xff]   ;;  %v750_v53 = vld [vmem:[%s6474_s1 + $0x38] sm:$0xff]  ;;  %vm769_vm2 = vcmp.gt.f32.partialorder %v751_v58, 0.0  ;;  %v4625_v62 = vld [vmem:[%s5048_s27 + $0x44] ss:$8 sps:$4 sm:$0xff]  }
  0x20   : > { %4072 = vmatpush3.bf16.msra.mxu0 %v4572_v19  ;;  %1480 = vmatpush1.bf16.msra.mxu1 %v4573_v20  ;;  %v749_v52 = vld [vmem:[%s6474_s1 + $0x30] sm:$0xff]  ;;  %v4615_v54 = vld [vmem:[%s6478_s5 + $0x208] ss:$20 sps:$4 sm:$0xff]   ;;  %vm768_vm1 = vcmp.gt.f32.partialorder %v750_v53, 0.0  ;;  %v805_v63 = vsel %vm769_vm2, 1, %v4878_v3  ;;  %vm770_vm4 = vcmp.gt.f32.partialorder %v752_v61, 0.0 }
  0x21   : > { %4073 = vmatprep.subr.bf16.mxu0 %v4574_v21  ;;  %1481 = vmatprep.subr.bf16.mxu1 %v4575_v22  ;;  %vm767_vm0 = vcmp.gt.f32.partialorder %v749_v52, 0.0  ;;  %v753_v56 = vld [vmem:[%s6474_s1 + $0x50] sm:$0xff]  ;;  %v804_v60 = vsel %vm768_vm1, 1, %v4878_v3  ;;  %v754_v0 = vld [vmem:[%s6474_s1 + $0x58] sm:$0xff]  ;;  %v743_v2 = vld [vmem:[%s6474_s1] sm:$0xff]  ;;  %v806_v5 = vsel %vm770_vm4, 1, %v4878_v3 }
  0x22   : > { %v803_v55 = vsel %vm767_vm0, 1, %v4878_v3  ;;  %v4619_v57 = vld [vmem:[%s6478_s5 + $0x234] ss:$20 sps:$4 sm:$0xff]   ;;  %vm771_vm3 = vcmp.gt.f32.partialorder %v753_v56, 0.0  ;;  %v4621_v1 = vld [vmem:[%s6478_s5 + $0x230] ss:$20 sps:$4 sm:$0xff]   ;;  %840 = vperm.xlu1 %4548, %v805_v63  }
  0x23   : > { %834 = vperm.xlu0 %4547, %v803_v55   ;;  %v4622_v4 = vld [vmem:[%s6478_s5 + $0x25c] ss:$20 sps:$4 sm:$0xff]   ;;  %v807_v6 = vsel %vm771_vm3, 1, %v4878_v3  ;;  %vm772_vm5 = vcmp.gt.f32.partialorder %v754_v0, 0.0  ;;  %vm761_vm6 = vcmp.gt.f32.partialorder %v743_v2, 0.0  ;;  %v744_v7 = vld [vmem:[%s6474_s1 + $0x8] sm:$0xff] }
  0x24   : > { %4074 = vmatpush3.bf16.msra.mxu0 %v4577_v23  ;;  %1482 = vmatpush1.bf16.msra.mxu1 %v4578_v24  ;;  %v4624_v8 = vld [vmem:[%s6478_s5 + $0x258] ss:$20 sps:$4 sm:$0xff]   ;;  %v745_v9 = vld [vmem:[%s6474_s1 + $0x10] sm:$0xff]  ;;  %v808_v10 = vsel %vm772_vm5, 1, %v4878_v3  ;;  %v4629_v11 = vld [vmem:[%s5048_s27 + $0x40] ss:$8 sps:$4 sm:$0xff]  }
  0x25   : > { %4075 = vmatprep.subr.bf16.mxu0 %v4579_v25  ;;  %1483 = vmatprep.subr.bf16.mxu1 %v4580_v26  ;;  %v797_v12 = vsel %vm761_vm6, 1, %v4878_v3  ;;  %vm762_vm7 = vcmp.gt.f32.partialorder %v744_v7, 0.0  ;;  %v5159_v13 = vld [vmem:[%s5048_s27 + $0x90] ss:$8 sps:$4 sm:$0xff]   ;;  %v4631_v14 = vld [vmem:[%s5048_s27 + $0x54] ss:$8 sps:$4 sm:$0xff]  }
  0x26   : > { %843 = vperm.xlu1 %4548, %v806_v5   ;;  %vm763_vm8 = vcmp.gt.f32.partialorder %v745_v9, 0.0  ;;  %v746_v15 = vld [vmem:[%s6474_s1 + $0x18] sm:$0xff]  ;;  %v5166_v16 = vld [vmem:[%s5048_s27 + $0xa4] ss:$8 sps:$4 sm:$0xff]   ;;  %v798_v18 = vsel %vm762_vm7, 1, %v4878_v3  ;;  %v1654_v24 = vld [vmem:[%s6474_s1 + $0x90] sm:$0xff] }
  0x27   : > { %837 = vperm.xlu0 %4547, %v804_v60   ;;  %v747_v17 = vld [vmem:[%s6474_s1 + $0x20] sm:$0xff]  ;;  %v799_v19 = vsel %vm763_vm8, 1, %v4878_v3  ;;  %vm764_vm9 = vcmp.gt.f32.partialorder %v746_v15, 0.0  ;;  %v748_v21 = vld [vmem:[%s6474_s1 + $0x28] sm:$0xff]  ;;  %v4635_v23 = vld [vmem:[%s5048_s27 + $0x50] ss:$8 sps:$4 sm:$0xff]  }
  0x28   : > { %4076 = vmatpush3.bf16.msra.mxu0 %v4582_v27  ;;  %1484 = vmatpush1.bf16.msra.mxu1 %v4583_v28  ;;  %v755_v20 = vld [vmem:[%s6474_s1 + $0x60] sm:$0xff]  ;;  %vm765_vm10 = vcmp.gt.f32.partialorder %v747_v17, 0.0  ;;  %v4649_v22 = vld [vmem:[%s6478_s5 + $0x8] ss:$20 sps:$4 sm:$0xff]   ;;  %v800_v28 = vsel %vm764_vm9, 1, %v4878_v3  ;;  %vm766_vm12 = vcmp.gt.f32.partialorder %v748_v21, 0.0 }
  0x29   : > { %4077 = vmatprep.subr.bf16.mxu0 %v4584_v29  ;;  %1485 = vmatprep.subr.bf16.mxu1 %v4585_v30  ;;  %v4651_v25 = vld [vmem:[%s6478_s5 + $0xc] ss:$20 sps:$4 sm:$0xff]   ;;  %vm773_vm11 = vcmp.gt.f32.partialorder %v755_v20, 0.0  ;;  %v4654_v29 = vld [vmem:[%s6478_s5 + $0x34] ss:$20 sps:$4 sm:$0xff]   ;;  %v801_v31 = vsel %vm765_vm10, 1, %v4878_v3 }
  0x2a   : > { %849 = vperm.xlu1 %4548, %v808_v10   ;;  %v5192_v26 = vld [vmem:[%s5048_s27 + $0xa0] ss:$8 sps:$4 sm:$0xff]   ;;  %v4637_v27 = vld [vmem:[%s5048_s27 + $0x64] ss:$8 sps:$4 sm:$0xff]   ;;  %v5200_v30 = vld [vmem:[%s5048_s27 + $0xb4] ss:$8 sps:$4 sm:$0xff]  }
  0x2b   : > { %846 = vperm.xlu0 %4547, %v807_v6   ;;  %vm1660_vm13 = vcmp.gt.f32.partialorder %v1654_v24, 0.0  ;;  %v3474_v56 = vld [vmem:[%s6475_s2 + $0x20] sm:$0xff]  ;;  %v1659_v60 = vld [vmem:[%s6474_s1 + $0xb8] sm:$0xff] }
  0x2c   : > { %4078 = vmatpush3.bf16.msra.mxu0 %v4587_v32  ;;  %1486 = vmatpush1.bf16.msra.mxu1 %v4588_v33  ;;  %v757_v32 = vld [vmem:[%s6474_s1 + $0x70] sm:$0xff]  ;;  %v1656_v33 = vld [vmem:[%s6474_s1 + $0xa0] sm:$0xff]  ;;  %vm3480_vm9 = vcmp.gt.f32.partialorder %v3474_v56, 0.0  ;;  %v3473_v7 = vld [vmem:[%s6475_s2 + $0x18] sm:$0xff]  ;;  %vm1665_vm10 = vcmp.gt.f32.partialorder %v1659_v60, 0.0  ;;  %v4879_v56 = vmov 0.0  }
  0x2d   : > { %1487 = vmatprep.subr.bf16.mxu1 %v4592_v34  ;;  %1534 = vmatprep.subr.bf16.mxu0 %v4651_v25  ;;  %v756_v34 = vld [vmem:[%s6474_s1 + $0x68] sm:$0xff]  ;;  %vm775_vm14 = vcmp.gt.f32.partialorder %v757_v32, 0.0  ;;  %vm1662_vm0 = vcmp.gt.f32.partialorder %v1656_v33, 0.0  ;;  %v4645_v9 = vld [vmem:[%s5048_s27 + $0x70] ss:$8 sps:$4 sm:$0xff]   ;;  %v5305_v10 = vsel %vm3480_vm9, 1, %v4878_v3 }
  0x2e   : > { %819 = vperm.xlu1 %4548, %v798_v18   ;;  %vm774_vm15 = vcmp.gt.f32.partialorder %v756_v34, 0.0  ;;  %v811_v52 = vsel %vm775_vm14, 1, %v4878_v3  ;;  %v1687_v55 = vsel %vm1662_vm0, 1, %v4878_v3  ;;  %v4663_v2 = vld [vmem:[%s6478_s5 + $0xac] ss:$20 sps:$4 sm:$0xff]   ;;  %v1690_v17 = vsel %vm1665_vm10, 1, %v4878_v3 }
  0x2f   : > { %671 = vmatmul.mubr.bf16.vlgmr.msra.gmra.mrb[0].mxu0 %v4589_v35  ;;  %816 = vperm.xlu0 %4547, %v797_v12   ;;  %v759_v35 = vld [vmem:[%s6474_s1 + $0x80] sm:$0xff]  ;;  %v810_v53 = vsel %vm774_vm15, 1, %v4878_v3  ;;  %v4696_v20 = vld [vmem:[%s6478_s5 + $0x178] ss:$20 sps:$4 sm:$0xff]   ;;  %v4703_v32 = vld [vmem:[%s6478_s5 + $0x1c8] ss:$20 sps:$4 sm:$0xff]  }
  0x30   : > { %678 = vmatprep.mubr.bf16.mxu0 %v4598_v36  ;;  %1488 = vmatpush1.bf16.msra.mxu1 %v4594_v37  ;;  %v809_v36 = vsel %vm773_vm11, 1, %v4878_v3  ;;  %v1655_v37 = vld [vmem:[%s6474_s1 + $0x98] sm:$0xff]  ;;  %vm777_vm1 = vcmp.gt.f32.partialorder %v759_v35, 0.0  ;;  %v4646_v12 = vld [vmem:[%s5048_s27 + $0x84] ss:$8 sps:$4 sm:$0xff]   ;;  %vm4880_vm14 = vmmov 0  }
  0x31   : > { %1489 = vmatprep.subr.bf16.mxu1 %v4595_v38  ;;  %1535 = vmatpush1.bf16.msra.mxu0 %v4649_v22  ;;  %v802_v38 = vsel %vm766_vm12, 1, %v4878_v3  ;;  %vm1661_vm2 = vcmp.gt.f32.partialorder %v1655_v37, 0.0  ;;  %v813_v58 = vsel %vm777_vm1, 1, %v4878_v3  ;;  %v4691_v15 = vld [vmem:[%s6478_s5 + $0x150] ss:$20 sps:$4 sm:$0xff]   ;;  %vm3479_vm12 = vcmp.gt.f32.partialorder %v3473_v7, 0.0 }
  0x32   : > { %825 = vperm.xlu1 %4548, %v800_v28   ;;  %1536 = vmatprep.subr.bf16.mxu0 %v4654_v29  ;;  %v4692_v18 = vld [vmem:[%s6478_s5 + $0x10] ss:$20 sps:$4 sm:$0xff]   ;;  %v4697_v25 = vld [vmem:[%s6478_s5 + $0x38] ss:$20 sps:$4 sm:$0xff]   ;;  %v4701_v28 = vld [vmem:[%s6478_s5 + $0x1a0] ss:$20 sps:$4 sm:$0xff]  }
  0x33   : > { %822 = vperm.xlu0 %4547, %v799_v19   ;;  %v4664_v19 = vld [vmem:[%s6478_s5 + $0xd0] ss:$20 sps:$4 sm:$0xff]   ;;  %v4667_v29 = vld [vmem:[%s6478_s5 + $0xf8] ss:$20 sps:$4 sm:$0xff]   ;;  %v4670_v33 = vld [vmem:[%s6478_s5 + $0x120] ss:$20 sps:$4 sm:$0xff]  }
  0x34   : > { %1490 = vmatpush1.bf16.msra.mxu1 %v4597_v39  ;;  %v1658_v39 = vld [vmem:[%s6474_s1 + $0xb0] sm:$0xff]  ;;  %v4675_v34 = vld [vmem:[%s6478_s5 + $0x14c] ss:$20 sps:$4 sm:$0xff]   ;;  %v4673_v35 = vld [vmem:[%s6478_s5 + $0x148] ss:$20 sps:$4 sm:$0xff]   ;;  %vm2634_vm9 = vcmask 1043456  }
  0x35   : > { %1491 = vmatprep.subr.bf16.mxu1 %v4601_v40  ;;  %v4652_v40 = vld [vmem:[%s6478_s5 + $0x30] ss:$20 sps:$4 sm:$0xff]   ;;  %vm1664_vm3 = vcmp.gt.f32.partialorder %v1658_v39, 0.0  ;;  %v4678_v37 = vld [vmem:[%s6478_s5 + $0x174] ss:$20 sps:$4 sm:$0xff]   ;;  %v4729_v7 = vld [vmem:[%s6480_s7 + $0x78] sm:$0xff]  }
  0x36   : > { %831 = vperm.xlu1 %4548, %v802_v38   ;;  %1537 = vmatpush1.bf16.msra.mxu0 %v4652_v40  ;;  %v1689_v61 = vsel %vm1664_vm3, 1, %v4878_v3  ;;  %v4669_v22 = vld [vmem:[%s6478_s5 + $0xfc] ss:$20 sps:$4 sm:$0xff]   ;;  %v4709_v39 = vld [vmem:[%s6478_s5 + $0x218] ss:$20 sps:$4 sm:$0xff]  }
  0x37   : > { %679 = vmatmul.mubr.bf16.gmra.mrb[4].mxu0 %v4600_v41  ;;  %828 = vperm.xlu0 %4547, %v801_v31   ;;  %v758_v41 = vld [vmem:[%s6474_s1 + $0x78] sm:$0xff]  ;;  %v4702_v31 = vld [vmem:[%s6478_s5 + $0x60] ss:$20 sps:$4 sm:$0xff]   ;;  %v4706_v38 = vld [vmem:[%s6478_s5 + $0x1f0] ss:$20 sps:$4 sm:$0xff]  }
  0x38   : > { %686 = vmatprep.mubr.bf16.mxu0 %v4607_v42  ;;  %1492 = vmatpush1.bf16.msra.mxu1 %v4603_v43  ;;  %v3470_v42 = vld [vmem:[%s6475_s2] sm:$0xff]  ;;  %v4657_v43 = vld [vmem:[%s6478_s5 + $0x5c] ss:$20 sps:$4 sm:$0xff]   ;;  %vm776_vm4 = vcmp.gt.f32.partialorder %v758_v41, 0.0  ;;  %v4721_v60 = vld [vmem:[%s6480_s7 + $0x48] sm:$0xff]  }
  0x39   : > { %1493 = vmatprep.subr.bf16.mxu1 %v4604_v44  ;;  %v1657_v44 = vld [vmem:[%s6474_s1 + $0xa8] sm:$0xff]  ;;  %1538 = vmatprep.subr.bf16.mxu0 %v4657_v43  ;;  %vm3476_vm5 = vcmp.gt.f32.partialorder %v3470_v42, 0.0  ;;  %v812_v63 = vsel %vm776_vm4, 1, %v4878_v3  ;;  %v4676_v40 = vld [vmem:[%s6478_s5 + $0x170] ss:$20 sps:$4 sm:$0xff]  }
  0x3a   : > { %855 = vperm.xlu1 %4548, %v810_v53   ;;  %vm1663_vm6 = vcmp.gt.f32.partialorder %v1657_v44, 0.0  ;;  %v5279_v0 = vsel %vm3476_vm5, 1, %v4878_v3  ;;  %v4681_v41 = vld [vmem:[%s6478_s5 + $0x19c] ss:$20 sps:$4 sm:$0xff]   ;;  %v4711_v42 = vld [vmem:[%s6478_s5 + $0xd8] ss:$20 sps:$4 sm:$0xff]  }
  0x3b   : > { %852 = vperm.xlu0 %4547, %v809_v36   ;;  %v4705_v36 = vld [vmem:[%s6478_s5 + $0x88] ss:$20 sps:$4 sm:$0xff]   ;;  %v4679_v43 = vld [vmem:[%s6478_s5 + $0x198] ss:$20 sps:$4 sm:$0xff]   ;;  %vm2043_vm5 = vsmask.f32 7424 }
  0x3c   : > { %1494 = vmatpush1.bf16.msra.mxu1 %v4606_v46  ;;  %v3472_v46 = vld [vmem:[%s6475_s2 + $0x10] sm:$0xff]  ;;  %v4684_v44 = vld [vmem:[%s6478_s5 + $0x1c4] ss:$20 sps:$4 sm:$0xff]   ;;  %v4685_v53 = vld [vmem:[%s6478_s5 + $0x1e8] ss:$20 sps:$4 sm:$0xff]  }
  0x3d   : > { %1495 = vmatprep.subr.bf16.mxu1 %v4610_v47  ;;  %v4641_v47 = vld [vmem:[%s5048_s27 + $0x60] ss:$8 sps:$4 sm:$0xff]   ;;  %vm3478_vm7 = vcmp.gt.f32.partialorder %v3472_v46, 0.0 }
  0x3e   : > { %v5292_v5 = vsel %vm3478_vm7, 1, %v4878_v3  ;;  %v4712_v46 = vld [vmem:[%s6478_s5 + $0x240] ss:$20 sps:$4 sm:$0xff]  }
  0x3f   : > { %687 = vmatmul.mubr.bf16.gmra.mrb[8].mxu0 %v4609_v48  ;;  %v1685_v48 = vsel %vm1660_vm13, 1, %v4878_v3 }
  0x40   : > { %694 = vmatprep.mubr.bf16.mxu0 %v4616_v49  ;;  %1496 = vmatpush1.bf16.msra.mxu1 %v4612_v50  ;;  %v760_v49 = vld [vmem:[%s6474_s1 + $0x88] sm:$0xff]  ;;  %v5250_v50 = vld [vmem:[%s5048_s27 + $0xb0] ss:$8 sps:$4 sm:$0xff]  }
  0x41   : > { %1497 = vmatprep.subr.bf16.mxu1 %v4613_v51  ;;  %v4643_v51 = vld [vmem:[%s5048_s27 + $0x74] ss:$8 sps:$4 sm:$0xff]   ;;  %vm778_vm8 = vcmp.gt.f32.partialorder %v760_v49, 0.0  ;;  %1692 = vperm.xlu0 %4547, %v1685_v48   ;;  %v4687_v49 = vld [vmem:[%s6478_s5 + $0x1ec] ss:$20 sps:$4 sm:$0xff]  }
  0x42   : > { %v814_v6 = vsel %vm778_vm8, 1, %v4878_v3  ;;  %v4714_v48 = vld [vmem:[%s6478_s5 + $0x100] ss:$20 sps:$4 sm:$0xff]  }
  0x44   : > { %1498 = vmatpush1.bf16.msra.mxu1 %v4615_v54  ;;  %v4655_v54 = vld [vmem:[%s6478_s5 + $0x58] ss:$20 sps:$4 sm:$0xff]  }
  0x45   : > { %1499 = vmatprep.subr.bf16.mxu1 %v4619_v57  ;;  %v4660_v57 = vld [vmem:[%s6478_s5 + $0x84] ss:$20 sps:$4 sm:$0xff]   ;;  %1539 = vmatpush1.bf16.msra.mxu0 %v4655_v54  ;;  %v4690_v54 = vld [vmem:[%s6478_s5 + $0x214] ss:$20 sps:$4 sm:$0xff]  }
  0x46   : > { %1540 = vmatprep.subr.bf16.mxu0 %v4660_v57  ;;  %858 = vperm.xlu0 %4547, %v811_v52   ;;  %v4717_v52 = vld [vmem:[%s6478_s5 + $0x128] ss:$20 sps:$4 sm:$0xff]   ;;  %v4719_v57 = vld [vmem:[%s6480_s7 + $0x40] sm:$0xff]  }
  0x47   : > { %695 = vmatmul.mubr.bf16.gmra.mrb[12].mxu0 %v4618_v59  ;;  %v1686_v59 = vsel %vm1661_vm2, 1, %v4878_v3 }
  0x48   : > { %702 = vmatprep.mubr.bf16.mxu0 %v4625_v62  ;;  %1500 = vmatpush1.bf16.msra.mxu1 %v4621_v1  ;;  %v4658_v62 = vld [vmem:[%s6478_s5 + $0x80] ss:$20 sps:$4 sm:$0xff]   ;;  %v3471_v1 = vld [vmem:[%s6475_s2 + $0x8] sm:$0xff] }
  0x49   : > { %1501 = vmatprep.subr.bf16.mxu1 %v4622_v4  ;;  %v1688_v4 = vsel %vm1663_vm6, 1, %v4878_v3  ;;  %1695 = vperm.xlu1 %4548, %v1686_v59   ;;  %vm3477_vm11 = vcmp.gt.f32.partialorder %v3471_v1, 0.0  ;;  %v4693_v59 = vld [vmem:[%s6478_s5 + $0x238] ss:$20 sps:$4 sm:$0xff]  }
  0x4a   : > { %1541 = vmatpush1.bf16.msra.mxu0 %v4658_v62  ;;  %1698 = vperm.xlu0 %4547, %v1687_v55   ;;  %v3483_v21 = vsel %vm3477_vm11, 1, %v4878_v3  ;;  %v4688_v55 = vld [vmem:[%s6478_s5 + $0x210] ss:$20 sps:$4 sm:$0xff]   ;;  %v4698_v62 = vld [vmem:[%s6478_s5 + $0x260] ss:$20 sps:$4 sm:$0xff]   ;;  %v4724_v1 = vld [vmem:[%s6480_s7 + $0x58] sm:$0xff]  }
  0x4b   : > { %1542 = vmatprep.subr.bf16.mxu0 %v4663_v2  ;;  %v4707_v2 = vld [vmem:[%s6480_s7 + $0x8] sm:$0xff]  }
  0x4c   : > { %1502 = vmatpush1.bf16.msra.mxu1 %v4624_v8  ;;  %v3475_v8 = vld [vmem:[%s6475_s2 + $0x28] sm:$0xff] }
  0x4d   : > { %861 = vperm.xlu1 %4548, %v812_v63   ;;  %vm3481_vm13 = vcmp.gt.f32.partialorder %v3475_v8, 0.0  ;;  %4133 = vmatprep.subr.bf16.mxu1 %v4691_v15  ;;  %v4723_v63 = vld [vmem:[%s6480_s7 + $0x50] sm:$0xff]  }
  0x4e   : > { %v3487_v24 = vsel %vm3481_vm13, 1, %v4878_v3  ;;  %864 = vperm.xlu0 %4547, %v813_v58   ;;  %v4695_v58 = vld [vmem:[%s6478_s5 + $0x23c] ss:$20 sps:$4 sm:$0xff]  }
  0x4f   : > { %703 = vmatmul.mubr.bf16.gmra.mrb[16].mxu0 %v4629_v11  ;;  %1504 = vmatmul.mubr.bf16.vlgmr.msra.gmra.mrb[0].mxu1 %v5159_v13  ;;  %v4661_v11 = vld [vmem:[%s6478_s5 + $0xa8] ss:$20 sps:$4 sm:$0xff]   ;;  %v4720_v8 = vld [vmem:[%s6480_s7 + $0x30] sm:$0xff]  }
  0x50   : > { %710 = vmatprep.mubr.bf16.mxu0 %v4631_v14  ;;  %1513 = vmatprep.mubr.bf16.mxu1 %v5166_v16  ;;  %v4666_v14 = vld [vmem:[%s6478_s5 + $0xd4] ss:$20 sps:$4 sm:$0xff]  }
  0x51   : > { %1543 = vmatpush1.bf16.msra.mxu0 %v4661_v11  ;;  %4134 = vmatpush3.bf16.msra.mxu1 %v4692_v18 }
  0x52   : > { %1544 = vmatprep.subr.bf16.mxu0 %v4666_v14  ;;  %1701 = vperm.xlu1 %4548, %v1688_v4   ;;  %v4725_v4 = vld [vmem:[%s6480_s7 + $0x60] sm:$0xff]  }
  0x53   : > { %4135 = vmatprep.subr.bf16.mxu1 %v4696_v20  ;;  %1704 = vperm.xlu0 %4547, %v1689_v61   ;;  %v4700_v61 = vld [vmem:[%s6478_s5 + $0x264] ss:$20 sps:$4 sm:$0xff]  }
  0x55   : > { %1545 = vmatpush1.bf16.msra.mxu0 %v4664_v19  ;;  %4136 = vmatpush3.bf16.msra.mxu1 %v4697_v25  ;;  %v5530_v19 = vld [vmem:[%s6477_s4] ss:$0 sm:$0xff] }
  0x56   : > { %1546 = vmatprep.subr.bf16.mxu0 %v4669_v22  ;;  %867 = vperm.xlu1 %4548, %v814_v6   ;;  %v4727_v6 = vld [vmem:[%s6480_s7 + $0x70] sm:$0xff]  }
  0x57   : > { %711 = vmatmul.mubr.bf16.gmra.mrb[20].mxu0 %v4635_v23  ;;  %1514 = vmatmul.mubr.bf16.gmra.mrb[4].mxu1 %v5192_v26  ;;  %v3485_v23 = vsel %vm3479_vm12, 1, %v4878_v3  ;;  %v4672_v3 = vld [vmem:[%s6478_s5 + $0x124] ss:$20 sps:$4 sm:$0xff]   ;;  %vm2920_vm12 = vsmask.f32 3328 }
  0x58   : > { %718 = vmatprep.mubr.bf16.mxu0 %v4637_v27  ;;  %1523 = vmatprep.mubr.bf16.mxu1 %v5200_v30  ;;  %v4648_v27 = vld [vmem:[%s5048_s27 + $0x80] ss:$8 sps:$4 sm:$0xff]  }
  0x59   : > { %4137 = vmatprep.subr.bf16.mxu1 %v4701_v28  ;;  %1547 = vmatpush1.bf16.msra.mxu0 %v4667_v29 }
  0x5a   : > { %1548 = vmatprep.subr.bf16.mxu0 %v4672_v3  ;;  %4138 = vmatpush3.bf16.msra.mxu1 %v4702_v31 }
  0x5b   : > { %1707 = vperm.xlu1 %4548, %v1690_v17   ;;  %4139 = vmatprep.subr.bf16.mxu1 %v4703_v32 }
  0x5c   : > { %3489 = vperm.xlu0 %4547, %v5279_v0   ;;  %v4704_v0 = vld [vmem:[%s6480_s7] sm:$0xff]  }
  0x5d   : > { %1549 = vmatpush1.bf16.msra.mxu0 %v4670_v33 }
  0x5e   : > { %1550 = vmatprep.subr.bf16.mxu0 %v4675_v34  ;;  %4140 = vmatpush3.bf16.msra.mxu1 %v4705_v36 }
  0x5f   : > { %719 = vmatmul.mubr.bf16.gmra.mrb[24].mxu0 %v4641_v47  ;;  %1524 = vmatmul.mubr.bf16.gmra.mrb[8].mxu1 %v5250_v50  ;;  %v4682_v47 = vld [vmem:[%s6478_s5 + $0x1c0] ss:$20 sps:$4 sm:$0xff]  }
  0x60   : > { %726 = vmatprep.mubr.bf16.mxu0 %v4643_v51  ;;  %1629 = vmatprep.mubr.bf16.mxu1 %v5089_v45  ;;  %v4715_v51 = vld [vmem:[%s6478_s5 + $0x268] ss:$20 sps:$4 sm:$0xff]  }
  0x61   : > { %3492 = vperm.xlu1 %4548, %v3483_v21   ;;  %4141 = vmatprep.subr.bf16.mxu1 %v4706_v38 }
  0x62   : > { %3495 = vperm.xlu0 %4547, %v5292_v5   ;;  %1551 = vmatpush1.bf16.msra.mxu0 %v4673_v35  ;;  %v4710_v5 = vld [vmem:[%s6480_s7 + $0x10] sm:$0xff]  }
  0x63   : > { %1552 = vmatprep.subr.bf16.mxu0 %v4678_v37 }
  0x65   : > { %3498 = vperm.xlu1 %4548, %v3485_v23  }
  0x66   : > { %3501 = vperm.xlu0 %4547, %v5305_v10   ;;  %1553 = vmatpush1.bf16.msra.mxu0 %v4676_v40 }
  0x67   : > { %727 = vmatmul.mubr.bf16.gmra.mrb[28].mxu0 %v4645_v9  ;;  %1554 = vmatprep.subr.bf16.mxu0 %v4681_v41 }
  0x68   : > { %734 = vmatprep.mubr.bf16.mxu0 %v4646_v12 }
  0x69   : > { %3504 = vperm.xlu1 %4548, %v3487_v24  }
  0x6a   : > { %1555 = vmatpush1.bf16.msra.mxu0 %v4679_v43 }
  0x6b   : > { %1556 = vmatprep.subr.bf16.mxu0 %v4684_v44 }
  0x6e   : > { %1557 = vmatpush1.bf16.msra.mxu0 %v4682_v47 }
  0x6f   : > { %735 = vmatmul.mubr.bf16.gmra.mrb[32].mxu0 %v4648_v27  ;;  %1558 = vmatprep.subr.bf16.mxu0 %v4687_v49  ;;  %v4730_v49 = vld [vmem:[%s6480_s7 + $0xc8] sm:$0xff]  }
  0x70   : > { %1566 = vmatprep.mubr.bf16.mxu0 %v5089_v45  ;;  %v4708_v45 = vld [vmem:[%s6478_s5 + $0xb0] ss:$20 sps:$4 sm:$0xff]  }
  0x71   : > { %4142 = vmatpush3.bf16.msra.mxu1 %v4708_v45  ;;  %v4728_v45 = vld [vmem:[%s6480_s7 + $0xc0] sm:$0xff]  }
  0x72   : > { %4143 = vmatprep.subr.bf16.mxu1 %v4709_v39  ;;  %1559 = vmatpush1.bf16.msra.mxu0 %v4685_v53 }
  0x73   : > { %1560 = vmatprep.subr.bf16.mxu0 %v4690_v54 }
  0x75   : > { %4144 = vmatpush3.bf16.msra.mxu1 %v4711_v42 }
  0x76   : > { %4145 = vmatprep.subr.bf16.mxu1 %v4712_v46  ;;  %1561 = vmatpush1.bf16.msra.mxu0 %v4688_v55 }
  0x77   : > { %1562 = vmatprep.subr.bf16.mxu0 %v4695_v58 }
  0x79   : > { %4146 = vmatpush3.bf16.msra.mxu1 %v4714_v48 }
  0x7a   : > { %4147 = vmatprep.subr.bf16.mxu1 %v4715_v51  ;;  %1563 = vmatpush1.bf16.msra.mxu0 %v4693_v59 }
  0x7b   : > { %1564 = vmatprep.subr.bf16.mxu0 %v4700_v61 }
  0x7d   : > { %4148 = vmatpush3.bf16.msra.mxu1 %v4717_v52 }
  0x7e   : > { %4266 = vmatprep.subr.bf16.mxu1 %v4879_v56  ;;  %1565 = vmatpush1.bf16.msra.mxu0 %v4698_v62 }
  0x7f   : > { %4294 = vmatprep.subr.bf16.mxu0 %v4879_v56 }
  0x80   : > { %1630 = vmatmul.mubr.bf16.vlgmr.msra.gmra.mrb[12].mxu1 %v5159_v13 }
  0x81   : > { %4267 = vmatpush3.bf16.msra.mxu1 %v4719_v57  ;;  %1637 = vmatprep.mubr.bf16.mxu1 %v5166_v16 }
  0x82   : > { %4268 = vmatprep.subr.bf16.mxu1 %v4879_v56  ;;  %1567 = vmatmul.mubr.bf16.vlgmr.msra.gmra.mrb[36].mxu0 %v5159_v13  ;;  %v4726_v13 = vld [vmem:[%s6480_s7 + $0x68] sm:$0xff]  }
  0x83   : > { %4295 = vmatpush3.bf16.msra.mxu0 %v4704_v0  ;;  %1576 = vmatprep.mubr.bf16.mxu0 %v5166_v16  ;;  %v4713_v16 = vld [vmem:[%s6480_s7 + $0x18] sm:$0xff]  }
  0x84   : > { %4296 = vmatprep.subr.bf16.mxu0 %v4879_v56 }
  0x85   : > { %4269 = vmatpush3.bf16.msra.mxu1 %v4721_v60  ;;  %v4732_v60 = vld [vmem:[%s6480_s7 + $0xd0] sm:$0xff]  }
  0x86   : > { %4270 = vmatprep.subr.bf16.mxu1 %v4879_v56 }
  0x87   : > { %4297 = vmatpush3.bf16.msra.mxu0 %v4707_v2 }
  0x88   : > { %1638 = vmatmul.mubr.bf16.gmra.mrb[16].mxu1 %v5192_v26  ;;  %4298 = vmatprep.subr.bf16.mxu0 %v4879_v56 }
  0x89   : > { %4271 = vmatpush3.bf16.msra.mxu1 %v4723_v63  ;;  %1645 = vmatprep.mubr.bf16.mxu1 %v5200_v30 }
  0x8a   : > { %4272 = vmatprep.subr.bf16.mxu1 %v4879_v56  ;;  %1577 = vmatmul.mubr.bf16.gmra.mrb[40].mxu0 %v5192_v26  ;;  %v4716_v26 = vld [vmem:[%s6480_s7 + $0x20] sm:$0xff]  }
  0x8b   : > { %4299 = vmatpush3.bf16.msra.mxu0 %v4710_v5  ;;  %1586 = vmatprep.mubr.bf16.mxu0 %v5200_v30  ;;  %v4718_v30 = vld [vmem:[%s6480_s7 + $0x28] sm:$0xff]  }
  0x8c   : > { %4300 = vmatprep.subr.bf16.mxu0 %v4879_v56 }
  0x8d   : > { %4273 = vmatpush3.bf16.msra.mxu1 %v4724_v1 }
  0x8e   : > { %4274 = vmatprep.subr.bf16.mxu1 %v4879_v56 }
  0x8f   : > { %4301 = vmatpush3.bf16.msra.mxu0 %v4713_v16 }
  0x90   : > { %1646 = vmatmul.mubr.bf16.gmra.mrb[20].mxu1 %v5250_v50  ;;  %4302 = vmatprep.subr.bf16.mxu0 %v4879_v56 }
  0x91   : > { %4275 = vmatpush3.bf16.msra.mxu1 %v4725_v4  ;;  %4282 = vmatprep.mubr.msk.bf16.mxu1 %vm4880_vm14, %v4879_v56 }
  0x92   : > { %4276 = vmatprep.subr.bf16.mxu1 %v4879_v56  ;;  %1587 = vmatmul.mubr.bf16.gmra.mrb[44].mxu0 %v5250_v50  ;;  %v4722_v50 = vld [vmem:[%s6480_s7 + $0x38] sm:$0xff]  }
  0x93   : > { %4303 = vmatpush3.bf16.msra.mxu0 %v4716_v26  ;;  %4310 = vmatprep.mubr.msk.bf16.mxu0 %vm4880_vm14, %v4879_v56 }
  0x94   : > { %4304 = vmatprep.subr.bf16.mxu0 %v4879_v56 }
  0x95   : > { %4277 = vmatpush3.bf16.msra.mxu1 %v4726_v13 }
  0x96   : > { %4278 = vmatprep.subr.bf16.mxu1 %v4879_v56 }
  0x97   : > { %4305 = vmatpush3.bf16.msra.mxu0 %v4718_v30  ;;  %v4734_v30 = vld [vmem:[%s6480_s7 + $0xd8] sm:$0xff]  }
  0x98   : > { %4306 = vmatprep.subr.bf16.mxu0 %v4879_v56 }
  0x99   : > { %4279 = vmatpush3.bf16.msra.mxu1 %v4727_v6 }
  0x9a   : > { %4280 = vmatprep.subr.bf16.mxu1 %v4879_v56 }
  0x9b   : > { %4307 = vmatpush3.bf16.msra.mxu0 %v4720_v8 }
  0x9c   : > { %4308 = vmatprep.subr.bf16.mxu0 %v4879_v56 }
  0x9d   : > { %4281 = vmatpush3.bf16.msra.mxu1 %v4729_v7 }
  0x9e   : > { %4322 = vmatprep.subr.bf16.mxu1 %v4879_v56 }
  0x9f   : > { %4309 = vmatpush3.bf16.msra.mxu0 %v4722_v50 }
  0xa0   : > { %4350 = vmatprep.subr.bf16.mxu0 %v4879_v56 }
  0xa1   : > { %v5517_v10 = vpop.permute.xlu1 %840 }
  0xa2   : > { %v5515_v9 = vpop.permute.xlu0 %834  ;;  %vm877_vm13 = vcmp.eq.s32.totalorder %v5517_v10, 1 }
  0xa3   : > { %vm875_vm10 = vcmp.eq.s32.totalorder %v5515_v9, 1  ;;  %v4733_v9 = vld [vmem:[%s6480_s7 + $0x88] sm:$0xff]  }
  0xa5   : > { %v5521_v12 = vpop.permute.xlu1 %843 }
  0xa6   : > { %v5519_v11 = vpop.permute.xlu0 %837 }
  0xa7   : > { %vm876_vm11 = vcmp.eq.s32.totalorder %v5519_v11, 1 }
  0xa9   : > { %v5525_v15 = vpop.permute.xlu1 %849 }
  0xaa   : > { %v5523_v14 = vpop.permute.xlu0 %846 }
  0xad   : > { %v820_v21 = vpop.permute.xlu1 %819 }
  0xae   : > { %v817_v18 = vpop.permute.xlu0 %816  ;;  %vm870_vm0 = vcmp.eq.s32.totalorder %v820_v21, 1 }
  0xaf   : > { %vm869_vm15 = vcmp.eq.s32.totalorder %v817_v18, 1 }
  0xb0   : > { %vm4834_vm1 = vmpackc.low %vm870_vm0, %vm869_vm15 }
  0xb1   : > { %v826_v31 = vpop.permute.xlu1 %825 }
  0xb2   : > { %v823_v3 = vpop.permute.xlu0 %822  ;;  %vm872_vm3 = vcmp.eq.s32.totalorder %v826_v31, 1 }
  0xb3   : > { %vm871_vm2 = vcmp.eq.s32.totalorder %v823_v3, 1 }
  0xb4   : > { %vm4837_vm4 = vmpackc.low %vm872_vm3, %vm871_vm2 }
  0xb5   : > { %v5544_v46 = vpop.permute.xlu1 %831 }
  0xb6   : > { %v5540_v43 = vpop.permute.xlu0 %828  ;;  %vm874_vm7 = vcmp.eq.s32.totalorder %v5544_v46, 1 }
  0xb7   : > { %vm873_vm6 = vcmp.eq.s32.totalorder %v5540_v43, 1  ;;  %v4738_v43 = vld [vmem:[%s6480_s7 + $0xe8] sm:$0xff]  }
  0xb8   : > { %vm4840_vm8 = vmpackc.low %vm874_vm7, %vm873_vm6 }
  0xb9   : > { %v5563_v1 = vpop.permute.xlu1 %855 }
  0xba   : > { %v5558_v61 = vpop.permute.xlu0 %852 }
 0x102   : > { %v4079_v17 = vpop.f32.mrb[0].mxu0 }
 0x103   : > { %v4080_v20 = vpop.f32.mrb[1].mxu0 }
 0x104   : > { %v4081_v22 = vadd.f32 %v4080_v20, %v4079_v17  ;;  %v4082_v23 = vpop.f32.mrb[2].mxu0 }
 0x105   : > { %v4083_v24 = vpop.f32.mrb[3].mxu0 }
 0x106   : > { %v673_v25 = vadd.f32 %v4081_v22, %v5530_v19  ;;  %v4084_v27 = vadd.f32 %v4083_v24, %v4082_v23  ;;  %v5579_v22 = vpop.permute.xlu0 %1692 }
 0x108   : > { %v779_v28 = vmax.f32 %v673_v25, 0.0  ;;  %v676_v29 = vadd.f32 %v4084_v27, %v5530_v19  ;;  %v5586_v27 = vpop.permute.xlu1 %1695 }
 0x10a   : > { %v780_v32 = vmax.f32 %v676_v29, 0.0  ;;  %v4085_v33 = vpop.f32.mrb[4].mxu0  ;;  %v887_v35 = vsel %vm869_vm15, %v779_v28, 0.0  ;;  %vm1710_vm15 = vcmp.eq.s32.totalorder %v5586_v27, 1 }
 0x10b   : > { %v4086_v34 = vpop.f32.mrb[5].mxu0 }
 0x10c   : > { %v888_v36 = vsel %vm870_vm0, %v780_v32, 0.0  ;;  %v4087_v37 = vadd.f32 %v4086_v34, %v4085_v33  ;;  %v4088_v38 = vpop.f32.mrb[6].mxu0  ;;  %v4835_v44 = vpack.c.bf16 %v780_v32, %v779_v28  ;;  %v4736_v32 = vld [vmem:[%s6480_s7 + $0xe0] sm:$0xff]   ;;  %vm4843_vm0 = vmpackc.low %vm876_vm11, %vm875_vm10 }
 0x10d   : > { %v905_v39 = vpack.c.bf16 %v888_v36, %v887_v35  ;;  %v4089_v40 = vpop.f32.mrb[7].mxu0 }
 0x10e   : > { %v681_v41 = vadd.f32 %v4087_v37, %v5530_v19  ;;  %v4090_v42 = vadd.f32 %v4089_v40, %v4088_v38  ;;  %4836 = vmatmul.mubr.msk.bf16.vlgmr.msra.gmra.mrb[48].mxu0 %vm4834_vm1, %v4835_v44  ;;  %v5613_v44 = vpop.permute.xlu0 %858  ;;  %vm878_vm1 = vcmp.eq.s32.totalorder %v5521_v12, 1 }
 0x10f   : > { %914 = vst [vmem:[#allocation2] sm:$0xff] %v905_v39  ;;  %4314 = vmatprep.mubr.msk.bf16.mxu0 %vm4880_vm14, %v4879_v56  ;;  %4351 = vmatpush3.bf16.msra.mxu0 %v4728_v45  ;;  %v2047_v51 = vshll.u32 %v905_v39, 16  ;;  %v2045_v13 = vshrl.u32 %v905_v39, 16 }
 0x110   : > { %v781_v47 = vmax.f32 %v681_v41, 0.0  ;;  %v684_v48 = vadd.f32 %v4090_v42, %v5530_v19  ;;  %4352 = vmatprep.subr.bf16.mxu0 %v4879_v56 }
 0x111   : > { %v2049_v0 = vrot.slane %v2047_v51, 1  ;;  %v5628_v51 = vpop.permute.xlu1 %861 }
 0x112   : > { %v782_v52 = vmax.f32 %v684_v48, 0.0  ;;  %v4091_v53 = vpop.f32.mrb[8].mxu0  ;;  %v889_v55 = vsel %vm871_vm2, %v781_v47, 0.0  ;;  %vm1709_vm2 = vcmp.eq.s32.totalorder %v5579_v22, 1  ;;  %v5680_v11 = vpop.permute.xlu0 %1698  ;;  %v4766_v22 = vld [vmem:[%s6480_s7 + $0x1d8] sm:$0xff]  }
 0x113   : > { %v4092_v54 = vpop.f32.mrb[9].mxu0  ;;  %4353 = vmatpush3.bf16.msra.mxu0 %v4730_v49  ;;  %v2050_v8 = vor.u32 %v2049_v0, %v2045_v13 }
 0x114   : > { %v890_v57 = vsel %vm872_vm3, %v782_v52, 0.0  ;;  %v4093_v58 = vadd.f32 %v4092_v54, %v4091_v53  ;;  %v4094_v59 = vpop.f32.mrb[10].mxu0  ;;  %4354 = vmatprep.subr.bf16.mxu0 %v4879_v56  ;;  %v4838_v5 = vpack.c.bf16 %v782_v52, %v781_v47  ;;  %vm4846_vm3 = vmpackc.low %vm878_vm1, %vm877_vm13 }
 0x115   : > { %v5560_v62 = vpack.c.bf16 %v890_v57, %v889_v55  ;;  %v4095_v63 = vpop.f32.mrb[11].mxu0 }
 0x116   : > { %v689_v2 = vadd.f32 %v4093_v58, %v5530_v19  ;;  %v4096_v4 = vadd.f32 %v4095_v63, %v4094_v59  ;;  %4839 = vmatmul.mubr.msk.bf16.gmra.mrb[52].mxu0 %vm4837_vm4, %v4838_v5  ;;  %v4731_v5 = vld [vmem:[%s6480_s7 + $0x80] sm:$0xff]   ;;  %vm1711_vm4 = vcmp.eq.s32.totalorder %v5680_v11, 1  ;;  %v5725_v10 = vpop.permute.xlu0 %864  ;;  %v4770_v11 = vld [vmem:[%s6480_s7 + $0x1e8] sm:$0xff]  }
 0x117   : > { %v2052_v16 = vshll.u32 %v5560_v62, 16  ;;  %v2056_v6 = vshrl.u32 %v5560_v62, 16  ;;  %4318 = vmatprep.mubr.msk.bf16.mxu0 %vm4880_vm14, %v4879_v56  ;;  %4355 = vmatpush3.bf16.msra.mxu0 %v4732_v60  ;;  %v2636_v39 = vrot.slane %v5560_v62, 4 }
 0x118   : > { %v783_v26 = vmax.f32 %v689_v2, 0.0  ;;  %v692_v7 = vadd.f32 %v4096_v4, %v5530_v19  ;;  %4356 = vmatprep.subr.bf16.mxu0 %v4879_v56 }
 0x119   : > { %v2054_v50 = vrot.slane %v2052_v16, 1  ;;  %v2929_v17 = vrot.slane %v2056_v6, 4  ;;  %v2930_v18 = vrot.slane %v2052_v16, 5 }
 0x11a   : > { %v784_v20 = vmax.f32 %v692_v7, 0.0  ;;  %v4097_v21 = vpop.f32.mrb[12].mxu0  ;;  %v891_v28 = vsel %vm873_vm6, %v783_v26, 0.0  ;;  %v4740_v7 = vld [vmem:[%s6480_s7 + $0xf0] sm:$0xff]  }
 0x11b   : > { %v4098_v23 = vpop.f32.mrb[13].mxu0  ;;  %v5582_v24 = vsel %vm2043_vm5, %v2050_v8, %v2054_v50  ;;  %v5584_v25 = vor.u32 %v2930_v18, %v2929_v17  ;;  %4357 = vmatpush3.bf16.msra.mxu0 %v4734_v30  ;;  %v2058_v46 = vor.u32 %v2056_v6, %v2054_v50 }
 0x11c   : > { %v892_v29 = vsel %vm874_vm7, %v784_v20, 0.0  ;;  %v4099_v3 = vadd.f32 %v4098_v23, %v4097_v21  ;;  %v4100_v31 = vpop.f32.mrb[14].mxu0  ;;  %4358 = vmatprep.subr.bf16.mxu0 %v4879_v56  ;;  %v4841_v37 = vpack.c.bf16 %v784_v20, %v783_v26  ;;  %vm879_vm7 = vcmp.eq.s32.totalorder %v5523_v14, 1  ;;  %v4741_v14 = vld [vmem:[%s6480_s7 + $0xa8] sm:$0xff]  }
 0x11d   : > { %v5595_v33 = vpack.c.bf16 %v892_v29, %v891_v28  ;;  %v4101_v34 = vpop.f32.mrb[15].mxu0 }
 0x11e   : > { %v697_v35 = vadd.f32 %v4099_v3, %v5530_v19  ;;  %v4102_v36 = vadd.f32 %v4101_v34, %v4100_v31  ;;  %4842 = vmatmul.mubr.msk.bf16.gmra.mrb[56].mxu0 %vm4840_vm8, %v4841_v37  ;;  %v4742_v3 = vld [vmem:[%s6480_s7 + $0xf8] sm:$0xff]   ;;  %v5686_v31 = vpop.permute.xlu1 %1701  ;;  %vm880_vm8 = vcmp.eq.s32.totalorder %v5525_v15, 1 }
 0x11f   : > { %v2060_v38 = vshll.u32 %v5595_v33, 16  ;;  %v2064_v45 = vshrl.u32 %v5595_v33, 16  ;;  %v2638_v40 = vrot.slane %v5595_v33, 4  ;;  %4359 = vmatpush3.bf16.msra.mxu0 %v4736_v32  ;;  %4366 = vmatprep.mubr.msk.bf16.mxu0 %vm4880_vm14, %v4879_v56  ;;  %vm1712_vm6 = vcmp.eq.s32.totalorder %v5686_v31, 1  ;;  %v4783_v33 = vld [vmem:[%s6480_s7 + $0x230] sm:$0xff]  }
 0x120   : > { %v785_v41 = vmax.f32 %v697_v35, 0.0  ;;  %v700_v42 = vadd.f32 %v4102_v36, %v5530_v19  ;;  %4360 = vmatprep.subr.bf16.mxu0 %v4879_v56 }
 0x121   : > { %v5616_v47 = vrot.slane %v2060_v38, 1  ;;  %v5623_v48 = vsel %vm2634_vm9, %v2636_v39, %v2638_v40  ;;  %v2933_v49 = vrot.slane %v2064_v45, 4  ;;  %v2934_v54 = vrot.slane %v2060_v38, 5 }
 0x122   : > { %v786_v52 = vmax.f32 %v700_v42, 0.0  ;;  %v4103_v53 = vpop.f32.mrb[16].mxu0  ;;  %v893_v55 = vsel %vm875_vm10, %v785_v41, 0.0  ;;  %v1505_v57 = vpop.f32.mrb[0].mxu1  ;;  %vm4849_vm10 = vmpackc.low %vm880_vm8, %vm879_vm7 }
 0x123   : > { %v4104_v58 = vpop.f32.mrb[17].mxu0  ;;  %v5635_v59 = vsel %vm2043_vm5, %v2058_v46, %v5616_v47  ;;  %v5640_v63 = vadd.f32 %v5530_v19, %v1505_v57  ;;  %v5642_v2 = vpop.f32.mrb[1].mxu1  ;;  %4361 = vmatpush3.bf16.msra.mxu0 %v4738_v43  ;;  %v5647_v13 = vor.u32 %v2934_v54, %v2933_v49  ;;  %v4735_v49 = vld [vmem:[%s6480_s7 + $0x90] sm:$0xff]  }
 0x124   : > { %v894_v60 = vsel %vm876_vm11, %v786_v52, 0.0  ;;  %v4105_v0 = vadd.f32 %v4104_v58, %v4103_v53  ;;  %v4106_v4 = vpop.f32.mrb[18].mxu0  ;;  %v1509_v6 = vpop.f32.mrb[2].mxu1  ;;  %4362 = vmatprep.subr.bf16.mxu0 %v4879_v56  ;;  %v4844_v20 = vpack.c.bf16 %v786_v52, %v785_v41 }
 0x125   : > { %v908_v16 = vpack.c.bf16 %v894_v60, %v893_v55  ;;  %v4107_v26 = vpop.f32.mrb[19].mxu0  ;;  %v1679_v30 = vmax.f32 %v5640_v63, 0.0  ;;  %v5656_v50 = vadd.f32 %v5530_v19, %v1509_v6  ;;  %v5658_v18 = vpop.f32.mrb[3].mxu1  ;;  %v5669_v21 = vsel %vm2920_vm12, %v5584_v25, %v5647_v13 }
 0x126   : > { %v705_v8 = vadd.f32 %v4105_v0, %v5530_v19  ;;  %v4108_v17 = vadd.f32 %v4107_v26, %v4106_v4  ;;  %4845 = vmatmul.mubr.msk.bf16.vlgmr.msra.gmra.mrb[24].mxu1 %vm4843_vm0, %v4844_v20  ;;  %v4737_v26 = vld [vmem:[%s6480_s7 + $0x98] sm:$0xff]   ;;  %v5729_v12 = vpop.permute.xlu1 %867  ;;  %vm881_vm0 = vcmp.eq.s32.totalorder %v5558_v61, 1 }
 0x127   : > { %917 = vst [vmem:[#allocation2 + $0x20] sm:$0xff] %v908_v16  ;;  %v1680_v28 = vmax.f32 %v5656_v50, 0.0  ;;  %4323 = vmatpush3.bf16.msra.mxu1 %v4731_v5  ;;  %4286 = vmatprep.mubr.msk.bf16.mxu1 %vm4880_vm14, %v4879_v56 }
 0x128   : > { %v787_v23 = vmax.f32 %v705_v8, 0.0  ;;  %v708_v29 = vadd.f32 %v4108_v17, %v5530_v19  ;;  %4324 = vmatprep.subr.bf16.mxu1 %v4879_v56  ;;  %4363 = vmatpush3.bf16.msra.mxu0 %v4740_v7 }
 0x129   : > { %4364 = vmatprep.subr.bf16.mxu0 %v4879_v56 }
 0x12a   : > { %v5690_v32 = vsel %vm877_vm13, %v787_v23, 0.0  ;;  %v788_v34 = vmax.f32 %v708_v29, 0.0  ;;  %v4109_v35 = vpop.f32.mrb[20].mxu0  ;;  %v1515_v36 = vpop.f32.mrb[4].mxu1 }
 0x12b   : > { %v4110_v37 = vpop.f32.mrb[21].mxu0  ;;  %v5696_v41 = vadd.f32 %v5530_v19, %v1515_v36  ;;  %v5698_v43 = vpop.f32.mrb[5].mxu1  ;;  %4325 = vmatpush3.bf16.msra.mxu1 %v4733_v9 }
 0x12c   : > { %v896_v38 = vsel %vm878_vm1, %v788_v34, 0.0  ;;  %v4111_v42 = vadd.f32 %v4110_v37, %v4109_v35  ;;  %v4112_v46 = vpop.f32.mrb[22].mxu0  ;;  %v1519_v53 = vpop.f32.mrb[6].mxu1  ;;  %4326 = vmatprep.subr.bf16.mxu1 %v4879_v56  ;;  %4365 = vmatpush3.bf16.msra.mxu0 %v4742_v3  ;;  %v4847_v4 = vpack.c.bf16 %v788_v34, %v787_v23  ;;  %v4739_v35 = vld [vmem:[%s6480_s7 + $0xa0] sm:$0xff]   ;;  %vm882_vm1 = vcmp.eq.s32.totalorder %v5563_v1, 1 }
 0x12d   : > { %v909_v52 = vpack.c.bf16 %v896_v38, %v5690_v32  ;;  %v4113_v54 = vpop.f32.mrb[23].mxu0  ;;  %v1681_v55 = vmax.f32 %v5696_v41, 0.0  ;;  %v5708_v58 = vadd.f32 %v5530_v19, %v1519_v53  ;;  %v5710_v0 = vpop.f32.mrb[7].mxu1  ;;  %4406 = vmatprep.subr.bf16.mxu0 %v4879_v56 }
 0x12e   : > { %v713_v57 = vadd.f32 %v4111_v42, %v5530_v19  ;;  %v4114_v60 = vadd.f32 %v4113_v54, %v4112_v46  ;;  %4848 = vmatmul.mubr.msk.bf16.gmra.mrb[28].mxu1 %vm4846_vm3, %v4847_v4  ;;  %vm4852_vm3 = vmpackc.low %vm882_vm1, %vm881_vm0 }
 0x12f   : > { %v1682_v16 = vmax.f32 %v5708_v58, 0.0  ;;  %4327 = vmatpush3.bf16.msra.mxu1 %v4735_v49  ;;  %4290 = vmatprep.mubr.msk.bf16.mxu1 %vm4880_vm14, %v4879_v56 }
 0x130   : > { %v789_v5 = vmax.f32 %v713_v57, 0.0  ;;  %v716_v6 = vadd.f32 %v4114_v60, %v5530_v19  ;;  %4328 = vmatprep.subr.bf16.mxu1 %v4879_v56  ;;  %v5757_v60 = vrot.slane %v909_v52, 4 }
 0x132   : > { %v790_v7 = vmax.f32 %v716_v6, 0.0  ;;  %v4115_v8 = vpop.f32.mrb[24].mxu0  ;;  %v1525_v17 = vpop.f32.mrb[8].mxu1  ;;  %v897_v23 = vsel %vm879_vm7, %v789_v5, 0.0  ;;  %vm883_vm7 = vcmp.eq.s32.totalorder %v5613_v44, 1 }
 0x133   : > { %v4116_v20 = vpop.f32.mrb[25].mxu0  ;;  %v5738_v9 = vadd.f32 %v5530_v19, %v1525_v17  ;;  %v5740_v32 = vpop.f32.mrb[9].mxu1  ;;  %4329 = vmatpush3.bf16.msra.mxu1 %v4737_v26 }
 0x134   : > { %v898_v29 = vsel %vm880_vm8, %v790_v7, 0.0  ;;  %v4117_v3 = vadd.f32 %v4116_v20, %v4115_v8  ;;  %v4118_v34 = vpop.f32.mrb[26].mxu0  ;;  %v1529_v37 = vpop.f32.mrb[10].mxu1  ;;  %4330 = vmatprep.subr.bf16.mxu1 %v4879_v56  ;;  %v4850_v57 = vpack.c.bf16 %v790_v7, %v789_v5  ;;  %vm884_vm8 = vcmp.eq.s32.totalorder %v5628_v51, 1 }
 0x135   : > { %v910_v36 = vpack.c.bf16 %v898_v29, %v897_v23  ;;  %v4119_v38 = vpop.f32.mrb[27].mxu0  ;;  %v1683_v42 = vmax.f32 %v5738_v9, 0.0  ;;  %v5749_v49 = vadd.f32 %v5530_v19, %v1529_v37  ;;  %v5751_v54 = vpop.f32.mrb[11].mxu1 }
 0x136   : > { %v721_v46 = vadd.f32 %v4117_v3, %v5530_v19  ;;  %v4120_v53 = vadd.f32 %v4119_v38, %v4118_v34  ;;  %4851 = vmatmul.mubr.msk.bf16.gmra.mrb[32].mxu1 %vm4849_vm10, %v4850_v57  ;;  %v5761_v6 = vpop.permute.xlu0 %1704  ;;  %v5763_v26 = vpop.permute.xlu1 %1707  ;;  %vm4855_vm10 = vmpackc.low %vm884_vm8, %vm883_vm7 }
 0x137   : > { %v5759_v4 = vrot.slane %v910_v36, 4  ;;  %v1684_v17 = vmax.f32 %v5749_v49, 0.0  ;;  %4331 = vmatpush3.bf16.msra.mxu1 %v4739_v35  ;;  %4338 = vmatprep.mubr.msk.bf16.mxu1 %vm4880_vm14, %v4879_v56  ;;  %vm1713_vm11 = vcmp.eq.s32.totalorder %v5761_v6, 1  ;;  %vm1714_vm13 = vcmp.eq.s32.totalorder %v5763_v26, 1  ;;  %v4743_v35 = vld [vmem:[%s6480_s7 + $0xb0] sm:$0xff]   ;;  %v4744_v36 = vld [vmem:[%s6480_s7 + $0x140] sm:$0xff]  }
 0x138   : > { %v791_v8 = vmax.f32 %v721_v46, 0.0  ;;  %v724_v20 = vadd.f32 %v4120_v53, %v5530_v19  ;;  %4332 = vmatprep.subr.bf16.mxu1 %v4879_v56  ;;  %v4774_v6 = vld [vmem:[%s6480_s7 + $0x1f8] sm:$0xff]  }
 0x139   : > { %v5778_v15 = vsel %vm2634_vm9, %v5757_v60, %v5759_v4 }
 0x13a   : > { %v792_v52 = vmax.f32 %v724_v20, 0.0  ;;  %v4121_v5 = vpop.f32.mrb[28].mxu0  ;;  %v899_v23 = vsel %vm881_vm0, %v791_v8, 0.0  ;;  %vm885_vm0 = vcmp.eq.s32.totalorder %v5725_v10, 1 }
 0x13b   : > { %v4122_v7 = vpop.f32.mrb[29].mxu0  ;;  %4333 = vmatpush3.bf16.msra.mxu1 %v4741_v14  ;;  %v4745_v14 = vld [vmem:[%s6480_s7 + $0xb8] sm:$0xff]  }
 0x13c   : > { %v900_v29 = vsel %vm882_vm1, %v792_v52, 0.0  ;;  %v4123_v3 = vadd.f32 %v4122_v7, %v4121_v5  ;;  %v4124_v34 = vpop.f32.mrb[30].mxu0  ;;  %4334 = vmatprep.subr.bf16.mxu1 %v4879_v56  ;;  %v4853_v53 = vpack.c.bf16 %v792_v52, %v791_v8  ;;  %v4746_v5 = vld [vmem:[%s6480_s7 + $0x148] sm:$0xff]   ;;  %vm886_vm1 = vcmp.eq.s32.totalorder %v5729_v12, 1 }
 0x13d   : > { %v911_v37 = vpack.c.bf16 %v900_v29, %v899_v23  ;;  %v4125_v38 = vpop.f32.mrb[31].mxu0 }
 0x13e   : > { %v729_v1 = vadd.f32 %v4123_v3, %v5530_v19  ;;  %v4126_v46 = vadd.f32 %v4125_v38, %v4124_v34  ;;  %4854 = vmatmul.mubr.msk.bf16.vlgmr.msra.gmra.mrb[60].mxu0 %vm4852_vm3, %v4853_v53  ;;  %vm4858_vm3 = vmpackc.low %vm886_vm1, %vm885_vm0 }
 0x13f   : > { %4335 = vmatpush3.bf16.msra.mxu1 %v4743_v35  ;;  %4407 = vmatpush3.bf16.msra.mxu0 %v4744_v36  ;;  %v2472_v61 = vshll.u32 %v911_v37, 16  ;;  %v4747_v35 = vld [vmem:[%s6480_s7 + $0x100] sm:$0xff]   ;;  %v4748_v36 = vld [vmem:[%s6480_s7 + $0x150] sm:$0xff]  }
 0x140   : > { %v793_v57 = vmax.f32 %v729_v1, 0.0  ;;  %v732_v20 = vadd.f32 %v4126_v46, %v5530_v19  ;;  %4336 = vmatprep.subr.bf16.mxu1 %v4879_v56  ;;  %4408 = vmatprep.subr.bf16.mxu0 %v4879_v56 }
 0x141   : > { %4370 = vmatprep.mubr.msk.bf16.mxu0 %vm4880_vm14, %v4879_v56  ;;  %v2474_v46 = vrot.slane %v2472_v61, 1  ;;  %v4749_v61 = vld [vmem:[%s6480_s7 + $0x108] sm:$0xff]  }
 0x142   : > { %v794_v8 = vmax.f32 %v732_v20, 0.0  ;;  %v4127_v52 = vpop.f32.mrb[32].mxu0  ;;  %v901_v23 = vsel %vm883_vm7, %v793_v57, 0.0  ;;  %vm4861_vm7 = vmpackc.low %vm1710_vm15, %vm1709_vm2 }
 0x143   : > { %v4128_v7 = vpop.f32.mrb[33].mxu0  ;;  %4337 = vmatpush3.bf16.msra.mxu1 %v4745_v14  ;;  %4409 = vmatpush3.bf16.msra.mxu0 %v4746_v5  ;;  %v2470_v5 = vshrl.u32 %v911_v37, 16  ;;  %vm4864_vm15 = vmpackc.low %vm1712_vm6, %vm1711_vm4 }
 0x144   : > { %v902_v29 = vsel %vm884_vm8, %v794_v8, 0.0  ;;  %v4129_v3 = vadd.f32 %v4128_v7, %v4127_v52  ;;  %v4130_v34 = vpop.f32.mrb[34].mxu0  ;;  %4378 = vmatprep.subr.bf16.mxu1 %v4879_v56  ;;  %4410 = vmatprep.subr.bf16.mxu0 %v4879_v56  ;;  %v4856_v14 = vpack.c.bf16 %v794_v8, %v793_v57 }
 0x145   : > { %v912_v38 = vpack.c.bf16 %v902_v29, %v901_v23  ;;  %v4131_v1 = vpop.f32.mrb[35].mxu0  ;;  %v2475_v44 = vor.u32 %v2474_v46, %v2470_v5 }
 0x146   : > { %v737_v53 = vadd.f32 %v4129_v3, %v5530_v19  ;;  %v4132_v20 = vadd.f32 %v4131_v1, %v4130_v34  ;;  %4339 = vmatmul.mubr.bf16.vlgmr.msra.gmra.mrb[36].mxu1 %v5582_v24  ;;  %4857 = vmatmul.mubr.msk.bf16.gmra.mrb[64].mxu0 %vm4855_vm10, %v4856_v14  ;;  %v4750_v24 = vld [vmem:[%s6480_s7 + $0x158] sm:$0xff]   ;;  %v4751_v3 = vld [vmem:[%s6480_s7 + $0x110] sm:$0xff]   ;;  %v4752_v34 = vld [vmem:[%s6480_s7 + $0x160] sm:$0xff]  }
 0x147   : > { %v2477_v52 = vshll.u32 %v912_v38, 16  ;;  %4379 = vmatpush3.bf16.msra.mxu1 %v4747_v35  ;;  %4411 = vmatpush3.bf16.msra.mxu0 %v4748_v36  ;;  %v2481_v1 = vshrl.u32 %v912_v38, 16  ;;  %v2066_v38 = vor.u32 %v2064_v45, %v5616_v47  ;;  %v4757_v47 = vld [vmem:[%s6480_s7 + $0x128] sm:$0xff]  }
 0x148   : > { %v795_v7 = vmax.f32 %v737_v53, 0.0  ;;  %v740_v23 = vadd.f32 %v4132_v20, %v5530_v19  ;;  %4380 = vmatprep.subr.bf16.mxu1 %v4879_v56  ;;  %4412 = vmatprep.subr.bf16.mxu0 %v4879_v56  ;;  %v2025_v19 = vld [vmem:[#allocation2 + $0x18] sm:$0x1]  ;;  %v4754_v20 = vld [vmem:[%s6480_s7 + $0x168] sm:$0xff]  }
 0x149   : > { %v2479_v51 = vrot.slane %v2477_v52, 1  ;;  %4342 = vmatprep.mubr.msk.bf16.mxu1 %vm4880_vm14, %v4879_v56  ;;  %4374 = vmatprep.mubr.msk.bf16.mxu0 %vm4880_vm14, %v4879_v56  ;;  %v2068_v12 = vshll.u32 %v2025_v19, 16  ;;  %v4753_v53 = vld [vmem:[%s6480_s7 + $0x118] sm:$0xff]   ;;  %v4755_v52 = vld [vmem:[%s6480_s7 + $0x120] sm:$0xff]  }
 0x14a   : > { %v796_v37 = vmax.f32 %v740_v23, 0.0  ;;  %v903_v8 = vsel %vm885_vm0, %v795_v7, 0.0  ;;  %v4758_v23 = vld [vmem:[%s6480_s7 + $0x178] sm:$0xff]  }
 0x14b   : > { %v2480_v57 = vsel %vm2043_vm5, %v2475_v44, %v2479_v51  ;;  %4381 = vmatpush3.bf16.msra.mxu1 %v4749_v61  ;;  %4413 = vmatpush3.bf16.msra.mxu0 %v4750_v24  ;;  %v2070_v14 = vrot.slane %v2068_v12, 1  ;;  %v4759_v44 = vld [vmem:[%s6480_s7 + $0x130] sm:$0xff]   ;;  %v2451_v12 = vld [vmem:[#allocation2 + $0x58] sm:$0x1] }
 0x14c   : > { %v904_v29 = vsel %vm886_vm1, %v796_v37, 0.0  ;;  %4382 = vmatprep.subr.bf16.mxu1 %v4879_v56  ;;  %4414 = vmatprep.subr.bf16.mxu0 %v4879_v56  ;;  %v4859_v36 = vpack.c.bf16 %v796_v37, %v795_v7  ;;  %v4756_v7 = vld [vmem:[%s6480_s7 + $0x170] sm:$0xff]  }
 0x14d   : > { %v5849_v35 = vpack.c.bf16 %v904_v29, %v903_v8  ;;  %v2071_v45 = vsel %vm2043_vm5, %v2066_v38, %v2070_v14  ;;  %v4765_v14 = vld [vmem:[%s6480_s7 + $0x188] sm:$0xff]  }
 0x14e   : > { %4343 = vmatmul.mubr.bf16.gmra.mrb[40].mxu1 %v5635_v59  ;;  %4860 = vmatmul.mubr.msk.bf16.gmra.mrb[68].mxu0 %vm4858_vm3, %v4859_v36  ;;  %v2483_v59 = vor.u32 %v2481_v1, %v2479_v51  ;;  %v4760_v51 = vld [vmem:[%s6480_s7 + $0x1c0] sm:$0xff]   ;;  %v4764_v36 = vld [vmem:[%s6480_s7 + $0x1d0] sm:$0xff]  }
 0x14f   : > { %v2485_v46 = vshll.u32 %v5849_v35, 16  ;;  %4383 = vmatpush3.bf16.msra.mxu1 %v4751_v3  ;;  %4415 = vmatpush3.bf16.msra.mxu0 %v4752_v34  ;;  %v4761_v3 = vld [vmem:[%s6480_s7 + $0x138] sm:$0xff]   ;;  %v4762_v34 = vld [vmem:[%s6480_s7 + $0x1c8] sm:$0xff]   ;;  %v2489_v27 = vshrl.u32 %v5849_v35, 16 }
 0x150   : > { %4384 = vmatprep.subr.bf16.mxu1 %v4879_v56  ;;  %4416 = vmatprep.subr.bf16.mxu0 %v4879_v56 }
 0x151   : > { %v5865_v10 = vrot.slane %v2485_v46, 1  ;;  %4346 = vmatprep.mubr.msk.bf16.mxu1 %vm4880_vm14, %v4879_v56  ;;  %4422 = vmatprep.mubr.msk.bf16.mxu0 %vm4880_vm14, %v4879_v56  ;;  %v2493_v46 = vshll.u32 %v2451_v12, 16  ;;  %v4868_v12 = vpack.c.bf16 %v1684_v17, %v1683_v42  ;;  %v4775_v17 = vld [vmem:[%s6480_s7 + $0x1b0] sm:$0xff]  }
 0x153   : > { %v2488_v5 = vsel %vm2043_vm5, %v2483_v59, %v5865_v10  ;;  %4385 = vmatpush3.bf16.msra.mxu1 %v4753_v53  ;;  %4417 = vmatpush3.bf16.msra.mxu0 %v4754_v20  ;;  %v4149_v61 = vpop.f32.mrb[12].mxu1  ;;  %v4862_v20 = vpack.c.bf16 %v1680_v28, %v1679_v30  ;;  %v2495_v35 = vrot.slane %v2493_v46, 1 }
 0x154   : > { %4386 = vmatprep.subr.bf16.mxu1 %v4879_v56  ;;  %4418 = vmatprep.subr.bf16.mxu0 %v4879_v56  ;;  %v4150_v24 = vpop.f32.mrb[13].mxu1 }
 0x155   : > { %v5901_v37 = vadd.f32 %v4150_v24, %v4149_v61  ;;  %v4152_v19 = vpop.f32.mrb[14].mxu1  ;;  %v5942_v63 = vpop.f32.mrb[36].mxu0  ;;  %v4865_v24 = vpack.c.bf16 %v1682_v16, %v1681_v55 }
 0x156   : > { %4347 = vmatmul.mubr.bf16.gmra.mrb[44].mxu1 %v2071_v45  ;;  %v4153_v8 = vpop.f32.mrb[15].mxu1  ;;  %v5946_v50 = vpop.f32.mrb[37].mxu0  ;;  %v4767_v45 = vld [vmem:[%s6480_s7 + $0x190] sm:$0xff]  }
 0x157   : > { %4387 = vmatpush3.bf16.msra.mxu1 %v4755_v52  ;;  %4419 = vmatpush3.bf16.msra.mxu0 %v4756_v7  ;;  %6485 = vst [vmem:[#allocation3_spill] sm:$0xff] %v5901_v37  ;;  %v5905_v29 = vadd.f32 %v4153_v8, %v4152_v19  ;;  %6487 = vst [vmem:[#allocation5_spill] sm:$0xff] %v5946_v50  ;;  %v5955_v52 = vpop.f32.mrb[38].mxu0  ;;  %v4769_v19 = vld [vmem:[%s6480_s7 + $0x198] sm:$0xff]  }
 0x158   : > { %4388 = vmatprep.subr.bf16.mxu1 %v4879_v56  ;;  %4420 = vmatprep.subr.bf16.mxu0 %v4879_v56  ;;  %v5957_v7 = vpop.f32.mrb[39].mxu0 }
 0x159   : > { %4394 = vmatprep.mubr.msk.bf16.mxu1 %vm4880_vm14, %v4879_v56  ;;  %6486 = vst [vmem:[#allocation4_spill] sm:$0xff] %v5905_v29  ;;  %6488 = vst [vmem:[#allocation6_spill] sm:$0xff] %v5957_v7 }
 0x15b   : > { %4389 = vmatpush3.bf16.msra.mxu1 %v4757_v47  ;;  %4421 = vmatpush3.bf16.msra.mxu0 %v4758_v23  ;;  %v4155_v1 = vpop.f32.mrb[16].mxu1  ;;  %v4768_v47 = vld [vmem:[%s6480_s7 + $0x1e0] sm:$0xff]  }
 0x15c   : > { %4390 = vmatprep.subr.bf16.mxu1 %v4879_v56  ;;  %4462 = vmatprep.subr.bf16.mxu0 %v4879_v56  ;;  %v4156_v53 = vpop.f32.mrb[17].mxu1 }
 0x15d   : > { %v5933_v59 = vadd.f32 %v4156_v53, %v4155_v1  ;;  %v4158_v38 = vpop.f32.mrb[18].mxu1  ;;  %v5984_v31 = vpop.f32.mrb[40].mxu0  ;;  %v2611_v53 = vld [vmem:[#allocation2] sm:$0xf0] }
 0x15e   : > { %4423 = vmatmul.mubr.bf16.vlgmr.msra.gmra.mrb[72].mxu0 %v2480_v57  ;;  %v4763_v57 = vld [vmem:[%s6480_s7 + $0x180] sm:$0xff]   ;;  %v4159_v30 = vpop.f32.mrb[19].mxu1  ;;  %v5988_v55 = vpop.f32.mrb[41].mxu0 }
 0x15f   : > { %4391 = vmatpush3.bf16.msra.mxu1 %v4759_v44  ;;  %4463 = vmatpush3.bf16.msra.mxu0 %v4760_v51  ;;  %v5948_v28 = vadd.f32 %v4159_v30, %v4158_v38  ;;  %v5996_v16 = vpop.f32.mrb[42].mxu0  ;;  %v2635_v38 = vrot.slane %v2611_v53, 4  ;;  %v2612_v30 = vld [vmem:[#allocation2 + $0x18] sm:$0xf] }
 0x160   : > { %4392 = vmatprep.subr.bf16.mxu1 %v4879_v56  ;;  %4464 = vmatprep.subr.bf16.mxu0 %v4879_v56  ;;  %v5998_v8 = vpop.f32.mrb[43].mxu0 }
 0x161   : > { %4426 = vmatprep.mubr.msk.bf16.mxu0 %vm4880_vm14, %v4879_v56 }
 0x163   : > { %4393 = vmatpush3.bf16.msra.mxu1 %v4761_v3  ;;  %4465 = vmatpush3.bf16.msra.mxu0 %v4762_v34  ;;  %v4771_v3 = vld [vmem:[%s6480_s7 + $0x1a0] sm:$0xff]   ;;  %v4772_v34 = vld [vmem:[%s6480_s7 + $0x1f0] sm:$0xff]  }
 0x164   : > { %4434 = vmatprep.subr.bf16.mxu1 %v4879_v56  ;;  %4466 = vmatprep.subr.bf16.mxu0 %v4879_v56 }
 0x165   : > { %v6022_v1 = vpop.f32.mrb[44].mxu0 }
 0x166   : > { %4863 = vmatmul.mubr.msk.bf16.vlgmr.msra.gmra.mrb[48].mxu1 %vm4861_vm7, %v4862_v20  ;;  %4427 = vmatmul.mubr.bf16.gmra.mrb[76].mxu0 %v2488_v5  ;;  %v2491_v5 = vor.u32 %v2489_v27, %v5865_v10  ;;  %v4161_v10 = vpop.f32.mrb[20].mxu1  ;;  %v6026_v9 = vpop.f32.mrb[45].mxu0  ;;  %v4776_v20 = vld [vmem:[%s6480_s7 + $0x1b8] sm:$0xff]   ;;  %v4778_v27 = vld [vmem:[%s6480_s7 + $0x208] sm:$0xff]  }
 0x167   : > { %4435 = vmatpush3.bf16.msra.mxu1 %v4763_v57  ;;  %4467 = vmatpush3.bf16.msra.mxu0 %v4764_v36  ;;  %v4162_v61 = vpop.f32.mrb[21].mxu1  ;;  %v2756_v57 = vld [vmem:[#allocation2 + $0x20] sm:$0xf0]  ;;  %v4773_v36 = vld [vmem:[%s6480_s7 + $0x1a8] sm:$0xff]   ;;  %6489 = vst [vmem:[#allocation7_spill] sm:$0xff] %v6026_v9  ;;  %v6030_v49 = vpop.f32.mrb[46].mxu0 }
 0x168   : > { %4436 = vmatprep.subr.bf16.mxu1 %v4879_v56  ;;  %4468 = vmatprep.subr.bf16.mxu0 %v4879_v56  ;;  %v2496_v23 = vsel %vm2043_vm5, %v2491_v5, %v2495_v35  ;;  %v5976_v44 = vadd.f32 %v4162_v61, %v4161_v10  ;;  %v4164_v51 = vpop.f32.mrb[22].mxu1  ;;  %vm4867_vm5 = vmpackc.low %vm1714_vm13, %vm1713_vm11  ;;  %v2781_v42 = vrot.slane %v2756_v57, 4  ;;  %6490 = vst [vmem:[#allocation8_spill] sm:$0xff] %v6030_v49  ;;  %v6032_v26 = vpop.f32.mrb[47].mxu0  ;;  %v4780_v5 = vld [vmem:[%s6480_s7 + $0x218] sm:$0xff]   ;;  %v2922_v10 = vshrl.u32 %v2611_v53, 16 }
 0x169   : > { %4398 = vmatprep.mubr.msk.bf16.mxu1 %vm4880_vm14, %v4879_v56  ;;  %4430 = vmatprep.mubr.msk.bf16.mxu0 %vm4880_vm14, %v4879_v56  ;;  %v4165_v41 = vpop.f32.mrb[23].mxu1  ;;  %6491 = vst [vmem:[#allocation9_spill] sm:$0xff] %v6032_v26  ;;  %v6075_v35 = vld [vmem:[#allocation2 + $0x18] sm:$0xff] }
 0x16a   : > { %v5990_v58 = vadd.f32 %v4165_v41, %v4164_v51  ;;  %v2783_v46 = vsel %vm2634_vm9, %v2781_v42, %v5757_v60  ;;  %v2637_v60 = vsel %vm2634_vm9, %v2635_v38, %v2636_v39  ;;  %v4779_v39 = vld [vmem:[%s6480_s7 + $0x210] sm:$0xff]  }
 0x16b   : > { %4437 = vmatpush3.bf16.msra.mxu1 %v4765_v14  ;;  %4469 = vmatpush3.bf16.msra.mxu0 %v4766_v22  ;;  %v4777_v14 = vld [vmem:[%s6480_s7 + $0x200] sm:$0xff]   ;;  %v2759_v22 = vld [vmem:[#allocation2 + $0x38] sm:$0xf] }
 0x16c   : > { %4438 = vmatprep.subr.bf16.mxu1 %v4879_v56  ;;  %4470 = vmatprep.subr.bf16.mxu0 %v4879_v56  ;;  %v2786_v62 = vrot.slane %v2759_v22, 4  ;;  %v4787_v42 = vld [vmem:[%s6482_s9 + $0x4] ss:$16 sps:$4 sm:$0xff]   ;;  %v4796_v22 = vld [vmem:[%s6482_s9 + $0xc] ss:$16 sps:$4 sm:$0xff]  }
 0x16d   : > { %v4793_v38 = vld [vmem:[%s6482_s9 + $0x44] ss:$16 sps:$4 sm:$0xff]  }
 0x16e   : > { %4866 = vmatmul.mubr.msk.bf16.gmra.mrb[52].mxu1 %vm4864_vm15, %v4865_v24  ;;  %4431 = vmatmul.mubr.bf16.gmra.mrb[80].mxu0 %v2496_v23  ;;  %v2925_v23 = vshll.u32 %v2611_v53, 16  ;;  %v4784_v24 = vld [vmem:[%s6480_s7 + $0x238] sm:$0xff]  }
 0x16f   : > { %4439 = vmatpush3.bf16.msra.mxu1 %v4767_v45  ;;  %4471 = vmatpush3.bf16.msra.mxu0 %v4768_v47  ;;  %v2640_v45 = vrot.slane %v2612_v30, 4  ;;  %v4782_v47 = vld [vmem:[%s6480_s7 + $0x228] sm:$0xff]  }
 0x170   : > { %4440 = vmatprep.subr.bf16.mxu1 %v4879_v56  ;;  %4472 = vmatprep.subr.bf16.mxu0 %v4879_v56  ;;  %v2927_v61 = vrot.slane %v2925_v23, 5  ;;  %v6148_v30 = vld [vmem:[%s6482_s9 + $0x2c] ss:$16 sps:$4 sm:$0xff]   ;;  %v6172_v23 = vld [vmem:[%s6482_s9 + $0x48] ss:$16 sps:$4 sm:$0xff]  }
 0x171   : > { %4402 = vmatprep.mubr.msk.bf16.mxu1 %vm4880_vm14, %v4879_v56  ;;  %4478 = vmatprep.mubr.msk.bf16.mxu0 %vm4880_vm14, %v4879_v56 }
 0x173   : > { %4441 = vmatpush3.bf16.msra.mxu1 %v4769_v19  ;;  %4473 = vmatpush3.bf16.msra.mxu0 %v4770_v11  ;;  %v2902_v11 = vld [vmem:[#allocation2 + $0x18] sm:$0x1f] }
 0x174   : > { %4442 = vmatprep.subr.bf16.mxu1 %v4879_v56  ;;  %4474 = vmatprep.subr.bf16.mxu0 %v4879_v56  ;;  %v2938_v41 = vshrl.u32 %v2902_v11, 16 }
 0x176   : > { %4869 = vmatmul.mubr.msk.bf16.gmra.mrb[56].mxu1 %vm4867_vm5, %v4868_v12 }
 0x177   : > { %4443 = vmatpush3.bf16.msra.mxu1 %v4771_v3  ;;  %4475 = vmatpush3.bf16.msra.mxu0 %v4772_v34  ;;  %v2941_v3 = vshll.u32 %v2902_v11, 16  ;;  %v2940_v34 = vrot.slane %v2938_v41, 4 }
 0x178   : > { %4444 = vmatprep.subr.bf16.mxu1 %v4879_v56  ;;  %4476 = vmatprep.subr.bf16.mxu0 %v4879_v56 }
 0x179   : > { %4450 = vmatprep.mubr.msk.bf16.mxu1 %vm4880_vm14, %v4879_v56  ;;  %v2943_v12 = vrot.slane %v2941_v3, 5 }
 0x17b   : > { %4445 = vmatpush3.bf16.msra.mxu1 %v4773_v36  ;;  %4477 = vmatpush3.bf16.msra.mxu0 %v4774_v6  ;;  %v2944_v57 = vor.u32 %v2943_v12, %v2940_v34  ;;  %v4817_v34 = vld [vmem:[%s6482_s9 + $0xc4] ss:$16 sps:$4 sm:$0xff]  }
 0x17c   : > { %4446 = vmatprep.subr.bf16.mxu1 %v4879_v56  ;;  %3296 = vmatprep.subr.bf16.mxu0 %v4787_v42 }
 0x17d   : > { %v2945_v36 = vsel %vm2920_vm12, %v5647_v13, %v2944_v57  ;;  %v4788_v13 = vld [vmem:[%s6482_s9 + $0x20] ss:$16 sps:$4 sm:$0xff]  }
 0x17e   : > { %4479 = vmatmul.mubr.bf16.vlgmr.msra.gmra.mrb[84].mxu0 %v2783_v46  ;;  %v4815_v57 = vld [vmem:[%s6482_s9 + $0xc0] ss:$16 sps:$4 sm:$0xff]  }
 0x17f   : > { %4447 = vmatpush3.bf16.msra.mxu1 %v4775_v17  ;;  %4482 = vmatprep.mubr.msk.bf16.mxu0 %vm4880_vm14, %v4879_v56 }
 0x180   : > { %4448 = vmatprep.subr.bf16.mxu1 %v4879_v56 }
 0x183   : > { %4449 = vmatpush3.bf16.msra.mxu1 %v4776_v20 }
 0x184   : > { %4490 = vmatprep.subr.bf16.mxu1 %v4879_v56 }
 0x186   : > { %4451 = vmatmul.mubr.bf16.vlgmr.msra.gmra.mrb[60].mxu1 %v2637_v60  ;;  %4483 = vmatmul.mubr.bf16.gmra.mrb[88].mxu0 %v5778_v15  ;;  %v2787_v15 = vsel %vm2634_vm9, %v5759_v4, %v2786_v62  ;;  %v2641_v4 = vsel %vm2634_vm9, %v2638_v40, %v2640_v45  ;;  %v2924_v40 = vrot.slane %v2922_v10, 4  ;;  %v4791_v60 = vld [vmem:[%s6482_s9 + $0x40] ss:$16 sps:$4 sm:$0xff]   ;;  %v6137_v62 = vld [vmem:[%s6482_s9 + $0x8] ss:$16 sps:$4 sm:$0xff]  }
 0x187   : > { %4491 = vmatpush3.bf16.msra.mxu1 %v4777_v14  ;;  %4454 = vmatprep.mubr.msk.bf16.mxu1 %vm4880_vm14, %v4879_v56  ;;  %v4805_v45 = vld [vmem:[%s6482_s9 + $0x84] ss:$16 sps:$4 sm:$0xff]  }
 0x188   : > { %4492 = vmatprep.subr.bf16.mxu1 %v4879_v56  ;;  %4486 = vmatprep.mubr.msk.bf16.mxu0 %vm4880_vm14, %v4879_v56  ;;  %v2928_v51 = vor.u32 %v2927_v61, %v2924_v40  ;;  %v6181_v61 = vld [vmem:[%s6482_s9 + $0x6c] ss:$16 sps:$4 sm:$0xff]  }
 0x18a   : > { %v2932_v19 = vsel %vm2920_vm12, %v2928_v51, %v5584_v25  ;;  %v4809_v51 = vld [vmem:[%s6482_s9 + $0xa0] ss:$16 sps:$4 sm:$0xff]  }
 0x18b   : > { %4493 = vmatpush3.bf16.msra.mxu1 %v4778_v27 }
 0x18c   : > { %4494 = vmatprep.subr.bf16.mxu1 %v4879_v56 }
 0x18e   : > { %4455 = vmatmul.mubr.bf16.gmra.mrb[64].mxu1 %v5623_v48  ;;  %4487 = vmatmul.mubr.bf16.gmra.mrb[92].mxu0 %v2787_v15  ;;  %v4781_v48 = vld [vmem:[%s6480_s7 + $0x220] sm:$0xff]  }
 0x18f   : > { %4495 = vmatpush3.bf16.msra.mxu1 %v4779_v39  ;;  %4458 = vmatprep.mubr.msk.bf16.mxu1 %vm4880_vm14, %v4879_v56  ;;  %v4797_v39 = vld [vmem:[%s6482_s9 + $0x60] ss:$16 sps:$4 sm:$0xff]   ;;  %v4799_v15 = vld [vmem:[%s6482_s9 + $0x64] ss:$16 sps:$4 sm:$0xff]  }
 0x190   : > { %4496 = vmatprep.subr.bf16.mxu1 %v4879_v56  ;;  %3328 = vmatprep.mubr.bf16.mxu0 %v6075_v35 }
 0x193   : > { %4497 = vmatpush3.bf16.msra.mxu1 %v4780_v5  ;;  %v6154_v5 = vld [vmem:[%s6482_s9 + $0x28] ss:$16 sps:$4 sm:$0xff]  }
 0x194   : > { %4498 = vmatprep.subr.bf16.mxu1 %v4879_v56 }
 0x196   : > { %4459 = vmatmul.mubr.bf16.gmra.mrb[68].mxu1 %v2641_v4 }
 0x197   : > { %4499 = vmatpush3.bf16.msra.mxu1 %v4781_v48  ;;  %4506 = vmatprep.mubr.msk.bf16.mxu1 %vm4880_vm14, %v4879_v56  ;;  %v6163_v48 = vld [vmem:[%s6482_s9 + $0x4c] ss:$16 sps:$4 sm:$0xff]  }
 0x198   : > { %4500 = vmatprep.subr.bf16.mxu1 %v4879_v56 }
 0x19b   : > { %4501 = vmatpush3.bf16.msra.mxu1 %v4782_v47  ;;  %v4803_v47 = vld [vmem:[%s6482_s9 + $0x80] ss:$16 sps:$4 sm:$0xff]  }
 0x19c   : > { %4502 = vmatprep.subr.bf16.mxu1 %v4879_v56 }
 0x19f   : > { %4503 = vmatpush3.bf16.msra.mxu1 %v4783_v33  ;;  %v4811_v33 = vld [vmem:[%s6482_s9 + $0xa4] ss:$16 sps:$4 sm:$0xff]  }
 0x1a0   : > { %4504 = vmatprep.subr.bf16.mxu1 %v4879_v56 }
 0x1a3   : > { %4505 = vmatpush3.bf16.msra.mxu1 %v4784_v24 }
 0x1a4   : > { %4518 = vmatprep.subr.bf16.mxu1 %v4796_v22 }
 0x1a6   : > { %4507 = vmatmul.mubr.bf16.vlgmr.msra.gmra.mrb[72].mxu1 %v2932_v19  ;;  %v6190_v19 = vld [vmem:[%s6482_s9 + $0x68] ss:$16 sps:$4 sm:$0xff]  }
 0x1a7   : > { %4510 = vmatprep.mubr.msk.bf16.mxu1 %vm4880_vm14, %v4879_v56  ;;  %4526 = vmatpush1.bf16.msra.mxu1 %v6137_v62 }
 0x1a8   : > { %4519 = vmatprep.subr.bf16.mxu1 %v6148_v30 }
 0x1ab   : > { %4527 = vmatpush1.bf16.msra.mxu1 %v6154_v5 }
 0x1ac   : > { %4520 = vmatprep.subr.bf16.mxu1 %v6163_v48 }
 0x1ae   : > { %4511 = vmatmul.mubr.bf16.gmra.mrb[76].mxu1 %v5669_v21  ;;  %v4785_v21 = vld [vmem:[%s6482_s9] ss:$16 sps:$4 sm:$0xff]  }
 0x1af   : > { %4514 = vmatprep.mubr.msk.bf16.mxu1 %vm4880_vm14, %v4879_v56  ;;  %v4790_v56 = vld [vmem:[%s6482_s9 + $0x24] ss:$16 sps:$4 sm:$0xff]   ;;  %3297 = vmatpush1.bf16.msra.mxu0 %v4785_v21 }
 0x1b0   : > { %3298 = vmatprep.subr.bf16.mxu0 %v4790_v56  ;;  %4528 = vmatpush1.bf16.msra.mxu1 %v6172_v23  ;;  %v4823_v21 = vld [vmem:[%s6482_s9 + $0xe4] ss:$16 sps:$4 sm:$0xff]   ;;  %v6226_v56 = vld [vmem:[%s6482_s9 + $0xa8] ss:$16 sps:$4 sm:$0xff]  }
 0x1b1   : > { %4521 = vmatprep.subr.bf16.mxu1 %v6181_v61 }
 0x1b3   : > { %3299 = vmatpush1.bf16.msra.mxu0 %v4788_v13 }
 0x1b4   : > { %3300 = vmatprep.subr.bf16.mxu0 %v4793_v38  ;;  %4529 = vmatpush1.bf16.msra.mxu1 %v6190_v19 }
 0x1b6   : > { %4515 = vmatmul.mubr.bf16.gmra.mrb[80].mxu1 %v2945_v36  ;;  %v6203_v36 = vld [vmem:[%s6482_s9 + $0x8c] ss:$16 sps:$4 sm:$0xff]  }
 0x1b7   : > { %3401 = vmatprep.mubr.bf16.mxu1 %v6075_v35  ;;  %3301 = vmatpush1.bf16.msra.mxu0 %v4791_v60 }
 0x1b8   : > { %3302 = vmatprep.subr.bf16.mxu0 %v4799_v15  ;;  %4522 = vmatprep.subr.bf16.mxu1 %v6203_v36 }
 0x1bb   : > { %3303 = vmatpush1.bf16.msra.mxu0 %v4797_v39 }
 0x1bc   : > { %3304 = vmatprep.subr.bf16.mxu0 %v4805_v45  ;;  %v6240_v45 = vld [vmem:[%s6482_s9 + $0xc8] ss:$16 sps:$4 sm:$0xff]  }
 0x1bf   : > { %3305 = vmatpush1.bf16.msra.mxu0 %v4803_v47 }
 0x1c0   : > { %3306 = vmatprep.subr.bf16.mxu0 %v4811_v33 }
 0x1c3   : > { %3307 = vmatpush1.bf16.msra.mxu0 %v4809_v51 }
 0x1c4   : > { %3308 = vmatprep.subr.bf16.mxu0 %v4817_v34 }
 0x1c7   : > { %3309 = vmatpush1.bf16.msra.mxu0 %v4815_v57 }
 0x1c8   : > { %3310 = vmatprep.subr.bf16.mxu0 %v4823_v21 }
 0x1e1   : > { %v1999_v25 = vpop.f32.mrb[48].mxu0 }
 0x1e2   : > { %v4312_v6 = vpop.f32.mrb[49].mxu0 }
 0x1e3   : > { %v2002_v17 = vpop.f32.mrb[50].mxu0 }
 0x1e4   : > { %v4313_v46 = vpop.f32.mrb[51].mxu0 }
 0x1e5   : > { %v6221_v46 = vld [vmem:[%s6482_s9 + $0xac] ss:$16 sps:$4 sm:$0xff]  }
 0x1e9   : > { %v6121_v53 = vpop.f32.mrb[52].mxu0 }
 0x1ea   : > { %v4316_v20 = vpop.f32.mrb[53].mxu0 }
 0x1eb   : > { %v6126_v14 = vpop.f32.mrb[54].mxu0 }
 0x1ec   : > { %v4317_v27 = vpop.f32.mrb[55].mxu0 }
 0x1ed   : > { %v6234_v27 = vld [vmem:[%s6482_s9 + $0xcc] ss:$16 sps:$4 sm:$0xff]  }
 0x1f1   : > { %v2015_v4 = vpop.f32.mrb[56].mxu0 }
 0x1f2   : > { %v4320_v10 = vpop.f32.mrb[57].mxu0 }
 0x1f3   : > { %v2018_v40 = vpop.f32.mrb[58].mxu0 }
 0x1f4   : > { %v4321_v24 = vpop.f32.mrb[59].mxu0 }
 0x1f9   : > { %v1894_v11 = vpop.f32.mrb[24].mxu1 }
 0x1fa   : > { %v2000_v41 = vadd.f32 %v1999_v25, %v1894_v11  ;;  %v4284_v3 = vpop.f32.mrb[25].mxu1  ;;  %v6208_v25 = vld [vmem:[%s6482_s9 + $0x88] ss:$16 sps:$4 sm:$0xff]  }
 0x1fb   : > { %v1897_v12 = vpop.f32.mrb[26].mxu1  ;;  %4530 = vmatpush1.bf16.msra.mxu1 %v6208_v25 }
 0x1fc   : > { %v2003_v6 = vadd.f32 %v2002_v17, %v1897_v12  ;;  %v4285_v42 = vpop.f32.mrb[27].mxu1  ;;  %v4821_v17 = vld [vmem:[%s6482_s9 + $0xe0] ss:$16 sps:$4 sm:$0xff]   ;;  %4523 = vmatprep.subr.bf16.mxu1 %v6221_v46 }
 0x1fd   : > { %3311 = vmatpush1.bf16.msra.mxu0 %v4821_v17 }
 0x1fe   : > { %3359 = vmatprep.subr.bf16.mxu0 %v4796_v22  ;;  %v6252_v22 = vld [vmem:[%s6482_s9 + $0xe8] ss:$16 sps:$4 sm:$0xff]  }
 0x1ff   : > { %4531 = vmatpush1.bf16.msra.mxu1 %v6226_v56 }
 0x200   : > { %4524 = vmatprep.subr.bf16.mxu1 %v6234_v27 }
 0x201   : > { %v1902_v13 = vpop.f32.mrb[28].mxu1 }
 0x202   : > { %v2008_v20 = vadd.f32 %v6121_v53, %v1902_v13  ;;  %v4288_v38 = vpop.f32.mrb[29].mxu1  ;;  %v6247_v53 = vld [vmem:[%s6482_s9 + $0xec] ss:$16 sps:$4 sm:$0xff]  }
 0x203   : > { %v1905_v60 = vpop.f32.mrb[30].mxu1  ;;  %4532 = vmatpush1.bf16.msra.mxu1 %v6240_v45 }
 0x204   : > { %v2011_v39 = vadd.f32 %v6126_v14, %v1905_v60  ;;  %v4289_v15 = vpop.f32.mrb[31].mxu1  ;;  %4525 = vmatprep.subr.bf16.mxu1 %v6247_v53 }
 0x207   : > { %4533 = vmatpush1.bf16.msra.mxu1 %v6252_v22 }
 0x209   : > { %v1910_v14 = vpop.f32.mrb[32].mxu1 }
 0x20a   : > { %v2016_v47 = vadd.f32 %v2015_v4, %v1910_v14  ;;  %v4292_v10 = vpop.f32.mrb[33].mxu1 }
 0x20b   : > { %v1913_v33 = vpop.f32.mrb[34].mxu1 }
 0x20c   : > { %v2019_v24 = vadd.f32 %v2018_v40, %v1913_v33  ;;  %v4293_v51 = vpop.f32.mrb[35].mxu1 }
 0x211   : > { %v2288_v11 = vpop.f32.mrb[60].mxu0 }
 0x212   : > { %v4368_v3 = vpop.f32.mrb[61].mxu0 }
 0x213   : > { %v2291_v34 = vpop.f32.mrb[62].mxu0 }
 0x214   : > { %v4369_v12 = vpop.f32.mrb[63].mxu0 }
 0x219   : > { %v2157_v57 = vpop.f32.mrb[36].mxu1  ;;  %v2296_v42 = vpop.f32.mrb[64].mxu0 }
 0x21a   : > { %v2180_v21 = vadd.f32 %v2157_v57, %v2000_v41  ;;  %v4340_v17 = vpop.f32.mrb[37].mxu1  ;;  %v4372_v13 = vpop.f32.mrb[65].mxu0 }
 0x21b   : > { %v2160_v38 = vpop.f32.mrb[38].mxu1  ;;  %v2299_v60 = vpop.f32.mrb[66].mxu0 }
 0x21c   : > { %v2181_v15 = vadd.f32 %v2160_v38, %v2003_v6  ;;  %v4341_v29 = vpop.f32.mrb[39].mxu1  ;;  %v4373_v4 = vpop.f32.mrb[67].mxu0  ;;  %v2311_v14 = vadd.f32 %v2288_v11, %v2180_v21 }
 0x21e   : > { %v2312_v10 = vadd.f32 %v2291_v34, %v2181_v15 }
 0x221   : > { %v2165_v7 = vpop.f32.mrb[40].mxu1  ;;  %v2304_v37 = vpop.f32.mrb[68].mxu0 }
 0x222   : > { %v2182_v40 = vadd.f32 %v2165_v7, %v2008_v20  ;;  %v4344_v33 = vpop.f32.mrb[41].mxu1  ;;  %v4376_v51 = vpop.f32.mrb[69].mxu0 }
 0x223   : > { %v2168_v3 = vpop.f32.mrb[42].mxu1  ;;  %v2307_v50 = vpop.f32.mrb[70].mxu0 }
 0x224   : > { %v2183_v12 = vadd.f32 %v2168_v3, %v2011_v39  ;;  %v4345_v26 = vpop.f32.mrb[43].mxu1  ;;  %v4377_v49 = vpop.f32.mrb[71].mxu0  ;;  %v2313_v41 = vadd.f32 %v2296_v42, %v2182_v40 }
 0x226   : > { %v2314_v57 = vadd.f32 %v2299_v60, %v2183_v12 }
 0x229   : > { %v2173_v17 = vpop.f32.mrb[44].mxu1 }
 0x22a   : > { %v2184_v13 = vadd.f32 %v2173_v17, %v2016_v47  ;;  %v4348_v9 = vpop.f32.mrb[45].mxu1 }
 0x22b   : > { %v2176_v6 = vpop.f32.mrb[46].mxu1 }
 0x22c   : > { %v2185_v29 = vadd.f32 %v2176_v6, %v2019_v24  ;;  %v4349_v38 = vpop.f32.mrb[47].mxu1  ;;  %v2315_v11 = vadd.f32 %v2304_v37, %v2184_v13 }
 0x22e   : > { %v2316_v34 = vadd.f32 %v2307_v50, %v2185_v29 }
 0x231   : > { %v2582_v21 = vpop.f32.mrb[72].mxu0 }
 0x232   : > { %v4424_v15 = vpop.f32.mrb[73].mxu0 }
 0x233   : > { %v2585_v7 = vpop.f32.mrb[74].mxu0 }
 0x234   : > { %v4425_v20 = vpop.f32.mrb[75].mxu0 }
 0x239   : > { %v2419_v4 = vpop.f32.mrb[48].mxu1  ;;  %v2590_v33 = vpop.f32.mrb[76].mxu0 }
 0x23a   : > { %v2442_v51 = vadd.f32 %v2419_v4, %v2311_v14  ;;  %v4396_v39 = vpop.f32.mrb[49].mxu1  ;;  %v4428_v26 = vpop.f32.mrb[77].mxu0 }
 0x23b   : > { %v2422_v49 = vpop.f32.mrb[50].mxu1  ;;  %v2593_v42 = vpop.f32.mrb[78].mxu0 }
 0x23c   : > { %v2443_v60 = vadd.f32 %v2422_v49, %v2312_v10  ;;  %v4397_v40 = vpop.f32.mrb[51].mxu1  ;;  %v4429_v47 = vpop.f32.mrb[79].mxu0  ;;  %v2605_v9 = vadd.f32 %v2582_v21, %v2442_v51 }
 0x23e   : > { %v2606_v3 = vadd.f32 %v2585_v7, %v2443_v60 }
 0x241   : > { %v2427_v24 = vpop.f32.mrb[52].mxu1  ;;  %v2598_v12 = vpop.f32.mrb[80].mxu0 }
 0x242   : > { %v2444_v37 = vadd.f32 %v2427_v24, %v2313_v41  ;;  %v4400_v50 = vpop.f32.mrb[53].mxu1  ;;  %v4432_v17 = vpop.f32.mrb[81].mxu0 }
 0x243   : > { %v2430_v13 = vpop.f32.mrb[54].mxu1  ;;  %v2601_v6 = vpop.f32.mrb[82].mxu0 }
 0x244   : > { %v2445_v29 = vadd.f32 %v2430_v13, %v2314_v57  ;;  %v4401_v38 = vpop.f32.mrb[55].mxu1  ;;  %v4433_v15 = vpop.f32.mrb[83].mxu0  ;;  %v2607_v14 = vadd.f32 %v2590_v33, %v2444_v37 }
 0x246   : > { %v2608_v20 = vadd.f32 %v2593_v42, %v2445_v29 }
 0x249   : > { %v2435_v4 = vpop.f32.mrb[56].mxu1 }
 0x24a   : > { %v2446_v39 = vadd.f32 %v2435_v4, %v2315_v11  ;;  %v4404_v26 = vpop.f32.mrb[57].mxu1 }
 0x24b   : > { %v2438_v10 = vpop.f32.mrb[58].mxu1 }
 0x24c   : > { %v2447_v49 = vadd.f32 %v2438_v10, %v2316_v34  ;;  %v4405_v40 = vpop.f32.mrb[59].mxu1  ;;  %v2609_v21 = vadd.f32 %v2598_v12, %v2446_v39 }
 0x24e   : > { %v2610_v7 = vadd.f32 %v2601_v6, %v2447_v49 }
 0x251   : > { %v2873_v51 = vpop.f32.mrb[84].mxu0 }
 0x252   : > { %v4480_v60 = vpop.f32.mrb[85].mxu0 }
 0x253   : > { %v2876_v41 = vpop.f32.mrb[86].mxu0 }
 0x254   : > { %v4481_v47 = vpop.f32.mrb[87].mxu0 }
 0x259   : > { %v2727_v24 = vpop.f32.mrb[60].mxu1  ;;  %v2881_v50 = vpop.f32.mrb[88].mxu0 }
 0x25a   : > { %v2750_v17 = vadd.f32 %v2727_v24, %v2605_v9  ;;  %v4452_v57 = vpop.f32.mrb[61].mxu1  ;;  %v4484_v13 = vpop.f32.mrb[89].mxu0 }
 0x25b   : > { %v2730_v38 = vpop.f32.mrb[62].mxu1  ;;  %v2884_v33 = vpop.f32.mrb[90].mxu0 }
 0x25c   : > { %v2751_v42 = vadd.f32 %v2730_v38, %v2606_v3  ;;  %v4453_v37 = vpop.f32.mrb[63].mxu1  ;;  %v4485_v11 = vpop.f32.mrb[91].mxu0  ;;  %v2896_v29 = vadd.f32 %v2873_v51, %v2750_v17 }
 0x25e   : > { %v2897_v15 = vadd.f32 %v2876_v41, %v2751_v42 }
 0x261   : > { %v2735_v34 = vpop.f32.mrb[64].mxu1  ;;  %v2889_v4 = vpop.f32.mrb[92].mxu0 }
 0x262   : > { %v2752_v12 = vadd.f32 %v2735_v34, %v2607_v14  ;;  %v4456_v6 = vpop.f32.mrb[65].mxu1  ;;  %v4488_v39 = vpop.f32.mrb[93].mxu0  ;;  %v4004_v14 = vld [vmem:[%s6481_s8] ss:$0 sm:$0xff] }
 0x263   : > { %v2738_v26 = vpop.f32.mrb[66].mxu1  ;;  %v2892_v10 = vpop.f32.mrb[94].mxu0 }
 0x264   : > { %v2753_v49 = vadd.f32 %v2738_v26, %v2608_v20  ;;  %v4457_v40 = vpop.f32.mrb[67].mxu1  ;;  %v4489_v60 = vpop.f32.mrb[95].mxu0  ;;  %v2898_v9 = vadd.f32 %v2881_v50, %v2752_v12 }
 0x266   : > { %v2899_v47 = vadd.f32 %v2884_v33, %v2753_v49 }
 0x269   : > { %v2743_v24 = vpop.f32.mrb[68].mxu1 }
 0x26a   : > { %v2754_v57 = vadd.f32 %v2743_v24, %v2609_v21  ;;  %v4460_v13 = vpop.f32.mrb[69].mxu1 }
 0x26b   : > { %v2746_v3 = vpop.f32.mrb[70].mxu1 }
 0x26c   : > { %v2755_v38 = vadd.f32 %v2746_v3, %v2610_v7  ;;  %v4461_v37 = vpop.f32.mrb[71].mxu1  ;;  %v2900_v51 = vadd.f32 %v2889_v4, %v2754_v57 }
 0x26e   : > { %v2901_v41 = vadd.f32 %v2892_v10, %v2755_v38 }
 0x279   : > { %v3031_v17 = vpop.f32.mrb[72].mxu1 }
 0x27a   : > { %v3054_v42 = vadd.f32 %v3031_v17, %v2896_v29  ;;  %v4508_v11 = vpop.f32.mrb[73].mxu1 }
 0x27b   : > { %v3034_v20 = vpop.f32.mrb[74].mxu1 }
 0x27c   : > { %v3067_v34 = vadd.f32 %v4004_v14, %v3054_v42  ;;  %v3055_v6 = vadd.f32 %v3034_v20, %v2897_v15  ;;  %v4509_v50 = vpop.f32.mrb[75].mxu1 }
 0x27e   : > { %v3068_v33 = vadd.f32 %v4004_v14, %v3055_v6  ;;  %v3073_v12 = vmax.f32 %v3067_v34, 0.0 }
 0x280   : > { %v3074_v21 = vmax.f32 %v3068_v33, 0.0 }
 0x281   : > { %v3039_v39 = vpop.f32.mrb[76].mxu1 }
 0x282   : > { %v3079_v26 = vpack.c.bf16 %v3074_v21, %v3073_v12  ;;  %v3056_v7 = vadd.f32 %v3039_v39, %v2898_v9  ;;  %v4512_v49 = vpop.f32.mrb[77].mxu1 }
 0x283   : > { %v3042_v4 = vpop.f32.mrb[78].mxu1 }
 0x284   : > { %v3069_v10 = vadd.f32 %v4004_v14, %v3056_v7  ;;  %v3057_v40 = vadd.f32 %v3042_v4, %v2899_v47  ;;  %v4513_v60 = vpop.f32.mrb[79].mxu1  ;;  %3329 = vmatmul.mubr.bf16.vlgmr.msra.gmra.mrb[96].mxu0 %v3079_v26 }
 0x285   : > { %3360 = vmatpush1.bf16.msra.mxu0 %v6137_v62  ;;  %3338 = vmatprep.mubr.bf16.mxu0 %v6075_v35 }
 0x286   : > { %v3070_v29 = vadd.f32 %v4004_v14, %v3057_v40  ;;  %3361 = vmatprep.subr.bf16.mxu0 %v6148_v30  ;;  %v3075_v15 = vmax.f32 %v3069_v10, 0.0 }
 0x288   : > { %v3076_v24 = vmax.f32 %v3070_v29, 0.0 }
 0x289   : > { %3362 = vmatpush1.bf16.msra.mxu0 %v6154_v5  ;;  %v3047_v57 = vpop.f32.mrb[80].mxu1 }
 0x28a   : > { %v3058_v13 = vadd.f32 %v3047_v57, %v2900_v51  ;;  %v4516_v9 = vpop.f32.mrb[81].mxu1  ;;  %3363 = vmatprep.subr.bf16.mxu0 %v6163_v48  ;;  %v3080_v3 = vpack.c.bf16 %v3076_v24, %v3075_v15 }
 0x28b   : > { %v3050_v47 = vpop.f32.mrb[82].mxu1 }
 0x28c   : > { %v3071_v38 = vadd.f32 %v4004_v14, %v3058_v13  ;;  %v3059_v37 = vadd.f32 %v3050_v47, %v2901_v41  ;;  %v4517_v17 = vpop.f32.mrb[83].mxu1  ;;  %3339 = vmatmul.mubr.bf16.gmra.mrb[100].mxu0 %v3080_v3  ;;  %3402 = vmatmul.mubr.bf16.vlgmr.msra.gmra.mrb[84].mxu1 %v3080_v3 }
 0x28d   : > { %3364 = vmatpush1.bf16.msra.mxu0 %v6172_v23  ;;  %3348 = vmatprep.mubr.bf16.mxu0 %v6075_v35  ;;  %v1729_v23 = vlaneseq }
 0x28e   : > { %v3072_v62 = vadd.f32 %v4004_v14, %v3059_v37  ;;  %3365 = vmatprep.subr.bf16.mxu0 %v6181_v61  ;;  %3411 = vmatprep.mubr.bf16.mxu1 %v6075_v35  ;;  %v3077_v30 = vmax.f32 %v3071_v38, 0.0  ;;  %v6292_v14 = vpop.permute.xlu1 %3492  ;;  %v6493_v38 = vld [vmem:[#allocation8_spill] sm:$0xff] }
 0x28f   : > { %v1730_v61 = vshrl.u32 %v1729_v23, 7  ;;  %vm3507_vm9 = vcmp.eq.s32.totalorder %v6292_v14, 1 }
 0x290   : > { %v3078_v5 = vmax.f32 %v3072_v62, 0.0 }
 0x291   : > { %3366 = vmatpush1.bf16.msra.mxu0 %v6190_v19  ;;  %v1731_v19 = vsub.s32 0, %v1730_v61 }
 0x292   : > { %3367 = vmatprep.subr.bf16.mxu0 %v6203_v36  ;;  %v3081_v48 = vpack.c.bf16 %v3078_v5, %v3077_v30  ;;  %v1735_v36 = vsub.s32 1, %v1730_v61  ;;  %v6342_v57 = vpop.permute.xlu1 %3498 }
 0x293   : > { %vm3509_vm2 = vcmp.eq.s32.totalorder %v6342_v57, 1 }
 0x294   : > { %3349 = vmatmul.mubr.bf16.gmra.mrb[104].mxu0 %v3081_v48  ;;  %3412 = vmatmul.mubr.bf16.gmra.mrb[88].mxu1 %v3081_v48 }
 0x295   : > { %3368 = vmatpush1.bf16.msra.mxu0 %v6208_v25  ;;  %3391 = vmatprep.mubr.bf16.mxu0 %v6075_v35  ;;  %v1727_v35 = vld [vmem:[%s6479_s6] sm:$0xf] }
 0x296   : > { %3369 = vmatprep.subr.bf16.mxu0 %v6221_v46  ;;  %v3114_v25 = vld [vmem:[%s6483_s10] sm:$0xf]  ;;  %v1732_v46 = vrot.slane %v1727_v35, %v1731_v19 }
 0x297   : > { %v6288_v51 = vrot.slane %v3114_v25, %v1735_v36 }
 0x298   : > { %v1749_v41 = vadd.f32 %v1732_v46, %v5642_v2  ;;  %v1753_v42 = vadd.f32 %v1732_v46, %v5658_v18  ;;  %v1757_v11 = vadd.f32 %v1732_v46, %v5698_v43  ;;  %v6298_v20 = vadd.f32 %v1732_v46, %v5710_v0 }
 0x299   : > { %3370 = vmatpush1.bf16.msra.mxu0 %v6226_v56  ;;  %v1743_v56 = vsub.s32 3, %v1730_v61  ;;  %v6303_v50 = vadd.f32 %v1732_v46, %v5740_v32  ;;  %v6306_v33 = vadd.f32 %v1732_v46, %v5751_v54 }
 0x29a   : > { %3371 = vmatprep.subr.bf16.mxu0 %v6234_v27  ;;  %v1739_v27 = vsub.s32 2, %v1730_v61 }
 0x29b   : > { %v6300_v34 = vrot.slane %v1727_v35, %v1743_v56  ;;  %v6340_v24 = vrot.slane %v3114_v25, %v1743_v56 }
 0x29c   : > { %v6308_v2 = vrot.slane %v1727_v35, %v1739_v27  ;;  %v6333_v29 = vrot.slane %v3114_v25, %v1739_v27 }
 0x29d   : > { %3372 = vmatpush1.bf16.msra.mxu0 %v6240_v45  ;;  %v6284_v45 = vrot.slane %v3114_v25, %v1731_v19  ;;  %v1760_v21 = vadd.f32 %v5933_v59, %v6300_v34  ;;  %v6319_v54 = vadd.f32 %v5948_v28, %v6300_v34 }
 0x29e   : > { %3373 = vmatprep.subr.bf16.mxu0 %v6247_v53  ;;  %v6286_v53 = vpop.permute.xlu0 %3489  ;;  %v1763_v13 = vadd.f32 %v6308_v2, %v5998_v8 }
 0x29f   : > { %vm3506_vm14 = vcmp.eq.s32.totalorder %v6286_v53, 1 }
 0x2a1   : > { %3374 = vmatpush1.bf16.msra.mxu0 %v6252_v22  ;;  %v1736_v22 = vrot.slane %v1727_v35, %v1735_v36  ;;  %v6494_v35 = vld [vmem:[#allocation9_spill] sm:$0xff] }
 0x2a2   : > { %v6372_v36 = vadd.f32 %v6308_v2, %v6494_v35 }
 0x2a3   : > { %v1750_v43 = vadd.f32 %v1736_v22, %v5942_v63  ;;  %v1754_v0 = vadd.f32 %v1736_v22, %v5955_v52  ;;  %v1759_v63 = vadd.f32 %v6308_v2, %v5988_v55  ;;  %v6326_v52 = vadd.f32 %v5976_v44, %v6300_v34 }
 0x2a4   : > { %3392 = vmatmul.mubr.bf16.vlgmr.msra.gmra.mrb[108].mxu0 %v3079_v26  ;;  %v1758_v26 = vadd.f32 %v1736_v22, %v5984_v31  ;;  %v6330_v31 = vpop.permute.xlu0 %3495  ;;  %v1762_v28 = vadd.f32 %v1736_v22, %v5996_v16  ;;  %v6338_v55 = vadd.f32 %v5990_v58, %v6300_v34  ;;  %v6347_v16 = vadd.f32 %v1736_v22, %v6022_v1  ;;  %v6492_v58 = vld [vmem:[#allocation7_spill] sm:$0xff] }
 0x2a5   : > { %vm3508_vm12 = vcmp.eq.s32.totalorder %v6330_v31, 1  ;;  %v6354_v47 = vadd.f32 %v6308_v2, %v6492_v58  ;;  %v6357_v37 = vadd.f32 %v1736_v22, %v6493_v38 }
 0x357   : > { %v3330_v6 = vpop.f32.mrb[96].mxu0 }
 0x358   : > { %v3331_v12 = vadd.f32 %v3330_v6, %v6284_v45  ;;  %v3332_v18 = vpop.f32.mrb[97].mxu0 }
 0x359   : > { %v3333_v39 = vadd.f32 %v3332_v18, %v6288_v51  ;;  %v3334_v32 = vpop.f32.mrb[98].mxu0 }
 0x35a   : > { %v3422_v7 = vadd.f32 %v3331_v12, %v1749_v41  ;;  %v3335_v49 = vadd.f32 %v3334_v32, %v6284_v45  ;;  %v3336_v4 = vpop.f32.mrb[99].mxu0 }
 0x35b   : > { %v3423_v59 = vadd.f32 %v3333_v39, %v1750_v43  ;;  %v3337_v10 = vadd.f32 %v3336_v4, %v6288_v51 }
 0x35c   : > { %v3446_v40 = vmax.f32 %v3422_v7, 0.0  ;;  %v3426_v60 = vadd.f32 %v3335_v49, %v1753_v42 }
 0x35d   : > { %v3447_v44 = vmax.f32 %v3423_v59, 0.0  ;;  %v3427_v15 = vadd.f32 %v3337_v10, %v1754_v0  ;;  %v6380_v0 = vpop.permute.xlu0 %3501 }
 0x35e   : > { %v3512_v9 = vsel %vm3506_vm14, %v3446_v40, 0.0  ;;  %v3450_v3 = vmax.f32 %v3426_v60, 0.0  ;;  %vm3510_vm4 = vcmp.eq.s32.totalorder %v6380_v0, 1 }
 0x35f   : > { %v3513_v8 = vsel %vm3506_vm14, %v3447_v44, 0.0  ;;  %v3451_v1 = vmax.f32 %v3427_v15, 0.0  ;;  %v3340_v17 = vpop.f32.mrb[100].mxu0  ;;  %v3403_v62 = vpop.f32.mrb[84].mxu1 }
 0x360   : > { %v4051_v30 = vpack.c.bf16 %v3513_v8, %v3512_v9  ;;  %v3516_v5 = vsel %vm3507_vm9, %v3450_v3, 0.0  ;;  %v3341_v48 = vadd.f32 %v3340_v17, %v6284_v45  ;;  %v3404_v23 = vadd.f32 %v3403_v62, %v6333_v29  ;;  %v3342_v61 = vpop.f32.mrb[101].mxu0  ;;  %v3405_v19 = vpop.f32.mrb[85].mxu1 }
 0x361   : > { %v3517_v25 = vsel %vm3507_vm9, %v3451_v1, 0.0  ;;  %v3343_v46 = vadd.f32 %v3342_v61, %v6288_v51  ;;  %v3406_v56 = vadd.f32 %v3405_v19, %v6340_v24  ;;  %v3344_v27 = vpop.f32.mrb[102].mxu0  ;;  %v3407_v22 = vpop.f32.mrb[86].mxu1 }
 0x362   : > { %3608 = vst [vmem:[%s6362_s24] sm:$0xff] %v4051_v30  ;;  %v4053_v41 = vpack.c.bf16 %v3517_v25, %v3516_v5  ;;  %v3430_v42 = vadd.f32 %v3341_v48, %v1757_v11  ;;  %v3432_v6 = vadd.f32 %v3404_v23, %v1759_v63  ;;  %v3345_v12 = vadd.f32 %v3344_v27, %v6284_v45  ;;  %v3346_v18 = vpop.f32.mrb[103].mxu0  ;;  %v3409_v43 = vpop.f32.mrb[87].mxu1 }
 0x363   : > { %v3431_v39 = vadd.f32 %v3343_v46, %v1758_v26  ;;  %v3433_v32 = vadd.f32 %v3406_v56, %v1760_v21  ;;  %v3408_v7 = vadd.f32 %v3407_v22, %v6333_v29  ;;  %v3347_v49 = vadd.f32 %v3346_v18, %v6288_v51  ;;  %v6387_v63 = vpop.permute.xlu1 %3504 }
 0x364   : > { %3610 = vst [vmem:[%s6362_s24 + $0x10] sm:$0xff] %v4053_v41  ;;  %v3454_v4 = vmax.f32 %v3430_v42, 0.0  ;;  %v3456_v59 = vmax.f32 %v3432_v6, 0.0  ;;  %v3434_v10 = vadd.f32 %v3345_v12, %v6298_v20  ;;  %v3410_v11 = vadd.f32 %v3409_v43, %v6340_v24 }
 0x365   : > { %v3455_v40 = vmax.f32 %v3431_v39, 0.0  ;;  %v3457_v60 = vmax.f32 %v3433_v32, 0.0  ;;  %v3436_v44 = vadd.f32 %v3408_v7, %v1763_v13  ;;  %v3435_v15 = vadd.f32 %v3347_v49, %v1762_v28 }
 0x366   : > { %v3520_v21 = vsel %vm3508_vm12, %v3454_v4, 0.0  ;;  %v3522_v26 = vsel %vm3508_vm12, %v3456_v59, 0.0  ;;  %v3458_v9 = vmax.f32 %v3434_v10, 0.0  ;;  %v3437_v3 = vadd.f32 %v3410_v11, %v6319_v54 }
 0x367   : > { %v3521_v20 = vsel %vm3508_vm12, %v3455_v40, 0.0  ;;  %v3523_v58 = vsel %vm3508_vm12, %v3457_v60, 0.0  ;;  %v3460_v38 = vmax.f32 %v3436_v44, 0.0  ;;  %v3459_v13 = vmax.f32 %v3435_v15, 0.0  ;;  %v3350_v28 = vpop.f32.mrb[104].mxu0  ;;  %v3413_v8 = vpop.f32.mrb[88].mxu1 }
 0x368   : > { %vm3511_vm6 = vcmp.eq.s32.totalorder %v6387_v63, 1  ;;  %v4055_v1 = vpack.c.bf16 %v3521_v20, %v3520_v21  ;;  %v4056_v17 = vpack.c.bf16 %v3523_v58, %v3522_v26  ;;  %v3524_v62 = vsel %vm3509_vm2, %v3458_v9, 0.0  ;;  %v3352_v30 = vpop.f32.mrb[105].mxu0  ;;  %v3415_v5 = vpop.f32.mrb[89].mxu1  ;;  %v6495_v58 = vld [vmem:[#allocation5_spill] sm:$0xff] }
 0x369   : > { %v3461_v54 = vmax.f32 %v3437_v3, 0.0  ;;  %v3526_v31 = vsel %vm3509_vm2, %v3460_v38, 0.0  ;;  %v3525_v48 = vsel %vm3509_vm2, %v3459_v13, 0.0  ;;  %v3351_v23 = vadd.f32 %v3350_v28, %v6284_v45  ;;  %v3354_v19 = vpop.f32.mrb[106].mxu0  ;;  %v3417_v35 = vpop.f32.mrb[90].mxu1 }
 0x36a   : > { %v3414_v61 = vadd.f32 %v3413_v8, %v6333_v29  ;;  %3612 = vst [vmem:[%s6362_s24 + $0x20] sm:$0xff] %v4055_v1  ;;  %3613 = vst [vmem:[%s6362_s24 + $0x28] sm:$0xff] %v4056_v17  ;;  %v4057_v25 = vpack.c.bf16 %v3525_v48, %v3524_v62  ;;  %v3353_v56 = vadd.f32 %v3352_v30, %v6288_v51  ;;  %v3356_v22 = vpop.f32.mrb[107].mxu0  ;;  %v3419_v41 = vpop.f32.mrb[91].mxu1  ;;  %v6496_v8 = vld [vmem:[#allocation3_spill] sm:$0xff]  ;;  %v6498_v48 = vld [vmem:[#allocation4_spill] sm:$0xff] }
 0x36b   : > { %v3527_v46 = vsel %vm3509_vm2, %v3461_v54, 0.0  ;;  %v3416_v27 = vadd.f32 %v3415_v5, %v6340_v24  ;;  %v3438_v6 = vadd.f32 %v3351_v23, %v6303_v50  ;;  %v3355_v18 = vadd.f32 %v3354_v19, %v6284_v45  ;;  %v6497_v54 = vld [vmem:[#allocation6_spill] sm:$0xff] }
 0x36c   : > { %v4058_v42 = vpack.c.bf16 %v3527_v46, %v3526_v31  ;;  %v3440_v12 = vadd.f32 %v3414_v61, %v6354_v47  ;;  %3614 = vst [vmem:[%s6362_s24 + $0x30] sm:$0xff] %v4057_v25  ;;  %v3439_v43 = vadd.f32 %v3353_v56, %v6347_v16  ;;  %v3418_v57 = vadd.f32 %v3417_v35, %v6333_v29 }
 0x36d   : > { %v3441_v39 = vadd.f32 %v3416_v27, %v6326_v52  ;;  %v3357_v32 = vadd.f32 %v3356_v22, %v6288_v51  ;;  %v3462_v7 = vmax.f32 %v3438_v6, 0.0  ;;  %v3442_v4 = vadd.f32 %v3355_v18, %v6306_v33 }
 0x36e   : > { %3615 = vst [vmem:[%s6362_s24 + $0x38] sm:$0xff] %v4058_v42  ;;  %v3464_v49 = vmax.f32 %v3440_v12, 0.0  ;;  %v3420_v50 = vadd.f32 %v3419_v41, %v6340_v24  ;;  %v3463_v59 = vmax.f32 %v3439_v43, 0.0  ;;  %v3444_v45 = vadd.f32 %v3418_v57, %v6372_v36 }
 0x36f   : > { %v3465_v47 = vmax.f32 %v3441_v39, 0.0  ;;  %v3443_v16 = vadd.f32 %v3357_v32, %v6357_v37  ;;  %v3528_v52 = vsel %vm3510_vm4, %v3462_v7, 0.0  ;;  %v3466_v10 = vmax.f32 %v3442_v4, 0.0 }
 0x370   : > { %v3530_v51 = vsel %vm3510_vm4, %v3464_v49, 0.0  ;;  %v3445_v11 = vadd.f32 %v3420_v50, %v6338_v55  ;;  %v3529_v33 = vsel %vm3510_vm4, %v3463_v59, 0.0  ;;  %v3468_v40 = vmax.f32 %v3444_v45, 0.0 }
 0x371   : > { %v3531_v36 = vsel %vm3510_vm4, %v3465_v47, 0.0  ;;  %v3467_v37 = vmax.f32 %v3443_v16, 0.0  ;;  %v4059_v60 = vpack.c.bf16 %v3529_v33, %v3528_v52  ;;  %v3532_v15 = vsel %vm3511_vm6, %v3466_v10, 0.0 }
 0x372   : > { %v4060_v44 = vpack.c.bf16 %v3531_v36, %v3530_v51  ;;  %v3469_v21 = vmax.f32 %v3445_v11, 0.0  ;;  %v3534_v26 = vsel %vm3511_vm6, %v3468_v40, 0.0  ;;  %v1751_v38 = vadd.f32 %v6308_v2, %v6495_v58 }
 0x373   : > { %v3533_v55 = vsel %vm3511_vm6, %v3467_v37, 0.0  ;;  %3616 = vst [vmem:[%s6362_s24 + $0x40] sm:$0xff] %v4059_v60  ;;  %v1752_v1 = vadd.f32 %v6496_v8, %v6300_v34  ;;  %v1755_v63 = vadd.f32 %v6308_v2, %v6497_v54  ;;  %v1756_v23 = vadd.f32 %v6498_v48, %v6300_v34 }
 0x374   : > { %3617 = vst [vmem:[%s6362_s24 + $0x48] sm:$0xff] %v4060_v44  ;;  %v4061_v9 = vpack.c.bf16 %v3533_v55, %v3532_v15  ;;  %v3535_v0 = vsel %vm3511_vm6, %v3469_v21, 0.0 }
 0x375   : > { %v4062_v3 = vpack.c.bf16 %v3535_v0, %v3534_v26 }
 0x376   : > { %3618 = vst [vmem:[%s6362_s24 + $0x50] sm:$0xff] %v4061_v9 }
 0x377   : > { %3619 = vst [vmem:[%s6362_s24 + $0x58] sm:$0xff] %v4062_v3  ;;  %v3393_v20 = vpop.f32.mrb[108].mxu0 }
 0x378   : > { %v3394_v13 = vadd.f32 %v3393_v20, %v6333_v29  ;;  %v3395_v28 = vpop.f32.mrb[109].mxu0 }
 0x379   : > { %v3396_v17 = vadd.f32 %v3395_v28, %v6340_v24  ;;  %v3397_v62 = vpop.f32.mrb[110].mxu0 }
 0x37a   : > { %v3424_v30 = vadd.f32 %v3394_v13, %v1751_v38  ;;  %v3398_v5 = vadd.f32 %v3397_v62, %v6333_v29  ;;  %v3399_v31 = vpop.f32.mrb[111].mxu0 }
 0x37b   : > { %v3425_v61 = vadd.f32 %v3396_v17, %v1752_v1  ;;  %v3400_v19 = vadd.f32 %v3399_v31, %v6340_v24 }
 0x37c   : > { %v3448_v35 = vmax.f32 %v3424_v30, 0.0  ;;  %v3428_v25 = vadd.f32 %v3398_v5, %v1755_v63 }
 0x37d   : > { %v3449_v46 = vmax.f32 %v3425_v61, 0.0  ;;  %v3429_v56 = vadd.f32 %v3400_v19, %v1756_v23 }
 0x37e   : > { %v3514_v27 = vsel %vm3506_vm14, %v3448_v35, 0.0  ;;  %v3452_v2 = vmax.f32 %v3428_v25, 0.0 }
 0x37f   : > { %v3515_v29 = vsel %vm3506_vm14, %v3449_v46, 0.0  ;;  %v3453_v22 = vmax.f32 %v3429_v56, 0.0 }
 0x380   : > { %v4052_v41 = vpack.c.bf16 %v3515_v29, %v3514_v27  ;;  %v3518_v34 = vsel %vm3507_vm9, %v3452_v2, 0.0 }
 0x381   : > { %v3519_v42 = vsel %vm3507_vm9, %v3453_v22, 0.0 }
 0x382   : > { %3609 = vst [vmem:[%s6362_s24 + $0x8] sm:$0xff] %v4052_v41  ;;  %v4054_v24 = vpack.c.bf16 %v3519_v42, %v3518_v34 }
 0x384   : > { %3611 = vst [vmem:[%s6362_s24 + $0x18] sm:$0xff] %v4054_v24 }
 0x385 PF: > { %s21_s17 = sadd.s32 1, %s4876_s17  }
 0x386   : > { %p18_p4 = scmp.ge.s32.totalorder %s21_s17, 4  }
 0x388   :  { %20 = sbr.rel (!%p18_p4) target bundleno = 1 (0x1), region = 105 }

// kernel: forward_nhwc.3
= control target key start
LH: loop header
LB: loop body
LE: loop exit
PB: predicated region body
PF: predicated region fallthrough
CT: control target
= control target key end

     0   :  { %13 = vsyncpa [#allocation4], 0  ;;  %s10031_s27 = smov 0   ;;  %s12925_s0 = inlined_call_operand.vmem [shape: bf16[2,48,512], index: 0, kind: input, shape index: {}]   ;;  %s12926_s1 = inlined_call_operand.vmem [shape: f32[48,1], index: 1, kind: input, shape index: {}]   ;;  %s12927_s2 = inlined_call_operand.vmem [shape: bf16[3,512,128], index: 2, kind: input, shape index: {}]   ;;  %s12928_s3 = inlined_call_operand.vmem [shape: f32[3,1,128], index: 3, kind: input, shape index: {}]   ;;  %s12929_s4 = inlined_call_operand.vmem [shape: bf16[3,9,128,128], index: 4, kind: input, shape index: {}]   ;;  %s12930_s5 = inlined_call_operand.hbm [shape: f32[3,1,128], index: 5, kind: input, shape index: {}]   ;;  %s12931_s6 = inlined_call_operand.vmem [shape: bf16[3,128,512], index: 6, kind: input, shape index: {}]   ;;  %s12932_s7 = inlined_call_operand.vmem [shape: f32[3,1,512], index: 7, kind: input, shape index: {}]   ;;  %s12933_s8 = inlined_call_operand.vmem [shape: f32[2,48,512], index: 8, kind: output, shape index: {}]  }
   0x1 LB: > { %s10037_s28 = sadd.s32 4294967295, %s9978_s27   ;;  %p7082_p0 = scmp.ge.s32.totalorder %s9978_s27, 1  ;;  %s9978_s27 = sphi %s10031_s27, %s19_s27  }
   0x2   : > { %p223_p1 = scmp.lt.s32.totalorder %s9978_s27, 3  ;;  %s9980_s29 = smov [#allocation3]  }
   0x3   : > { %s247_s30 = sshll.u32 %s9980_s29, 4  ;;  %p12934_p3 = scmp.eq.s32.totalorder %s10037_s28, 0  ;;  %s248_s30 = int_to_ptr.vmem [resolvable:$true] %s247_s30 }
   0x4   : > { %p10041_p2 = pnand %p7082_p0, %p223_p1  ;;  %s9940_s13 = scalar_lea.hbm %s12930_s5, 48 }
   0x5   : > { %p9941_p6 = scmp.ne.s32.totalorder %s12930_s5, %s9940_s13  ;;  %p9947_p10 = scmp.lt.u32.totalorder %s9940_s13, %s12930_s5 }
   0x6   : > { %s13013_s9 = scalar_select %p10041_p2, 1, 0 }
   0x7   : > { %p9408_p4 = pneg %p10041_p2 }
   0x9   : > { %p10050_p5 = pnand %p12934_p3, %p9408_p4 }
   0xb   : > { %p9942_p7 = pneg %p10050_p5 }
   0xd   : > { %p9943_p8 = pnand %p9942_p7, %p9941_p6 }
   0xf   : > { %p9944_p9 = pneg %p9943_p8 }
  0x11   : > { %p9949_p11 = pnand %p9947_p10, %p9944_p9 }
  0x13   : > { %9952 = shalt.err (!%p9949_p11)
}
  0x14   : > { %s9953_s18 = scalar_lea.vmem %s248_s30, 48  ;;  %s9960_s19 = scalar_lea.vmem %s248_s30, 64 }
  0x15   : > { %p9954_p12 = scmp.ne.s32.totalorder %s248_s30, %s9953_s18  ;;  %p9961_p1 = scmp.lt.s32.totalorder %s248_s30, %s248_s30 }
  0x16   : > { %p9962_p4 = scmp.lt.s32.totalorder %s9960_s19, %s9953_s18 }
  0x17   : > { %p9956_p13 = pnand %p9954_p12, %p9942_p7 }
  0x18   : > { %p9963_p3 = por %p9962_p4, %p9961_p1 }
  0x19   : > { %p9957_p0 = pneg %p9956_p13 }
  0x1b   : > { %p9964_p2 = pnand %p9963_p3, %p9957_p0 }
  0x1d   : > { %9967 = shalt.err (!%p9964_p2)
}
  0x1e   : > { %s9981_s20 = smov 16   ;;  %s9982_s21 = smov 1  }
  0x1f   : > { %9411 = dma.hbm_to_vmem [thread:$0]  (!%p10050_p5), %s12930_s5, 48, %s248_s30, [#allocation4], %s9981_s20, %s9981_s20, %s9982_s21  }
  0x20   : > { %p13015_p6 = scmp.ne.s32.totalorder %s13013_s9, 0 }
  0x22   : > { %277 = sbr.rel (%p13015_p6) target bundleno = 2527 (0x9df), region = 52 }
  0x29   : > { %p13016_p7 = scmp.eq.s32.totalorder %s10037_s28, 0 }
  0x2b   : > { %9973 = dma.done.wait (%p13016_p7), [#allocation4], 48   ;;  %p13017_p8 = pmov %p13016_p7 }
  0x2c   : > { %v9983_v0 = vmov 0   ;;  %v9430_v1 = vld [vmem:[%s12927_s2 + $0x40] sm:$0xff]   ;;  %v9434_v5 = vld [vmem:[%s12927_s2 + $0x48] sm:$0xff]   ;;  %v9438_v9 = vld [vmem:[%s12927_s2 + $0x50] sm:$0xff]   ;;  %p311_p2 = scmp.lt.s32.totalorder %s10037_s28, 1  ;;  %v12961_v41 = vmov 0.0  }
  0x2d   : > { %9975 = vsyncadd (%p13017_p8), [#allocation4], 4294967248  ;;  %9428 = vset.pattern.permute.xlu0 %v9983_v0  ;;  %322 = vst [vmem:[#allocation2] sm:$0xff] %v9983_v0  ;;  %9429 = vset.pattern.permute.xlu1 %v9983_v0  ;;  %v9431_v2 = vld [vmem:[%s12927_s2 + $0xc0] sm:$0xff]   ;;  %v9435_v6 = vld [vmem:[%s12927_s2 + $0xc8] sm:$0xff]   ;;  %vm9985_vm6 = vmmov 0  }
  0x2e   : > { %323 = vst [vmem:[#allocation2 + $0x20] sm:$0xff] %v9983_v0  ;;  %8129 = vmatprep.subr.bf16.mxu0 %v9430_v1  ;;  %v9432_v3 = vld [vmem:[%s12927_s2] sm:$0xff]   ;;  %8163 = vmatprep.subr.bf16.mxu1 %v9431_v2  ;;  %v9436_v7 = vld [vmem:[%s12927_s2 + $0x8] sm:$0xff]   ;;  %v9439_v10 = vld [vmem:[%s12927_s2 + $0xd0] sm:$0xff]   ;;  %s13121_s28 = smov (!%p311_p2, %s10037_s28), 1  ;;  %vm899_vm8 = vcmask 1043456  }
  0x2f   : > { %v9433_v4 = vld [vmem:[%s12927_s2 + $0x80] sm:$0xff]   ;;  %8130 = vmatpush3.bf16.msra.mxu0 %v9432_v3  ;;  %v9437_v8 = vld [vmem:[%s12927_s2 + $0x88] sm:$0xff]   ;;  %v9440_v11 = vld [vmem:[%s12927_s2 + $0x10] sm:$0xff]   ;;  %s9402_s16 = smul.u32 96, %s13121_s28  ;;  %vm1015_vm11 = vsmask.f32 4352 }
  0x30   : > { %8164 = vmatpush3.bf16.msra.mxu1 %v9433_v4  ;;  %8131 = vmatprep.subr.bf16.mxu0 %v9434_v5  ;;  %v9441_v12 = vld [vmem:[%s12927_s2 + $0x90] sm:$0xff]   ;;  %v9442_v13 = vld [vmem:[%s12927_s2 + $0x58] sm:$0xff]   ;;  %v9446_v17 = vld [vmem:[%s12927_s2 + $0x60] sm:$0xff]   ;;  %vm1177_vm15 = vsmask.f32 3328  ;;  %s9403_s22 = smul.u32 192, %s13121_s28 }
  0x31   : > { %8165 = vmatprep.subr.bf16.mxu1 %v9435_v6  ;;  %v9443_v14 = vld [vmem:[%s12927_s2 + $0xd8] sm:$0xff]   ;;  %v9447_v18 = vld [vmem:[%s12927_s2 + $0xe0] sm:$0xff]   ;;  %v9450_v21 = vld [vmem:[%s12927_s2 + $0x68] sm:$0xff]   ;;  %s10178_s29 = scalar_lea.vmem %s12925_s0, %s9402_s16 }
  0x32   : > { %v9444_v15 = vld [vmem:[%s12927_s2 + $0x18] sm:$0xff]   ;;  %v9448_v19 = vld [vmem:[%s12927_s2 + $0x20] sm:$0xff]   ;;  %v9451_v22 = vld [vmem:[%s12927_s2 + $0xe8] sm:$0xff]   ;;  %s12834_s24 = scalar_lea.vmem %s12933_s8, %s9403_s22 }
  0x33   : > { %8132 = vmatpush3.bf16.msra.mxu0 %v9436_v7  ;;  %v9445_v16 = vld [vmem:[%s12927_s2 + $0x98] sm:$0xff]   ;;  %v9449_v20 = vld [vmem:[%s12927_s2 + $0xa0] sm:$0xff]   ;;  %v9452_v23 = vld [vmem:[%s12927_s2 + $0x28] sm:$0xff]  }
  0x34   : > { %8166 = vmatpush3.bf16.msra.mxu1 %v9437_v8  ;;  %8133 = vmatprep.subr.bf16.mxu0 %v9438_v9  ;;  %v9453_v24 = vld [vmem:[%s12927_s2 + $0xa8] sm:$0xff]   ;;  %v9454_v25 = vld [vmem:[%s12927_s2 + $0x70] sm:$0xff]   ;;  %v9458_v29 = vld [vmem:[%s12927_s2 + $0x78] sm:$0xff]  }
  0x35   : > { %8167 = vmatprep.subr.bf16.mxu1 %v9439_v10  ;;  %v9455_v26 = vld [vmem:[%s12927_s2 + $0xf0] sm:$0xff]   ;;  %v9459_v30 = vld [vmem:[%s12927_s2 + $0xf8] sm:$0xff]   ;;  %v366_v33 = vld [vmem:[%s10178_s29] sm:$0xff] }
  0x36   : > { %v9456_v27 = vld [vmem:[%s12927_s2 + $0x30] sm:$0xff]   ;;  %v9460_v31 = vld [vmem:[%s12927_s2 + $0x38] sm:$0xff]   ;;  %v367_v35 = vld [vmem:[%s10178_s29 + $0x8] sm:$0xff] }
  0x37   : > { %8134 = vmatpush3.bf16.msra.mxu0 %v9440_v11  ;;  %v9457_v28 = vld [vmem:[%s12927_s2 + $0xb0] sm:$0xff]   ;;  %v9461_v32 = vld [vmem:[%s12927_s2 + $0xb8] sm:$0xff]   ;;  %v370_v39 = vld [vmem:[%s10178_s29 + $0x20] sm:$0xff] }
  0x38   : > { %8168 = vmatpush3.bf16.msra.mxu1 %v9441_v12  ;;  %8135 = vmatprep.subr.bf16.mxu0 %v9442_v13  ;;  %v368_v34 = vld [vmem:[%s10178_s29 + $0x10] sm:$0xff]  ;;  %v369_v37 = vld [vmem:[%s10178_s29 + $0x18] sm:$0xff]  ;;  %v371_v45 = vld [vmem:[%s10178_s29 + $0x28] sm:$0xff] }
  0x39   : > { %8169 = vmatprep.subr.bf16.mxu1 %v9443_v14  ;;  %v7091_v36 = vcombine.high %v366_v33, %v368_v34  ;;  %v7090_v38 = vcombine.low %v366_v33, %v368_v34  ;;  %v372_v40 = vld [vmem:[%s10178_s29 + $0x30] sm:$0xff]  ;;  %v7093_v42 = vcombine.high %v367_v35, %v369_v37  ;;  %v7092_v43 = vcombine.low %v367_v35, %v369_v37  ;;  %v373_v46 = vld [vmem:[%s10178_s29 + $0x38] sm:$0xff]  ;;  %v374_v48 = vld [vmem:[%s10178_s29 + $0x40] sm:$0xff] }
  0x3a   : > { %v7095_v44 = vcombine.high %v370_v39, %v372_v40  ;;  %v7097_v47 = vcombine.high %v371_v45, %v373_v46  ;;  %v376_v49 = vld [vmem:[%s10178_s29 + $0x50] sm:$0xff]  ;;  %v324_v50 = vld [vmem:[%s12926_s1] sm:$0xff]  ;;  %v325_v51 = vld [vmem:[%s12926_s1 + $0x8] sm:$0xff]  ;;  %v7094_v61 = vcombine.low %v370_v39, %v372_v40  ;;  %v7096_v1 = vcombine.low %v371_v45, %v373_v46 }
  0x3b   : > { %8136 = vmatpush3.bf16.msra.mxu0 %v9444_v15  ;;  %757 = vmatprep.mubr.bf16.mxu0 %v7091_v36  ;;  %v328_v52 = vld [vmem:[%s12926_s1 + $0x20] sm:$0xff]  ;;  %vm330_vm0 = vcmp.gt.f32.partialorder %v324_v50, 0.0  ;;  %vm331_vm1 = vcmp.gt.f32.partialorder %v325_v51, 0.0  ;;  %v326_v53 = vld [vmem:[%s12926_s1 + $0x10] sm:$0xff]  ;;  %v327_v54 = vld [vmem:[%s12926_s1 + $0x18] sm:$0xff]  ;;  %v7099_v2 = vcombine.high %v374_v48, %v376_v49  ;;  %v7098_v8 = vcombine.low %v374_v48, %v376_v49 }
  0x3c   : > { %8170 = vmatpush3.bf16.msra.mxu1 %v9445_v16  ;;  %8137 = vmatprep.subr.bf16.mxu0 %v9446_v17  ;;  %vm334_vm2 = vcmp.gt.f32.partialorder %v328_v52, 0.0  ;;  %v329_v55 = vld [vmem:[%s12926_s1 + $0x28] sm:$0xff]  ;;  %v377_v57 = vld [vmem:[%s10178_s29 + $0x58] sm:$0xff]  ;;  %v336_v58 = vsel %vm330_vm0, 1, %v9983_v0  ;;  %vm332_vm3 = vcmp.gt.f32.partialorder %v326_v53, 0.0  ;;  %vm333_vm4 = vcmp.gt.f32.partialorder %v327_v54, 0.0 }
  0x3d   : > { %8171 = vmatprep.subr.bf16.mxu1 %v9447_v18  ;;  %814 = vmatprep.mubr.bf16.mxu1 %v7093_v42  ;;  %v375_v56 = vld [vmem:[%s10178_s29 + $0x48] sm:$0xff]  ;;  %v338_v59 = vsel %vm332_vm3, 1, %v9983_v0  ;;  %vm335_vm5 = vcmp.gt.f32.partialorder %v329_v55, 0.0  ;;  %v9474_v60 = vld [vmem:[%s12929_s4 + $0x40] sm:$0xff]   ;;  %v337_v62 = vsel %vm331_vm1, 1, %v9983_v0  ;;  %v340_v63 = vsel %vm334_vm2, 1, %v9983_v0 }
  0x3e   : > { %343 = vperm.xlu0 %9428, %v336_v58   ;;  %349 = vperm.xlu1 %9429, %v338_v59   ;;  %v339_v3 = vsel %vm333_vm4, 1, %v9983_v0  ;;  %v9475_v4 = vld [vmem:[%s12929_s4 + $0x48] sm:$0xff]   ;;  %v7101_v5 = vcombine.high %v375_v56, %v377_v57  ;;  %v341_v6 = vsel %vm335_vm5, 1, %v9983_v0  ;;  %v9476_v7 = vld [vmem:[%s12929_s4] sm:$0xff]   ;;  %v7100_v0 = vcombine.low %v375_v56, %v377_v57  ;;  %v9477_v9 = vld [vmem:[%s12929_s4 + $0x50] sm:$0xff]  }
  0x3f   : > { %8138 = vmatpush3.bf16.msra.mxu0 %v9448_v19  ;;  %v9478_v10 = vld [vmem:[%s12929_s4 + $0x8] sm:$0xff]   ;;  %v9479_v11 = vld [vmem:[%s12929_s4 + $0x58] sm:$0xff]   ;;  %v9480_v12 = vld [vmem:[%s12929_s4 + $0x10] sm:$0xff]   ;;  %vm1336_vm0 = vsmask.f32 256 }
  0x40   : > { %8172 = vmatpush3.bf16.msra.mxu1 %v9449_v20  ;;  %8139 = vmatprep.subr.bf16.mxu0 %v9450_v21  ;;  %v9481_v13 = vld [vmem:[%s12929_s4 + $0x60] sm:$0xff]   ;;  %v9482_v14 = vld [vmem:[%s12929_s4 + $0x18] sm:$0xff]   ;;  %v9483_v15 = vld [vmem:[%s12929_s4 + $0x68] sm:$0xff]   ;;  %vm1618_vm2 = vsmask.f32 7424 }
  0x41   : > { %8173 = vmatprep.subr.bf16.mxu1 %v9451_v22  ;;  %v9484_v16 = vld [vmem:[%s12929_s4 + $0x20] sm:$0xff]   ;;  %v9485_v17 = vld [vmem:[%s12929_s4 + $0x70] sm:$0xff]   ;;  %v9486_v18 = vld [vmem:[%s12929_s4 + $0x28] sm:$0xff]  }
  0x42   : > { %346 = vperm.xlu0 %9428, %v337_v62   ;;  %352 = vperm.xlu1 %9429, %v339_v3   ;;  %v9487_v19 = vld [vmem:[%s12929_s4 + $0x78] sm:$0xff]   ;;  %v9488_v20 = vld [vmem:[%s12929_s4 + $0x30] sm:$0xff]   ;;  %v10294_v22 = vld [vmem:[#allocation2] sm:$0xf0] }
  0x43   : > { %8140 = vmatpush3.bf16.msra.mxu0 %v9452_v23  ;;  %v9489_v21 = vld [vmem:[%s12929_s4 + $0x38] sm:$0xff]   ;;  %v857_v23 = vld [vmem:[#allocation2] sm:$0xf8] }
  0x44   : > { %8174 = vmatpush3.bf16.msra.mxu1 %v9453_v24  ;;  %8141 = vmatprep.subr.bf16.mxu0 %v9454_v25  ;;  %v900_v24 = vrot.slane %v10294_v22, 4  ;;  %v1017_v25 = vshrl.u32 %v857_v23, 16 }
  0x45   : > { %8175 = vmatprep.subr.bf16.mxu1 %v9455_v26  ;;  %v1020_v26 = vshll.u32 %v857_v23, 16 }
  0x46   : > { %355 = vperm.xlu0 %9428, %v340_v63   ;;  %358 = vperm.xlu1 %9429, %v341_v6   ;;  %v10304_v35 = vrot.slane %v1017_v25, 3 }
  0x47   : > { %8142 = vmatpush3.bf16.msra.mxu0 %v9456_v27  ;;  %v10300_v27 = vld [vmem:[%s12928_s3] ss:$0 sm:$0xff]  ;;  %v10311_v46 = vrot.slane %v1020_v26, 4  ;;  %v9491_v26 = vld [vmem:[%s12929_s4 + $0x88] sm:$0xff]  }
  0x48   : > { %8176 = vmatpush3.bf16.msra.mxu1 %v9457_v28  ;;  %8143 = vmatprep.subr.bf16.mxu0 %v9458_v29 }
  0x49   : > { %8177 = vmatprep.subr.bf16.mxu1 %v9459_v30 }
  0x4b   : > { %8144 = vmatpush3.bf16.msra.mxu0 %v9460_v31 }
  0x4c   : > { %8178 = vmatpush3.bf16.msra.mxu1 %v9461_v32  ;;  %8630 = vmatprep.subr.bf16.mxu0 %v12961_v41 }
  0x4d   : > { %8658 = vmatprep.subr.bf16.mxu1 %v12961_v41 }
  0x4e   : > { %758 = vmatmul.mubr.bf16.vlgmr.msra.gmra.mrb[0].mxu0 %v7090_v38 }
  0x4f   : > { %815 = vmatmul.mubr.bf16.vlgmr.msra.gmra.mrb[0].mxu1 %v7092_v43  ;;  %765 = vmatprep.mubr.bf16.mxu0 %v7095_v44 }
  0x50   : > { %822 = vmatprep.mubr.bf16.mxu1 %v7097_v47  ;;  %8631 = vmatpush3.bf16.msra.mxu0 %v9474_v60 }
  0x51   : > { %8632 = vmatprep.subr.bf16.mxu0 %v12961_v41  ;;  %8659 = vmatpush3.bf16.msra.mxu1 %v9476_v7 }
  0x52   : > { %8660 = vmatprep.subr.bf16.mxu1 %v12961_v41 }
  0x54   : > { %8633 = vmatpush3.bf16.msra.mxu0 %v9475_v4 }
  0x55   : > { %8634 = vmatprep.subr.bf16.mxu0 %v12961_v41  ;;  %8661 = vmatpush3.bf16.msra.mxu1 %v9478_v10 }
  0x56   : > { %766 = vmatmul.mubr.bf16.gmra.mrb[4].mxu0 %v7094_v61  ;;  %8662 = vmatprep.subr.bf16.mxu1 %v12961_v41 }
  0x57   : > { %823 = vmatmul.mubr.bf16.gmra.mrb[4].mxu1 %v7096_v1  ;;  %773 = vmatprep.mubr.bf16.mxu0 %v7099_v2 }
  0x58   : > { %830 = vmatprep.mubr.bf16.mxu1 %v7101_v5  ;;  %8635 = vmatpush3.bf16.msra.mxu0 %v9477_v9  ;;  %v9490_v5 = vld [vmem:[%s12929_s4 + $0x80] sm:$0xff]  }
  0x59   : > { %8636 = vmatprep.subr.bf16.mxu0 %v12961_v41  ;;  %8663 = vmatpush3.bf16.msra.mxu1 %v9480_v12 }
  0x5a   : > { %8664 = vmatprep.subr.bf16.mxu1 %v12961_v41 }
  0x5c   : > { %8637 = vmatpush3.bf16.msra.mxu0 %v9479_v11 }
  0x5d   : > { %8638 = vmatprep.subr.bf16.mxu0 %v12961_v41  ;;  %8665 = vmatpush3.bf16.msra.mxu1 %v9482_v14  ;;  %v1023_v14 = vor.u32 %v10311_v46, %v10304_v35  ;;  %v9493_v46 = vld [vmem:[%s12929_s4 + $0x90] sm:$0xff]  }
  0x5e   : > { %774 = vmatmul.mubr.bf16.gmra.mrb[8].mxu0 %v7098_v8  ;;  %8666 = vmatprep.subr.bf16.mxu1 %v12961_v41 }
  0x5f   : > { %831 = vmatmul.mubr.bf16.gmra.mrb[8].mxu1 %v7100_v0  ;;  %8646 = vmatprep.mubr.msk.bf16.mxu0 %vm9985_vm6, %v12961_v41 }
  0x60   : > { %8639 = vmatpush3.bf16.msra.mxu0 %v9481_v13  ;;  %8674 = vmatprep.mubr.msk.bf16.mxu1 %vm9985_vm6, %v12961_v41 }
  0x61   : > { %8640 = vmatprep.subr.bf16.mxu0 %v12961_v41  ;;  %8667 = vmatpush3.bf16.msra.mxu1 %v9484_v16 }
  0x62   : > { %8668 = vmatprep.subr.bf16.mxu1 %v12961_v41 }
  0x64   : > { %8641 = vmatpush3.bf16.msra.mxu0 %v9483_v15 }
  0x65   : > { %8642 = vmatprep.subr.bf16.mxu0 %v12961_v41  ;;  %8669 = vmatpush3.bf16.msra.mxu1 %v9486_v18 }
  0x66   : > { %8670 = vmatprep.subr.bf16.mxu1 %v12961_v41 }
  0x68   : > { %8643 = vmatpush3.bf16.msra.mxu0 %v9485_v17 }
  0x69   : > { %8644 = vmatprep.subr.bf16.mxu0 %v12961_v41  ;;  %8671 = vmatpush3.bf16.msra.mxu1 %v9488_v20 }
  0x6a   : > { %8672 = vmatprep.subr.bf16.mxu1 %v12961_v41 }
  0x6c   : > { %8645 = vmatpush3.bf16.msra.mxu0 %v9487_v19 }
  0x6d   : > { %8686 = vmatprep.subr.bf16.mxu0 %v12961_v41  ;;  %8673 = vmatpush3.bf16.msra.mxu1 %v9489_v21 }
  0x6e   : > { %8714 = vmatprep.subr.bf16.mxu1 %v12961_v41 }
  0xbd   : > { %v10302_v28 = vpop.permute.xlu0 %343  ;;  %v10313_v47 = vpop.permute.xlu1 %349 }
  0xbe   : > { %13018 = vst [vmem:[#allocation6_spill] sm:$0xff] %v10302_v28  ;;  %vm360_vm7 = vcmp.eq.s32.totalorder %v10302_v28, 1  ;;  %13019 = vst [vmem:[#allocation7_spill] sm:$0xff] %v10313_v47  ;;  %vm362_vm9 = vcmp.eq.s32.totalorder %v10313_v47, 1 }
  0xc1   : > { %v10316_v49 = vpop.permute.xlu0 %346  ;;  %v10351_v13 = vpop.permute.xlu1 %352 }
  0xc2   : > { %13020 = vst [vmem:[#allocation8_spill] sm:$0xff] %v10316_v49  ;;  %vm361_vm10 = vcmp.eq.s32.totalorder %v10316_v49, 1  ;;  %13021 = vst [vmem:[#allocation9_spill] sm:$0xff] %v10351_v13  ;;  %vm363_vm12 = vcmp.eq.s32.totalorder %v10351_v13, 1  ;;  %v3496_v13 = vld [vmem:[#allocation2] sm:$0x80] }
  0xc3   : > { %vm10614_vm1 = vmpackc.low %vm361_vm10, %vm360_vm7 }
  0xc4   : > { %vm10651_vm3 = vmpackc.low %vm363_vm12, %vm362_vm9 }
 0x121   : > { %v8145_v29 = vpop.f32.mrb[0].mxu0 }
 0x122   : > { %v8179_v30 = vpop.f32.mrb[0].mxu1  ;;  %v8146_v31 = vpop.f32.mrb[1].mxu0 }
 0x123   : > { %v8147_v32 = vadd.f32 %v8146_v31, %v8145_v29  ;;  %v8180_v33 = vpop.f32.mrb[1].mxu1  ;;  %v8148_v34 = vpop.f32.mrb[2].mxu0  ;;  %v9492_v29 = vld [vmem:[%s12929_s4 + $0xc0] sm:$0xff]  }
 0x124   : > { %v8181_v36 = vadd.f32 %v8180_v33, %v8179_v30  ;;  %v8182_v37 = vpop.f32.mrb[2].mxu1  ;;  %v8149_v38 = vpop.f32.mrb[3].mxu0 }
 0x125   : > { %v760_v39 = vadd.f32 %v8147_v32, %v10300_v27  ;;  %v8150_v40 = vadd.f32 %v8149_v38, %v8148_v34  ;;  %v8183_v42 = vpop.f32.mrb[3].mxu1 }
 0x126   : > { %v8184_v43 = vadd.f32 %v8183_v42, %v8182_v37 }
 0x127   : > { %v10308_v44 = vadd.f32 %v8181_v36, %v760_v39  ;;  %v763_v45 = vadd.f32 %v8150_v40, %v10300_v27 }
 0x129   : > { %v839_v48 = vmax.f32 %v10308_v44, 0.0  ;;  %v10318_v50 = vadd.f32 %v8184_v43, %v763_v45  ;;  %v8151_v51 = vpop.f32.mrb[4].mxu0 }
 0x12a   : > { %v8152_v52 = vpop.f32.mrb[5].mxu0  ;;  %v8185_v53 = vpop.f32.mrb[4].mxu1 }
 0x12b   : > { %v840_v54 = vmax.f32 %v10318_v50, 0.0  ;;  %v8153_v55 = vadd.f32 %v8152_v52, %v8151_v51  ;;  %v8154_v56 = vpop.f32.mrb[6].mxu0  ;;  %v8186_v57 = vpop.f32.mrb[5].mxu1  ;;  %v845_v61 = vsel %vm360_vm7, %v839_v48, 0.0  ;;  %v9494_v51 = vld [vmem:[%s12929_s4 + $0xc8] sm:$0xff]   ;;  %v1179_v52 = vshrl.u32 %v10294_v22, 16 }
 0x12c   : > { %v8155_v58 = vpop.f32.mrb[7].mxu0  ;;  %v8187_v59 = vadd.f32 %v8186_v57, %v8185_v53  ;;  %v8188_v60 = vpop.f32.mrb[6].mxu1  ;;  %v9526_v50 = vld [vmem:[%s12929_s4 + $0x1c8] sm:$0xff]  }
 0x12d   : > { %v846_v62 = vsel %vm361_vm10, %v840_v54, 0.0  ;;  %v768_v63 = vadd.f32 %v8153_v55, %v10300_v27  ;;  %v8156_v1 = vadd.f32 %v8155_v58, %v8154_v56  ;;  %v8189_v2 = vpop.f32.mrb[7].mxu1  ;;  %v10401_v57 = vpop.permute.xlu0 %355 }
 0x12e   : > { %v10332_v3 = vpack.c.bf16 %v846_v62, %v845_v61  ;;  %v8190_v4 = vadd.f32 %v8189_v2, %v8188_v60  ;;  %13022 = vst [vmem:[#allocation10_spill] sm:$0xff] %v10401_v57  ;;  %v10406_v60 = vpop.permute.xlu1 %358  ;;  %v9495_v2 = vld [vmem:[%s12929_s4 + $0x98] sm:$0xff]   ;;  %vm364_vm13 = vcmp.eq.s32.totalorder %v10401_v57, 1 }
 0x12f   : > { %v771_v6 = vadd.f32 %v8156_v1, %v10300_v27  ;;  %v10338_v7 = vadd.f32 %v8187_v59, %v768_v63  ;;  %13023 = vst [vmem:[#allocation11_spill] sm:$0xff] %v10406_v60  ;;  %vm365_vm14 = vcmp.eq.s32.totalorder %v10406_v60, 1  ;;  %v9653_v60 = vld [vmem:[%s12929_s4 + $0x2f0] sm:$0xff]  }
 0x130   : > { %854 = vst [vmem:[#allocation2 + $0x8] sm:$0xff] %v10332_v3  ;;  %v901_v8 = vrot.slane %v10332_v3, 4  ;;  %v10343_v0 = vshrl.u32 %v10332_v3, 16  ;;  %v10346_v9 = vshll.u32 %v10332_v3, 16  ;;  %v10420_v3 = vrot.slane %v1179_v52, 4  ;;  %v9503_v52 = vld [vmem:[%s12929_s4 + $0xb8] sm:$0xff]   ;;  %vm10688_vm4 = vmpackc.low %vm365_vm14, %vm364_vm13 }
 0x131   : > { %v841_v10 = vmax.f32 %v10338_v7, 0.0  ;;  %v10349_v11 = vadd.f32 %v8190_v4, %v771_v6  ;;  %v8157_v12 = vpop.f32.mrb[8].mxu0  ;;  %v1182_v4 = vshll.u32 %v10294_v22, 16  ;;  %v9496_v6 = vld [vmem:[%s12929_s4 + $0xd0] sm:$0xff]  }
 0x132   : > { %v8158_v15 = vpop.f32.mrb[9].mxu0  ;;  %v8191_v16 = vpop.f32.mrb[8].mxu1  ;;  %v902_v17 = vsel %vm899_vm8, %v900_v24, %v901_v8  ;;  %v1027_v18 = vrot.slane %v10343_v0, 3  ;;  %v1030_v19 = vrot.slane %v10346_v9, 4  ;;  %v1624_v34 = vrot.slane %v10346_v9, 1 }
 0x133   : > { %v842_v20 = vmax.f32 %v10349_v11, 0.0  ;;  %v8159_v21 = vadd.f32 %v8158_v15, %v8157_v12  ;;  %v8160_v23 = vpop.f32.mrb[10].mxu0  ;;  %v8192_v25 = vpop.f32.mrb[9].mxu1  ;;  %8647 = vmatmul.mubr.bf16.vlgmr.msra.gmra.mrb[12].mxu0 %v902_v17  ;;  %v847_v24 = vsel %vm362_vm9, %v841_v10, 0.0  ;;  %v9497_v15 = vld [vmem:[%s12929_s4 + $0xa0] sm:$0xff]   ;;  %v1184_v17 = vrot.slane %v1182_v4, 5 }
 0x134   : > { %v8161_v30 = vpop.f32.mrb[11].mxu0  ;;  %v8193_v31 = vadd.f32 %v8192_v25, %v8191_v16  ;;  %v8194_v32 = vpop.f32.mrb[10].mxu1  ;;  %8687 = vmatpush3.bf16.msra.mxu0 %v9490_v5  ;;  %v1031_v33 = vor.u32 %v1030_v19, %v1027_v18  ;;  %8650 = vmatprep.mubr.msk.bf16.mxu0 %vm9985_vm6, %v12961_v41  ;;  %v10393_v53 = vor.u32 %v1624_v34, %v10343_v0  ;;  %v9498_v16 = vld [vmem:[%s12929_s4 + $0xd8] sm:$0xff]   ;;  %v1317_v25 = vld [vmem:[#allocation2] sm:$0x80] }
 0x135   : > { %v776_v35 = vadd.f32 %v8159_v21, %v10300_v27  ;;  %v848_v36 = vsel %vm363_vm12, %v842_v20, 0.0  ;;  %v8162_v37 = vadd.f32 %v8161_v30, %v8160_v23  ;;  %v8195_v38 = vpop.f32.mrb[11].mxu1  ;;  %8688 = vmatprep.subr.bf16.mxu0 %v12961_v41  ;;  %v9499_v21 = vld [vmem:[%s12929_s4 + $0xa8] sm:$0xff]   ;;  %v9500_v23 = vld [vmem:[%s12929_s4 + $0xe0] sm:$0xff]  }
 0x136   : > { %v852_v39 = vpack.c.bf16 %v848_v36, %v847_v24  ;;  %v8196_v40 = vadd.f32 %v8195_v38, %v8194_v32  ;;  %v1032_v42 = vsel %vm1015_vm11, %v1023_v14, %v1031_v33  ;;  %v9501_v32 = vld [vmem:[%s12929_s4 + $0xb0] sm:$0xff]   ;;  %v9529_v11 = vld [vmem:[%s12929_s4 + $0x1a0] sm:$0xff]  }
 0x137   : > { %v779_v43 = vadd.f32 %v8162_v37, %v10300_v27  ;;  %v10383_v45 = vadd.f32 %v8193_v31, %v776_v35  ;;  %8675 = vmatmul.mubr.bf16.vlgmr.msra.gmra.mrb[12].mxu1 %v1032_v42 }
 0x138   : > { %8689 = vmatpush3.bf16.msra.mxu0 %v9491_v26  ;;  %8715 = vmatpush3.bf16.msra.mxu1 %v9492_v29  ;;  %v10395_v55 = vrot.slane %v852_v39, 4  ;;  %v10397_v27 = vshrl.u32 %v852_v39, 16  ;;  %v10399_v56 = vshll.u32 %v852_v39, 16  ;;  %v9502_v39 = vld [vmem:[%s12929_s4 + $0xe8] sm:$0xff]  }
 0x139   : > { %v843_v58 = vmax.f32 %v10383_v45, 0.0  ;;  %v10404_v59 = vadd.f32 %v8196_v40, %v779_v43  ;;  %8690 = vmatprep.subr.bf16.mxu0 %v12961_v41  ;;  %8716 = vmatprep.subr.bf16.mxu1 %v12961_v41  ;;  %v1186_v40 = vrot.slane %v10343_v0, 4 }
 0x13a   : > { %v904_v61 = vsel %vm899_vm8, %v901_v8, %v10395_v55  ;;  %8678 = vmatprep.mubr.msk.bf16.mxu1 %vm9985_vm6, %v12961_v41  ;;  %v1036_v62 = vrot.slane %v10397_v27, 3  ;;  %v1039_v63 = vrot.slane %v10399_v56, 4  ;;  %v1190_v26 = vrot.slane %v10397_v27, 4 }
 0x13b   : > { %v844_v1 = vmax.f32 %v10404_v59, 0.0  ;;  %8651 = vmatmul.mubr.bf16.gmra.mrb[16].mxu0 %v904_v61  ;;  %v849_v8 = vsel %vm364_vm13, %v843_v58, 0.0  ;;  %v1191_v29 = vrot.slane %v10399_v56, 5  ;;  %v9504_v61 = vld [vmem:[%s12929_s4 + $0xf0] sm:$0xff]  }
 0x13c   : > { %8691 = vmatpush3.bf16.msra.mxu0 %v9493_v46  ;;  %8717 = vmatpush3.bf16.msra.mxu1 %v9494_v51  ;;  %v10425_v5 = vor.u32 %v1039_v63, %v1036_v62  ;;  %v1187_v62 = vrot.slane %v10346_v9, 5  ;;  %v1341_v63 = vrot.slane %v10343_v0, 7  ;;  %v9505_v0 = vld [vmem:[%s12929_s4 + $0xf8] sm:$0xff]  }
 0x13d   : > { %v850_v22 = vsel %vm365_vm14, %v844_v1, 0.0  ;;  %8692 = vmatprep.subr.bf16.mxu0 %v12961_v41  ;;  %8718 = vmatprep.subr.bf16.mxu1 %v12961_v41  ;;  %v10478_v34 = vor.u32 %v1191_v29, %v1190_v26  ;;  %v9509_v29 = vld [vmem:[%s12929_s4 + $0x110] sm:$0xff]  }
 0x13e   : > { %v10440_v12 = vpack.c.bf16 %v850_v22, %v849_v8  ;;  %v1041_v14 = vsel %vm1015_vm11, %v1031_v33, %v10425_v5  ;;  %8654 = vmatprep.mubr.msk.bf16.mxu0 %vm9985_vm6, %v12961_v41  ;;  %v1338_v33 = vshrl.u32 %v1317_v25, 16  ;;  %v1188_v8 = vor.u32 %v1187_v62, %v1186_v40  ;;  %v9506_v22 = vld [vmem:[%s12929_s4 + $0x100] sm:$0xff]  }
 0x13f   : > { %8679 = vmatmul.mubr.bf16.gmra.mrb[16].mxu1 %v1041_v14  ;;  %v9516_v62 = vld [vmem:[%s12929_s4 + $0x160] sm:$0xff]  }
 0x140   : > { %856 = vst [vmem:[#allocation2 + $0x18] sm:$0xff] %v10440_v12  ;;  %8693 = vmatpush3.bf16.msra.mxu0 %v9495_v2  ;;  %8719 = vmatpush3.bf16.msra.mxu1 %v9496_v6  ;;  %v10454_v18 = vshrl.u32 %v10440_v12, 16  ;;  %v10459_v19 = vshll.u32 %v10440_v12, 16  ;;  %v1185_v6 = vor.u32 %v1184_v17, %v10420_v3  ;;  %v1340_v3 = vrot.slane %v1338_v33, 7  ;;  %v9507_v17 = vld [vmem:[%s12929_s4 + $0x108] sm:$0xff]  }
 0x141   : > { %8694 = vmatprep.subr.bf16.mxu0 %v12961_v41  ;;  %8720 = vmatprep.subr.bf16.mxu1 %v12961_v41 }
 0x142   : > { %8682 = vmatprep.mubr.msk.bf16.mxu1 %vm9985_vm6, %v12961_v41  ;;  %v2092_v24 = vrot.slane %v10454_v18, 4  ;;  %v2093_v30 = vrot.slane %v10459_v19, 5  ;;  %v1350_v40 = vrot.slane %v10454_v18, 7 }
 0x144   : > { %8695 = vmatpush3.bf16.msra.mxu0 %v9497_v15  ;;  %8721 = vmatpush3.bf16.msra.mxu1 %v9498_v16  ;;  %v10480_v35 = vor.u32 %v2093_v30, %v2092_v24  ;;  %v1189_v15 = vsel %vm1177_vm15, %v1185_v6, %v1188_v8  ;;  %v1342_v16 = vor.u32 %v1341_v63, %v10346_v9  ;;  %v1344_v9 = vrot.slane %v10397_v27, 7  ;;  %v9510_v24 = vld [vmem:[%s12929_s4 + $0x148] sm:$0xff]   ;;  %v9519_v6 = vld [vmem:[%s12929_s4 + $0x138] sm:$0xff]  }
 0x145   : > { %8696 = vmatprep.subr.bf16.mxu0 %v12961_v41  ;;  %8722 = vmatprep.subr.bf16.mxu1 %v12961_v41  ;;  %v1193_v30 = vsel %vm1177_vm15, %v1188_v8, %v10478_v34  ;;  %v9520_v8 = vld [vmem:[%s12929_s4 + $0x170] sm:$0xff]  }
 0x146   : > { %v10491_v42 = vsel %vm1177_vm15, %v10478_v34, %v10480_v35 }
 0x147   : > { %v860_v31 = vld [vmem:[#allocation2 + $0x18] sm:$0xf] }
 0x148   : > { %v905_v36 = vrot.slane %v860_v31, 4  ;;  %v1043_v37 = vshrl.u32 %v860_v31, 16  ;;  %v1046_v38 = vshll.u32 %v860_v31, 16  ;;  %8697 = vmatpush3.bf16.msra.mxu0 %v9499_v21  ;;  %8723 = vmatpush3.bf16.msra.mxu1 %v9500_v23  ;;  %v1159_v14 = vld [vmem:[#allocation2 + $0x18] sm:$0x1f]  ;;  %v9508_v21 = vld [vmem:[%s12929_s4 + $0x140] sm:$0xff]   ;;  %v1343_v23 = vsel %vm1336_vm0, %v1340_v3, %v1342_v16 }
 0x149   : > { %8698 = vmatprep.subr.bf16.mxu0 %v12961_v41  ;;  %8724 = vmatprep.subr.bf16.mxu1 %v12961_v41  ;;  %v1195_v25 = vshrl.u32 %v1159_v14, 16  ;;  %v1198_v26 = vshll.u32 %v1159_v14, 16  ;;  %v1345_v31 = vor.u32 %v1344_v9, %v10399_v56  ;;  %v1629_v14 = vrot.slane %v10399_v56, 1  ;;  %v9523_v56 = vld [vmem:[%s12929_s4 + $0x188] sm:$0xff]   ;;  %v9524_v16 = vld [vmem:[%s12929_s4 + $0x1c0] sm:$0xff]  }
 0x14a   : > { %v906_v43 = vsel %vm899_vm8, %v10395_v55, %v905_v36  ;;  %v1045_v46 = vrot.slane %v1043_v37, 3  ;;  %v1048_v51 = vrot.slane %v1046_v38, 4  ;;  %v9511_v36 = vld [vmem:[%s12929_s4 + $0x118] sm:$0xff]   ;;  %v9512_v37 = vld [vmem:[%s12929_s4 + $0x150] sm:$0xff]   ;;  %v9914_v3 = vpack.c.bf16 %v840_v54, %v839_v48 }
 0x14b   : > { %8655 = vmatmul.mubr.bf16.gmra.mrb[20].mxu0 %v906_v43  ;;  %v1200_v33 = vrot.slane %v1198_v26, 5  ;;  %v1346_v38 = vsel %vm1336_vm0, %v1341_v63, %v1345_v31  ;;  %v9513_v43 = vld [vmem:[%s12929_s4 + $0x120] sm:$0xff]   ;;  %v1630_v44 = vsel %vm1618_vm2, %v10393_v53, %v1629_v14  ;;  %v9525_v48 = vld [vmem:[%s12929_s4 + $0x190] sm:$0xff]   ;;  %v1637_v54 = vrot.slane %v10459_v19, 1  ;;  %v9531_v31 = vld [vmem:[%s12929_s4 + $0x1a8] sm:$0xff]  }
 0x14c   : > { %v1049_v2 = vor.u32 %v1048_v51, %v1045_v46  ;;  %8699 = vmatpush3.bf16.msra.mxu0 %v9501_v32  ;;  %8725 = vmatpush3.bf16.msra.mxu1 %v9502_v39  ;;  %v1197_v32 = vrot.slane %v1195_v25, 4  ;;  %v9514_v46 = vld [vmem:[%s12929_s4 + $0x158] sm:$0xff]   ;;  %v9528_v25 = vld [vmem:[%s12929_s4 + $0x1d0] sm:$0xff]  }
 0x14d   : > { %8700 = vmatprep.subr.bf16.mxu0 %v12961_v41  ;;  %8726 = vmatprep.subr.bf16.mxu1 %v12961_v41 }
 0x14e   : > { %v1050_v4 = vsel %vm1015_vm11, %v10425_v5, %v1049_v2  ;;  %8702 = vmatprep.mubr.msk.bf16.mxu0 %vm9985_vm6, %v12961_v41  ;;  %v1201_v39 = vor.u32 %v1200_v33, %v1197_v32  ;;  %v9517_v2 = vld [vmem:[%s12929_s4 + $0x130] sm:$0xff]   ;;  %v9532_v32 = vld [vmem:[%s12929_s4 + $0x1e0] sm:$0xff]   ;;  %v9534_v33 = vld [vmem:[%s12929_s4 + $0x1e8] sm:$0xff]  }
 0x14f   : > { %8683 = vmatmul.mubr.bf16.gmra.mrb[20].mxu1 %v1050_v4  ;;  %v9518_v4 = vld [vmem:[%s12929_s4 + $0x168] sm:$0xff]  }
 0x150   : > { %8701 = vmatpush3.bf16.msra.mxu0 %v9503_v52  ;;  %8727 = vmatpush3.bf16.msra.mxu1 %v9504_v61  ;;  %v1202_v51 = vsel %vm1177_vm15, %v10478_v34, %v1201_v39  ;;  %v1353_v52 = vor.u32 %v10459_v19, %v1350_v40  ;;  %v9515_v61 = vld [vmem:[%s12929_s4 + $0x128] sm:$0xff]   ;;  %v9536_v39 = vld [vmem:[%s12929_s4 + $0x1f0] sm:$0xff]  }
 0x151   : > { %8728 = vmatprep.subr.bf16.mxu1 %v12961_v41  ;;  %8742 = vmatprep.subr.bf16.mxu0 %v12961_v41 }
 0x152   : > { %8730 = vmatprep.mubr.msk.bf16.mxu1 %vm9985_vm6, %v12961_v41  ;;  %v1354_v63 = vsel %vm1336_vm0, %v1344_v9, %v1353_v52  ;;  %v9527_v9 = vld [vmem:[%s12929_s4 + $0x198] sm:$0xff]  }
 0x153   : > { %8703 = vmatmul.mubr.bf16.vlgmr.msra.gmra.mrb[24].mxu0 %v1189_v15  ;;  %v9829_v15 = vld [vmem:[%s12929_s4 + $0x610] sm:$0xff]  }
 0x154   : > { %8729 = vmatpush3.bf16.msra.mxu1 %v9505_v0  ;;  %8743 = vmatpush3.bf16.msra.mxu0 %v9506_v22  ;;  %v9521_v0 = vld [vmem:[%s12929_s4 + $0x178] sm:$0xff]   ;;  %v9522_v22 = vld [vmem:[%s12929_s4 + $0x180] sm:$0xff]  }
 0x155   : > { %8744 = vmatprep.subr.bf16.mxu0 %v12961_v41  ;;  %8770 = vmatprep.subr.bf16.mxu1 %v12961_v41 }
 0x156   : > { %8706 = vmatprep.mubr.msk.bf16.mxu0 %vm9985_vm6, %v12961_v41 }
 0x157   : > { %8731 = vmatmul.mubr.bf16.vlgmr.msra.gmra.mrb[24].mxu1 %v1343_v23  ;;  %v1633_v23 = vor.u32 %v1629_v14, %v10397_v27  ;;  %v1641_v27 = vor.u32 %v1637_v54, %v10454_v18  ;;  %v1944_v14 = vrot.slane %v10440_v12, 4 }
 0x158   : > { %8745 = vmatpush3.bf16.msra.mxu0 %v9507_v17  ;;  %8771 = vmatpush3.bf16.msra.mxu1 %v9508_v21  ;;  %v9917_v17 = vpack.c.bf16 %v842_v20, %v841_v10  ;;  %v1600_v21 = vld [vmem:[#allocation2 + $0x20] sm:$0x1]  ;;  %v9530_v20 = vld [vmem:[%s12929_s4 + $0x1d8] sm:$0xff]  }
 0x159   : > { %8746 = vmatprep.subr.bf16.mxu0 %v12961_v41  ;;  %8772 = vmatprep.subr.bf16.mxu1 %v12961_v41  ;;  %v1638_v7 = vsel %vm1618_vm2, %v1633_v23, %v1637_v54  ;;  %v1643_v10 = vshll.u32 %v1600_v21, 16  ;;  %v9544_v23 = vld [vmem:[%s12929_s4 + $0x230] sm:$0xff]  }
 0x15a   : > { %8734 = vmatprep.mubr.msk.bf16.mxu1 %vm9985_vm6, %v12961_v41 }
 0x15b   : > { %8707 = vmatmul.mubr.bf16.gmra.mrb[28].mxu0 %v1193_v30  ;;  %v1645_v26 = vrot.slane %v1643_v10, 1  ;;  %v1761_v30 = vld [vmem:[#allocation2 + $0x8] sm:$0xf8]  ;;  %v9545_v10 = vld [vmem:[%s12929_s4 + $0x238] sm:$0xff]  }
 0x15c   : > { %8747 = vmatpush3.bf16.msra.mxu0 %v9509_v29  ;;  %8773 = vmatpush3.bf16.msra.mxu1 %v9510_v24  ;;  %v9920_v24 = vpack.c.bf16 %v844_v1, %v843_v58  ;;  %v1781_v58 = vshrl.u32 %v1761_v30, 16  ;;  %v1784_v59 = vshll.u32 %v1761_v30, 16  ;;  %v9533_v1 = vld [vmem:[%s12929_s4 + $0x1b0] sm:$0xff]  }
 0x15d   : > { %8748 = vmatprep.subr.bf16.mxu0 %v12961_v41  ;;  %8774 = vmatprep.subr.bf16.mxu1 %v12961_v41  ;;  %v1646_v45 = vsel %vm1618_vm2, %v1641_v27, %v1645_v26  ;;  %v2062_v27 = vld [vmem:[#allocation2 + $0x20] sm:$0x1f] }
 0x15e   : > { %8710 = vmatprep.mubr.msk.bf16.mxu0 %vm9985_vm6, %v12961_v41  ;;  %v2097_v26 = vshrl.u32 %v2062_v27, 16 }
 0x15f   : > { %8735 = vmatmul.mubr.bf16.gmra.mrb[28].mxu1 %v1346_v38  ;;  %v9535_v38 = vld [vmem:[%s12929_s4 + $0x1b8] sm:$0xff]  }
 0x160   : > { %8749 = vmatpush3.bf16.msra.mxu0 %v9511_v36  ;;  %8775 = vmatpush3.bf16.msra.mxu1 %v9512_v37  ;;  %v1783_v36 = vrot.slane %v1781_v58, 3  ;;  %v1786_v37 = vrot.slane %v1784_v59, 4  ;;  %v2099_v30 = vrot.slane %v2097_v26, 4  ;;  %v9548_v58 = vld [vmem:[%s12931_s6 + $0x4] ss:$16 sps:$4 sm:$0xff]  }
 0x161   : > { %8750 = vmatprep.subr.bf16.mxu0 %v12961_v41  ;;  %8776 = vmatprep.subr.bf16.mxu1 %v12961_v41  ;;  %v9551_v59 = vld [vmem:[%s12931_s6 + $0xc] ss:$16 sps:$4 sm:$0xff]  }
 0x162   : > { %8738 = vmatprep.mubr.msk.bf16.mxu1 %vm9985_vm6, %v12961_v41  ;;  %v1787_v40 = vor.u32 %v1786_v37, %v1783_v36  ;;  %v9557_v36 = vld [vmem:[%s12931_s6 + $0x2c] ss:$16 sps:$4 sm:$0xff]   ;;  %v9558_v37 = vld [vmem:[%s12931_s6 + $0x40] ss:$16 sps:$4 sm:$0xff]  }
 0x163   : > { %8711 = vmatmul.mubr.bf16.gmra.mrb[32].mxu0 %v1202_v51  ;;  %v9538_v51 = vld [vmem:[%s12929_s4 + $0x200] sm:$0xff]  }
 0x164   : > { %8751 = vmatpush3.bf16.msra.mxu0 %v9513_v43  ;;  %8777 = vmatpush3.bf16.msra.mxu1 %v9514_v46  ;;  %v1919_v43 = vld [vmem:[#allocation2 + $0x8] sm:$0xf0]  ;;  %v9537_v46 = vld [vmem:[%s12929_s4 + $0x1f8] sm:$0xff]   ;;  %v1791_v52 = vsel %vm1015_vm11, %v1787_v40, %v10425_v5 }
 0x165   : > { %8752 = vmatprep.subr.bf16.mxu0 %v12961_v41  ;;  %8778 = vmatprep.subr.bf16.mxu1 %v12961_v41  ;;  %v2084_v21 = vshll.u32 %v1919_v43, 16  ;;  %v9563_v40 = vld [vmem:[%s12931_s6 + $0x4c] ss:$16 sps:$4 sm:$0xff]  }
 0x166   : > { %8758 = vmatprep.mubr.msk.bf16.mxu0 %vm9985_vm6, %v12961_v41 }
 0x167   : > { %8739 = vmatmul.mubr.bf16.gmra.mrb[32].mxu1 %v1354_v63  ;;  %v1793_v63 = vrot.slane %v10459_v19, 4  ;;  %v9540_v19 = vld [vmem:[%s12929_s4 + $0x210] sm:$0xff]  }
 0x168   : > { %8753 = vmatpush3.bf16.msra.mxu0 %v9515_v61  ;;  %8779 = vmatpush3.bf16.msra.mxu1 %v9516_v62  ;;  %v1941_v61 = vrot.slane %v1919_v43, 4  ;;  %v1792_v62 = vrot.slane %v10454_v18, 3 }
 0x169   : > { %8754 = vmatprep.subr.bf16.mxu0 %v12961_v41  ;;  %8780 = vmatprep.subr.bf16.mxu1 %v12961_v41 }
 0x16a   : > { %8786 = vmatprep.mubr.msk.bf16.mxu1 %vm9985_vm6, %v12961_v41 }
 0x16c   : > { %8755 = vmatpush3.bf16.msra.mxu0 %v9517_v2  ;;  %8781 = vmatpush3.bf16.msra.mxu1 %v9518_v4  ;;  %v1762_v2 = vld [vmem:[#allocation2 + $0x20] sm:$0xf]  ;;  %v9539_v4 = vld [vmem:[%s12929_s4 + $0x208] sm:$0xff]  }
 0x16d   : > { %8756 = vmatprep.subr.bf16.mxu0 %v12961_v41  ;;  %8782 = vmatprep.subr.bf16.mxu1 %v12961_v41  ;;  %v1797_v18 = vshrl.u32 %v1762_v2, 16 }
 0x170   : > { %8757 = vmatpush3.bf16.msra.mxu0 %v9519_v6  ;;  %8783 = vmatpush3.bf16.msra.mxu1 %v9520_v8  ;;  %v1943_v6 = vsel %vm899_vm8, %v1941_v61, %v10395_v55  ;;  %v1794_v8 = vor.u32 %v1793_v63, %v1792_v62  ;;  %v9572_v61 = vld [vmem:[%s12931_s6 + $0x84] ss:$16 sps:$4 sm:$0xff]   ;;  %v9575_v62 = vld [vmem:[%s12931_s6 + $0x8c] ss:$16 sps:$4 sm:$0xff]   ;;  %v9570_v63 = vld [vmem:[%s12931_s6 + $0x80] ss:$16 sps:$4 sm:$0xff]  }
 0x171   : > { %8784 = vmatprep.subr.bf16.mxu1 %v12961_v41  ;;  %8798 = vmatprep.subr.bf16.mxu0 %v12961_v41 }
 0x173   : > { %9915 = vmatmul.mubr.msk.bf16.vlgmr.msra.gmra.mrb[36].mxu0 %vm10614_vm1, %v9914_v3  ;;  %v1799_v3 = vrot.slane %v1797_v18, 3  ;;  %v9579_v18 = vld [vmem:[%s12931_s6 + $0xa8] ss:$16 sps:$4 sm:$0xff]  }
 0x174   : > { %8785 = vmatpush3.bf16.msra.mxu1 %v9521_v0  ;;  %8799 = vmatpush3.bf16.msra.mxu0 %v9522_v22  ;;  %v1800_v0 = vshll.u32 %v1762_v2, 16  ;;  %v1795_v22 = vsel %vm1015_vm11, %v10425_v5, %v1794_v8  ;;  %v9542_v5 = vld [vmem:[%s12929_s4 + $0x220] sm:$0xff]  }
 0x175   : > { %8800 = vmatprep.subr.bf16.mxu0 %v12961_v41  ;;  %8826 = vmatprep.subr.bf16.mxu1 %v12961_v41 }
 0x176   : > { %8762 = vmatprep.mubr.msk.bf16.mxu0 %vm9985_vm6, %v12961_v41 }
 0x177   : > { %8787 = vmatmul.mubr.bf16.vlgmr.msra.gmra.mrb[36].mxu1 %v1630_v44  ;;  %v1945_v44 = vsel %vm899_vm8, %v10395_v55, %v1944_v14  ;;  %v9543_v55 = vld [vmem:[%s12929_s4 + $0x228] sm:$0xff]  }
 0x178   : > { %8801 = vmatpush3.bf16.msra.mxu0 %v9523_v56  ;;  %8827 = vmatpush3.bf16.msra.mxu1 %v9524_v16  ;;  %v1802_v56 = vrot.slane %v1800_v0, 4  ;;  %v9541_v16 = vld [vmem:[%s12929_s4 + $0x218] sm:$0xff]  }
 0x179   : > { %8802 = vmatprep.subr.bf16.mxu0 %v12961_v41  ;;  %8828 = vmatprep.subr.bf16.mxu1 %v12961_v41 }
 0x17a   : > { %8790 = vmatprep.mubr.msk.bf16.mxu1 %vm9985_vm6, %v12961_v41 }
 0x17b   : > { %9918 = vmatmul.mubr.msk.bf16.gmra.mrb[40].mxu0 %vm10651_vm3, %v9917_v17  ;;  %v2081_v17 = vshrl.u32 %v1919_v43, 16  ;;  %v9564_v43 = vld [vmem:[%s12931_s6 + $0x60] ss:$16 sps:$4 sm:$0xff]  }
 0x17c   : > { %8803 = vmatpush3.bf16.msra.mxu0 %v9525_v48  ;;  %8829 = vmatpush3.bf16.msra.mxu1 %v9526_v50  ;;  %v1803_v48 = vor.u32 %v1802_v56, %v1799_v3  ;;  %v1946_v50 = vrot.slane %v1762_v2, 4  ;;  %v9573_v2 = vld [vmem:[%s12931_s6 + $0x88] ss:$16 sps:$4 sm:$0xff]  }
 0x17d   : > { %8804 = vmatprep.subr.bf16.mxu0 %v12961_v41  ;;  %8830 = vmatprep.subr.bf16.mxu1 %v12961_v41 }
 0x17e   : > { %8766 = vmatprep.mubr.msk.bf16.mxu0 %vm9985_vm6, %v12961_v41  ;;  %v1804_v12 = vsel %vm1015_vm11, %v1794_v8, %v1803_v48  ;;  %v1947_v54 = vsel %vm899_vm8, %v1944_v14, %v1946_v50  ;;  %v9576_v8 = vld [vmem:[%s12931_s6 + $0xa0] ss:$16 sps:$4 sm:$0xff]  }
 0x17f   : > { %8791 = vmatmul.mubr.bf16.gmra.mrb[40].mxu1 %v1638_v7  ;;  %v2086_v7 = vrot.slane %v2084_v21, 5  ;;  %v9585_v21 = vld [vmem:[%s12931_s6 + $0xc8] ss:$16 sps:$4 sm:$0xff]  }
 0x180   : > { %8805 = vmatpush3.bf16.msra.mxu0 %v9527_v9  ;;  %8831 = vmatpush3.bf16.msra.mxu1 %v9528_v25  ;;  %v10781_v9 = vld [vmem:[#allocation2] sm:$0xff]  ;;  %v2083_v25 = vrot.slane %v2081_v17, 4 }
 0x181   : > { %8806 = vmatprep.subr.bf16.mxu0 %v12961_v41  ;;  %8832 = vmatprep.subr.bf16.mxu1 %v12961_v41 }
 0x182   : > { %8794 = vmatprep.mubr.msk.bf16.mxu1 %vm9985_vm6, %v12961_v41 }
 0x183   : > { %9921 = vmatmul.mubr.msk.bf16.gmra.mrb[44].mxu0 %vm10688_vm4, %v9920_v24  ;;  %v2100_v24 = vshll.u32 %v2062_v27, 16 }
 0x184   : > { %8807 = vmatpush3.bf16.msra.mxu0 %v9529_v11  ;;  %8833 = vmatpush3.bf16.msra.mxu1 %v9530_v20  ;;  %v2087_v11 = vor.u32 %v2086_v7, %v2083_v25  ;;  %v9590_v7 = vld [vmem:[%s12931_s6 + $0xe4] ss:$16 sps:$4 sm:$0xff]  }
 0x185   : > { %8808 = vmatprep.subr.bf16.mxu0 %v12961_v41  ;;  %8834 = vmatprep.subr.bf16.mxu1 %v12961_v41 }
 0x186   : > { %8814 = vmatprep.mubr.msk.bf16.mxu0 %vm9985_vm6, %v12961_v41  ;;  %v2091_v20 = vsel %vm1177_vm15, %v2087_v11, %v10478_v34  ;;  %v9546_v34 = vld [vmem:[%s12931_s6] ss:$16 sps:$4 sm:$0xff]  }
 0x187   : > { %8795 = vmatmul.mubr.bf16.gmra.mrb[44].mxu1 %v1646_v45  ;;  %v9588_v11 = vld [vmem:[%s12931_s6 + $0xe0] ss:$16 sps:$4 sm:$0xff]  }
 0x188   : > { %8809 = vmatpush3.bf16.msra.mxu0 %v9531_v31  ;;  %8835 = vmatpush3.bf16.msra.mxu1 %v9532_v32  ;;  %v2102_v31 = vrot.slane %v2100_v24, 5  ;;  %v9591_v24 = vld [vmem:[%s12931_s6 + $0xe8] ss:$16 sps:$4 sm:$0xff]  }
 0x189   : > { %8810 = vmatprep.subr.bf16.mxu0 %v12961_v41  ;;  %8836 = vmatprep.subr.bf16.mxu1 %v12961_v41 }
 0x18a   : > { %8842 = vmatprep.mubr.msk.bf16.mxu1 %vm9985_vm6, %v12961_v41  ;;  %v2103_v32 = vor.u32 %v2102_v31, %v2099_v30 }
 0x18c   : > { %8811 = vmatpush3.bf16.msra.mxu0 %v9533_v1  ;;  %8837 = vmatpush3.bf16.msra.mxu1 %v9534_v33  ;;  %v2104_v45 = vsel %vm1177_vm15, %v10480_v35, %v2103_v32  ;;  %v9552_v35 = vld [vmem:[%s12931_s6 + $0x20] ss:$16 sps:$4 sm:$0xff]   ;;  %v9554_v1 = vld [vmem:[%s12931_s6 + $0x24] ss:$16 sps:$4 sm:$0xff]   ;;  %v9555_v33 = vld [vmem:[%s12931_s6 + $0x28] ss:$16 sps:$4 sm:$0xff]  }
 0x18d   : > { %8812 = vmatprep.subr.bf16.mxu0 %v12961_v41  ;;  %8838 = vmatprep.subr.bf16.mxu1 %v12961_v41 }
 0x190   : > { %8813 = vmatpush3.bf16.msra.mxu0 %v9535_v38  ;;  %8839 = vmatpush3.bf16.msra.mxu1 %v9536_v39  ;;  %v9560_v38 = vld [vmem:[%s12931_s6 + $0x44] ss:$16 sps:$4 sm:$0xff]   ;;  %v9561_v39 = vld [vmem:[%s12931_s6 + $0x48] ss:$16 sps:$4 sm:$0xff]  }
 0x191   : > { %8840 = vmatprep.subr.bf16.mxu1 %v12961_v41  ;;  %8854 = vmatprep.subr.bf16.mxu0 %v12961_v41 }
 0x193   : > { %8815 = vmatmul.mubr.bf16.vlgmr.msra.gmra.mrb[48].mxu0 %v1791_v52  ;;  %v9569_v52 = vld [vmem:[%s12931_s6 + $0x6c] ss:$16 sps:$4 sm:$0xff]  }
 0x194   : > { %8841 = vmatpush3.bf16.msra.mxu1 %v9537_v46  ;;  %8855 = vmatpush3.bf16.msra.mxu0 %v9538_v51  ;;  %v9566_v46 = vld [vmem:[%s12931_s6 + $0x64] ss:$16 sps:$4 sm:$0xff]   ;;  %v9567_v51 = vld [vmem:[%s12931_s6 + $0x68] ss:$16 sps:$4 sm:$0xff]  }
 0x195   : > { %8856 = vmatprep.subr.bf16.mxu0 %v12961_v41  ;;  %8818 = vmatprep.mubr.msk.bf16.mxu0 %vm9985_vm6, %v12961_v41 }
 0x196   : > { %2455 = vmatprep.subr.bf16.mxu1 %v9548_v58 }
 0x197   : > { %8843 = vmatmul.mubr.bf16.vlgmr.msra.gmra.mrb[48].mxu1 %v1943_v6  ;;  %v9581_v6 = vld [vmem:[%s12931_s6 + $0xac] ss:$16 sps:$4 sm:$0xff]  }
 0x198   : > { %8857 = vmatpush3.bf16.msra.mxu0 %v9539_v4  ;;  %8846 = vmatprep.mubr.msk.bf16.mxu1 %vm9985_vm6, %v12961_v41  ;;  %v9578_v4 = vld [vmem:[%s12931_s6 + $0xa4] ss:$16 sps:$4 sm:$0xff]  }
 0x199   : > { %8858 = vmatprep.subr.bf16.mxu0 %v12961_v41  ;;  %2456 = vmatpush1.bf16.msra.mxu1 %v9546_v34 }
 0x19a   : > { %2457 = vmatprep.subr.bf16.mxu1 %v9554_v1 }
 0x19b   : > { %8819 = vmatmul.mubr.bf16.gmra.mrb[52].mxu0 %v1795_v22 }
 0x19c   : > { %8859 = vmatpush3.bf16.msra.mxu0 %v9540_v19  ;;  %8822 = vmatprep.mubr.msk.bf16.mxu0 %vm9985_vm6, %v12961_v41 }
 0x19d   : > { %8860 = vmatprep.subr.bf16.mxu0 %v12961_v41  ;;  %2458 = vmatpush1.bf16.msra.mxu1 %v9552_v35  ;;  %v9595_v35 = vld [vmem:[%s12927_s2 + $0x1c0] sm:$0xff]  }
 0x19e   : > { %2459 = vmatprep.subr.bf16.mxu1 %v9560_v38 }
 0x19f   : > { %8847 = vmatmul.mubr.bf16.gmra.mrb[52].mxu1 %v1945_v44 }
 0x1a0   : > { %8861 = vmatpush3.bf16.msra.mxu0 %v9541_v16  ;;  %8850 = vmatprep.mubr.msk.bf16.mxu1 %vm9985_vm6, %v12961_v41 }
 0x1a1   : > { %8862 = vmatprep.subr.bf16.mxu0 %v12961_v41  ;;  %2460 = vmatpush1.bf16.msra.mxu1 %v9558_v37 }
 0x1a2   : > { %2461 = vmatprep.subr.bf16.mxu1 %v9566_v46 }
 0x1a3   : > { %8823 = vmatmul.mubr.bf16.gmra.mrb[56].mxu0 %v1804_v12 }
 0x1a4   : > { %8863 = vmatpush3.bf16.msra.mxu0 %v9542_v5  ;;  %8870 = vmatprep.mubr.msk.bf16.mxu0 %vm9985_vm6, %v12961_v41 }
 0x1a5   : > { %8864 = vmatprep.subr.bf16.mxu0 %v12961_v41  ;;  %2462 = vmatpush1.bf16.msra.mxu1 %v9564_v43 }
 0x1a6   : > { %2463 = vmatprep.subr.bf16.mxu1 %v9572_v61 }
 0x1a7   : > { %8851 = vmatmul.mubr.bf16.gmra.mrb[56].mxu1 %v1947_v54  ;;  %v9584_v54 = vld [vmem:[%s12931_s6 + $0xc4] ss:$16 sps:$4 sm:$0xff]  }
 0x1a8   : > { %8865 = vmatpush3.bf16.msra.mxu0 %v9543_v55  ;;  %2487 = vmatprep.mubr.bf16.mxu1 %v10781_v9  ;;  %v9582_v55 = vld [vmem:[%s12931_s6 + $0xc0] ss:$16 sps:$4 sm:$0xff]  }
 0x1a9   : > { %8866 = vmatprep.subr.bf16.mxu0 %v12961_v41  ;;  %2464 = vmatpush1.bf16.msra.mxu1 %v9570_v63 }
 0x1aa   : > { %2465 = vmatprep.subr.bf16.mxu1 %v9578_v4 }
 0x1ac   : > { %8867 = vmatpush3.bf16.msra.mxu0 %v9544_v23  ;;  %v9587_v23 = vld [vmem:[%s12931_s6 + $0xcc] ss:$16 sps:$4 sm:$0xff]  }
 0x1ad   : > { %8868 = vmatprep.subr.bf16.mxu0 %v12961_v41  ;;  %2466 = vmatpush1.bf16.msra.mxu1 %v9576_v8 }
 0x1ae   : > { %2467 = vmatprep.subr.bf16.mxu1 %v9584_v54 }
 0x1b0   : > { %8869 = vmatpush3.bf16.msra.mxu0 %v9545_v10 }
 0x1b1   : > { %2518 = vmatprep.subr.bf16.mxu0 %v9551_v59  ;;  %2468 = vmatpush1.bf16.msra.mxu1 %v9582_v55  ;;  %v9594_v59 = vld [vmem:[%s12927_s2 + $0x140] sm:$0xff]  }
 0x1b2   : > { %2469 = vmatprep.subr.bf16.mxu1 %v9590_v7 }
 0x1b3   : > { %8871 = vmatmul.mubr.bf16.vlgmr.msra.gmra.mrb[60].mxu0 %v2091_v20  ;;  %v9593_v20 = vld [vmem:[%s12931_s6 + $0xec] ss:$16 sps:$4 sm:$0xff]  }
 0x1b4   : > { %8874 = vmatprep.mubr.msk.bf16.mxu0 %vm9985_vm6, %v12961_v41 }
 0x1b5   : > { %2470 = vmatpush1.bf16.msra.mxu1 %v9588_v11 }
 0x1b6   : > { %8296 = vmatprep.subr.bf16.mxu1 %v9594_v59 }
 0x1bb   : > { %8875 = vmatmul.mubr.bf16.gmra.mrb[64].mxu0 %v10491_v42  ;;  %v9549_v42 = vld [vmem:[%s12931_s6 + $0x8] ss:$16 sps:$4 sm:$0xff]  }
 0x1bc   : > { %8878 = vmatprep.mubr.msk.bf16.mxu0 %vm9985_vm6, %v12961_v41  ;;  %2519 = vmatpush1.bf16.msra.mxu0 %v9549_v42 }
 0x1bd   : > { %2520 = vmatprep.subr.bf16.mxu0 %v9557_v36 }
 0x1c0   : > { %2521 = vmatpush1.bf16.msra.mxu0 %v9555_v33 }
 0x1c1   : > { %2522 = vmatprep.subr.bf16.mxu0 %v9563_v40 }
 0x1c3   : > { %8879 = vmatmul.mubr.bf16.gmra.mrb[68].mxu0 %v2104_v45 }
 0x1c4   : > { %2550 = vmatprep.mubr.bf16.mxu0 %v10781_v9  ;;  %2523 = vmatpush1.bf16.msra.mxu0 %v9561_v39 }
 0x1c5   : > { %2524 = vmatprep.subr.bf16.mxu0 %v9569_v52 }
 0x1c8   : > { %2525 = vmatpush1.bf16.msra.mxu0 %v9567_v51 }
 0x1c9   : > { %2526 = vmatprep.subr.bf16.mxu0 %v9575_v62 }
 0x1cc   : > { %2527 = vmatpush1.bf16.msra.mxu0 %v9573_v2 }
 0x1cd   : > { %2528 = vmatprep.subr.bf16.mxu0 %v9581_v6 }
 0x1d0   : > { %2529 = vmatpush1.bf16.msra.mxu0 %v9579_v18 }
 0x1d1   : > { %2530 = vmatprep.subr.bf16.mxu0 %v9587_v23 }
 0x1d4   : > { %2531 = vmatpush1.bf16.msra.mxu0 %v9585_v21 }
 0x1d5   : > { %2532 = vmatprep.subr.bf16.mxu0 %v9593_v20 }
 0x1d8   : > { %2533 = vmatpush1.bf16.msra.mxu0 %v9591_v24 }
 0x1d9   : > { %8330 = vmatprep.subr.bf16.mxu0 %v9595_v35 }
 0x206   : > { %v992_v0 = vpop.f32.mrb[12].mxu0 }
 0x207   : > { %v8648_v19 = vpop.f32.mrb[13].mxu0 }
 0x208   : > { %v995_v22 = vpop.f32.mrb[14].mxu0 }
 0x209   : > { %v8649_v14 = vpop.f32.mrb[15].mxu0 }
 0x20a   : > { %v1136_v3 = vpop.f32.mrb[12].mxu1 }
 0x20b   : > { %v1137_v56 = vadd.f32 %v1136_v3, %v992_v0  ;;  %v8676_v16 = vpop.f32.mrb[13].mxu1 }
 0x20c   : > { %v1139_v44 = vpop.f32.mrb[14].mxu1 }
 0x20d   : > { %v1140_v48 = vadd.f32 %v1139_v44, %v995_v22  ;;  %v8677_v5 = vpop.f32.mrb[15].mxu1 }
 0x20e   : > { %v1000_v12 = vpop.f32.mrb[16].mxu0 }
 0x20f   : > { %v8652_v50 = vpop.f32.mrb[17].mxu0 }
 0x210   : > { %v1003_v17 = vpop.f32.mrb[18].mxu0 }
 0x211   : > { %v8653_v25 = vpop.f32.mrb[19].mxu0 }
 0x212   : > { %v1144_v10 = vpop.f32.mrb[16].mxu1 }
 0x213   : > { %v1145_v27 = vadd.f32 %v1144_v10, %v1000_v12  ;;  %v8680_v26 = vpop.f32.mrb[17].mxu1 }
 0x214   : > { %v1147_v30 = vpop.f32.mrb[18].mxu1 }
 0x215   : > { %v1148_v31 = vadd.f32 %v1147_v30, %v1003_v17  ;;  %v8681_v32 = vpop.f32.mrb[19].mxu1 }
 0x21e   : > { %v1008_v45 = vpop.f32.mrb[20].mxu0 }
 0x21f   : > { %v8656_v34 = vpop.f32.mrb[21].mxu0 }
 0x220   : > { %v1011_v58 = vpop.f32.mrb[22].mxu0 }
 0x221   : > { %v8657_v42 = vpop.f32.mrb[23].mxu0 }
 0x222   : > { %v1152_v1 = vpop.f32.mrb[20].mxu1 }
 0x223   : > { %v1153_v33 = vadd.f32 %v1152_v1, %v1008_v45  ;;  %v8684_v36 = vpop.f32.mrb[21].mxu1 }
 0x224   : > { %v1155_v37 = vpop.f32.mrb[22].mxu1 }
 0x225   : > { %v1156_v38 = vadd.f32 %v1155_v37, %v1011_v58  ;;  %v8685_v39 = vpop.f32.mrb[23].mxu1 }
 0x226   : > { %v1288_v40 = vpop.f32.mrb[24].mxu0 }
 0x227   : > { %v1311_v43 = vadd.f32 %v1288_v40, %v1137_v56  ;;  %v8704_v46 = vpop.f32.mrb[25].mxu0 }
 0x228   : > { %v1291_v51 = vpop.f32.mrb[26].mxu0 }
 0x229   : > { %v1312_v52 = vadd.f32 %v1291_v51, %v1140_v48  ;;  %v8705_v61 = vpop.f32.mrb[27].mxu0 }
 0x22a   : > { %v1440_v62 = vpop.f32.mrb[24].mxu1 }
 0x22b   : > { %v1463_v63 = vadd.f32 %v1440_v62, %v1311_v43  ;;  %v8732_v2 = vpop.f32.mrb[25].mxu1 }
 0x22c   : > { %v1443_v4 = vpop.f32.mrb[26].mxu1 }
 0x22d   : > { %v1464_v6 = vadd.f32 %v1443_v4, %v1312_v52  ;;  %v8733_v8 = vpop.f32.mrb[27].mxu1 }
 0x22e   : > { %v1296_v18 = vpop.f32.mrb[28].mxu0 }
 0x22f   : > { %v1313_v0 = vadd.f32 %v1296_v18, %v1145_v27  ;;  %v8708_v19 = vpop.f32.mrb[29].mxu0 }
 0x230   : > { %v1299_v22 = vpop.f32.mrb[30].mxu0 }
 0x231   : > { %v1314_v14 = vadd.f32 %v1299_v22, %v1148_v31  ;;  %v8709_v3 = vpop.f32.mrb[31].mxu0 }
 0x232   : > { %v1448_v16 = vpop.f32.mrb[28].mxu1 }
 0x233   : > { %v1465_v44 = vadd.f32 %v1448_v16, %v1313_v0  ;;  %v8736_v5 = vpop.f32.mrb[29].mxu1 }
 0x234   : > { %v1451_v56 = vpop.f32.mrb[30].mxu1 }
 0x235   : > { %v1466_v12 = vadd.f32 %v1451_v56, %v1314_v14  ;;  %v8737_v50 = vpop.f32.mrb[31].mxu1 }
 0x236   : > { %v1304_v48 = vpop.f32.mrb[32].mxu0 }
 0x237   : > { %v1315_v55 = vadd.f32 %v1304_v48, %v1153_v33  ;;  %v8712_v54 = vpop.f32.mrb[33].mxu0 }
 0x238   : > { %v1307_v17 = vpop.f32.mrb[34].mxu0 }
 0x239   : > { %v1316_v21 = vadd.f32 %v1307_v17, %v1156_v38  ;;  %v8713_v23 = vpop.f32.mrb[35].mxu0 }
 0x23a   : > { %v1456_v25 = vpop.f32.mrb[32].mxu1 }
 0x23b   : > { %v1467_v7 = vadd.f32 %v1456_v25, %v1315_v55  ;;  %v8740_v10 = vpop.f32.mrb[33].mxu1 }
 0x23c   : > { %v1459_v11 = vpop.f32.mrb[34].mxu1 }
 0x23d   : > { %v1468_v20 = vadd.f32 %v1459_v11, %v1316_v21  ;;  %v8741_v27 = vpop.f32.mrb[35].mxu1 }
 0x246   : > { %v1568_v26 = vpop.f32.mrb[36].mxu0 }
 0x247   : > { %v1591_v24 = vadd.f32 %v1568_v26, %v1463_v63  ;;  %v8760_v30 = vpop.f32.mrb[37].mxu0 }
 0x248   : > { %v1571_v31 = vpop.f32.mrb[38].mxu0 }
 0x249   : > { %v1592_v32 = vadd.f32 %v1571_v31, %v1464_v6  ;;  %v8761_v45 = vpop.f32.mrb[39].mxu0 }
 0x24a   : > { %v1732_v34 = vpop.f32.mrb[36].mxu1 }
 0x24b   : > { %v1755_v58 = vadd.f32 %v1732_v34, %v1591_v24  ;;  %v8788_v42 = vpop.f32.mrb[37].mxu1 }
 0x24c   : > { %v1735_v59 = vpop.f32.mrb[38].mxu1 }
 0x24d   : > { %v1756_v35 = vadd.f32 %v1735_v59, %v1592_v32  ;;  %v8789_v1 = vpop.f32.mrb[39].mxu1 }
 0x24e   : > { %v1576_v33 = vpop.f32.mrb[40].mxu0 }
 0x24f   : > { %v1593_v36 = vadd.f32 %v1576_v33, %v1465_v44  ;;  %v8764_v37 = vpop.f32.mrb[41].mxu0 }
 0x250   : > { %v1579_v38 = vpop.f32.mrb[42].mxu0 }
 0x251   : > { %v1594_v39 = vadd.f32 %v1579_v38, %v1466_v12  ;;  %v8765_v40 = vpop.f32.mrb[43].mxu0 }
 0x252   : > { %v1740_v43 = vpop.f32.mrb[40].mxu1 }
 0x253   : > { %v1757_v46 = vadd.f32 %v1740_v43, %v1593_v36  ;;  %v8792_v51 = vpop.f32.mrb[41].mxu1 }
 0x254   : > { %v1743_v52 = vpop.f32.mrb[42].mxu1  ;;  %v7334_v51 = vld [vmem:[#allocation3] ss:$0 sm:$0xff] }
 0x255   : > { %v1758_v61 = vadd.f32 %v1743_v52, %v1594_v39  ;;  %v8793_v62 = vpop.f32.mrb[43].mxu1 }
 0x256   : > { %v1584_v63 = vpop.f32.mrb[44].mxu0 }
 0x257   : > { %v1595_v2 = vadd.f32 %v1584_v63, %v1467_v7  ;;  %v8768_v4 = vpop.f32.mrb[45].mxu0 }
 0x258   : > { %v1587_v6 = vpop.f32.mrb[46].mxu0 }
 0x259   : > { %v1596_v8 = vadd.f32 %v1587_v6, %v1468_v20  ;;  %v8769_v18 = vpop.f32.mrb[47].mxu0 }
 0x25a   : > { %v1748_v0 = vpop.f32.mrb[44].mxu1 }
 0x25b   : > { %v1759_v19 = vadd.f32 %v1748_v0, %v1595_v2  ;;  %v8796_v22 = vpop.f32.mrb[45].mxu1 }
 0x25c   : > { %v1751_v14 = vpop.f32.mrb[46].mxu1 }
 0x25d   : > { %v1760_v3 = vadd.f32 %v1751_v14, %v1596_v8  ;;  %v8797_v16 = vpop.f32.mrb[47].mxu1 }
 0x25e   : > { %v9597_v16 = vld [vmem:[%s12927_s2 + $0x180] sm:$0xff]  }
 0x266   : > { %v1890_v44 = vpop.f32.mrb[48].mxu0 }
 0x267   : > { %v1913_v5 = vadd.f32 %v1890_v44, %v1755_v58  ;;  %v8816_v56 = vpop.f32.mrb[49].mxu0 }
 0x268   : > { %v1893_v12 = vpop.f32.mrb[50].mxu0  ;;  %v9599_v56 = vld [vmem:[%s12927_s2 + $0x1c8] sm:$0xff]  }
 0x269   : > { %v1914_v50 = vadd.f32 %v1893_v12, %v1756_v35  ;;  %v8817_v48 = vpop.f32.mrb[51].mxu0 }
 0x26a   : > { %v2033_v55 = vpop.f32.mrb[48].mxu1 }
 0x26b   : > { %v2056_v54 = vadd.f32 %v2033_v55, %v1913_v5  ;;  %v8844_v17 = vpop.f32.mrb[49].mxu1  ;;  %v9598_v5 = vld [vmem:[%s12927_s2 + $0x148] sm:$0xff]  }
 0x26c   : > { %v2036_v21 = vpop.f32.mrb[50].mxu1  ;;  %v9601_v17 = vld [vmem:[%s12927_s2 + $0x188] sm:$0xff]  }
 0x26d   : > { %v2057_v23 = vadd.f32 %v2036_v21, %v1914_v50  ;;  %v8845_v25 = vpop.f32.mrb[51].mxu1  ;;  %v9602_v21 = vld [vmem:[%s12927_s2 + $0x150] sm:$0xff]  }
 0x26e   : > { %v1898_v7 = vpop.f32.mrb[52].mxu0 }
 0x26f   : > { %v1915_v10 = vadd.f32 %v1898_v7, %v1757_v46  ;;  %v8820_v11 = vpop.f32.mrb[53].mxu0 }
 0x270   : > { %v1901_v20 = vpop.f32.mrb[54].mxu0 }
 0x271   : > { %v1916_v27 = vadd.f32 %v1901_v20, %v1758_v61  ;;  %v8821_v26 = vpop.f32.mrb[55].mxu0 }
 0x272   : > { %v2041_v24 = vpop.f32.mrb[52].mxu1  ;;  %v9604_v26 = vld [vmem:[%s12927_s2 + $0x110] sm:$0xff]  }
 0x273   : > { %v2058_v30 = vadd.f32 %v2041_v24, %v1915_v10  ;;  %v8848_v31 = vpop.f32.mrb[53].mxu1  ;;  %v9605_v24 = vld [vmem:[%s12927_s2 + $0x190] sm:$0xff]  }
 0x274   : > { %v2044_v32 = vpop.f32.mrb[54].mxu1  ;;  %v9606_v31 = vld [vmem:[%s12927_s2 + $0x158] sm:$0xff]  }
 0x275   : > { %v2059_v45 = vadd.f32 %v2044_v32, %v1916_v27  ;;  %v8849_v34 = vpop.f32.mrb[55].mxu1  ;;  %v9607_v32 = vld [vmem:[%s12927_s2 + $0x1d8] sm:$0xff]  }
 0x276   : > { %v1906_v58 = vpop.f32.mrb[56].mxu0 }
 0x277   : > { %v1917_v42 = vadd.f32 %v1906_v58, %v1759_v19  ;;  %v8824_v59 = vpop.f32.mrb[57].mxu0 }
 0x278   : > { %v1909_v35 = vpop.f32.mrb[58].mxu0  ;;  %v9608_v59 = vld [vmem:[%s12927_s2 + $0x118] sm:$0xff]  }
 0x279   : > { %v1918_v1 = vadd.f32 %v1909_v35, %v1760_v3  ;;  %v8825_v33 = vpop.f32.mrb[59].mxu0  ;;  %v9596_v3 = vld [vmem:[%s12927_s2 + $0x100] sm:$0xff]   ;;  %v9609_v35 = vld [vmem:[%s12927_s2 + $0x198] sm:$0xff]  }
 0x27a   : > { %v2049_v36 = vpop.f32.mrb[56].mxu1 }
 0x27b   : > { %v2060_v37 = vadd.f32 %v2049_v36, %v1917_v42  ;;  %v8852_v38 = vpop.f32.mrb[57].mxu1 }
 0x27c   : > { %v2052_v39 = vpop.f32.mrb[58].mxu1  ;;  %v9612_v38 = vld [vmem:[%s12927_s2 + $0x120] sm:$0xff]  }
 0x27d   : > { %v2061_v40 = vadd.f32 %v2052_v39, %v1918_v1  ;;  %v8853_v43 = vpop.f32.mrb[59].mxu1  ;;  %v9610_v1 = vld [vmem:[%s12927_s2 + $0x160] sm:$0xff]  }
 0x27e   : > { %v9613_v39 = vld [vmem:[%s12927_s2 + $0x1a0] sm:$0xff]   ;;  %v9615_v43 = vld [vmem:[%s12927_s2 + $0x1e8] sm:$0xff]  }
 0x286   : > { %v2190_v46 = vpop.f32.mrb[60].mxu0 }
 0x287   : > { %v2213_v52 = vadd.f32 %v2190_v46, %v2056_v54  ;;  %v8872_v61 = vpop.f32.mrb[61].mxu0  ;;  %v9600_v54 = vld [vmem:[%s12927_s2 + $0x108] sm:$0xff]  }
 0x288   : > { %v2193_v62 = vpop.f32.mrb[62].mxu0  ;;  %v9616_v46 = vld [vmem:[%s12927_s2 + $0x128] sm:$0xff]   ;;  %v9619_v61 = vld [vmem:[%s12927_s2 + $0x1f0] sm:$0xff]  }
 0x289   : > { %v2226_v63 = vadd.f32 %v7334_v51, %v2213_v52  ;;  %v2214_v2 = vadd.f32 %v2193_v62, %v2057_v23  ;;  %v8873_v4 = vpop.f32.mrb[63].mxu0  ;;  %v9603_v23 = vld [vmem:[%s12927_s2 + $0x1d0] sm:$0xff]  }
 0x28a   : > { %v9618_v52 = vld [vmem:[%s12927_s2 + $0x170] sm:$0xff]   ;;  %v9623_v4 = vld [vmem:[%s12927_s2 + $0x1f8] sm:$0xff]  }
 0x28b   : > { %v2227_v6 = vadd.f32 %v7334_v51, %v2214_v2  ;;  %v2232_v8 = vmax.f32 %v2226_v63, 0.0  ;;  %v9620_v62 = vld [vmem:[%s12927_s2 + $0x130] sm:$0xff]   ;;  %v9622_v2 = vld [vmem:[%s12927_s2 + $0x178] sm:$0xff]  }
 0x28c   : > { %v9621_v63 = vld [vmem:[%s12927_s2 + $0x1b0] sm:$0xff]  }
 0x28d   : > { %v2233_v18 = vmax.f32 %v2227_v6, 0.0  ;;  %v9624_v6 = vld [vmem:[%s12927_s2 + $0x138] sm:$0xff]  }
 0x28e   : > { %v2198_v0 = vpop.f32.mrb[64].mxu0 }
 0x28f   : > { %v2238_v19 = vpack.c.bf16 %v2233_v18, %v2232_v8  ;;  %v2215_v22 = vadd.f32 %v2198_v0, %v2058_v30  ;;  %v8876_v14 = vpop.f32.mrb[65].mxu0  ;;  %v9625_v8 = vld [vmem:[%s12927_s2 + $0x1b8] sm:$0xff]   ;;  %v2275_v18 = vlaneseq }
 0x290   : > { %v2201_v44 = vpop.f32.mrb[66].mxu0  ;;  %v2273_v14 = vld [vmem:[%s12932_s7] sm:$0xf] }
 0x291   : > { %v2228_v12 = vadd.f32 %v7334_v51, %v2215_v22  ;;  %v2216_v50 = vadd.f32 %v2201_v44, %v2059_v45  ;;  %v8877_v48 = vpop.f32.mrb[67].mxu0  ;;  %2488 = vmatmul.mubr.bf16.vlgmr.msra.gmra.mrb[60].mxu1 %v2238_v19  ;;  %2551 = vmatmul.mubr.bf16.vlgmr.msra.gmra.mrb[72].mxu0 %v2238_v19  ;;  %v2276_v0 = vshrl.u32 %v2275_v18, 7 }
 0x292   : > { %2497 = vmatprep.mubr.bf16.mxu1 %v10781_v9  ;;  %2560 = vmatprep.mubr.bf16.mxu0 %v10781_v9 }
 0x293   : > { %v2229_v55 = vadd.f32 %v7334_v51, %v2216_v50  ;;  %8297 = vmatpush3.bf16.msra.mxu1 %v9596_v3  ;;  %8331 = vmatpush3.bf16.msra.mxu0 %v9597_v16  ;;  %v2234_v25 = vmax.f32 %v2228_v12, 0.0  ;;  %v10997_v19 = vsub.s32 0, %v2276_v0  ;;  %v10999_v22 = vsub.s32 2, %v2276_v0  ;;  %v9900_v50 = vld [vmem:[%s10178_s29 + $0x8] sm:$0xff] }
 0x294   : > { %8298 = vmatprep.subr.bf16.mxu1 %v9598_v5  ;;  %8332 = vmatprep.subr.bf16.mxu0 %v9599_v56  ;;  %v11004_v3 = vsub.s32 1, %v2276_v0  ;;  %v11006_v16 = vsub.s32 3, %v2276_v0  ;;  %v9899_v56 = vld [vmem:[%s10178_s29] sm:$0xff]  ;;  %v380_v48 = vunpack.c.l.bf16 %v9900_v50 }
 0x295   : > { %v2235_v7 = vmax.f32 %v2229_v55, 0.0  ;;  %v11009_v44 = vrot.slane %v2273_v14, %v10997_v19  ;;  %v11012_v5 = vrot.slane %v2273_v14, %v10999_v22  ;;  %v378_v12 = vunpack.c.l.bf16 %v9899_v56 }
 0x296   : > { %v2206_v10 = vpop.f32.mrb[68].mxu0  ;;  %v11017_v55 = vrot.slane %v2273_v14, %v11004_v3 }
 0x297   : > { %v2217_v11 = vadd.f32 %v2206_v10, %v2060_v37  ;;  %v8880_v20 = vpop.f32.mrb[69].mxu0  ;;  %v2239_v27 = vpack.c.bf16 %v2235_v7, %v2234_v25  ;;  %8299 = vmatpush3.bf16.msra.mxu1 %v9600_v54  ;;  %8333 = vmatpush3.bf16.msra.mxu0 %v9601_v17  ;;  %v11020_v54 = vrot.slane %v2273_v14, %v11006_v16  ;;  %v379_v17 = vunpack.c.h.bf16 %v9899_v56  ;;  %v9902_v7 = vld [vmem:[%s10178_s29 + $0x18] sm:$0xff] }
 0x298   : > { %v2209_v30 = vpop.f32.mrb[70].mxu0  ;;  %8300 = vmatprep.subr.bf16.mxu1 %v9602_v21  ;;  %8334 = vmatprep.subr.bf16.mxu0 %v9603_v23  ;;  %v381_v21 = vunpack.c.h.bf16 %v9900_v50  ;;  %v9901_v23 = vld [vmem:[%s10178_s29 + $0x10] sm:$0xff]  ;;  %v384_v10 = vunpack.c.l.bf16 %v9902_v7  ;;  %v11069_v50 = vld [vmem:[%s10178_s29 + $0x40] sm:$0xff] }
 0x299   : > { %v2230_v45 = vadd.f32 %v7334_v51, %v2217_v11  ;;  %v2218_v34 = vadd.f32 %v2209_v30, %v2061_v40  ;;  %v8881_v58 = vpop.f32.mrb[71].mxu0  ;;  %2498 = vmatmul.mubr.bf16.gmra.mrb[64].mxu1 %v2239_v27  ;;  %2561 = vmatmul.mubr.bf16.gmra.mrb[76].mxu0 %v2239_v27  ;;  %v9614_v40 = vld [vmem:[%s12927_s2 + $0x168] sm:$0xff]   ;;  %v382_v25 = vunpack.c.l.bf16 %v9901_v23  ;;  %v383_v27 = vunpack.c.h.bf16 %v9901_v23 }
 0x29a   : > { %2507 = vmatprep.mubr.bf16.mxu1 %v10781_v9  ;;  %2570 = vmatprep.mubr.bf16.mxu0 %v10781_v9  ;;  %v9611_v9 = vld [vmem:[%s12927_s2 + $0x1e0] sm:$0xff]  }
 0x29b   : > { %v2231_v42 = vadd.f32 %v7334_v51, %v2218_v34  ;;  %8301 = vmatpush3.bf16.msra.mxu1 %v9604_v26  ;;  %8335 = vmatpush3.bf16.msra.mxu0 %v9605_v24  ;;  %v2236_v33 = vmax.f32 %v2230_v45, 0.0  ;;  %v9617_v51 = vld [vmem:[%s12927_s2 + $0x1a8] sm:$0xff]   ;;  %v385_v26 = vunpack.c.h.bf16 %v9902_v7  ;;  %v11025_v24 = vld [vmem:[%s10178_s29 + $0x20] sm:$0xff] }
 0x29c   : > { %8302 = vmatprep.subr.bf16.mxu1 %v9606_v31  ;;  %8336 = vmatprep.subr.bf16.mxu0 %v9607_v32  ;;  %v386_v30 = vunpack.c.l.bf16 %v11025_v24  ;;  %v11029_v31 = vld [vmem:[%s10178_s29 + $0x28] sm:$0xff] }
 0x29d   : > { %v2237_v36 = vmax.f32 %v2231_v42, 0.0  ;;  %v388_v32 = vunpack.c.l.bf16 %v11029_v31 }
 0x29f   : > { %v2240_v37 = vpack.c.bf16 %v2237_v36, %v2236_v33  ;;  %8303 = vmatpush3.bf16.msra.mxu1 %v9608_v59  ;;  %8337 = vmatpush3.bf16.msra.mxu0 %v9609_v35  ;;  %v387_v59 = vunpack.c.h.bf16 %v11025_v24  ;;  %v389_v35 = vunpack.c.h.bf16 %v11029_v31  ;;  %v9627_v31 = vld [vmem:[%s12929_s4 + $0x288] sm:$0xff]  }
 0x2a0   : > { %8304 = vmatprep.subr.bf16.mxu1 %v9610_v1  ;;  %8338 = vmatprep.subr.bf16.mxu0 %v9611_v9 }
 0x2a1   : > { %2508 = vmatmul.mubr.bf16.gmra.mrb[68].mxu1 %v2240_v37  ;;  %2571 = vmatmul.mubr.bf16.gmra.mrb[80].mxu0 %v2240_v37  ;;  %v11039_v37 = vld [vmem:[%s10178_s29 + $0x30] sm:$0xff] }
 0x2a3   : > { %8305 = vmatpush3.bf16.msra.mxu1 %v9612_v38  ;;  %8339 = vmatpush3.bf16.msra.mxu0 %v9613_v39  ;;  %v390_v38 = vunpack.c.l.bf16 %v11039_v37  ;;  %v11043_v39 = vld [vmem:[%s10178_s29 + $0x38] sm:$0xff] }
 0x2a4   : > { %8306 = vmatprep.subr.bf16.mxu1 %v9614_v40  ;;  %8340 = vmatprep.subr.bf16.mxu0 %v9615_v43  ;;  %v392_v40 = vunpack.c.l.bf16 %v11043_v39  ;;  %v393_v14 = vunpack.c.h.bf16 %v11043_v39 }
 0x2a7   : > { %8307 = vmatpush3.bf16.msra.mxu1 %v9616_v46  ;;  %8341 = vmatpush3.bf16.msra.mxu0 %v9617_v51 }
 0x2a8   : > { %8308 = vmatprep.subr.bf16.mxu1 %v9618_v52  ;;  %8342 = vmatprep.subr.bf16.mxu0 %v9619_v61 }
 0x2ab   : > { %8309 = vmatpush3.bf16.msra.mxu1 %v9620_v62  ;;  %8343 = vmatpush3.bf16.msra.mxu0 %v9621_v63  ;;  %v391_v62 = vunpack.c.h.bf16 %v11039_v37 }
 0x2ac   : > { %8310 = vmatprep.subr.bf16.mxu1 %v9622_v2  ;;  %8344 = vmatprep.subr.bf16.mxu0 %v9623_v4 }
 0x2af   : > { %8311 = vmatpush3.bf16.msra.mxu1 %v9624_v6  ;;  %8345 = vmatpush3.bf16.msra.mxu0 %v9625_v8 }
 0x2b0   : > { %8882 = vmatprep.subr.bf16.mxu1 %v12961_v41  ;;  %8910 = vmatprep.subr.bf16.mxu0 %v12961_v41 }
 0x364   : > { %v2489_v11 = vpop.f32.mrb[60].mxu1  ;;  %v2552_v20 = vpop.f32.mrb[72].mxu0 }
 0x365   : > { %v2490_v45 = vadd.f32 %v2489_v11, %v11009_v44  ;;  %v2553_v34 = vadd.f32 %v2552_v20, %v11012_v5  ;;  %v2491_v58 = vpop.f32.mrb[61].mxu1  ;;  %v2554_v42 = vpop.f32.mrb[73].mxu0 }
 0x366   : > { %v2492_v1 = vadd.f32 %v2491_v58, %v11017_v55  ;;  %v2555_v9 = vadd.f32 %v2554_v42, %v11020_v54  ;;  %v2493_v33 = vpop.f32.mrb[62].mxu1  ;;  %v2556_v36 = vpop.f32.mrb[74].mxu0 }
 0x367   : > { %v11046_v43 = vadd.f32 %v2490_v45, %v378_v12  ;;  %v2494_v46 = vadd.f32 %v2493_v33, %v11009_v44  ;;  %v2557_v51 = vadd.f32 %v2556_v36, %v11012_v5  ;;  %v2495_v52 = vpop.f32.mrb[63].mxu1  ;;  %v2558_v61 = vpop.f32.mrb[75].mxu0  ;;  %v11057_v8 = vadd.f32 %v2553_v34, %v380_v48 }
 0x368   : > { %v11051_v63 = vadd.f32 %v2492_v1, %v379_v17  ;;  %v11053_v2 = vadd.f32 %v2555_v9, %v381_v21  ;;  %v2496_v4 = vadd.f32 %v2495_v52, %v11017_v55  ;;  %v2559_v6 = vadd.f32 %v2558_v61, %v11020_v54  ;;  %v11073_v21 = vld [vmem:[%s10178_s29 + $0x48] sm:$0xff]  ;;  %v9626_v61 = vld [vmem:[%s12929_s4 + $0x280] sm:$0xff]  }
 0x369   : > { %v11059_v18 = vadd.f32 %v2494_v46, %v382_v25  ;;  %v11061_v0 = vadd.f32 %v2557_v51, %v384_v10  ;;  %v12943_v48 = vmax.f32 %v11046_v43, 0.0  ;;  %v395_v10 = vunpack.c.h.bf16 %v11069_v50 }
 0x36a   : > { %v11064_v56 = vadd.f32 %v2496_v4, %v383_v27  ;;  %v11066_v12 = vadd.f32 %v2559_v6, %v385_v26  ;;  %v12942_v11 = vmax.f32 %v11051_v63, 0.0  ;;  %v12941_v20 = vmax.f32 %v11053_v2, 0.0 }
 0x36b   : > { %v12938_v25 = vmax.f32 %v11059_v18, 0.0  ;;  %v12939_v7 = vmax.f32 %v11061_v0, 0.0  ;;  %v12940_v34 = vmax.f32 %v11057_v8, 0.0 }
 0x36c   : > { %v12937_v27 = vmax.f32 %v11064_v56, 0.0  ;;  %v12936_v26 = vmax.f32 %v11066_v12, 0.0  ;;  %v2499_v24 = vpop.f32.mrb[64].mxu1  ;;  %v2562_v45 = vpop.f32.mrb[76].mxu0 }
 0x36d   : > { %v2629_v58 = vpack.c.bf16 %v12938_v25, %v12943_v48  ;;  %v2500_v42 = vadd.f32 %v2499_v24, %v11009_v44  ;;  %v2563_v1 = vadd.f32 %v2562_v45, %v11012_v5  ;;  %v2501_v9 = vpop.f32.mrb[65].mxu1  ;;  %v2564_v33 = vpop.f32.mrb[77].mxu0  ;;  %v2631_v4 = vpack.c.bf16 %v12939_v7, %v12940_v34 }
 0x36e   : > { %v2502_v36 = vadd.f32 %v2501_v9, %v11017_v55  ;;  %v2565_v37 = vadd.f32 %v2564_v33, %v11020_v54  ;;  %v2503_v39 = vpop.f32.mrb[66].mxu1  ;;  %v2566_v46 = vpop.f32.mrb[78].mxu0  ;;  %v2630_v51 = vpack.c.bf16 %v12937_v27, %v12942_v11  ;;  %v2632_v52 = vpack.c.bf16 %v12936_v26, %v12941_v20  ;;  %v9628_v26 = vld [vmem:[%s12929_s4 + $0x240] sm:$0xff]  }
 0x36f   : > { %v11108_v6 = vadd.f32 %v2500_v42, %v386_v30  ;;  %v2504_v24 = vadd.f32 %v2503_v39, %v11009_v44  ;;  %v2567_v45 = vadd.f32 %v2566_v46, %v11012_v5  ;;  %v2505_v9 = vpop.f32.mrb[67].mxu1  ;;  %v2568_v33 = vpop.f32.mrb[79].mxu0  ;;  %v11123_v42 = vadd.f32 %v2563_v1, %v388_v32 }
 0x370   : > { %v11115_v27 = vadd.f32 %v2502_v36, %v387_v59  ;;  %v11117_v25 = vadd.f32 %v2565_v37, %v389_v35  ;;  %v2506_v7 = vadd.f32 %v2505_v9, %v11017_v55  ;;  %v2569_v30 = vadd.f32 %v2568_v33, %v11020_v54  ;;  %2938 = vmatprep.mubr.bf16.mxu1 %v2630_v51  ;;  %v9909_v37 = vld [vmem:[%s10178_s29 + $0x50] sm:$0xff]  ;;  %v9910_v51 = vld [vmem:[%s10178_s29 + $0x58] sm:$0xff] }
 0x371   : > { %v11125_v39 = vadd.f32 %v2504_v24, %v390_v38  ;;  %v11127_v46 = vadd.f32 %v2567_v45, %v392_v40  ;;  %2995 = vmatprep.mubr.bf16.mxu0 %v2632_v52  ;;  %2939 = vmatmul.mubr.bf16.vlgmr.msra.gmra.mrb[72].mxu1 %v2629_v58  ;;  %v397_v59 = vunpack.c.h.bf16 %v11073_v21  ;;  %v398_v9 = vunpack.c.l.bf16 %v9909_v37 }
 0x372   : > { %v11130_v36 = vadd.f32 %v2506_v7, %v391_v62  ;;  %v11132_v35 = vadd.f32 %v2569_v30, %v393_v14  ;;  %2996 = vmatmul.mubr.bf16.vlgmr.msra.gmra.mrb[84].mxu0 %v2631_v4  ;;  %v400_v33 = vunpack.c.l.bf16 %v9910_v51  ;;  %8883 = vmatpush3.bf16.msra.mxu1 %v9626_v61  ;;  %v399_v40 = vunpack.c.h.bf16 %v9909_v37 }
 0x373   : > { %v12946_v32 = vmax.f32 %v11125_v39, 0.0  ;;  %v12947_v38 = vmax.f32 %v11127_v46, 0.0  ;;  %v401_v58 = vunpack.c.h.bf16 %v9910_v51  ;;  %8884 = vmatprep.subr.bf16.mxu1 %v12961_v41  ;;  %8911 = vmatpush3.bf16.msra.mxu0 %v9628_v26  ;;  %v12958_v62 = vmax.f32 %v11115_v27, 0.0 }
 0x374   : > { %v12957_v14 = vmax.f32 %v11117_v25, 0.0  ;;  %v12944_v7 = vmax.f32 %v11130_v36, 0.0  ;;  %v12945_v1 = vmax.f32 %v11132_v35, 0.0  ;;  %v2509_v52 = vpop.f32.mrb[68].mxu1  ;;  %v2572_v61 = vpop.f32.mrb[80].mxu0  ;;  %8912 = vmatprep.subr.bf16.mxu0 %v12961_v41  ;;  %v12959_v4 = vmax.f32 %v11108_v6, 0.0 }
 0x375   : > { %v12956_v24 = vmax.f32 %v11123_v42, 0.0  ;;  %v2510_v45 = vadd.f32 %v2509_v52, %v11009_v44  ;;  %v2573_v26 = vadd.f32 %v2572_v61, %v11012_v5  ;;  %v2511_v30 = vpop.f32.mrb[69].mxu1  ;;  %v2574_v37 = vpop.f32.mrb[81].mxu0 }
 0x376   : > { %v2512_v51 = vadd.f32 %v2511_v30, %v11017_v55  ;;  %v2575_v34 = vadd.f32 %v2574_v37, %v11020_v54  ;;  %v2513_v20 = vpop.f32.mrb[70].mxu1  ;;  %v2576_v11 = vpop.f32.mrb[82].mxu0  ;;  %v2634_v48 = vpack.c.bf16 %v12944_v7, %v12958_v62  ;;  %v2636_v52 = vpack.c.bf16 %v12945_v1, %v12957_v14  ;;  %8885 = vmatpush3.bf16.msra.mxu1 %v9627_v31 }
 0x377   : > { %v2514_v61 = vadd.f32 %v2513_v20, %v11009_v44  ;;  %v2577_v23 = vadd.f32 %v2576_v11, %v11012_v5  ;;  %v2515_v30 = vpop.f32.mrb[71].mxu1  ;;  %v2578_v17 = vpop.f32.mrb[83].mxu0  ;;  %v2633_v37 = vpack.c.bf16 %v12946_v32, %v12959_v4  ;;  %v2635_v7 = vpack.c.bf16 %v12947_v38, %v12956_v24  ;;  %8886 = vmatprep.subr.bf16.mxu1 %v12961_v41 }
 0x378   : > { %v11174_v31 = vadd.f32 %v2512_v51, %v395_v10  ;;  %v11176_v44 = vadd.f32 %v2575_v34, %v397_v59  ;;  %v2516_v5 = vadd.f32 %v2515_v30, %v11017_v55  ;;  %v2579_v11 = vadd.f32 %v2578_v17, %v11020_v54  ;;  %2946 = vmatprep.mubr.bf16.mxu1 %v2634_v48  ;;  %v9633_v30 = vld [vmem:[%s12929_s4 + $0x2a0] sm:$0xff]  }
 0x379   : > { %v13030_v20 = vunpack.c.l.bf16 %v11069_v50  ;;  %v11184_v32 = vadd.f32 %v2514_v61, %v398_v9  ;;  %v11186_v38 = vadd.f32 %v2577_v23, %v400_v33  ;;  %3003 = vmatprep.mubr.bf16.mxu0 %v2636_v52  ;;  %2947 = vmatmul.mubr.bf16.gmra.mrb[76].mxu1 %v2633_v37  ;;  %v13031_v10 = vunpack.c.l.bf16 %v11073_v21  ;;  %v9631_v52 = vld [vmem:[%s12929_s4 + $0x298] sm:$0xff]   ;;  %v9632_v61 = vld [vmem:[%s12929_s4 + $0x250] sm:$0xff]  }
 0x37a   : > { %v11192_v34 = vadd.f32 %v2516_v5, %v399_v40  ;;  %v11194_v55 = vadd.f32 %v2579_v11, %v401_v58  ;;  %3004 = vmatmul.mubr.bf16.gmra.mrb[88].mxu0 %v2635_v7  ;;  %v12955_v54 = vmax.f32 %v11174_v31, 0.0  ;;  %v12954_v17 = vmax.f32 %v11176_v44, 0.0  ;;  %v9634_v37 = vld [vmem:[%s12929_s4 + $0x258] sm:$0xff]   ;;  %v9635_v5 = vld [vmem:[%s12929_s4 + $0x2a8] sm:$0xff]   ;;  %v9636_v11 = vld [vmem:[%s12929_s4 + $0x260] sm:$0xff]  }
 0x37b   : > { %v11182_v1 = vadd.f32 %v2510_v45, %v13030_v20  ;;  %v11190_v51 = vadd.f32 %v2573_v26, %v13031_v10  ;;  %v12952_v50 = vmax.f32 %v11184_v32, 0.0  ;;  %v12951_v23 = vmax.f32 %v11186_v38, 0.0  ;;  %v9629_v45 = vld [vmem:[%s12929_s4 + $0x290] sm:$0xff]   ;;  %v9630_v26 = vld [vmem:[%s12929_s4 + $0x248] sm:$0xff]  }
 0x37c   : > { %13033 = vst [vmem:[#allocation13_spill] sm:$0xff] %v11192_v34  ;;  %13034 = vst [vmem:[#allocation14_spill] sm:$0xff] %v11194_v55  ;;  %v12949_v48 = vmax.f32 %v11192_v34, 0.0  ;;  %v12948_v59 = vmax.f32 %v11194_v55, 0.0  ;;  %8887 = vmatpush3.bf16.msra.mxu1 %v9629_v45  ;;  %8913 = vmatpush3.bf16.msra.mxu0 %v9630_v26  ;;  %v9637_v20 = vld [vmem:[%s12929_s4 + $0x2b0] sm:$0xff]   ;;  %v9638_v10 = vld [vmem:[%s12929_s4 + $0x268] sm:$0xff]  }
 0x37d   : > { %13032 = vst [vmem:[#allocation12_spill] sm:$0xff] %v11190_v51  ;;  %v12953_v21 = vmax.f32 %v11182_v1, 0.0  ;;  %v12950_v9 = vmax.f32 %v11190_v51, 0.0  ;;  %8888 = vmatprep.subr.bf16.mxu1 %v12961_v41  ;;  %8914 = vmatprep.subr.bf16.mxu0 %v12961_v41  ;;  %v11279_v26 = vld [vmem:[%s12928_s3 + $0x1] ss:$0 sm:$0xff] }
 0x37e   : > { %v2638_v33 = vpack.c.bf16 %v12949_v48, %v12955_v54  ;;  %v2640_v40 = vpack.c.bf16 %v12948_v59, %v12954_v17 }
 0x37f   : > { %v2637_v58 = vpack.c.bf16 %v12952_v50, %v12953_v21  ;;  %v2639_v7 = vpack.c.bf16 %v12951_v23, %v12950_v9  ;;  %v3038_v9 = vld [vmem:[#allocation2] sm:$0xf8] }
 0x380   : > { %2954 = vmatprep.mubr.bf16.mxu1 %v2638_v33  ;;  %3011 = vmatprep.mubr.bf16.mxu0 %v2640_v40  ;;  %v9639_v33 = vld [vmem:[%s12929_s4 + $0x2b8] sm:$0xff]   ;;  %v9640_v40 = vld [vmem:[%s12929_s4 + $0x270] sm:$0xff]   ;;  %v3197_v21 = vshrl.u32 %v3038_v9, 16  ;;  %v3200_v17 = vshll.u32 %v3038_v9, 16 }
 0x381   : > { %2955 = vmatmul.mubr.bf16.gmra.mrb[80].mxu1 %v2637_v58  ;;  %8915 = vmatpush3.bf16.msra.mxu0 %v9632_v61  ;;  %v9641_v58 = vld [vmem:[%s12929_s4 + $0x278] sm:$0xff]  }
 0x382   : > { %3012 = vmatmul.mubr.bf16.gmra.mrb[92].mxu0 %v2639_v7  ;;  %8898 = vmatprep.mubr.msk.bf16.mxu1 %vm9985_vm6, %v12961_v41  ;;  %v3202_v24 = vrot.slane %v3200_v17, 4 }
 0x383   : > { %8926 = vmatprep.mubr.msk.bf16.mxu0 %vm9985_vm6, %v12961_v41  ;;  %8889 = vmatpush3.bf16.msra.mxu1 %v9631_v52 }
 0x384   : > { %8890 = vmatprep.subr.bf16.mxu1 %v12961_v41  ;;  %8916 = vmatprep.subr.bf16.mxu0 %v12961_v41 }
 0x385   : > { %8917 = vmatpush3.bf16.msra.mxu0 %v9634_v37 }
 0x386   : > { %8918 = vmatprep.subr.bf16.mxu0 %v12961_v41 }
 0x387   : > { %8891 = vmatpush3.bf16.msra.mxu1 %v9633_v30 }
 0x388   : > { %8892 = vmatprep.subr.bf16.mxu1 %v12961_v41 }
 0x389   : > { %8919 = vmatpush3.bf16.msra.mxu0 %v9636_v11 }
 0x38a   : > { %8920 = vmatprep.subr.bf16.mxu0 %v12961_v41 }
 0x38b   : > { %8893 = vmatpush3.bf16.msra.mxu1 %v9635_v5 }
 0x38c   : > { %8894 = vmatprep.subr.bf16.mxu1 %v12961_v41 }
 0x38d   : > { %8921 = vmatpush3.bf16.msra.mxu0 %v9638_v10 }
 0x38e   : > { %8922 = vmatprep.subr.bf16.mxu0 %v12961_v41 }
 0x38f   : > { %8895 = vmatpush3.bf16.msra.mxu1 %v9637_v20 }
 0x390   : > { %8896 = vmatprep.subr.bf16.mxu1 %v12961_v41 }
 0x391   : > { %8923 = vmatpush3.bf16.msra.mxu0 %v9640_v40 }
 0x392   : > { %8924 = vmatprep.subr.bf16.mxu0 %v12961_v41 }
 0x393   : > { %8897 = vmatpush3.bf16.msra.mxu1 %v9639_v33 }
 0x394   : > { %8938 = vmatprep.subr.bf16.mxu1 %v12961_v41 }
 0x395   : > { %8925 = vmatpush3.bf16.msra.mxu0 %v9641_v58 }
 0x396   : > { %8966 = vmatprep.subr.bf16.mxu0 %v12961_v41 }
 0x444   : > { %v8312_v7 = vpop.f32.mrb[72].mxu1 }
 0x445   : > { %v8346_v45 = vpop.f32.mrb[84].mxu0  ;;  %v8313_v52 = vpop.f32.mrb[73].mxu1 }
 0x446   : > { %v8314_v61 = vadd.f32 %v8313_v52, %v8312_v7  ;;  %v8347_v30 = vpop.f32.mrb[85].mxu0  ;;  %v8315_v37 = vpop.f32.mrb[74].mxu1  ;;  %v11288_v52 = vld [vmem:[#allocation2] sm:$0xf0] }
 0x447   : > { %v8348_v5 = vadd.f32 %v8347_v30, %v8346_v45  ;;  %v8349_v11 = vpop.f32.mrb[86].mxu0  ;;  %v8316_v20 = vpop.f32.mrb[75].mxu1 }
 0x448   : > { %v2941_v10 = vadd.f32 %v8314_v61, %v11279_v26  ;;  %v8317_v33 = vadd.f32 %v8316_v20, %v8315_v37  ;;  %v8350_v40 = vpop.f32.mrb[87].mxu0 }
 0x449   : > { %v8351_v58 = vadd.f32 %v8350_v40, %v8349_v11  ;;  %v3081_v40 = vrot.slane %v11288_v52, 4 }
 0x44a   : > { %v11282_v59 = vadd.f32 %v8348_v5, %v2941_v10  ;;  %v2944_v48 = vadd.f32 %v8317_v33, %v11279_v26 }
 0x44c   : > { %v12960_v23 = vmax.f32 %v11282_v59, 0.0  ;;  %v11286_v50 = vadd.f32 %v8351_v58, %v2944_v48  ;;  %v8318_v7 = vpop.f32.mrb[76].mxu1 }
 0x44d   : > { %v8352_v45 = vpop.f32.mrb[88].mxu0  ;;  %v8319_v30 = vpop.f32.mrb[77].mxu1 }
 0x44e   : > { %v12963_v61 = vmax.f32 %v11286_v50, 0.0  ;;  %v8320_v37 = vadd.f32 %v8319_v30, %v8318_v7  ;;  %v8353_v11 = vpop.f32.mrb[89].mxu0  ;;  %v8321_v5 = vpop.f32.mrb[78].mxu1  ;;  %v3026_v48 = vsel %vm360_vm7, %v12960_v23, 0.0  ;;  %v9642_v23 = vld [vmem:[%s12929_s4 + $0x2c0] sm:$0xff]  }
 0x44f   : > { %v8354_v20 = vadd.f32 %v8353_v11, %v8352_v45  ;;  %v8355_v10 = vpop.f32.mrb[90].mxu0  ;;  %v8322_v33 = vpop.f32.mrb[79].mxu1  ;;  %v3199_v11 = vrot.slane %v3197_v21, 3 }
 0x450   : > { %v3027_v9 = vsel %vm361_vm10, %v12963_v61, 0.0  ;;  %v2949_v58 = vadd.f32 %v8320_v37, %v11279_v26  ;;  %v8323_v7 = vadd.f32 %v8322_v33, %v8321_v5  ;;  %v8356_v30 = vpop.f32.mrb[91].mxu0 }
 0x451   : > { %v3032_v54 = vpack.c.bf16 %v3027_v9, %v3026_v48  ;;  %v8357_v45 = vadd.f32 %v8356_v30, %v8355_v10  ;;  %v3203_v33 = vor.u32 %v3202_v24, %v3199_v11  ;;  %v9644_v24 = vld [vmem:[%s12929_s4 + $0x300] sm:$0xff]   ;;  %v13035_v11 = vmov 0.0  }
 0x452   : > { %v11301_v14 = vadd.f32 %v8354_v20, %v2949_v58  ;;  %v2952_v62 = vadd.f32 %v8323_v7, %v11279_v26 }
 0x453   : > { %3035 = vst [vmem:[#allocation2 + $0x8] sm:$0xff] %v3032_v54  ;;  %v3082_v4 = vrot.slane %v3032_v54, 4  ;;  %v11307_v41 = vshrl.u32 %v3032_v54, 16  ;;  %v11309_v61 = vshll.u32 %v3032_v54, 16 }
 0x454   : > { %v11312_v5 = vadd.f32 %v8357_v45, %v2952_v62  ;;  %v8324_v21 = vpop.f32.mrb[80].mxu1 }
 0x455   : > { %v8358_v17 = vpop.f32.mrb[92].mxu0  ;;  %v8325_v20 = vpop.f32.mrb[81].mxu1  ;;  %v3083_v10 = vsel %vm899_vm8, %v3081_v40, %v3082_v4  ;;  %v3207_v48 = vrot.slane %v11307_v41, 3  ;;  %v3210_v9 = vrot.slane %v11309_v61, 4  ;;  %v9643_v40 = vld [vmem:[%s12929_s4 + $0x2c8] sm:$0xff]   ;;  %v3366_v57 = vrot.slane %v11309_v61, 5 }
 0x456   : > { %v12969_v58 = vmax.f32 %v11312_v5, 0.0  ;;  %v8326_v7 = vadd.f32 %v8325_v20, %v8324_v21  ;;  %v8359_v30 = vpop.f32.mrb[93].mxu0  ;;  %v8327_v54 = vpop.f32.mrb[82].mxu1  ;;  %8899 = vmatmul.mubr.bf16.vlgmr.msra.gmra.mrb[84].mxu1 %v3083_v10  ;;  %v3801_v21 = vrot.slane %v11309_v61, 1  ;;  %v13036_v20 = vmax.f32 %v11301_v14, 0.0 }
 0x457   : > { %v8360_v49 = vadd.f32 %v8359_v30, %v8358_v17  ;;  %v8361_v37 = vpop.f32.mrb[94].mxu0  ;;  %v8328_v62 = vpop.f32.mrb[83].mxu1  ;;  %8939 = vmatpush3.bf16.msra.mxu1 %v9642_v23  ;;  %v3211_v45 = vor.u32 %v3210_v9, %v3207_v48  ;;  %8902 = vmatprep.mubr.msk.bf16.mxu1 %vm9985_vm6, %v13035_v11 }
 0x458   : > { %v3028_v17 = vsel %vm362_vm9, %v13036_v20, 0.0  ;;  %v3029_v23 = vsel %vm363_vm12, %v12969_v58, 0.0  ;;  %v2957_v10 = vadd.f32 %v8326_v7, %v11279_v26  ;;  %v8329_v48 = vadd.f32 %v8328_v62, %v8327_v54  ;;  %v8362_v9 = vpop.f32.mrb[95].mxu0  ;;  %8940 = vmatprep.subr.bf16.mxu1 %v13035_v11  ;;  %v9645_v7 = vld [vmem:[%s12929_s4 + $0x2d0] sm:$0xff]  }
 0x459   : > { %v3033_v30 = vpack.c.bf16 %v3029_v23, %v3028_v17  ;;  %v8363_v28 = vadd.f32 %v8362_v9, %v8361_v37  ;;  %v3212_v55 = vsel %vm1015_vm11, %v3203_v33, %v3211_v45  ;;  %v11342_v20 = vor.u32 %v3801_v21, %v11307_v41  ;;  %v9646_v37 = vld [vmem:[%s12929_s4 + $0x308] sm:$0xff]   ;;  %v9650_v9 = vld [vmem:[%s12929_s4 + $0x318] sm:$0xff]  }
 0x45a   : > { %v11338_v34 = vadd.f32 %v8360_v49, %v2957_v10  ;;  %v2960_v47 = vadd.f32 %v8329_v48, %v11279_v26  ;;  %8927 = vmatmul.mubr.bf16.vlgmr.msra.gmra.mrb[96].mxu0 %v3212_v55  ;;  %v9649_v48 = vld [vmem:[%s12929_s4 + $0x2e0] sm:$0xff]  }
 0x45b   : > { %8941 = vmatpush3.bf16.msra.mxu1 %v9643_v40  ;;  %8967 = vmatpush3.bf16.msra.mxu0 %v9644_v24  ;;  %v11344_v58 = vrot.slane %v3033_v30, 4  ;;  %v11352_v49 = vshrl.u32 %v3033_v30, 16  ;;  %v11354_v33 = vshll.u32 %v3033_v30, 16 }
 0x45c   : > { %v12971_v55 = vmax.f32 %v11338_v34, 0.0  ;;  %v11357_v26 = vadd.f32 %v8363_v28, %v2960_v47  ;;  %8942 = vmatprep.subr.bf16.mxu1 %v13035_v11  ;;  %8968 = vmatprep.subr.bf16.mxu0 %v13035_v11  ;;  %v9647_v47 = vld [vmem:[%s12929_s4 + $0x2d8] sm:$0xff]  }
 0x45d   : > { %v3085_v54 = vsel %vm899_vm8, %v3082_v4, %v11344_v58  ;;  %8930 = vmatprep.mubr.msk.bf16.mxu0 %vm9985_vm6, %v13035_v11  ;;  %v3216_v62 = vrot.slane %v11352_v49, 3  ;;  %v3219_v40 = vrot.slane %v11354_v33, 4  ;;  %v9648_v4 = vld [vmem:[%s12929_s4 + $0x310] sm:$0xff]  }
 0x45e   : > { %v12970_v24 = vmax.f32 %v11357_v26, 0.0  ;;  %8903 = vmatmul.mubr.bf16.gmra.mrb[88].mxu1 %v3085_v54  ;;  %v3030_v21 = vsel %vm364_vm13, %v12971_v55, 0.0  ;;  %v9651_v54 = vld [vmem:[%s12929_s4 + $0x2e8] sm:$0xff]  }
 0x45f   : > { %8943 = vmatpush3.bf16.msra.mxu1 %v9645_v7  ;;  %8969 = vmatpush3.bf16.msra.mxu0 %v9646_v37  ;;  %v11368_v28 = vor.u32 %v3219_v40, %v3216_v62  ;;  %v3369_v7 = vrot.slane %v11352_v49, 4  ;;  %v3370_v37 = vrot.slane %v11354_v33, 5  ;;  %v9652_v62 = vld [vmem:[%s12929_s4 + $0x320] sm:$0xff]  }
 0x460   : > { %v3031_v17 = vsel %vm365_vm14, %v12970_v24, 0.0  ;;  %8944 = vmatprep.subr.bf16.mxu1 %v13035_v11  ;;  %8970 = vmatprep.subr.bf16.mxu0 %v13035_v11 }
 0x461   : > { %v11386_v23 = vpack.c.bf16 %v3031_v17, %v3030_v21  ;;  %v3221_v10 = vsel %vm1015_vm11, %v3211_v45, %v11368_v28  ;;  %8906 = vmatprep.mubr.msk.bf16.mxu1 %vm9985_vm6, %v13035_v11 }
 0x462   : > { %8931 = vmatmul.mubr.bf16.gmra.mrb[100].mxu0 %v3221_v10  ;;  %v11423_v10 = vor.u32 %v3370_v37, %v3369_v7 }
 0x463   : > { %3037 = vst [vmem:[#allocation2 + $0x18] sm:$0xff] %v11386_v23  ;;  %8945 = vmatpush3.bf16.msra.mxu1 %v9647_v47  ;;  %8971 = vmatpush3.bf16.msra.mxu0 %v9648_v4  ;;  %v11400_v30 = vshrl.u32 %v11386_v23, 16  ;;  %v11405_v45 = vshll.u32 %v11386_v23, 16  ;;  %v3358_v47 = vshrl.u32 %v11288_v52, 16  ;;  %v3361_v4 = vshll.u32 %v11288_v52, 16  ;;  %v9654_v52 = vld [vmem:[%s12929_s4 + $0x328] sm:$0xff]  }
 0x464   : > { %8946 = vmatprep.subr.bf16.mxu1 %v13035_v11  ;;  %8972 = vmatprep.subr.bf16.mxu0 %v13035_v11 }
 0x465   : > { %8934 = vmatprep.mubr.msk.bf16.mxu0 %vm9985_vm6, %v13035_v11  ;;  %v4269_v40 = vrot.slane %v11400_v30, 4  ;;  %v4270_v21 = vrot.slane %v11405_v45, 5  ;;  %v3360_v7 = vrot.slane %v3358_v47, 4  ;;  %v3363_v37 = vrot.slane %v3361_v4, 5  ;;  %v9655_v47 = vld [vmem:[%s12929_s4 + $0x2f8] sm:$0xff]   ;;  %v9656_v4 = vld [vmem:[%s12929_s4 + $0x330] sm:$0xff]  }
 0x467   : > { %8947 = vmatpush3.bf16.msra.mxu1 %v9649_v48  ;;  %8973 = vmatpush3.bf16.msra.mxu0 %v9650_v9  ;;  %v11425_v48 = vor.u32 %v4270_v21, %v4269_v40  ;;  %v3365_v40 = vrot.slane %v11307_v41, 4 }
 0x468   : > { %8948 = vmatprep.subr.bf16.mxu1 %v13035_v11  ;;  %8974 = vmatprep.subr.bf16.mxu0 %v13035_v11 }
 0x46a   : > { %v3041_v17 = vld [vmem:[#allocation2 + $0x18] sm:$0xf] }
 0x46b   : > { %v3086_v9 = vrot.slane %v3041_v17, 4  ;;  %v3223_v24 = vshrl.u32 %v3041_v17, 16  ;;  %v3226_v55 = vshll.u32 %v3041_v17, 16  ;;  %8949 = vmatpush3.bf16.msra.mxu1 %v9651_v54  ;;  %8975 = vmatpush3.bf16.msra.mxu0 %v9652_v62  ;;  %v11439_v54 = vsel %vm1177_vm15, %v11423_v10, %v11425_v48 }
 0x46c   : > { %8950 = vmatprep.subr.bf16.mxu1 %v13035_v11  ;;  %8976 = vmatprep.subr.bf16.mxu0 %v13035_v11 }
 0x46d   : > { %v3087_v62 = vsel %vm899_vm8, %v11344_v58, %v3086_v9  ;;  %v3225_v21 = vrot.slane %v3223_v24, 3  ;;  %v3228_v17 = vrot.slane %v3226_v55, 4  ;;  %v3516_v55 = vshrl.u32 %v3496_v13, 16  ;;  %v9658_v13 = vld [vmem:[%s12929_s4 + $0x340] sm:$0xff]  }
 0x46e   : > { %8907 = vmatmul.mubr.bf16.gmra.mrb[92].mxu1 %v3087_v62  ;;  %v3367_v9 = vor.u32 %v3366_v57, %v3365_v40  ;;  %v9657_v62 = vld [vmem:[%s12929_s4 + $0x338] sm:$0xff]   ;;  %v9660_v40 = vld [vmem:[%s12929_s4 + $0x380] sm:$0xff]  }
 0x46f   : > { %v3229_v51 = vor.u32 %v3228_v17, %v3225_v21  ;;  %8951 = vmatpush3.bf16.msra.mxu1 %v9653_v60  ;;  %8977 = vmatpush3.bf16.msra.mxu0 %v9654_v52  ;;  %v3364_v60 = vor.u32 %v3363_v37, %v3360_v7  ;;  %v3519_v52 = vrot.slane %v11307_v41, 7  ;;  %v3518_v41 = vrot.slane %v3516_v55, 7  ;;  %v3339_v7 = vld [vmem:[#allocation2 + $0x18] sm:$0x1f]  ;;  %v9659_v37 = vld [vmem:[%s12929_s4 + $0x348] sm:$0xff]  }
 0x470   : > { %8952 = vmatprep.subr.bf16.mxu1 %v13035_v11  ;;  %8978 = vmatprep.subr.bf16.mxu0 %v13035_v11  ;;  %v3374_v17 = vshrl.u32 %v3339_v7, 16  ;;  %v9662_v55 = vld [vmem:[%s12929_s4 + $0x388] sm:$0xff]  }
 0x471   : > { %v3230_v24 = vsel %vm1015_vm11, %v11368_v28, %v3229_v51  ;;  %8954 = vmatprep.mubr.msk.bf16.mxu1 %vm9985_vm6, %v13035_v11  ;;  %v3368_v51 = vsel %vm1177_vm15, %v3364_v60, %v3367_v9  ;;  %v3520_v57 = vor.u32 %v3519_v52, %v11309_v61  ;;  %v3522_v61 = vrot.slane %v11352_v49, 7 }
 0x472   : > { %8935 = vmatmul.mubr.bf16.gmra.mrb[104].mxu0 %v3230_v24  ;;  %v3372_v24 = vsel %vm1177_vm15, %v3367_v9, %v11423_v10 }
 0x473   : > { %8953 = vmatpush3.bf16.msra.mxu1 %v9655_v47  ;;  %8979 = vmatpush3.bf16.msra.mxu0 %v9656_v4  ;;  %v3521_v21 = vsel %vm1336_vm0, %v3518_v41, %v3520_v57  ;;  %v3377_v47 = vshll.u32 %v3339_v7, 16  ;;  %v9661_v4 = vld [vmem:[%s12929_s4 + $0x350] sm:$0xff]   ;;  %v3523_v60 = vor.u32 %v3522_v61, %v11354_v33  ;;  %v3528_v7 = vrot.slane %v11400_v30, 7 }
 0x474   : > { %8980 = vmatprep.subr.bf16.mxu0 %v13035_v11  ;;  %8994 = vmatprep.subr.bf16.mxu1 %v13035_v11  ;;  %v9664_v41 = vld [vmem:[%s12929_s4 + $0x390] sm:$0xff]  }
 0x475   : > { %8982 = vmatprep.mubr.msk.bf16.mxu0 %vm9985_vm6, %v13035_v11  ;;  %v3524_v9 = vsel %vm1336_vm0, %v3519_v52, %v3523_v60  ;;  %v9672_v60 = vld [vmem:[%s12929_s4 + $0x3b0] sm:$0xff]  }
 0x476   : > { %8955 = vmatmul.mubr.bf16.vlgmr.msra.gmra.mrb[96].mxu1 %v3368_v51  ;;  %v9663_v51 = vld [vmem:[%s12929_s4 + $0x358] sm:$0xff]  }
 0x477   : > { %8981 = vmatpush3.bf16.msra.mxu0 %v9657_v62  ;;  %8995 = vmatpush3.bf16.msra.mxu1 %v9658_v13  ;;  %v3376_v62 = vrot.slane %v3374_v17, 4  ;;  %v3379_v13 = vrot.slane %v3377_v47, 5  ;;  %v9667_v17 = vld [vmem:[%s12929_s4 + $0x368] sm:$0xff]   ;;  %v9668_v47 = vld [vmem:[%s12929_s4 + $0x3a0] sm:$0xff]  }
 0x478   : > { %8996 = vmatprep.subr.bf16.mxu1 %v13035_v11  ;;  %9022 = vmatprep.subr.bf16.mxu0 %v13035_v11 }
 0x479   : > { %8958 = vmatprep.mubr.msk.bf16.mxu1 %vm9985_vm6, %v13035_v11  ;;  %v3380_v57 = vor.u32 %v3379_v13, %v3376_v62  ;;  %v9673_v62 = vld [vmem:[%s12929_s4 + $0x3b8] sm:$0xff]   ;;  %v9674_v13 = vld [vmem:[%s12929_s4 + $0x3c0] sm:$0xff]  }
 0x47a   : > { %8983 = vmatmul.mubr.bf16.vlgmr.msra.gmra.mrb[108].mxu0 %v3521_v21  ;;  %v3531_v21 = vor.u32 %v11405_v45, %v3528_v7  ;;  %v9675_v7 = vld [vmem:[%s12929_s4 + $0x3c8] sm:$0xff]  }
 0x47b   : > { %8997 = vmatpush3.bf16.msra.mxu1 %v9659_v37  ;;  %9023 = vmatpush3.bf16.msra.mxu0 %v9660_v40  ;;  %v9665_v37 = vld [vmem:[%s12929_s4 + $0x360] sm:$0xff]   ;;  %v9666_v40 = vld [vmem:[%s12929_s4 + $0x398] sm:$0xff]   ;;  %v3381_v52 = vsel %vm1177_vm15, %v11423_v10, %v3380_v57 }
 0x47c   : > { %8998 = vmatprep.subr.bf16.mxu1 %v13035_v11  ;;  %9024 = vmatprep.subr.bf16.mxu0 %v13035_v11 }
 0x47d   : > { %8986 = vmatprep.mubr.msk.bf16.mxu0 %vm9985_vm6, %v13035_v11 }
 0x47e   : > { %8959 = vmatmul.mubr.bf16.gmra.mrb[100].mxu1 %v3372_v24  ;;  %v9670_v24 = vld [vmem:[%s12929_s4 + $0x3a8] sm:$0xff]  }
 0x47f   : > { %8999 = vmatpush3.bf16.msra.mxu1 %v9661_v4  ;;  %9025 = vmatpush3.bf16.msra.mxu0 %v9662_v55  ;;  %v3532_v4 = vsel %vm1336_vm0, %v3522_v61, %v3531_v21  ;;  %v9669_v55 = vld [vmem:[%s12929_s4 + $0x370] sm:$0xff]   ;;  %v9671_v61 = vld [vmem:[%s12929_s4 + $0x378] sm:$0xff]  }
 0x480   : > { %9000 = vmatprep.subr.bf16.mxu1 %v13035_v11  ;;  %9026 = vmatprep.subr.bf16.mxu0 %v13035_v11 }
 0x481   : > { %8962 = vmatprep.mubr.msk.bf16.mxu1 %vm9985_vm6, %v13035_v11 }
 0x482   : > { %8987 = vmatmul.mubr.bf16.gmra.mrb[112].mxu0 %v3524_v9  ;;  %v13038_v9 = vmax.f32 %v11286_v50, 0.0 }
 0x483   : > { %9001 = vmatpush3.bf16.msra.mxu1 %v9663_v51  ;;  %9027 = vmatpush3.bf16.msra.mxu0 %v9664_v41  ;;  %v3806_v51 = vrot.slane %v11354_v33, 1  ;;  %v13037_v41 = vmax.f32 %v11282_v59, 0.0  ;;  %v9677_v59 = vld [vmem:[%s12929_s4 + $0x3d0] sm:$0xff]   ;;  %v9678_v33 = vld [vmem:[%s12929_s4 + $0x408] sm:$0xff]  }
 0x484   : > { %9002 = vmatprep.subr.bf16.mxu1 %v13035_v11  ;;  %9028 = vmatprep.subr.bf16.mxu0 %v13035_v11 }
 0x485   : > { %8990 = vmatprep.mubr.msk.bf16.mxu0 %vm9985_vm6, %v13035_v11  ;;  %v9923_v57 = vpack.c.bf16 %v13038_v9, %v13037_v41  ;;  %v3807_v50 = vsel %vm1618_vm2, %v11342_v20, %v3806_v51  ;;  %v3814_v20 = vrot.slane %v11405_v45, 1  ;;  %v3938_v41 = vld [vmem:[#allocation2 + $0x8] sm:$0xf8] }
 0x486   : > { %8963 = vmatmul.mubr.bf16.gmra.mrb[104].mxu1 %v3381_v52  ;;  %v13040_v52 = vmax.f32 %v11312_v5, 0.0  ;;  %v9683_v9 = vld [vmem:[%s12929_s4 + $0x3e8] sm:$0xff]  }
 0x487   : > { %9003 = vmatpush3.bf16.msra.mxu1 %v9665_v37  ;;  %9029 = vmatpush3.bf16.msra.mxu0 %v9666_v40  ;;  %v9676_v37 = vld [vmem:[%s12929_s4 + $0x400] sm:$0xff]   ;;  %v13039_v40 = vmax.f32 %v11301_v14, 0.0 }
 0x488   : > { %9004 = vmatprep.subr.bf16.mxu1 %v13035_v11  ;;  %9030 = vmatprep.subr.bf16.mxu0 %v13035_v11 }
 0x489   : > { %9010 = vmatprep.mubr.msk.bf16.mxu1 %vm9985_vm6, %v13035_v11  ;;  %v9926_v21 = vpack.c.bf16 %v13040_v52, %v13039_v40  ;;  %v9688_v40 = vld [vmem:[%s12929_s4 + $0x430] sm:$0xff]  }
 0x48a   : > { %8991 = vmatmul.mubr.bf16.gmra.mrb[116].mxu0 %v3532_v4  ;;  %v9679_v4 = vld [vmem:[%s12929_s4 + $0x3d8] sm:$0xff]  }
 0x48b   : > { %9005 = vmatpush3.bf16.msra.mxu1 %v9667_v17  ;;  %9031 = vmatpush3.bf16.msra.mxu0 %v9668_v47  ;;  %v3778_v17 = vld [vmem:[#allocation2 + $0x20] sm:$0x1]  ;;  %v3810_v47 = vor.u32 %v3806_v51, %v11352_v49 }
 0x48c   : > { %9006 = vmatprep.subr.bf16.mxu1 %v13035_v11  ;;  %9032 = vmatprep.subr.bf16.mxu0 %v13035_v11  ;;  %v3820_v5 = vshll.u32 %v3778_v17, 16  ;;  %v9681_v49 = vld [vmem:[%s12929_s4 + $0x3e0] sm:$0xff]   ;;  %v9689_v17 = vld [vmem:[%s12929_s4 + $0x438] sm:$0xff]  }
 0x48d   : > { %9038 = vmatprep.mubr.msk.bf16.mxu0 %vm9985_vm6, %v13035_v11  ;;  %v3815_v14 = vsel %vm1618_vm2, %v3810_v47, %v3814_v20  ;;  %v9690_v47 = vld [vmem:[%s12929_s4 + $0x440] sm:$0xff]  }
 0x48f   : > { %9007 = vmatpush3.bf16.msra.mxu1 %v9669_v55  ;;  %9033 = vmatpush3.bf16.msra.mxu0 %v9670_v24  ;;  %v9680_v55 = vld [vmem:[%s12929_s4 + $0x410] sm:$0xff]   ;;  %v9682_v24 = vld [vmem:[%s12929_s4 + $0x418] sm:$0xff]  }
 0x490   : > { %9008 = vmatprep.subr.bf16.mxu1 %v13035_v11  ;;  %9034 = vmatprep.subr.bf16.mxu0 %v13035_v11 }
 0x493   : > { %9009 = vmatpush3.bf16.msra.mxu1 %v9671_v61  ;;  %9035 = vmatpush3.bf16.msra.mxu0 %v9672_v60  ;;  %v3818_v61 = vor.u32 %v3814_v20, %v11400_v30  ;;  %v3822_v60 = vrot.slane %v3820_v5, 1  ;;  %v9687_v20 = vld [vmem:[%s12929_s4 + $0x3f8] sm:$0xff]   ;;  %v3970_v5 = vrot.slane %v11405_v45, 4  ;;  %v9692_v45 = vld [vmem:[%s12929_s4 + $0x450] sm:$0xff]  }
 0x494   : > { %9036 = vmatprep.subr.bf16.mxu0 %v13035_v11  ;;  %9050 = vmatprep.subr.bf16.mxu1 %v13035_v11 }
 0x496   : > { %9924 = vmatmul.mubr.msk.bf16.vlgmr.msra.gmra.mrb[108].mxu1 %vm10614_vm1, %v9923_v57  ;;  %v9684_v57 = vld [vmem:[%s12929_s4 + $0x420] sm:$0xff]  }
 0x497   : > { %9037 = vmatpush3.bf16.msra.mxu0 %v9673_v62  ;;  %9051 = vmatpush3.bf16.msra.mxu1 %v9674_v13  ;;  %v13041_v62 = vmax.f32 %v11338_v34, 0.0  ;;  %v13042_v13 = vmax.f32 %v11357_v26, 0.0  ;;  %v3823_v34 = vsel %vm1618_vm2, %v3818_v61, %v3822_v60  ;;  %v3958_v26 = vshrl.u32 %v3938_v41, 16 }
 0x498   : > { %9052 = vmatprep.subr.bf16.mxu1 %v13035_v11  ;;  %9078 = vmatprep.subr.bf16.mxu0 %v13035_v11 }
 0x499   : > { %9014 = vmatprep.mubr.msk.bf16.mxu1 %vm9985_vm6, %v13035_v11  ;;  %v9929_v51 = vpack.c.bf16 %v13042_v13, %v13041_v62 }
 0x49a   : > { %9039 = vmatmul.mubr.bf16.vlgmr.msra.gmra.mrb[120].mxu0 %v3807_v50  ;;  %v9686_v50 = vld [vmem:[%s12929_s4 + $0x428] sm:$0xff]  }
 0x49b   : > { %9053 = vmatpush3.bf16.msra.mxu1 %v9675_v7  ;;  %9079 = vmatpush3.bf16.msra.mxu0 %v9676_v37  ;;  %v3961_v7 = vshll.u32 %v3938_v41, 16  ;;  %v9685_v37 = vld [vmem:[%s12929_s4 + $0x3f0] sm:$0xff]  }
 0x49c   : > { %9054 = vmatprep.subr.bf16.mxu1 %v13035_v11  ;;  %9080 = vmatprep.subr.bf16.mxu0 %v13035_v11 }
 0x49d   : > { %9042 = vmatprep.mubr.msk.bf16.mxu0 %vm9985_vm6, %v13035_v11 }
 0x49e   : > { %9927 = vmatmul.mubr.msk.bf16.gmra.mrb[112].mxu1 %vm10651_vm3, %v9926_v21  ;;  %v4096_v21 = vld [vmem:[#allocation2 + $0x8] sm:$0xf0] }
 0x49f   : > { %9055 = vmatpush3.bf16.msra.mxu1 %v9677_v59  ;;  %9081 = vmatpush3.bf16.msra.mxu0 %v9678_v33  ;;  %v3960_v59 = vrot.slane %v3958_v26, 3  ;;  %v3963_v33 = vrot.slane %v3961_v7, 4 }
 0x4a0   : > { %9056 = vmatprep.subr.bf16.mxu1 %v13035_v11  ;;  %9082 = vmatprep.subr.bf16.mxu0 %v13035_v11 }
 0x4a1   : > { %9018 = vmatprep.mubr.msk.bf16.mxu1 %vm9985_vm6, %v13035_v11  ;;  %v3964_v52 = vor.u32 %v3963_v33, %v3960_v59  ;;  %v4261_v59 = vshll.u32 %v4096_v21, 16  ;;  %v9696_v33 = vld [vmem:[%s12929_s4 + $0x470] sm:$0xff]  }
 0x4a2   : > { %9043 = vmatmul.mubr.bf16.gmra.mrb[124].mxu0 %v3815_v14  ;;  %v3969_v14 = vrot.slane %v11400_v30, 3 }
 0x4a3   : > { %9057 = vmatpush3.bf16.msra.mxu1 %v9679_v4  ;;  %9083 = vmatpush3.bf16.msra.mxu0 %v9680_v55  ;;  %v3968_v4 = vsel %vm1015_vm11, %v3964_v52, %v11368_v28  ;;  %v4118_v55 = vrot.slane %v4096_v21, 4  ;;  %v4263_v52 = vrot.slane %v4261_v59, 5  ;;  %v9730_v59 = vld [vmem:[%s12931_s6 + $0x1a4] ss:$16 sps:$4 sm:$0xff]  }
 0x4a4   : > { %9058 = vmatprep.subr.bf16.mxu1 %v13035_v11  ;;  %9084 = vmatprep.subr.bf16.mxu0 %v13035_v11  ;;  %v3971_v60 = vor.u32 %v3970_v5, %v3969_v14 }
 0x4a5   : > { %9046 = vmatprep.mubr.msk.bf16.mxu0 %vm9985_vm6, %v13035_v11  ;;  %v4120_v61 = vsel %vm899_vm8, %v4118_v55, %v11344_v58 }
 0x4a6   : > { %9930 = vmatmul.mubr.msk.bf16.gmra.mrb[116].mxu1 %vm10688_vm4, %v9929_v51  ;;  %v3972_v13 = vsel %vm1015_vm11, %v11368_v28, %v3971_v60  ;;  %v4121_v51 = vrot.slane %v11386_v23, 4  ;;  %v9694_v28 = vld [vmem:[%s12929_s4 + $0x460] sm:$0xff]  }
 0x4a7   : > { %9059 = vmatpush3.bf16.msra.mxu1 %v9681_v49  ;;  %9085 = vmatpush3.bf16.msra.mxu0 %v9682_v24  ;;  %v3939_v49 = vld [vmem:[#allocation2 + $0x20] sm:$0xf]  ;;  %v9691_v24 = vld [vmem:[%s12929_s4 + $0x448] sm:$0xff]  }
 0x4a8   : > { %9060 = vmatprep.subr.bf16.mxu1 %v13035_v11  ;;  %9086 = vmatprep.subr.bf16.mxu0 %v13035_v11  ;;  %v3974_v30 = vshrl.u32 %v3939_v49, 16  ;;  %v3977_v62 = vshll.u32 %v3939_v49, 16  ;;  %v4123_v7 = vrot.slane %v3939_v49, 4 }
 0x4a9   : > { %9066 = vmatprep.mubr.msk.bf16.mxu1 %vm9985_vm6, %v13035_v11 }
 0x4aa   : > { %9047 = vmatmul.mubr.bf16.gmra.mrb[128].mxu0 %v3823_v34  ;;  %v3976_v41 = vrot.slane %v3974_v30, 3  ;;  %v4122_v34 = vsel %vm899_vm8, %v11344_v58, %v4121_v51  ;;  %v9695_v58 = vld [vmem:[%s12929_s4 + $0x468] sm:$0xff]  }
 0x4ab   : > { %9061 = vmatpush3.bf16.msra.mxu1 %v9683_v9  ;;  %9087 = vmatpush3.bf16.msra.mxu0 %v9684_v57  ;;  %v3979_v9 = vrot.slane %v3977_v62, 4  ;;  %v9693_v57 = vld [vmem:[%s12929_s4 + $0x458] sm:$0xff]   ;;  %v9706_v62 = vld [vmem:[%s12931_s6 + $0x124] ss:$16 sps:$4 sm:$0xff]  }
 0x4ac   : > { %9062 = vmatprep.subr.bf16.mxu1 %v13035_v11  ;;  %9088 = vmatprep.subr.bf16.mxu0 %v13035_v11  ;;  %v9703_v30 = vld [vmem:[%s12931_s6 + $0x10c] ss:$16 sps:$4 sm:$0xff]  }
 0x4ad   : > { %9094 = vmatprep.mubr.msk.bf16.mxu0 %vm9985_vm6, %v13035_v11  ;;  %v3980_v26 = vor.u32 %v3979_v9, %v3976_v41  ;;  %v9712_v41 = vld [vmem:[%s12931_s6 + $0x144] ss:$16 sps:$4 sm:$0xff]   ;;  %v9713_v9 = vld [vmem:[%s12931_s6 + $0x148] ss:$16 sps:$4 sm:$0xff]  }
 0x4af   : > { %9063 = vmatpush3.bf16.msra.mxu1 %v9685_v37  ;;  %9089 = vmatpush3.bf16.msra.mxu0 %v9686_v50  ;;  %v3981_v23 = vsel %vm1015_vm11, %v3971_v60, %v3980_v26  ;;  %v4124_v37 = vsel %vm899_vm8, %v4121_v51, %v4123_v7  ;;  %v4258_v50 = vshrl.u32 %v4096_v21, 16  ;;  %v9700_v60 = vld [vmem:[%s12931_s6 + $0x104] ss:$16 sps:$4 sm:$0xff]   ;;  %v9710_v51 = vld [vmem:[%s12931_s6 + $0x140] ss:$16 sps:$4 sm:$0xff]  }
 0x4b0   : > { %9064 = vmatprep.subr.bf16.mxu1 %v13035_v11  ;;  %9090 = vmatprep.subr.bf16.mxu0 %v13035_v11  ;;  %v9718_v26 = vld [vmem:[%s12931_s6 + $0x164] ss:$16 sps:$4 sm:$0xff]  }
 0x4b1   : > { %v9724_v7 = vld [vmem:[%s12931_s6 + $0x184] ss:$16 sps:$4 sm:$0xff]  }
 0x4b3   : > { %9065 = vmatpush3.bf16.msra.mxu1 %v9687_v20  ;;  %9091 = vmatpush3.bf16.msra.mxu0 %v9688_v40  ;;  %v11704_v20 = vld [vmem:[#allocation2] sm:$0xff]  ;;  %v4260_v40 = vrot.slane %v4258_v50, 4  ;;  %v9725_v50 = vld [vmem:[%s12931_s6 + $0x188] ss:$16 sps:$4 sm:$0xff]  }
 0x4b4   : > { %9092 = vmatprep.subr.bf16.mxu0 %v13035_v11  ;;  %9106 = vmatprep.subr.bf16.mxu1 %v13035_v11 }
 0x4b5   : > { %v4264_v21 = vor.u32 %v4263_v52, %v4260_v40  ;;  %v9728_v40 = vld [vmem:[%s12931_s6 + $0x1a0] ss:$16 sps:$4 sm:$0xff]   ;;  %v9731_v52 = vld [vmem:[%s12931_s6 + $0x1a8] ss:$16 sps:$4 sm:$0xff]  }
 0x4b6   : > { %9067 = vmatmul.mubr.bf16.vlgmr.msra.gmra.mrb[120].mxu1 %v3968_v4  ;;  %v4239_v4 = vld [vmem:[#allocation2 + $0x20] sm:$0x1f] }
 0x4b7   : > { %9093 = vmatpush3.bf16.msra.mxu0 %v9689_v17  ;;  %9107 = vmatpush3.bf16.msra.mxu1 %v9690_v47  ;;  %v9697_v17 = vld [vmem:[%s12929_s4 + $0x478] sm:$0xff]   ;;  %v4268_v47 = vsel %vm1177_vm15, %v4264_v21, %v11423_v10  ;;  %v4274_v55 = vshrl.u32 %v4239_v4, 16  ;;  %v4277_v14 = vshll.u32 %v4239_v4, 16  ;;  %v9698_v10 = vld [vmem:[%s12931_s6 + $0x100] ss:$16 sps:$4 sm:$0xff]  }
 0x4b8   : > { %9108 = vmatprep.subr.bf16.mxu1 %v13035_v11  ;;  %9070 = vmatprep.mubr.msk.bf16.mxu1 %vm9985_vm6, %v13035_v11 }
 0x4b9   : > { %v4276_v5 = vrot.slane %v4274_v55, 4  ;;  %v4279_v49 = vrot.slane %v4277_v14, 5  ;;  %4635 = vmatprep.subr.bf16.mxu0 %v9700_v60 }
 0x4ba   : > { %9095 = vmatmul.mubr.bf16.vlgmr.msra.gmra.mrb[132].mxu0 %v4120_v61 }
 0x4bb   : > { %9109 = vmatpush3.bf16.msra.mxu1 %v9691_v24  ;;  %9098 = vmatprep.mubr.msk.bf16.mxu0 %vm9985_vm6, %v13035_v11  ;;  %v4280_v24 = vor.u32 %v4279_v49, %v4276_v5 }
 0x4bc   : > { %9110 = vmatprep.subr.bf16.mxu1 %v13035_v11  ;;  %4636 = vmatpush1.bf16.msra.mxu0 %v9698_v10 }
 0x4bd   : > { %v4281_v61 = vsel %vm1177_vm15, %v11425_v48, %v4280_v24  ;;  %v9704_v48 = vld [vmem:[%s12931_s6 + $0x120] ss:$16 sps:$4 sm:$0xff]   ;;  %4637 = vmatprep.subr.bf16.mxu0 %v9706_v62  ;;  %v9737_v62 = vld [vmem:[%s12931_s6 + $0x1c8] ss:$16 sps:$4 sm:$0xff]  }
 0x4be   : > { %9071 = vmatmul.mubr.bf16.gmra.mrb[124].mxu1 %v3972_v13  ;;  %v9709_v13 = vld [vmem:[%s12931_s6 + $0x12c] ss:$16 sps:$4 sm:$0xff]  }
 0x4bf   : > { %9111 = vmatpush3.bf16.msra.mxu1 %v9692_v45  ;;  %9074 = vmatprep.mubr.msk.bf16.mxu1 %vm9985_vm6, %v13035_v11  ;;  %v9707_v45 = vld [vmem:[%s12931_s6 + $0x128] ss:$16 sps:$4 sm:$0xff]  }
 0x4c0   : > { %9112 = vmatprep.subr.bf16.mxu1 %v13035_v11  ;;  %4638 = vmatpush1.bf16.msra.mxu0 %v9704_v48 }
 0x4c1   : > { %4639 = vmatprep.subr.bf16.mxu0 %v9712_v41 }
 0x4c2   : > { %9099 = vmatmul.mubr.bf16.gmra.mrb[136].mxu0 %v4122_v34  ;;  %v9716_v34 = vld [vmem:[%s12931_s6 + $0x160] ss:$16 sps:$4 sm:$0xff]  }
 0x4c3   : > { %9113 = vmatpush3.bf16.msra.mxu1 %v9693_v57  ;;  %9102 = vmatprep.mubr.msk.bf16.mxu0 %vm9985_vm6, %v13035_v11  ;;  %v9715_v57 = vld [vmem:[%s12931_s6 + $0x14c] ss:$16 sps:$4 sm:$0xff]  }
 0x4c4   : > { %9114 = vmatprep.subr.bf16.mxu1 %v13035_v11  ;;  %4640 = vmatpush1.bf16.msra.mxu0 %v9710_v51  ;;  %v9742_v51 = vld [vmem:[%s12931_s6 + $0x1e4] ss:$16 sps:$4 sm:$0xff]  }
 0x4c5   : > { %4641 = vmatprep.subr.bf16.mxu0 %v9718_v26 }
 0x4c6   : > { %9075 = vmatmul.mubr.bf16.gmra.mrb[128].mxu1 %v3981_v23  ;;  %v9721_v23 = vld [vmem:[%s12931_s6 + $0x16c] ss:$16 sps:$4 sm:$0xff]  }
 0x4c7   : > { %9115 = vmatpush3.bf16.msra.mxu1 %v9694_v28  ;;  %9122 = vmatprep.mubr.msk.bf16.mxu1 %vm9985_vm6, %v13035_v11  ;;  %v9719_v28 = vld [vmem:[%s12931_s6 + $0x168] ss:$16 sps:$4 sm:$0xff]  }
 0x4c8   : > { %9116 = vmatprep.subr.bf16.mxu1 %v13035_v11  ;;  %4642 = vmatpush1.bf16.msra.mxu0 %v9716_v34 }
 0x4c9   : > { %4643 = vmatprep.subr.bf16.mxu0 %v9724_v7 }
 0x4ca   : > { %9103 = vmatmul.mubr.bf16.gmra.mrb[140].mxu0 %v4124_v37  ;;  %v9722_v37 = vld [vmem:[%s12931_s6 + $0x180] ss:$16 sps:$4 sm:$0xff]  }
 0x4cb   : > { %9117 = vmatpush3.bf16.msra.mxu1 %v9695_v58  ;;  %4667 = vmatprep.mubr.bf16.mxu0 %v11704_v20  ;;  %v9727_v58 = vld [vmem:[%s12931_s6 + $0x18c] ss:$16 sps:$4 sm:$0xff]  }
 0x4cc   : > { %9118 = vmatprep.subr.bf16.mxu1 %v13035_v11  ;;  %4644 = vmatpush1.bf16.msra.mxu0 %v9722_v37 }
 0x4cd   : > { %4645 = vmatprep.subr.bf16.mxu0 %v9730_v59 }
 0x4cf   : > { %9119 = vmatpush3.bf16.msra.mxu1 %v9696_v33  ;;  %v9733_v33 = vld [vmem:[%s12931_s6 + $0x1ac] ss:$16 sps:$4 sm:$0xff]  }
 0x4d0   : > { %9120 = vmatprep.subr.bf16.mxu1 %v13035_v11  ;;  %4646 = vmatpush1.bf16.msra.mxu0 %v9728_v40  ;;  %v9746_v40 = vld [vmem:[%s12927_s2 + $0x240] sm:$0xff]  }
 0x4d3   : > { %9121 = vmatpush3.bf16.msra.mxu1 %v9697_v17 }
 0x4d4   : > { %4698 = vmatprep.subr.bf16.mxu1 %v9703_v30  ;;  %v9736_v30 = vld [vmem:[%s12931_s6 + $0x1c4] ss:$16 sps:$4 sm:$0xff]  }
 0x4d5   : > { %4647 = vmatprep.subr.bf16.mxu0 %v9736_v30 }
 0x4d6   : > { %9123 = vmatmul.mubr.bf16.vlgmr.msra.gmra.mrb[132].mxu1 %v4268_v47 }
 0x4d7   : > { %9126 = vmatprep.mubr.msk.bf16.mxu1 %vm9985_vm6, %v13035_v11 }
 0x4de   : > { %9127 = vmatmul.mubr.bf16.gmra.mrb[136].mxu1 %v11439_v54  ;;  %v9701_v54 = vld [vmem:[%s12931_s6 + $0x108] ss:$16 sps:$4 sm:$0xff]  }
 0x4df   : > { %9130 = vmatprep.mubr.msk.bf16.mxu1 %vm9985_vm6, %v13035_v11  ;;  %4699 = vmatpush1.bf16.msra.mxu1 %v9701_v54  ;;  %v9734_v54 = vld [vmem:[%s12931_s6 + $0x1c0] ss:$16 sps:$4 sm:$0xff]  }
 0x4e0   : > { %4700 = vmatprep.subr.bf16.mxu1 %v9709_v13  ;;  %4648 = vmatpush1.bf16.msra.mxu0 %v9734_v54 }
 0x4e1   : > { %4649 = vmatprep.subr.bf16.mxu0 %v9742_v51 }
 0x4e3   : > { %4701 = vmatpush1.bf16.msra.mxu1 %v9707_v45  ;;  %v9739_v45 = vld [vmem:[%s12931_s6 + $0x1cc] ss:$16 sps:$4 sm:$0xff]  }
 0x4e4   : > { %4702 = vmatprep.subr.bf16.mxu1 %v9715_v57  ;;  %v9745_v57 = vld [vmem:[%s12931_s6 + $0x1ec] ss:$16 sps:$4 sm:$0xff]  }
 0x4e6   : > { %9131 = vmatmul.mubr.bf16.gmra.mrb[140].mxu1 %v4281_v61 }
 0x4e7   : > { %4730 = vmatprep.mubr.bf16.mxu1 %v11704_v20  ;;  %4703 = vmatpush1.bf16.msra.mxu1 %v9713_v9  ;;  %v9740_v9 = vld [vmem:[%s12931_s6 + $0x1e0] ss:$16 sps:$4 sm:$0xff]  }
 0x4e8   : > { %4704 = vmatprep.subr.bf16.mxu1 %v9721_v23  ;;  %4650 = vmatpush1.bf16.msra.mxu0 %v9740_v9 }
 0x4e9   : > { %8463 = vmatprep.subr.bf16.mxu0 %v9746_v40 }
 0x4eb   : > { %4705 = vmatpush1.bf16.msra.mxu1 %v9719_v28  ;;  %v9743_v28 = vld [vmem:[%s12931_s6 + $0x1e8] ss:$16 sps:$4 sm:$0xff]  }
 0x4ec   : > { %4706 = vmatprep.subr.bf16.mxu1 %v9727_v58 }
 0x4ef   : > { %4707 = vmatpush1.bf16.msra.mxu1 %v9725_v50 }
 0x4f0   : > { %4708 = vmatprep.subr.bf16.mxu1 %v9733_v33 }
 0x4f3   : > { %4709 = vmatpush1.bf16.msra.mxu1 %v9731_v52  ;;  %v9747_v52 = vld [vmem:[%s12927_s2 + $0x2c0] sm:$0xff]  }
 0x4f4   : > { %4710 = vmatprep.subr.bf16.mxu1 %v9739_v45 }
 0x4f7   : > { %4711 = vmatpush1.bf16.msra.mxu1 %v9737_v62 }
 0x4f8   : > { %4712 = vmatprep.subr.bf16.mxu1 %v9745_v57 }
 0x4fb   : > { %4713 = vmatpush1.bf16.msra.mxu1 %v9743_v28 }
 0x4fc   : > { %8497 = vmatprep.subr.bf16.mxu1 %v9747_v52 }
 0x529   : > { %v3173_v17 = vpop.f32.mrb[84].mxu1 }
 0x52a   : > { %v8900_v21 = vpop.f32.mrb[85].mxu1 }
 0x52b   : > { %v3176_v47 = vpop.f32.mrb[86].mxu1 }
 0x52c   : > { %v8901_v4 = vpop.f32.mrb[87].mxu1 }
 0x52d   : > { %v3316_v55 = vpop.f32.mrb[96].mxu0 }
 0x52e   : > { %v3317_v14 = vadd.f32 %v3316_v55, %v3173_v17  ;;  %v8928_v5 = vpop.f32.mrb[97].mxu0 }
 0x52f   : > { %v3319_v49 = vpop.f32.mrb[98].mxu0 }
 0x530   : > { %v3320_v24 = vadd.f32 %v3319_v49, %v3176_v47  ;;  %v8929_v61 = vpop.f32.mrb[99].mxu0 }
 0x531   : > { %v3181_v10 = vpop.f32.mrb[88].mxu1 }
 0x532   : > { %v8904_v60 = vpop.f32.mrb[89].mxu1 }
 0x533   : > { %v3184_v48 = vpop.f32.mrb[90].mxu1 }
 0x534   : > { %v8905_v13 = vpop.f32.mrb[91].mxu1 }
 0x535   : > { %v3324_v41 = vpop.f32.mrb[100].mxu0 }
 0x536   : > { %v3325_v34 = vadd.f32 %v3324_v41, %v3181_v10  ;;  %v8932_v26 = vpop.f32.mrb[101].mxu0 }
 0x537   : > { %v3327_v23 = vpop.f32.mrb[102].mxu0 }
 0x538   : > { %v3328_v7 = vadd.f32 %v3327_v23, %v3184_v48  ;;  %v8933_v58 = vpop.f32.mrb[103].mxu0 }
 0x541   : > { %v3189_v37 = vpop.f32.mrb[92].mxu1 }
 0x542   : > { %v8908_v50 = vpop.f32.mrb[93].mxu1 }
 0x543   : > { %v3192_v59 = vpop.f32.mrb[94].mxu1 }
 0x544   : > { %v8909_v33 = vpop.f32.mrb[95].mxu1 }
 0x545   : > { %v3332_v17 = vpop.f32.mrb[104].mxu0 }
 0x546   : > { %v3333_v21 = vadd.f32 %v3332_v17, %v3189_v37  ;;  %v8936_v47 = vpop.f32.mrb[105].mxu0 }
 0x547   : > { %v3335_v4 = vpop.f32.mrb[106].mxu0 }
 0x548   : > { %v3336_v55 = vadd.f32 %v3335_v4, %v3192_v59  ;;  %v8937_v5 = vpop.f32.mrb[107].mxu0 }
 0x549   : > { %v3467_v49 = vpop.f32.mrb[96].mxu1 }
 0x54a   : > { %v3490_v61 = vadd.f32 %v3467_v49, %v3317_v14  ;;  %v8956_v10 = vpop.f32.mrb[97].mxu1 }
 0x54b   : > { %v3470_v60 = vpop.f32.mrb[98].mxu1 }
 0x54c   : > { %v3491_v54 = vadd.f32 %v3470_v60, %v3320_v24  ;;  %v8957_v30 = vpop.f32.mrb[99].mxu1 }
 0x54d   : > { %v3618_v48 = vpop.f32.mrb[108].mxu0 }
 0x54e   : > { %v3641_v62 = vadd.f32 %v3618_v48, %v3490_v61  ;;  %v8984_v45 = vpop.f32.mrb[109].mxu0 }
 0x54f   : > { %v3621_v13 = vpop.f32.mrb[110].mxu0 }
 0x550   : > { %v3642_v51 = vadd.f32 %v3621_v13, %v3491_v54  ;;  %v8985_v41 = vpop.f32.mrb[111].mxu0 }
 0x551   : > { %v3475_v9 = vpop.f32.mrb[100].mxu1 }
 0x552   : > { %v3492_v57 = vadd.f32 %v3475_v9, %v3325_v34  ;;  %v8960_v26 = vpop.f32.mrb[101].mxu1 }
 0x553   : > { %v3478_v28 = vpop.f32.mrb[102].mxu1 }
 0x554   : > { %v3493_v23 = vadd.f32 %v3478_v28, %v3328_v7  ;;  %v8961_v58 = vpop.f32.mrb[103].mxu1 }
 0x555   : > { %v3626_v37 = vpop.f32.mrb[112].mxu0 }
 0x556   : > { %v3643_v50 = vadd.f32 %v3626_v37, %v3492_v57  ;;  %v8988_v59 = vpop.f32.mrb[113].mxu0 }
 0x557   : > { %v3629_v14 = vpop.f32.mrb[114].mxu0 }
 0x558   : > { %v3644_v33 = vadd.f32 %v3629_v14, %v3493_v23  ;;  %v8989_v40 = vpop.f32.mrb[115].mxu0 }
 0x559   : > { %v3483_v24 = vpop.f32.mrb[104].mxu1 }
 0x55a   : > { %v3494_v52 = vadd.f32 %v3483_v24, %v3333_v21  ;;  %v8964_v17 = vpop.f32.mrb[105].mxu1 }
 0x55b   : > { %v3486_v47 = vpop.f32.mrb[106].mxu1 }
 0x55c   : > { %v3495_v4 = vadd.f32 %v3486_v47, %v3336_v55  ;;  %v8965_v5 = vpop.f32.mrb[107].mxu1 }
 0x55d   : > { %v3634_v49 = vpop.f32.mrb[116].mxu0 }
 0x55e   : > { %v3645_v61 = vadd.f32 %v3634_v49, %v3494_v52  ;;  %v8992_v10 = vpop.f32.mrb[117].mxu0 }
 0x55f   : > { %v3637_v34 = vpop.f32.mrb[118].mxu0 }
 0x560   : > { %v3646_v60 = vadd.f32 %v3637_v34, %v3495_v4  ;;  %v8993_v54 = vpop.f32.mrb[119].mxu0 }
 0x569   : > { %v3746_v7 = vpop.f32.mrb[108].mxu1 }
 0x56a   : > { %v3769_v30 = vadd.f32 %v3746_v7, %v3641_v62  ;;  %v9012_v48 = vpop.f32.mrb[109].mxu1 }
 0x56b   : > { %v3749_v45 = vpop.f32.mrb[110].mxu1 }
 0x56c   : > { %v3770_v13 = vadd.f32 %v3749_v45, %v3642_v51  ;;  %v9013_v41 = vpop.f32.mrb[111].mxu1 }
 0x56d   : > { %v3909_v9 = vpop.f32.mrb[120].mxu0 }
 0x56e   : > { %v3932_v57 = vadd.f32 %v3909_v9, %v3769_v30  ;;  %v9040_v26 = vpop.f32.mrb[121].mxu0 }
 0x56f   : > { %v3912_v21 = vpop.f32.mrb[122].mxu0 }
 0x570   : > { %v3933_v28 = vadd.f32 %v3912_v21, %v3770_v13  ;;  %v9041_v23 = vpop.f32.mrb[123].mxu0 }
 0x571   : > { %v3754_v55 = vpop.f32.mrb[112].mxu1 }
 0x572   : > { %v3771_v58 = vadd.f32 %v3754_v55, %v3643_v50  ;;  %v9016_v37 = vpop.f32.mrb[113].mxu1 }
 0x573   : > { %v3757_v59 = vpop.f32.mrb[114].mxu1 }
 0x574   : > { %v3772_v14 = vadd.f32 %v3757_v59, %v3644_v33  ;;  %v9017_v40 = vpop.f32.mrb[115].mxu1 }
 0x575   : > { %v3917_v24 = vpop.f32.mrb[124].mxu0 }
 0x576   : > { %v3934_v52 = vadd.f32 %v3917_v24, %v3771_v58  ;;  %v9044_v17 = vpop.f32.mrb[125].mxu0 }
 0x577   : > { %v3920_v62 = vpop.f32.mrb[126].mxu0 }
 0x578   : > { %v3935_v47 = vadd.f32 %v3920_v62, %v3772_v14  ;;  %v9045_v4 = vpop.f32.mrb[127].mxu0 }
 0x579   : > { %v3762_v51 = vpop.f32.mrb[116].mxu1 }
 0x57a   : > { %v3773_v5 = vadd.f32 %v3762_v51, %v3645_v61  ;;  %v9020_v49 = vpop.f32.mrb[117].mxu1 }
 0x57b   : > { %v3765_v10 = vpop.f32.mrb[118].mxu1 }
 0x57c   : > { %v3774_v34 = vadd.f32 %v3765_v10, %v3646_v60  ;;  %v9021_v54 = vpop.f32.mrb[119].mxu1 }
 0x57d   : > { %v3925_v7 = vpop.f32.mrb[128].mxu0 }
 0x57e   : > { %v3936_v30 = vadd.f32 %v3925_v7, %v3773_v5  ;;  %v9048_v48 = vpop.f32.mrb[129].mxu0 }
 0x57f   : > { %v3928_v50 = vpop.f32.mrb[130].mxu0 }
 0x580   : > { %v3937_v45 = vadd.f32 %v3928_v50, %v3774_v34  ;;  %v9049_v13 = vpop.f32.mrb[131].mxu0 }
 0x589   : > { %v4067_v33 = vpop.f32.mrb[120].mxu1 }
 0x58a   : > { %v4090_v41 = vadd.f32 %v4067_v33, %v3932_v57  ;;  %v9068_v9 = vpop.f32.mrb[121].mxu1 }
 0x58b   : > { %v4070_v26 = vpop.f32.mrb[122].mxu1 }
 0x58c   : > { %v4091_v21 = vadd.f32 %v4070_v26, %v3933_v28  ;;  %v9069_v23 = vpop.f32.mrb[123].mxu1 }
 0x58d   : > { %v4210_v55 = vpop.f32.mrb[132].mxu0  ;;  %v7681_v23 = vld [vmem:[#allocation3 + $0x1] ss:$0 sm:$0xff] }
 0x58e   : > { %v4233_v58 = vadd.f32 %v4210_v55, %v4090_v41  ;;  %v9096_v37 = vpop.f32.mrb[133].mxu0 }
 0x58f   : > { %v4213_v61 = vpop.f32.mrb[134].mxu0 }
 0x590   : > { %v4234_v59 = vadd.f32 %v4213_v61, %v4091_v21  ;;  %v9097_v14 = vpop.f32.mrb[135].mxu0 }
 0x591   : > { %v4075_v60 = vpop.f32.mrb[124].mxu1 }
 0x592   : > { %v4092_v40 = vadd.f32 %v4075_v60, %v3934_v52  ;;  %v9072_v24 = vpop.f32.mrb[125].mxu1 }
 0x593   : > { %v4078_v17 = vpop.f32.mrb[126].mxu1 }
 0x594   : > { %v4093_v62 = vadd.f32 %v4078_v17, %v3935_v47  ;;  %v9073_v4 = vpop.f32.mrb[127].mxu1 }
 0x595   : > { %v4218_v51 = vpop.f32.mrb[136].mxu0 }
 0x596   : > { %v4235_v5 = vadd.f32 %v4218_v51, %v4092_v40  ;;  %v9100_v49 = vpop.f32.mrb[137].mxu0 }
 0x597   : > { %v4221_v57 = vpop.f32.mrb[138].mxu0  ;;  %v9748_v49 = vld [vmem:[%s12927_s2 + $0x200] sm:$0xff]  }
 0x598   : > { %v4236_v10 = vadd.f32 %v4221_v57, %v4093_v62  ;;  %v9101_v34 = vpop.f32.mrb[139].mxu0 }
 0x599   : > { %v4083_v28 = vpop.f32.mrb[128].mxu1  ;;  %v9751_v34 = vld [vmem:[%s12927_s2 + $0x2c8] sm:$0xff]  }
 0x59a   : > { %v4094_v54 = vadd.f32 %v4083_v28, %v3936_v30  ;;  %v9076_v7 = vpop.f32.mrb[129].mxu1 }
 0x59b   : > { %v4086_v48 = vpop.f32.mrb[130].mxu1 }
 0x59c   : > { %v4095_v50 = vadd.f32 %v4086_v48, %v3937_v45  ;;  %v9077_v13 = vpop.f32.mrb[131].mxu1  ;;  %v9752_v48 = vld [vmem:[%s12927_s2 + $0x208] sm:$0xff]  }
 0x59d   : > { %v4226_v33 = vpop.f32.mrb[140].mxu0  ;;  %v9755_v13 = vld [vmem:[%s12927_s2 + $0x2d0] sm:$0xff]  }
 0x59e   : > { %v4237_v41 = vadd.f32 %v4226_v33, %v4094_v54  ;;  %v9104_v9 = vpop.f32.mrb[141].mxu0 }
 0x59f   : > { %v4229_v52 = vpop.f32.mrb[142].mxu0 }
 0x5a0   : > { %v4238_v26 = vadd.f32 %v4229_v52, %v4095_v50  ;;  %v9105_v21 = vpop.f32.mrb[143].mxu0  ;;  %v9753_v50 = vld [vmem:[%s12927_s2 + $0x288] sm:$0xff]  }
 0x5a9   : > { %v4367_v47 = vpop.f32.mrb[132].mxu1 }
 0x5aa   : > { %v4390_v55 = vadd.f32 %v4367_v47, %v4233_v58  ;;  %v9124_v37 = vpop.f32.mrb[133].mxu1  ;;  %v9749_v58 = vld [vmem:[%s12927_s2 + $0x280] sm:$0xff]  }
 0x5ab   : > { %v4370_v61 = vpop.f32.mrb[134].mxu1  ;;  %v9756_v37 = vld [vmem:[%s12927_s2 + $0x210] sm:$0xff]  }
 0x5ac   : > { %v4404_v14 = vadd.f32 %v7681_v23, %v4390_v55  ;;  %v4391_v60 = vadd.f32 %v4370_v61, %v4234_v59  ;;  %v9125_v40 = vpop.f32.mrb[135].mxu1  ;;  %v9750_v59 = vld [vmem:[%s12927_s2 + $0x248] sm:$0xff]   ;;  %v9757_v61 = vld [vmem:[%s12927_s2 + $0x290] sm:$0xff]  }
 0x5ae   : > { %v4405_v24 = vadd.f32 %v7681_v23, %v4391_v60  ;;  %v4410_v30 = vmax.f32 %v4404_v14, 0.0  ;;  %v9758_v60 = vld [vmem:[%s12927_s2 + $0x258] sm:$0xff]  }
 0x5b0   : > { %v4411_v17 = vmax.f32 %v4405_v24, 0.0 }
 0x5b1   : > { %v4375_v62 = vpop.f32.mrb[136].mxu1 }
 0x5b2   : > { %v4416_v45 = vpack.c.bf16 %v4411_v17, %v4410_v30  ;;  %v4392_v4 = vadd.f32 %v4375_v62, %v4235_v5  ;;  %v9128_v51 = vpop.f32.mrb[137].mxu1  ;;  %v9760_v62 = vld [vmem:[%s12927_s2 + $0x218] sm:$0xff]  }
 0x5b3   : > { %v4378_v57 = vpop.f32.mrb[138].mxu1 }
 0x5b4   : > { %v4406_v28 = vadd.f32 %v7681_v23, %v4392_v4  ;;  %v4393_v5 = vadd.f32 %v4378_v57, %v4236_v10  ;;  %v9129_v54 = vpop.f32.mrb[139].mxu1  ;;  %4668 = vmatmul.mubr.bf16.vlgmr.msra.gmra.mrb[144].mxu0 %v4416_v45  ;;  %4731 = vmatmul.mubr.bf16.vlgmr.msra.gmra.mrb[144].mxu1 %v4416_v45  ;;  %v9754_v10 = vld [vmem:[%s12927_s2 + $0x250] sm:$0xff]   ;;  %v9761_v45 = vld [vmem:[%s12927_s2 + $0x298] sm:$0xff]   ;;  %v9766_v57 = vld [vmem:[%s12927_s2 + $0x268] sm:$0xff]  }
 0x5b5   : > { %4677 = vmatprep.mubr.bf16.mxu0 %v11704_v20  ;;  %4740 = vmatprep.mubr.bf16.mxu1 %v11704_v20  ;;  %v9771_v54 = vld [vmem:[%s12927_s2 + $0x2f0] sm:$0xff]  }
 0x5b6   : > { %v4407_v7 = vadd.f32 %v7681_v23, %v4393_v5  ;;  %8464 = vmatpush3.bf16.msra.mxu0 %v9748_v49  ;;  %8498 = vmatpush3.bf16.msra.mxu1 %v9749_v58  ;;  %v4412_v33 = vmax.f32 %v4406_v28, 0.0  ;;  %v9764_v49 = vld [vmem:[%s12927_s2 + $0x220] sm:$0xff]   ;;  %v9769_v28 = vld [vmem:[%s12927_s2 + $0x2a8] sm:$0xff]   ;;  %v9770_v5 = vld [vmem:[%s12927_s2 + $0x270] sm:$0xff]  }
 0x5b7   : > { %8465 = vmatprep.subr.bf16.mxu0 %v9750_v59  ;;  %8499 = vmatprep.subr.bf16.mxu1 %v9751_v34  ;;  %v9765_v58 = vld [vmem:[%s12927_s2 + $0x2a0] sm:$0xff]   ;;  %v9767_v59 = vld [vmem:[%s12927_s2 + $0x2e8] sm:$0xff]  }
 0x5b8   : > { %v4413_v9 = vmax.f32 %v4407_v7, 0.0  ;;  %v9768_v34 = vld [vmem:[%s12927_s2 + $0x228] sm:$0xff]   ;;  %v9772_v7 = vld [vmem:[%s12927_s2 + $0x230] sm:$0xff]  }
 0x5b9   : > { %v4383_v52 = vpop.f32.mrb[140].mxu1 }
 0x5ba   : > { %v4394_v21 = vadd.f32 %v4383_v52, %v4237_v41  ;;  %v9132_v47 = vpop.f32.mrb[141].mxu1  ;;  %v4417_v55 = vpack.c.bf16 %v4413_v9, %v4412_v33  ;;  %8466 = vmatpush3.bf16.msra.mxu0 %v9752_v48  ;;  %8500 = vmatpush3.bf16.msra.mxu1 %v9753_v50  ;;  %v9759_v41 = vld [vmem:[%s12927_s2 + $0x2d8] sm:$0xff]   ;;  %v9773_v48 = vld [vmem:[%s12927_s2 + $0x2b0] sm:$0xff]   ;;  %v7714_v9 = vld [vmem:[%s12932_s7 + $0x4] sm:$0xf] }
 0x5bb   : > { %v4386_v14 = vpop.f32.mrb[142].mxu1  ;;  %8467 = vmatprep.subr.bf16.mxu0 %v9754_v10  ;;  %8501 = vmatprep.subr.bf16.mxu1 %v9755_v13  ;;  %v9774_v50 = vld [vmem:[%s12927_s2 + $0x278] sm:$0xff]   ;;  %v11924_v52 = vrot.slane %v7714_v9, %v10997_v19  ;;  %v11930_v47 = vrot.slane %v7714_v9, %v11004_v3 }
 0x5bc   : > { %v4408_v40 = vadd.f32 %v7681_v23, %v4394_v21  ;;  %v4395_v24 = vadd.f32 %v4386_v14, %v4238_v26  ;;  %v9133_v30 = vpop.f32.mrb[143].mxu1  ;;  %4678 = vmatmul.mubr.bf16.gmra.mrb[148].mxu0 %v4417_v55  ;;  %4741 = vmatmul.mubr.bf16.gmra.mrb[148].mxu1 %v4417_v55  ;;  %v9762_v26 = vld [vmem:[%s12927_s2 + $0x260] sm:$0xff]   ;;  %v9775_v10 = vld [vmem:[%s12927_s2 + $0x2f8] sm:$0xff]   ;;  %v11927_v21 = vrot.slane %v7714_v9, %v10999_v22 }
 0x5bd   : > { %4687 = vmatprep.mubr.bf16.mxu0 %v11704_v20  ;;  %4750 = vmatprep.mubr.bf16.mxu1 %v11704_v20  ;;  %v9763_v20 = vld [vmem:[%s12927_s2 + $0x2e0] sm:$0xff]   ;;  %v9776_v13 = vld [vmem:[%s12927_s2 + $0x238] sm:$0xff]   ;;  %v11933_v55 = vrot.slane %v7714_v9, %v11006_v16 }
 0x5be   : > { %v4409_v17 = vadd.f32 %v7681_v23, %v4395_v24  ;;  %8468 = vmatpush3.bf16.msra.mxu0 %v9756_v37  ;;  %8502 = vmatpush3.bf16.msra.mxu1 %v9757_v61  ;;  %v4414_v23 = vmax.f32 %v4408_v40, 0.0  ;;  %v9777_v33 = vld [vmem:[%s12927_s2 + $0x2b8] sm:$0xff]  }
 0x5bf   : > { %8469 = vmatprep.subr.bf16.mxu0 %v9758_v60  ;;  %8503 = vmatprep.subr.bf16.mxu1 %v9759_v41 }
 0x5c0   : > { %v4415_v4 = vmax.f32 %v4409_v17, 0.0 }
 0x5c2   : > { %v4418_v51 = vpack.c.bf16 %v4415_v4, %v4414_v23  ;;  %8470 = vmatpush3.bf16.msra.mxu0 %v9760_v62  ;;  %8504 = vmatpush3.bf16.msra.mxu1 %v9761_v45  ;;  %v13043_v45 = vmax.f32 %v11046_v43, 0.0 }
 0x5c3   : > { %8471 = vmatprep.subr.bf16.mxu0 %v9762_v26  ;;  %8505 = vmatprep.subr.bf16.mxu1 %v9763_v20 }
 0x5c4   : > { %4688 = vmatmul.mubr.bf16.gmra.mrb[152].mxu0 %v4418_v51  ;;  %4751 = vmatmul.mubr.bf16.gmra.mrb[152].mxu1 %v4418_v51 }
 0x5c6   : > { %8472 = vmatpush3.bf16.msra.mxu0 %v9764_v49  ;;  %8506 = vmatpush3.bf16.msra.mxu1 %v9765_v58  ;;  %v13044_v49 = vmax.f32 %v11051_v63, 0.0  ;;  %v13048_v63 = vmax.f32 %v11061_v0, 0.0 }
 0x5c7   : > { %8473 = vmatprep.subr.bf16.mxu0 %v9766_v57  ;;  %8507 = vmatprep.subr.bf16.mxu1 %v9767_v59  ;;  %v13045_v57 = vmax.f32 %v11053_v2, 0.0  ;;  %v13049_v2 = vmax.f32 %v11064_v56, 0.0 }
 0x5ca   : > { %8474 = vmatpush3.bf16.msra.mxu0 %v9768_v34  ;;  %8508 = vmatpush3.bf16.msra.mxu1 %v9769_v28  ;;  %v13046_v28 = vmax.f32 %v11057_v8, 0.0 }
 0x5cb   : > { %8475 = vmatprep.subr.bf16.mxu0 %v9770_v5  ;;  %8509 = vmatprep.subr.bf16.mxu1 %v9771_v54  ;;  %v13047_v54 = vmax.f32 %v11059_v18, 0.0 }
 0x5ce   : > { %8476 = vmatpush3.bf16.msra.mxu0 %v9772_v7  ;;  %8510 = vmatpush3.bf16.msra.mxu1 %v9773_v48 }
 0x5cf   : > { %8477 = vmatprep.subr.bf16.mxu0 %v9774_v50  ;;  %8511 = vmatprep.subr.bf16.mxu1 %v9775_v10  ;;  %v13050_v10 = vmax.f32 %v11066_v12, 0.0 }
 0x5d2   : > { %8478 = vmatpush3.bf16.msra.mxu0 %v9776_v13  ;;  %8512 = vmatpush3.bf16.msra.mxu1 %v9777_v33 }
 0x5d3   : > { %9134 = vmatprep.subr.bf16.mxu0 %v13035_v11  ;;  %9162 = vmatprep.subr.bf16.mxu1 %v13035_v11 }
 0x687   : > { %v4669_v37 = vpop.f32.mrb[144].mxu0  ;;  %v4732_v61 = vpop.f32.mrb[144].mxu1 }
 0x688   : > { %v4670_v14 = vadd.f32 %v4669_v37, %v11924_v52  ;;  %v4733_v60 = vadd.f32 %v4732_v61, %v11927_v21  ;;  %v4671_v41 = vpop.f32.mrb[145].mxu0  ;;  %v4734_v40 = vpop.f32.mrb[145].mxu1 }
 0x689   : > { %v4672_v24 = vadd.f32 %v4671_v41, %v11930_v47  ;;  %v4735_v30 = vadd.f32 %v4734_v40, %v11933_v55  ;;  %v4673_v17 = vpop.f32.mrb[146].mxu0  ;;  %v4736_v62 = vpop.f32.mrb[146].mxu1 }
 0x68a   : > { %v11941_v26 = vadd.f32 %v4670_v14, %v13043_v45  ;;  %v4674_v20 = vadd.f32 %v4673_v17, %v11924_v52  ;;  %v4737_v23 = vadd.f32 %v4736_v62, %v11927_v21  ;;  %v4675_v4 = vpop.f32.mrb[147].mxu0  ;;  %v4738_v51 = vpop.f32.mrb[147].mxu1  ;;  %v11957_v5 = vadd.f32 %v4733_v60, %v13046_v28 }
 0x68b   : > { %v11947_v58 = vadd.f32 %v4672_v24, %v13044_v49  ;;  %v11951_v59 = vadd.f32 %v4735_v30, %v13045_v57  ;;  %v4676_v34 = vadd.f32 %v4675_v4, %v11930_v47  ;;  %v4739_v43 = vadd.f32 %v4738_v51, %v11933_v55  ;;  %v9778_v51 = vld [vmem:[%s12929_s4 + $0x4c0] sm:$0xff]  }
 0x68c   : > { %v11961_v7 = vadd.f32 %v4674_v20, %v13047_v54  ;;  %v11965_v48 = vadd.f32 %v4737_v23, %v13048_v63  ;;  %v12999_v8 = vmax.f32 %v11941_v26, 0.0  ;;  %v12998_v12 = vmax.f32 %v11957_v5, 0.0 }
 0x68d   : > { %v11969_v50 = vadd.f32 %v4676_v34, %v13049_v2  ;;  %v11973_v13 = vadd.f32 %v4739_v43, %v13050_v10  ;;  %v12997_v9 = vmax.f32 %v11947_v58, 0.0  ;;  %v12996_v0 = vmax.f32 %v11951_v59, 0.0  ;;  %v9780_v2 = vld [vmem:[%s12929_s4 + $0x480] sm:$0xff]  }
 0x68e   : > { %v12995_v33 = vmax.f32 %v11961_v7, 0.0  ;;  %v12994_v18 = vmax.f32 %v11965_v48, 0.0  ;;  %v13051_v57 = vmax.f32 %v11108_v6, 0.0  ;;  %v13052_v10 = vmax.f32 %v11115_v27, 0.0 }
 0x68f   : > { %v12993_v37 = vmax.f32 %v11969_v50, 0.0  ;;  %v12992_v56 = vmax.f32 %v11973_v13, 0.0  ;;  %v4679_v61 = vpop.f32.mrb[148].mxu0  ;;  %v4742_v14 = vpop.f32.mrb[148].mxu1  ;;  %v13057_v27 = vmax.f32 %v11127_v46, 0.0 }
 0x690   : > { %v4809_v60 = vpack.c.bf16 %v12995_v33, %v12999_v8  ;;  %v4680_v41 = vadd.f32 %v4679_v61, %v11924_v52  ;;  %v4743_v40 = vadd.f32 %v4742_v14, %v11927_v21  ;;  %v4681_v24 = vpop.f32.mrb[149].mxu0  ;;  %v4744_v30 = vpop.f32.mrb[149].mxu1  ;;  %v4811_v49 = vpack.c.bf16 %v12994_v18, %v12998_v12  ;;  %v9794_v33 = vld [vmem:[%s12929_s4 + $0x500] sm:$0xff]  }
 0x691   : > { %v4682_v17 = vadd.f32 %v4681_v24, %v11930_v47  ;;  %v4745_v62 = vadd.f32 %v4744_v30, %v11933_v55  ;;  %v4683_v45 = vpop.f32.mrb[150].mxu0  ;;  %v4746_v20 = vpop.f32.mrb[150].mxu1  ;;  %v4810_v23 = vpack.c.bf16 %v12993_v37, %v12997_v9  ;;  %v4812_v4 = vpack.c.bf16 %v12992_v56, %v12996_v0 }
 0x692   : > { %v12008_v34 = vadd.f32 %v4680_v41, %v13051_v57  ;;  %v4684_v43 = vadd.f32 %v4683_v45, %v11924_v52  ;;  %v4747_v28 = vadd.f32 %v4746_v20, %v11927_v21  ;;  %v4685_v54 = vpop.f32.mrb[151].mxu0  ;;  %v4748_v63 = vpop.f32.mrb[151].mxu1  ;;  %v13053_v14 = vmax.f32 %v11117_v25, 0.0 }
 0x693   : > { %v12017_v61 = vadd.f32 %v4682_v17, %v13052_v10  ;;  %v4686_v6 = vadd.f32 %v4685_v54, %v11930_v47  ;;  %v4749_v41 = vadd.f32 %v4748_v63, %v11933_v55  ;;  %5118 = vmatprep.mubr.bf16.mxu0 %v4810_v23  ;;  %v13055_v30 = vmax.f32 %v11123_v42, 0.0  ;;  %5175 = vmatprep.mubr.bf16.mxu1 %v4812_v4  ;;  %v9779_v42 = vld [vmem:[%s12929_s4 + $0x4c8] sm:$0xff]  }
 0x694   : > { %v12021_v24 = vadd.f32 %v4745_v62, %v13053_v14  ;;  %v13056_v20 = vmax.f32 %v11125_v39, 0.0  ;;  %v12035_v17 = vadd.f32 %v4747_v28, %v13057_v27  ;;  %5119 = vmatmul.mubr.bf16.vlgmr.msra.gmra.mrb[156].mxu0 %v4809_v60  ;;  %v13059_v25 = vmax.f32 %v11130_v36, 0.0  ;;  %5176 = vmatmul.mubr.bf16.vlgmr.msra.gmra.mrb[156].mxu1 %v4811_v49 }
 0x695   : > { %v12027_v45 = vadd.f32 %v4743_v40, %v13055_v30  ;;  %v13060_v23 = vmax.f32 %v11132_v35, 0.0  ;;  %9135 = vmatpush3.bf16.msra.mxu0 %v9778_v51  ;;  %9163 = vmatpush3.bf16.msra.mxu1 %v9780_v2  ;;  %v12990_v36 = vmax.f32 %v12017_v61, 0.0  ;;  %v12991_v49 = vmax.f32 %v12008_v34, 0.0 }
 0x696   : > { %13054 = vst [vmem:[#allocation15_spill] sm:$0xff] %v12021_v24  ;;  %v12031_v57 = vadd.f32 %v4684_v43, %v13056_v20  ;;  %13058 = vst [vmem:[#allocation16_spill] sm:$0xff] %v12035_v17  ;;  %v12039_v62 = vadd.f32 %v4686_v6, %v13059_v25  ;;  %v12979_v46 = vmax.f32 %v12035_v17, 0.0  ;;  %9136 = vmatprep.subr.bf16.mxu0 %v13035_v11  ;;  %v12977_v60 = vmax.f32 %v12021_v24, 0.0 }
 0x697   : > { %v12043_v54 = vadd.f32 %v4749_v41, %v13060_v23  ;;  %v4689_v4 = vpop.f32.mrb[152].mxu0  ;;  %v4752_v51 = vpop.f32.mrb[152].mxu1  ;;  %9164 = vmatprep.subr.bf16.mxu1 %v13035_v11  ;;  %v12980_v43 = vmax.f32 %v12027_v45, 0.0 }
 0x698   : > { %v12989_v39 = vmax.f32 %v12031_v57, 0.0  ;;  %v12978_v35 = vmax.f32 %v12039_v62, 0.0  ;;  %v4690_v28 = vadd.f32 %v4689_v4, %v11924_v52  ;;  %v4753_v63 = vadd.f32 %v4752_v51, %v11927_v21  ;;  %v4691_v2 = vpop.f32.mrb[153].mxu0  ;;  %v4754_v10 = vpop.f32.mrb[153].mxu1 }
 0x699   : > { %13061 = vst [vmem:[#allocation17_spill] sm:$0xff] %v12043_v54  ;;  %v12976_v40 = vmax.f32 %v12043_v54, 0.0  ;;  %v4692_v14 = vadd.f32 %v4691_v2, %v11930_v47  ;;  %v4755_v6 = vadd.f32 %v4754_v10, %v11933_v55  ;;  %v4693_v41 = vpop.f32.mrb[154].mxu0  ;;  %v4756_v30 = vpop.f32.mrb[154].mxu1  ;;  %9137 = vmatpush3.bf16.msra.mxu0 %v9779_v42  ;;  %v4815_v10 = vpack.c.bf16 %v12979_v46, %v12980_v43 }
 0x69a   : > { %v4814_v20 = vpack.c.bf16 %v12978_v35, %v12990_v36  ;;  %v4694_v25 = vadd.f32 %v4693_v41, %v11924_v52  ;;  %v4757_v23 = vadd.f32 %v4756_v30, %v11927_v21  ;;  %v4695_v4 = vpop.f32.mrb[155].mxu0  ;;  %v4758_v51 = vpop.f32.mrb[155].mxu1  ;;  %v4813_v2 = vpack.c.bf16 %v12989_v39, %v12991_v49  ;;  %9138 = vmatprep.subr.bf16.mxu0 %v13035_v11 }
 0x69b   : > { %v4816_v27 = vpack.c.bf16 %v12976_v40, %v12977_v60  ;;  %v13062_v42 = vmax.f32 %v11174_v31, 0.0  ;;  %v13063_v52 = vmax.f32 %v11176_v44, 0.0  ;;  %v4696_v41 = vadd.f32 %v4695_v4, %v11930_v47  ;;  %v13069_v44 = vld [vmem:[#allocation12_spill] sm:$0xff] }
 0x69c   : > { %v4759_v30 = vadd.f32 %v4758_v51, %v11933_v55  ;;  %5126 = vmatprep.mubr.bf16.mxu0 %v4814_v20  ;;  %v13065_v60 = vmax.f32 %v11182_v1, 0.0  ;;  %v13066_v46 = vmax.f32 %v11184_v32, 0.0  ;;  %v13067_v31 = vmax.f32 %v11186_v38, 0.0  ;;  %v13072_v55 = vld [vmem:[#allocation13_spill] sm:$0xff]  ;;  %v13074_v1 = vld [vmem:[#allocation14_spill] sm:$0xff] }
 0x69d   : > { %v12083_v40 = vadd.f32 %v4692_v14, %v13062_v42  ;;  %v12087_v21 = vadd.f32 %v4755_v6, %v13063_v52  ;;  %5183 = vmatprep.mubr.bf16.mxu1 %v4816_v27  ;;  %5127 = vmatmul.mubr.bf16.gmra.mrb[160].mxu0 %v4813_v2  ;;  %v13070_v6 = vmax.f32 %v13069_v44, 0.0  ;;  %v13073_v20 = vmax.f32 %v13072_v55, 0.0  ;;  %v9784_v44 = vld [vmem:[%s12929_s4 + $0x490] sm:$0xff]   ;;  %v9786_v55 = vld [vmem:[%s12929_s4 + $0x498] sm:$0xff]  }
 0x69e   : > { %v12093_v35 = vadd.f32 %v4690_v28, %v13065_v60  ;;  %v12097_v43 = vadd.f32 %v4694_v25, %v13066_v46  ;;  %v12101_v14 = vadd.f32 %v4757_v23, %v13067_v31  ;;  %v13075_v60 = vmax.f32 %v13074_v1, 0.0  ;;  %5184 = vmatmul.mubr.bf16.gmra.mrb[160].mxu1 %v4815_v10  ;;  %v9783_v31 = vld [vmem:[%s12929_s4 + $0x4d8] sm:$0xff]   ;;  %v9788_v1 = vld [vmem:[%s12929_s4 + $0x4a0] sm:$0xff]  }
 0x69f   : > { %13064 = vst [vmem:[#allocation18_spill] sm:$0xff] %v12087_v21  ;;  %v12105_v47 = vadd.f32 %v4753_v63, %v13070_v6  ;;  %v12109_v4 = vadd.f32 %v4696_v41, %v13073_v20  ;;  %v12987_v32 = vmax.f32 %v12083_v40, 0.0  ;;  %v12983_v46 = vmax.f32 %v12087_v21, 0.0  ;;  %v9781_v41 = vld [vmem:[%s12929_s4 + $0x4d0] sm:$0xff]   ;;  %v9785_v6 = vld [vmem:[%s12929_s4 + $0x4e0] sm:$0xff]   ;;  %v9787_v20 = vld [vmem:[%s12929_s4 + $0x4e8] sm:$0xff]  }
 0x6a0   : > { %13068 = vst [vmem:[#allocation19_spill] sm:$0xff] %v12101_v14  ;;  %v12113_v28 = vadd.f32 %v4759_v30, %v13075_v60  ;;  %v12986_v38 = vmax.f32 %v12097_v43, 0.0  ;;  %v12982_v27 = vmax.f32 %v12101_v14, 0.0  ;;  %v12988_v23 = vmax.f32 %v12093_v35, 0.0  ;;  %v9782_v30 = vld [vmem:[%s12929_s4 + $0x488] sm:$0xff]   ;;  %9139 = vmatpush3.bf16.msra.mxu0 %v9781_v41  ;;  %v9789_v60 = vld [vmem:[%s12929_s4 + $0x4f0] sm:$0xff]  }
 0x6a1   : > { %13071 = vst [vmem:[#allocation12_spill] sm:$0xff] %v12105_v47  ;;  %v12985_v63 = vmax.f32 %v12109_v4, 0.0  ;;  %v12984_v51 = vmax.f32 %v12105_v47, 0.0  ;;  %9165 = vmatpush3.bf16.msra.mxu1 %v9782_v30  ;;  %9140 = vmatprep.subr.bf16.mxu0 %v13035_v11  ;;  %v5676_v14 = vld [vmem:[#allocation2] sm:$0x80] }
 0x6a2   : > { %13076 = vst [vmem:[#allocation13_spill] sm:$0xff] %v12113_v28  ;;  %v12981_v25 = vmax.f32 %v12113_v28, 0.0  ;;  %v4817_v42 = vpack.c.bf16 %v12986_v38, %v12988_v23  ;;  %9166 = vmatprep.subr.bf16.mxu1 %v13035_v11 }
 0x6a3   : > { %v4818_v2 = vpack.c.bf16 %v12985_v63, %v12987_v32  ;;  %v4819_v52 = vpack.c.bf16 %v12982_v27, %v12984_v51  ;;  %v5218_v51 = vld [vmem:[#allocation2] sm:$0xf8] }
 0x6a4   : > { %v4820_v10 = vpack.c.bf16 %v12981_v25, %v12983_v46  ;;  %9141 = vmatpush3.bf16.msra.mxu0 %v9783_v31  ;;  %v12198_v31 = vld [vmem:[%s12928_s3 + $0x2] ss:$0 sm:$0xff]  ;;  %v5377_v32 = vshrl.u32 %v5218_v51, 16  ;;  %v5380_v23 = vshll.u32 %v5218_v51, 16 }
 0x6a5   : > { %5134 = vmatprep.mubr.bf16.mxu0 %v4818_v2  ;;  %9167 = vmatpush3.bf16.msra.mxu1 %v9784_v44  ;;  %v9790_v2 = vld [vmem:[%s12929_s4 + $0x4a8] sm:$0xff]  }
 0x6a6   : > { %5191 = vmatprep.mubr.bf16.mxu1 %v4820_v10  ;;  %5135 = vmatmul.mubr.bf16.gmra.mrb[164].mxu0 %v4817_v42  ;;  %v9791_v10 = vld [vmem:[%s12929_s4 + $0x4f8] sm:$0xff]   ;;  %v9792_v42 = vld [vmem:[%s12929_s4 + $0x4b0] sm:$0xff]   ;;  %v5382_v56 = vrot.slane %v5380_v23, 4 }
 0x6a7   : > { %5192 = vmatmul.mubr.bf16.gmra.mrb[164].mxu1 %v4819_v52  ;;  %9150 = vmatprep.mubr.msk.bf16.mxu0 %vm9985_vm6, %v13035_v11  ;;  %v9793_v52 = vld [vmem:[%s12929_s4 + $0x4b8] sm:$0xff]  }
 0x6a8   : > { %9178 = vmatprep.mubr.msk.bf16.mxu1 %vm9985_vm6, %v13035_v11  ;;  %9142 = vmatprep.subr.bf16.mxu0 %v13035_v11 }
 0x6a9   : > { %9168 = vmatprep.subr.bf16.mxu1 %v13035_v11  ;;  %9143 = vmatpush3.bf16.msra.mxu0 %v9785_v6 }
 0x6aa   : > { %9169 = vmatpush3.bf16.msra.mxu1 %v9786_v55  ;;  %9144 = vmatprep.subr.bf16.mxu0 %v13035_v11 }
 0x6ab   : > { %9170 = vmatprep.subr.bf16.mxu1 %v13035_v11 }
 0x6ad   : > { %9145 = vmatpush3.bf16.msra.mxu0 %v9787_v20 }
 0x6ae   : > { %9171 = vmatpush3.bf16.msra.mxu1 %v9788_v1  ;;  %9146 = vmatprep.subr.bf16.mxu0 %v13035_v11 }
 0x6af   : > { %9172 = vmatprep.subr.bf16.mxu1 %v13035_v11 }
 0x6b1   : > { %9147 = vmatpush3.bf16.msra.mxu0 %v9789_v60 }
 0x6b2   : > { %9173 = vmatpush3.bf16.msra.mxu1 %v9790_v2  ;;  %9148 = vmatprep.subr.bf16.mxu0 %v13035_v11 }
 0x6b3   : > { %9174 = vmatprep.subr.bf16.mxu1 %v13035_v11 }
 0x6b5   : > { %9149 = vmatpush3.bf16.msra.mxu0 %v9791_v10 }
 0x6b6   : > { %9175 = vmatpush3.bf16.msra.mxu1 %v9792_v42  ;;  %9190 = vmatprep.subr.bf16.mxu0 %v13035_v11 }
 0x6b7   : > { %9176 = vmatprep.subr.bf16.mxu1 %v13035_v11 }
 0x6ba   : > { %9177 = vmatpush3.bf16.msra.mxu1 %v9793_v52 }
 0x6bb   : > { %9218 = vmatprep.subr.bf16.mxu1 %v13035_v11 }
 0x767   : > { %v8479_v41 = vpop.f32.mrb[156].mxu0  ;;  %v8513_v30 = vpop.f32.mrb[156].mxu1 }
 0x768   : > { %v8480_v44 = vpop.f32.mrb[157].mxu0  ;;  %v8514_v55 = vpop.f32.mrb[157].mxu1 }
 0x769   : > { %v8481_v6 = vadd.f32 %v8480_v44, %v8479_v41  ;;  %v8482_v20 = vpop.f32.mrb[158].mxu0  ;;  %v8515_v1 = vadd.f32 %v8514_v55, %v8513_v30  ;;  %v8516_v60 = vpop.f32.mrb[158].mxu1  ;;  %v12207_v44 = vld [vmem:[#allocation2] sm:$0xf0] }
 0x76a   : > { %v8483_v2 = vpop.f32.mrb[159].mxu0  ;;  %v8517_v52 = vpop.f32.mrb[159].mxu1 }
 0x76b   : > { %v5121_v10 = vadd.f32 %v8481_v6, %v12198_v31  ;;  %v8484_v42 = vadd.f32 %v8483_v2, %v8482_v20  ;;  %v8518_v25 = vadd.f32 %v8517_v52, %v8516_v60  ;;  %v5261_v52 = vrot.slane %v12207_v44, 4 }
 0x76d   : > { %v12201_v27 = vadd.f32 %v8515_v1, %v5121_v10  ;;  %v5124_v46 = vadd.f32 %v8484_v42, %v12198_v31 }
 0x76f   : > { %v13001_v63 = vmax.f32 %v12201_v27, 0.0  ;;  %v12205_v38 = vadd.f32 %v8518_v25, %v5124_v46 }
 0x770   : > { %v8485_v41 = vpop.f32.mrb[160].mxu0 }
 0x771   : > { %v8519_v30 = vpop.f32.mrb[160].mxu1  ;;  %v8486_v55 = vpop.f32.mrb[161].mxu0  ;;  %v13000_v6 = vmax.f32 %v12205_v38, 0.0  ;;  %v5206_v25 = vsel %vm360_vm7, %v13001_v63, 0.0 }
 0x772   : > { %v8487_v20 = vadd.f32 %v8486_v55, %v8485_v41  ;;  %v8520_v60 = vpop.f32.mrb[161].mxu1  ;;  %v8488_v1 = vpop.f32.mrb[162].mxu0 }
 0x773   : > { %v8521_v2 = vadd.f32 %v8520_v60, %v8519_v30  ;;  %v8522_v10 = vpop.f32.mrb[162].mxu1  ;;  %v8489_v42 = vpop.f32.mrb[163].mxu0  ;;  %v5207_v51 = vsel %vm361_vm10, %v13000_v6, 0.0  ;;  %v5379_v60 = vrot.slane %v5377_v32, 3 }
 0x774   : > { %v5129_v36 = vadd.f32 %v8487_v20, %v12198_v31  ;;  %v8490_v41 = vadd.f32 %v8489_v42, %v8488_v1  ;;  %v8523_v55 = vpop.f32.mrb[163].mxu1  ;;  %v5212_v49 = vpack.c.bf16 %v5207_v51, %v5206_v25 }
 0x775   : > { %v8524_v30 = vadd.f32 %v8523_v55, %v8522_v10  ;;  %v5383_v10 = vor.u32 %v5382_v56, %v5379_v60  ;;  %v9796_v56 = vld [vmem:[%s12929_s4 + $0x540] sm:$0xff]  }
 0x776   : > { %v12220_v37 = vadd.f32 %v8521_v2, %v5129_v36  ;;  %v5132_v18 = vadd.f32 %v8490_v41, %v12198_v31  ;;  %5215 = vst [vmem:[#allocation2 + $0x8] sm:$0xff] %v5212_v49  ;;  %v5262_v46 = vrot.slane %v5212_v49, 4  ;;  %v12226_v39 = vshrl.u32 %v5212_v49, 16 }
 0x777   : > { %v12228_v0 = vshll.u32 %v5212_v49, 16 }
 0x778   : > { %v13002_v20 = vmax.f32 %v12220_v37, 0.0  ;;  %v12231_v1 = vadd.f32 %v8524_v30, %v5132_v18  ;;  %v5263_v2 = vsel %vm899_vm8, %v5261_v52, %v5262_v46  ;;  %v5387_v42 = vrot.slane %v12226_v39, 3  ;;  %v9795_v52 = vld [vmem:[%s12929_s4 + $0x508] sm:$0xff]  }
 0x779   : > { %v8491_v32 = vpop.f32.mrb[164].mxu0  ;;  %v5390_v25 = vrot.slane %v12228_v0, 4  ;;  %9151 = vmatmul.mubr.bf16.vlgmr.msra.gmra.mrb[168].mxu0 %v5263_v2  ;;  %v5981_v60 = vrot.slane %v12228_v0, 1  ;;  %v5546_v28 = vrot.slane %v12228_v0, 5 }
 0x77a   : > { %v8525_v23 = vpop.f32.mrb[164].mxu1  ;;  %v8492_v36 = vpop.f32.mrb[165].mxu0  ;;  %v13005_v51 = vmax.f32 %v12231_v1, 0.0  ;;  %9191 = vmatpush3.bf16.msra.mxu0 %v9794_v33  ;;  %9154 = vmatprep.mubr.msk.bf16.mxu0 %vm9985_vm6, %v13035_v11 }
 0x77b   : > { %v8493_v41 = vadd.f32 %v8492_v36, %v8491_v32  ;;  %v8526_v55 = vpop.f32.mrb[165].mxu1  ;;  %v8494_v49 = vpop.f32.mrb[166].mxu0  ;;  %v5391_v30 = vor.u32 %v5390_v25, %v5387_v42  ;;  %9192 = vmatprep.subr.bf16.mxu0 %v13035_v11 }
 0x77c   : > { %v8527_v9 = vadd.f32 %v8526_v55, %v8525_v23  ;;  %v8528_v12 = vpop.f32.mrb[166].mxu1  ;;  %v8495_v18 = vpop.f32.mrb[167].mxu0  ;;  %v5208_v23 = vsel %vm362_vm9, %v13002_v20, 0.0  ;;  %v5209_v36 = vsel %vm363_vm12, %v13005_v51, 0.0  ;;  %v12261_v20 = vor.u32 %v5981_v60, %v12226_v39  ;;  %v9799_v60 = vld [vmem:[%s12929_s4 + $0x518] sm:$0xff]   ;;  %v9805_v51 = vld [vmem:[%s12929_s4 + $0x530] sm:$0xff]  }
 0x77d   : > { %v5137_v2 = vadd.f32 %v8493_v41, %v12198_v31  ;;  %v8496_v42 = vadd.f32 %v8495_v18, %v8494_v49  ;;  %v8529_v25 = vpop.f32.mrb[167].mxu1  ;;  %v5213_v55 = vpack.c.bf16 %v5209_v36, %v5208_v23  ;;  %v5392_v6 = vsel %vm1015_vm11, %v5383_v10, %v5391_v30  ;;  %v9797_v41 = vld [vmem:[%s12929_s4 + $0x510] sm:$0xff]  }
 0x77e   : > { %v8530_v8 = vadd.f32 %v8529_v25, %v8528_v12  ;;  %9179 = vmatmul.mubr.bf16.vlgmr.msra.gmra.mrb[168].mxu1 %v5392_v6  ;;  %9193 = vmatpush3.bf16.msra.mxu0 %v9795_v52  ;;  %v9798_v12 = vld [vmem:[%s12929_s4 + $0x548] sm:$0xff]   ;;  %v5538_v23 = vshrl.u32 %v12207_v44, 16 }
 0x77f   : > { %v12257_v63 = vadd.f32 %v8527_v9, %v5137_v2  ;;  %v5140_v32 = vadd.f32 %v8496_v42, %v12198_v31  ;;  %9219 = vmatpush3.bf16.msra.mxu1 %v9796_v56  ;;  %v12263_v33 = vrot.slane %v5213_v55, 4  ;;  %v12271_v9 = vshrl.u32 %v5213_v55, 16  ;;  %9194 = vmatprep.subr.bf16.mxu0 %v13035_v11 }
 0x780   : > { %v12273_v10 = vshll.u32 %v5213_v55, 16  ;;  %9220 = vmatprep.subr.bf16.mxu1 %v13035_v11  ;;  %9182 = vmatprep.mubr.msk.bf16.mxu1 %vm9985_vm6, %v13035_v11 }
 0x781   : > { %v13004_v31 = vmax.f32 %v12257_v63, 0.0  ;;  %v12276_v6 = vadd.f32 %v8530_v8, %v5140_v32  ;;  %v5265_v49 = vsel %vm899_vm8, %v5262_v46, %v12263_v33  ;;  %v5396_v18 = vrot.slane %v12271_v9, 3  ;;  %v9800_v46 = vld [vmem:[%s12929_s4 + $0x550] sm:$0xff]   ;;  %v9801_v32 = vld [vmem:[%s12929_s4 + $0x520] sm:$0xff]  }
 0x782   : > { %v5399_v52 = vrot.slane %v12273_v10, 4  ;;  %9155 = vmatmul.mubr.bf16.gmra.mrb[172].mxu0 %v5265_v49  ;;  %v5549_v49 = vrot.slane %v12271_v9, 4 }
 0x783   : > { %v13003_v56 = vmax.f32 %v12276_v6, 0.0  ;;  %9195 = vmatpush3.bf16.msra.mxu0 %v9797_v41  ;;  %9221 = vmatpush3.bf16.msra.mxu1 %v9798_v12  ;;  %v5210_v36 = vsel %vm364_vm13, %v13004_v31, 0.0  ;;  %v9802_v41 = vld [vmem:[%s12929_s4 + $0x558] sm:$0xff]  }
 0x784   : > { %v12287_v8 = vor.u32 %v5399_v52, %v5396_v18  ;;  %9196 = vmatprep.subr.bf16.mxu0 %v13035_v11  ;;  %9222 = vmatprep.subr.bf16.mxu1 %v13035_v11  ;;  %v5550_v18 = vrot.slane %v12273_v10, 5  ;;  %v9803_v52 = vld [vmem:[%s12929_s4 + $0x528] sm:$0xff]  }
 0x785   : > { %v5211_v42 = vsel %vm365_vm14, %v13003_v56, 0.0  ;;  %9158 = vmatprep.mubr.msk.bf16.mxu0 %vm9985_vm6, %v13035_v11 }
 0x786   : > { %v12305_v25 = vpack.c.bf16 %v5211_v42, %v5210_v36  ;;  %v5401_v55 = vsel %vm1015_vm11, %v5391_v30, %v12287_v8  ;;  %v5541_v36 = vshll.u32 %v12207_v44, 16  ;;  %v9806_v44 = vld [vmem:[%s12929_s4 + $0x568] sm:$0xff]  }
 0x787   : > { %9183 = vmatmul.mubr.bf16.gmra.mrb[172].mxu1 %v5401_v55  ;;  %9197 = vmatpush3.bf16.msra.mxu0 %v9799_v60  ;;  %v9804_v60 = vld [vmem:[%s12929_s4 + $0x560] sm:$0xff]   ;;  %v12342_v55 = vor.u32 %v5550_v18, %v5549_v49  ;;  %v5540_v49 = vrot.slane %v5538_v23, 4  ;;  %v9807_v23 = vld [vmem:[%s12929_s4 + $0x538] sm:$0xff]  }
 0x788   : > { %5217 = vst [vmem:[#allocation2 + $0x18] sm:$0xff] %v12305_v25  ;;  %9223 = vmatpush3.bf16.msra.mxu1 %v9800_v46  ;;  %v12319_v12 = vshrl.u32 %v12305_v25, 16  ;;  %9198 = vmatprep.subr.bf16.mxu0 %v13035_v11  ;;  %v12324_v30 = vshll.u32 %v12305_v25, 16  ;;  %v5543_v18 = vrot.slane %v5541_v36, 5  ;;  %v9808_v36 = vld [vmem:[%s12929_s4 + $0x570] sm:$0xff]  }
 0x789   : > { %9224 = vmatprep.subr.bf16.mxu1 %v13035_v11  ;;  %9186 = vmatprep.mubr.msk.bf16.mxu1 %vm9985_vm6, %v13035_v11 }
 0x78a   : > { %v6449_v46 = vrot.slane %v12319_v12, 4  ;;  %v6450_v2 = vrot.slane %v12324_v30, 5 }
 0x78b   : > { %9199 = vmatpush3.bf16.msra.mxu0 %v9801_v32 }
 0x78c   : > { %9225 = vmatpush3.bf16.msra.mxu1 %v9802_v41  ;;  %9200 = vmatprep.subr.bf16.mxu0 %v13035_v11  ;;  %v12344_v32 = vor.u32 %v6450_v2, %v6449_v46  ;;  %v5545_v46 = vrot.slane %v12226_v39, 4 }
 0x78d   : > { %9226 = vmatprep.subr.bf16.mxu1 %v13035_v11 }
 0x78f   : > { %v5221_v42 = vld [vmem:[#allocation2 + $0x18] sm:$0xf]  ;;  %9201 = vmatpush3.bf16.msra.mxu0 %v9803_v52  ;;  %v12358_v52 = vsel %vm1177_vm15, %v12342_v55, %v12344_v32 }
 0x790   : > { %v5266_v41 = vrot.slane %v5221_v42, 4  ;;  %v5403_v56 = vshrl.u32 %v5221_v42, 16  ;;  %v5406_v31 = vshll.u32 %v5221_v42, 16  ;;  %9227 = vmatpush3.bf16.msra.mxu1 %v9804_v60  ;;  %9202 = vmatprep.subr.bf16.mxu0 %v13035_v11 }
 0x791   : > { %9228 = vmatprep.subr.bf16.mxu1 %v13035_v11 }
 0x792   : > { %v5267_v60 = vsel %vm899_vm8, %v12263_v33, %v5266_v41  ;;  %v5405_v2 = vrot.slane %v5403_v56, 3  ;;  %v5408_v42 = vrot.slane %v5406_v31, 4  ;;  %v5696_v31 = vshrl.u32 %v5676_v14, 16  ;;  %v9810_v14 = vld [vmem:[%s12929_s4 + $0x580] sm:$0xff]  }
 0x793   : > { %9159 = vmatmul.mubr.bf16.gmra.mrb[176].mxu0 %v5267_v60  ;;  %v5547_v41 = vor.u32 %v5546_v28, %v5545_v46  ;;  %v9809_v60 = vld [vmem:[%s12929_s4 + $0x578] sm:$0xff]   ;;  %v9812_v46 = vld [vmem:[%s12929_s4 + $0x5c0] sm:$0xff]  }
 0x794   : > { %v5409_v21 = vor.u32 %v5408_v42, %v5405_v2  ;;  %9203 = vmatpush3.bf16.msra.mxu0 %v9805_v51  ;;  %9229 = vmatpush3.bf16.msra.mxu1 %v9806_v44  ;;  %v5544_v51 = vor.u32 %v5543_v18, %v5540_v49  ;;  %v5699_v44 = vrot.slane %v12226_v39, 7  ;;  %v5698_v28 = vrot.slane %v5696_v31, 7  ;;  %v5519_v49 = vld [vmem:[#allocation2 + $0x18] sm:$0x1f]  ;;  %v9811_v18 = vld [vmem:[%s12929_s4 + $0x588] sm:$0xff]  }
 0x795   : > { %9204 = vmatprep.subr.bf16.mxu0 %v13035_v11  ;;  %9230 = vmatprep.subr.bf16.mxu1 %v13035_v11  ;;  %v5554_v42 = vshrl.u32 %v5519_v49, 16  ;;  %v9814_v31 = vld [vmem:[%s12929_s4 + $0x5c8] sm:$0xff]  }
 0x796   : > { %v5410_v56 = vsel %vm1015_vm11, %v12287_v8, %v5409_v21  ;;  %9206 = vmatprep.mubr.msk.bf16.mxu0 %vm9985_vm6, %v13035_v11  ;;  %v5548_v21 = vsel %vm1177_vm15, %v5544_v51, %v5547_v41  ;;  %v5700_v39 = vor.u32 %v5699_v44, %v12228_v0  ;;  %v5702_v0 = vrot.slane %v12271_v9, 7 }
 0x797   : > { %9187 = vmatmul.mubr.bf16.gmra.mrb[176].mxu1 %v5410_v56  ;;  %v5552_v56 = vsel %vm1177_vm15, %v5547_v41, %v12342_v55 }
 0x798   : > { %9205 = vmatpush3.bf16.msra.mxu0 %v9807_v23  ;;  %9231 = vmatpush3.bf16.msra.mxu1 %v9808_v36  ;;  %v5701_v2 = vsel %vm1336_vm0, %v5698_v28, %v5700_v39  ;;  %v5557_v23 = vshll.u32 %v5519_v49, 16  ;;  %v9813_v36 = vld [vmem:[%s12929_s4 + $0x590] sm:$0xff]   ;;  %v5703_v51 = vor.u32 %v5702_v0, %v12273_v10  ;;  %v5708_v49 = vrot.slane %v12319_v12, 7 }
 0x799   : > { %9232 = vmatprep.subr.bf16.mxu1 %v13035_v11  ;;  %9246 = vmatprep.subr.bf16.mxu0 %v13035_v11  ;;  %v9816_v28 = vld [vmem:[%s12929_s4 + $0x5d0] sm:$0xff]  }
 0x79a   : > { %9234 = vmatprep.mubr.msk.bf16.mxu1 %vm9985_vm6, %v13035_v11  ;;  %v5704_v41 = vsel %vm1336_vm0, %v5699_v44, %v5703_v51  ;;  %v9824_v51 = vld [vmem:[%s12929_s4 + $0x5f0] sm:$0xff]  }
 0x79b   : > { %9207 = vmatmul.mubr.bf16.vlgmr.msra.gmra.mrb[180].mxu0 %v5548_v21  ;;  %v9815_v21 = vld [vmem:[%s12929_s4 + $0x598] sm:$0xff]  }
 0x79c   : > { %9233 = vmatpush3.bf16.msra.mxu1 %v9809_v60  ;;  %9247 = vmatpush3.bf16.msra.mxu0 %v9810_v14  ;;  %v5556_v60 = vrot.slane %v5554_v42, 4  ;;  %v5559_v14 = vrot.slane %v5557_v23, 5  ;;  %v9819_v42 = vld [vmem:[%s12929_s4 + $0x5a8] sm:$0xff]   ;;  %v9820_v23 = vld [vmem:[%s12929_s4 + $0x5e0] sm:$0xff]  }
 0x79d   : > { %9248 = vmatprep.subr.bf16.mxu0 %v13035_v11  ;;  %9274 = vmatprep.subr.bf16.mxu1 %v13035_v11 }
 0x79e   : > { %9210 = vmatprep.mubr.msk.bf16.mxu0 %vm9985_vm6, %v13035_v11  ;;  %v5560_v39 = vor.u32 %v5559_v14, %v5556_v60  ;;  %v9825_v60 = vld [vmem:[%s12929_s4 + $0x5f8] sm:$0xff]   ;;  %v9826_v14 = vld [vmem:[%s12929_s4 + $0x600] sm:$0xff]  }
 0x79f   : > { %9235 = vmatmul.mubr.bf16.vlgmr.msra.gmra.mrb[180].mxu1 %v5701_v2  ;;  %v5711_v2 = vor.u32 %v12324_v30, %v5708_v49  ;;  %v9827_v49 = vld [vmem:[%s12929_s4 + $0x608] sm:$0xff]  }
 0x7a0   : > { %9249 = vmatpush3.bf16.msra.mxu0 %v9811_v18  ;;  %9275 = vmatpush3.bf16.msra.mxu1 %v9812_v46  ;;  %v9817_v18 = vld [vmem:[%s12929_s4 + $0x5a0] sm:$0xff]   ;;  %v9818_v46 = vld [vmem:[%s12929_s4 + $0x5d8] sm:$0xff]   ;;  %v5561_v44 = vsel %vm1177_vm15, %v12342_v55, %v5560_v39 }
 0x7a1   : > { %9250 = vmatprep.subr.bf16.mxu0 %v13035_v11  ;;  %9276 = vmatprep.subr.bf16.mxu1 %v13035_v11 }
 0x7a2   : > { %9238 = vmatprep.mubr.msk.bf16.mxu1 %vm9985_vm6, %v13035_v11 }
 0x7a3   : > { %9211 = vmatmul.mubr.bf16.gmra.mrb[184].mxu0 %v5552_v56  ;;  %v9822_v56 = vld [vmem:[%s12929_s4 + $0x5e8] sm:$0xff]  }
 0x7a4   : > { %9251 = vmatpush3.bf16.msra.mxu0 %v9813_v36  ;;  %9277 = vmatpush3.bf16.msra.mxu1 %v9814_v31  ;;  %v5712_v36 = vsel %vm1336_vm0, %v5702_v0, %v5711_v2  ;;  %v9821_v31 = vld [vmem:[%s12929_s4 + $0x5b0] sm:$0xff]   ;;  %v9823_v0 = vld [vmem:[%s12929_s4 + $0x5b8] sm:$0xff]   ;;  %v5958_v2 = vld [vmem:[#allocation2 + $0x20] sm:$0x1] }
 0x7a5   : > { %9252 = vmatprep.subr.bf16.mxu0 %v13035_v11  ;;  %9278 = vmatprep.subr.bf16.mxu1 %v13035_v11 }
 0x7a6   : > { %9214 = vmatprep.mubr.msk.bf16.mxu0 %vm9985_vm6, %v13035_v11 }
 0x7a7   : > { %9239 = vmatmul.mubr.bf16.gmra.mrb[184].mxu1 %v5704_v41  ;;  %v13084_v41 = vmax.f32 %v12205_v38, 0.0 }
 0x7a8   : > { %9253 = vmatpush3.bf16.msra.mxu0 %v9815_v21  ;;  %9279 = vmatpush3.bf16.msra.mxu1 %v9816_v28  ;;  %v5986_v21 = vrot.slane %v12273_v10, 1  ;;  %v13083_v28 = vmax.f32 %v12201_v27, 0.0  ;;  %v9830_v27 = vld [vmem:[%s12929_s4 + $0x648] sm:$0xff]   ;;  %v13085_v10 = vmax.f32 %v12220_v37, 0.0  ;;  %v6000_v37 = vshll.u32 %v5958_v2, 16 }
 0x7a9   : > { %9254 = vmatprep.subr.bf16.mxu0 %v13035_v11  ;;  %9280 = vmatprep.subr.bf16.mxu1 %v13035_v11 }
 0x7aa   : > { %9242 = vmatprep.mubr.msk.bf16.mxu1 %vm9985_vm6, %v13035_v11  ;;  %v9932_v39 = vpack.c.bf16 %v13084_v41, %v13083_v28  ;;  %v5987_v38 = vsel %vm1618_vm2, %v12261_v20, %v5986_v21  ;;  %v5994_v20 = vrot.slane %v12324_v30, 1  ;;  %v9836_v28 = vld [vmem:[%s12929_s4 + $0x660] sm:$0xff]   ;;  %v9837_v41 = vld [vmem:[%s12929_s4 + $0x630] sm:$0xff]  }
 0x7ab   : > { %9215 = vmatmul.mubr.bf16.gmra.mrb[188].mxu0 %v5561_v44 }
 0x7ac   : > { %9255 = vmatpush3.bf16.msra.mxu0 %v9817_v18  ;;  %9281 = vmatpush3.bf16.msra.mxu1 %v9818_v46  ;;  %v9828_v18 = vld [vmem:[%s12929_s4 + $0x640] sm:$0xff]   ;;  %v13086_v46 = vmax.f32 %v12231_v1, 0.0 }
 0x7ad   : > { %9256 = vmatprep.subr.bf16.mxu0 %v13035_v11  ;;  %9282 = vmatprep.subr.bf16.mxu1 %v13035_v11  ;;  %v9833_v1 = vld [vmem:[%s12929_s4 + $0x620] sm:$0xff]  }
 0x7ae   : > { %9262 = vmatprep.mubr.msk.bf16.mxu0 %vm9985_vm6, %v13035_v11  ;;  %v9935_v44 = vpack.c.bf16 %v13086_v46, %v13085_v10  ;;  %v9841_v10 = vld [vmem:[%s12929_s4 + $0x678] sm:$0xff]   ;;  %v9842_v46 = vld [vmem:[%s12929_s4 + $0x680] sm:$0xff]  }
 0x7af   : > { %9243 = vmatmul.mubr.bf16.gmra.mrb[188].mxu1 %v5712_v36  ;;  %v9832_v36 = vld [vmem:[%s12929_s4 + $0x650] sm:$0xff]  }
 0x7b0   : > { %9257 = vmatpush3.bf16.msra.mxu0 %v9819_v42  ;;  %9283 = vmatpush3.bf16.msra.mxu1 %v9820_v23  ;;  %v5990_v42 = vor.u32 %v5986_v21, %v12271_v9  ;;  %v9831_v23 = vld [vmem:[%s12929_s4 + $0x618] sm:$0xff]   ;;  %v9835_v21 = vld [vmem:[%s12929_s4 + $0x628] sm:$0xff]  }
 0x7b1   : > { %9258 = vmatprep.subr.bf16.mxu0 %v13035_v11  ;;  %9284 = vmatprep.subr.bf16.mxu1 %v13035_v11  ;;  %v9834_v9 = vld [vmem:[%s12929_s4 + $0x658] sm:$0xff]  }
 0x7b2   : > { %9290 = vmatprep.mubr.msk.bf16.mxu1 %vm9985_vm6, %v13035_v11  ;;  %v5995_v53 = vsel %vm1618_vm2, %v5990_v42, %v5994_v20  ;;  %v6149_v42 = vrot.slane %v12319_v12, 3 }
 0x7b4   : > { %9259 = vmatpush3.bf16.msra.mxu0 %v9821_v31  ;;  %9285 = vmatpush3.bf16.msra.mxu1 %v9822_v56  ;;  %v5998_v31 = vor.u32 %v5994_v20, %v12319_v12  ;;  %v6002_v56 = vrot.slane %v6000_v37, 1  ;;  %v6276_v20 = vld [vmem:[#allocation2 + $0x8] sm:$0xf0] }
 0x7b5   : > { %9260 = vmatprep.subr.bf16.mxu0 %v13035_v11  ;;  %9286 = vmatprep.subr.bf16.mxu1 %v13035_v11  ;;  %v6298_v2 = vrot.slane %v6276_v20, 4 }
 0x7b7   : > { %v6300_v37 = vsel %vm899_vm8, %v6298_v2, %v12263_v33 }
 0x7b8   : > { %9261 = vmatpush3.bf16.msra.mxu0 %v9823_v0  ;;  %9287 = vmatpush3.bf16.msra.mxu1 %v9824_v51  ;;  %v13087_v0 = vmax.f32 %v12257_v63, 0.0  ;;  %v13088_v51 = vmax.f32 %v12276_v6, 0.0  ;;  %v6003_v63 = vsel %vm1618_vm2, %v5998_v31, %v6002_v56  ;;  %v6301_v56 = vrot.slane %v12305_v25, 4 }
 0x7b9   : > { %9288 = vmatprep.subr.bf16.mxu1 %v13035_v11  ;;  %9302 = vmatprep.subr.bf16.mxu0 %v13035_v11 }
 0x7bb   : > { %9933 = vmatmul.mubr.msk.bf16.vlgmr.msra.gmra.mrb[192].mxu0 %vm10614_vm1, %v9932_v39  ;;  %v9838_v39 = vld [vmem:[%s12929_s4 + $0x668] sm:$0xff]  }
 0x7bc   : > { %9289 = vmatpush3.bf16.msra.mxu1 %v9825_v60  ;;  %9303 = vmatpush3.bf16.msra.mxu0 %v9826_v14  ;;  %v9938_v60 = vpack.c.bf16 %v13088_v51, %v13087_v0  ;;  %v6118_v14 = vld [vmem:[#allocation2 + $0x8] sm:$0xf8] }
 0x7bd   : > { %9304 = vmatprep.subr.bf16.mxu0 %v13035_v11  ;;  %9330 = vmatprep.subr.bf16.mxu1 %v13035_v11  ;;  %v6138_v29 = vshrl.u32 %v6118_v14, 16  ;;  %v6141_v6 = vshll.u32 %v6118_v14, 16  ;;  %v6302_v14 = vsel %vm899_vm8, %v12263_v33, %v6301_v56  ;;  %v9847_v33 = vld [vmem:[%s12929_s4 + $0x6a8] sm:$0xff]  }
 0x7be   : > { %9266 = vmatprep.mubr.msk.bf16.mxu0 %vm9985_vm6, %v13035_v11 }
 0x7bf   : > { %9291 = vmatmul.mubr.bf16.vlgmr.msra.gmra.mrb[192].mxu1 %v5987_v38  ;;  %v9839_v38 = vld [vmem:[%s12929_s4 + $0x638] sm:$0xff]  }
 0x7c0   : > { %9305 = vmatpush3.bf16.msra.mxu0 %v9827_v49  ;;  %9331 = vmatpush3.bf16.msra.mxu1 %v9828_v18  ;;  %v6140_v49 = vrot.slane %v6138_v29, 3  ;;  %v6143_v18 = vrot.slane %v6141_v6, 4  ;;  %v6438_v29 = vshrl.u32 %v6276_v20, 16  ;;  %v6441_v6 = vshll.u32 %v6276_v20, 16  ;;  %v6419_v20 = vld [vmem:[#allocation2 + $0x20] sm:$0x1f] }
 0x7c1   : > { %9306 = vmatprep.subr.bf16.mxu0 %v13035_v11  ;;  %9332 = vmatprep.subr.bf16.mxu1 %v13035_v11 }
 0x7c2   : > { %9294 = vmatprep.mubr.msk.bf16.mxu1 %vm9985_vm6, %v13035_v11 }
 0x7c3   : > { %9936 = vmatmul.mubr.msk.bf16.gmra.mrb[196].mxu0 %vm10651_vm3, %v9935_v44 }
 0x7c4   : > { %9307 = vmatpush3.bf16.msra.mxu0 %v9829_v15  ;;  %9333 = vmatpush3.bf16.msra.mxu1 %v9830_v27  ;;  %v9840_v15 = vld [vmem:[%s12929_s4 + $0x670] sm:$0xff]   ;;  %v6144_v27 = vor.u32 %v6143_v18, %v6140_v49  ;;  %v6440_v49 = vrot.slane %v6438_v29, 4  ;;  %v6443_v18 = vrot.slane %v6441_v6, 5  ;;  %v12745_v29 = vld [vmem:[%s12931_s6 + $0x2a8] ss:$16 sps:$4 sm:$0xff]  }
 0x7c5   : > { %9308 = vmatprep.subr.bf16.mxu0 %v13035_v11  ;;  %9334 = vmatprep.subr.bf16.mxu1 %v13035_v11 }
 0x7c6   : > { %9270 = vmatprep.mubr.msk.bf16.mxu0 %vm9985_vm6, %v13035_v11  ;;  %v6148_v44 = vsel %vm1015_vm11, %v6144_v27, %v12287_v8 }
 0x7c7   : > { %9295 = vmatmul.mubr.bf16.gmra.mrb[196].mxu1 %v5995_v53  ;;  %v9843_v53 = vld [vmem:[%s12929_s4 + $0x688] sm:$0xff]  }
 0x7c8   : > { %9309 = vmatpush3.bf16.msra.mxu0 %v9831_v23  ;;  %9335 = vmatpush3.bf16.msra.mxu1 %v9832_v36  ;;  %v6150_v23 = vrot.slane %v12324_v30, 4  ;;  %v6119_v36 = vld [vmem:[#allocation2 + $0x20] sm:$0xf]  ;;  %v9844_v30 = vld [vmem:[%s12929_s4 + $0x690] sm:$0xff]  }
 0x7c9   : > { %9310 = vmatprep.subr.bf16.mxu0 %v13035_v11  ;;  %9336 = vmatprep.subr.bf16.mxu1 %v13035_v11  ;;  %v6154_v12 = vshrl.u32 %v6119_v36, 16 }
 0x7ca   : > { %9298 = vmatprep.mubr.msk.bf16.mxu1 %vm9985_vm6, %v13035_v11 }
 0x7cb   : > { %9939 = vmatmul.mubr.msk.bf16.gmra.mrb[200].mxu0 %vm10688_vm4, %v9938_v60  ;;  %v6156_v0 = vrot.slane %v6154_v12, 3  ;;  %v9845_v60 = vld [vmem:[%s12929_s4 + $0x698] sm:$0xff]   ;;  %v9862_v12 = vld [vmem:[%s12931_s6 + $0x240] ss:$16 sps:$4 sm:$0xff]  }
 0x7cc   : > { %9311 = vmatpush3.bf16.msra.mxu0 %v9833_v1  ;;  %9337 = vmatpush3.bf16.msra.mxu1 %v9834_v9  ;;  %v6151_v1 = vor.u32 %v6150_v23, %v6149_v42  ;;  %v6157_v9 = vshll.u32 %v6119_v36, 16 }
 0x7cd   : > { %9312 = vmatprep.subr.bf16.mxu0 %v13035_v11  ;;  %9338 = vmatprep.subr.bf16.mxu1 %v13035_v11 }
 0x7ce   : > { %9318 = vmatprep.mubr.msk.bf16.mxu0 %vm9985_vm6, %v13035_v11  ;;  %v6152_v31 = vsel %vm1015_vm11, %v12287_v8, %v6151_v1  ;;  %v6159_v51 = vrot.slane %v6157_v9, 4  ;;  %v9846_v8 = vld [vmem:[%s12929_s4 + $0x6a0] sm:$0xff]  }
 0x7cf   : > { %9299 = vmatmul.mubr.bf16.gmra.mrb[200].mxu1 %v6003_v63  ;;  %v9864_v9 = vld [vmem:[%s12931_s6 + $0x244] ss:$16 sps:$4 sm:$0xff]  }
 0x7d0   : > { %9313 = vmatpush3.bf16.msra.mxu0 %v9835_v21  ;;  %9339 = vmatpush3.bf16.msra.mxu1 %v9836_v28  ;;  %v6160_v21 = vor.u32 %v6159_v51, %v6156_v0  ;;  %v6303_v28 = vrot.slane %v6119_v36, 4  ;;  %v9852_v36 = vld [vmem:[%s12931_s6 + $0x204] ss:$16 sps:$4 sm:$0xff]   ;;  %v12704_v51 = vld [vmem:[%s12931_s6 + $0x268] ss:$16 sps:$4 sm:$0xff]  }
 0x7d1   : > { %9314 = vmatprep.subr.bf16.mxu0 %v13035_v11  ;;  %9340 = vmatprep.subr.bf16.mxu1 %v13035_v11  ;;  %v9870_v0 = vld [vmem:[%s12931_s6 + $0x264] ss:$16 sps:$4 sm:$0xff]  }
 0x7d2   : > { %9346 = vmatprep.mubr.msk.bf16.mxu1 %vm9985_vm6, %v13035_v11  ;;  %v6161_v25 = vsel %vm1015_vm11, %v6151_v1, %v6160_v21  ;;  %v6304_v63 = vsel %vm899_vm8, %v6301_v56, %v6303_v28  ;;  %v12673_v1 = vld [vmem:[%s12931_s6 + $0x22c] ss:$16 sps:$4 sm:$0xff]   ;;  %v9868_v56 = vld [vmem:[%s12931_s6 + $0x260] ss:$16 sps:$4 sm:$0xff]   ;;  %v9882_v28 = vld [vmem:[%s12931_s6 + $0x2a4] ss:$16 sps:$4 sm:$0xff]  }
 0x7d3   : > { %v12717_v21 = vld [vmem:[%s12931_s6 + $0x28c] ss:$16 sps:$4 sm:$0xff]  }
 0x7d4   : > { %9315 = vmatpush3.bf16.msra.mxu0 %v9837_v41  ;;  %9341 = vmatpush3.bf16.msra.mxu1 %v9838_v39  ;;  %v9848_v41 = vld [vmem:[%s12929_s4 + $0x6b0] sm:$0xff]   ;;  %v12623_v39 = vld [vmem:[#allocation2] sm:$0xff] }
 0x7d5   : > { %9316 = vmatprep.subr.bf16.mxu0 %v13035_v11  ;;  %9342 = vmatprep.subr.bf16.mxu1 %v13035_v11 }
 0x7d8   : > { %9317 = vmatpush3.bf16.msra.mxu0 %v9839_v38  ;;  %9343 = vmatpush3.bf16.msra.mxu1 %v9840_v15  ;;  %v9849_v38 = vld [vmem:[%s12929_s4 + $0x6b8] sm:$0xff]   ;;  %v6444_v15 = vor.u32 %v6443_v18, %v6440_v49 }
 0x7d9   : > { %9344 = vmatprep.subr.bf16.mxu1 %v13035_v11  ;;  %9358 = vmatprep.subr.bf16.mxu0 %v13035_v11 }
 0x7da   : > { %v6448_v27 = vsel %vm1177_vm15, %v6444_v15, %v12342_v55  ;;  %v9850_v55 = vld [vmem:[%s12931_s6 + $0x200] ss:$16 sps:$4 sm:$0xff]  }
 0x7db   : > { %9319 = vmatmul.mubr.bf16.vlgmr.msra.gmra.mrb[204].mxu0 %v6148_v44 }
 0x7dc   : > { %9345 = vmatpush3.bf16.msra.mxu1 %v9841_v10  ;;  %9359 = vmatpush3.bf16.msra.mxu0 %v9842_v46  ;;  %v6454_v10 = vshrl.u32 %v6419_v20, 16  ;;  %v6457_v46 = vshll.u32 %v6419_v20, 16 }
 0x7dd   : > { %9360 = vmatprep.subr.bf16.mxu0 %v13035_v11  ;;  %9322 = vmatprep.mubr.msk.bf16.mxu0 %vm9985_vm6, %v13035_v11 }
 0x7de   : > { %v6456_v44 = vrot.slane %v6454_v10, 4  ;;  %v6459_v2 = vrot.slane %v6457_v46, 5  ;;  %6815 = vmatprep.subr.bf16.mxu1 %v9852_v36 }
 0x7df   : > { %9347 = vmatmul.mubr.bf16.vlgmr.msra.gmra.mrb[204].mxu1 %v6300_v37  ;;  %v12668_v37 = vld [vmem:[%s12931_s6 + $0x228] ss:$16 sps:$4 sm:$0xff]  }
 0x7e0   : > { %9361 = vmatpush3.bf16.msra.mxu0 %v9843_v53  ;;  %9350 = vmatprep.mubr.msk.bf16.mxu1 %vm9985_vm6, %v13035_v11  ;;  %v6460_v42 = vor.u32 %v6459_v2, %v6456_v44  ;;  %v9858_v53 = vld [vmem:[%s12931_s6 + $0x224] ss:$16 sps:$4 sm:$0xff]  }
 0x7e1   : > { %9362 = vmatprep.subr.bf16.mxu0 %v13035_v11  ;;  %6816 = vmatpush1.bf16.msra.mxu1 %v9850_v55  ;;  %v9888_v2 = vld [vmem:[%s12931_s6 + $0x2c4] ss:$16 sps:$4 sm:$0xff]   ;;  %v12758_v55 = vld [vmem:[%s12931_s6 + $0x2c8] ss:$16 sps:$4 sm:$0xff]  }
 0x7e2   : > { %v6461_v23 = vsel %vm1177_vm15, %v12344_v32, %v6460_v42  ;;  %v9856_v32 = vld [vmem:[%s12931_s6 + $0x220] ss:$16 sps:$4 sm:$0xff]   ;;  %6817 = vmatprep.subr.bf16.mxu1 %v9858_v53 }
 0x7e3   : > { %9323 = vmatmul.mubr.bf16.gmra.mrb[208].mxu0 %v6152_v31  ;;  %v12691_v31 = vld [vmem:[%s12931_s6 + $0x24c] ss:$16 sps:$4 sm:$0xff]  }
 0x7e4   : > { %9363 = vmatpush3.bf16.msra.mxu0 %v9844_v30  ;;  %9326 = vmatprep.mubr.msk.bf16.mxu0 %vm9985_vm6, %v13035_v11  ;;  %v12686_v30 = vld [vmem:[%s12931_s6 + $0x248] ss:$16 sps:$4 sm:$0xff]  }
 0x7e5   : > { %9364 = vmatprep.subr.bf16.mxu0 %v13035_v11  ;;  %6818 = vmatpush1.bf16.msra.mxu1 %v9856_v32  ;;  %v12763_v32 = vld [vmem:[%s12931_s6 + $0x2cc] ss:$16 sps:$4 sm:$0xff]  }
 0x7e6   : > { %6819 = vmatprep.subr.bf16.mxu1 %v9864_v9  ;;  %v9894_v9 = vld [vmem:[%s12931_s6 + $0x2e4] ss:$16 sps:$4 sm:$0xff]  }
 0x7e7   : > { %9351 = vmatmul.mubr.bf16.gmra.mrb[208].mxu1 %v6302_v14  ;;  %v9876_v14 = vld [vmem:[%s12931_s6 + $0x284] ss:$16 sps:$4 sm:$0xff]  }
 0x7e8   : > { %9365 = vmatpush3.bf16.msra.mxu0 %v9845_v60  ;;  %9354 = vmatprep.mubr.msk.bf16.mxu1 %vm9985_vm6, %v13035_v11  ;;  %v12709_v60 = vld [vmem:[%s12931_s6 + $0x26c] ss:$16 sps:$4 sm:$0xff]  }
 0x7e9   : > { %9366 = vmatprep.subr.bf16.mxu0 %v13035_v11  ;;  %6820 = vmatpush1.bf16.msra.mxu1 %v9862_v12  ;;  %v9892_v12 = vld [vmem:[%s12931_s6 + $0x2e0] ss:$16 sps:$4 sm:$0xff]  }
 0x7ea   : > { %6821 = vmatprep.subr.bf16.mxu1 %v9870_v0  ;;  %v12775_v0 = vld [vmem:[%s12931_s6 + $0x2ec] ss:$16 sps:$4 sm:$0xff]  }
 0x7eb   : > { %9327 = vmatmul.mubr.bf16.gmra.mrb[212].mxu0 %v6161_v25  ;;  %v12727_v25 = vld [vmem:[%s12931_s6 + $0x288] ss:$16 sps:$4 sm:$0xff]  }
 0x7ec   : > { %9367 = vmatpush3.bf16.msra.mxu0 %v9846_v8  ;;  %9374 = vmatprep.mubr.msk.bf16.mxu0 %vm9985_vm6, %v13035_v11  ;;  %v9874_v8 = vld [vmem:[%s12931_s6 + $0x280] ss:$16 sps:$4 sm:$0xff]  }
 0x7ed   : > { %9368 = vmatprep.subr.bf16.mxu0 %v13035_v11  ;;  %6822 = vmatpush1.bf16.msra.mxu1 %v9868_v56 }
 0x7ee   : > { %6823 = vmatprep.subr.bf16.mxu1 %v9876_v14 }
 0x7ef   : > { %9355 = vmatmul.mubr.bf16.gmra.mrb[212].mxu1 %v6304_v63  ;;  %v9880_v63 = vld [vmem:[%s12931_s6 + $0x2a0] ss:$16 sps:$4 sm:$0xff]  }
 0x7f0   : > { %9369 = vmatpush3.bf16.msra.mxu0 %v9847_v33  ;;  %6847 = vmatprep.mubr.bf16.mxu1 %v12623_v39  ;;  %v12736_v33 = vld [vmem:[%s12931_s6 + $0x2ac] ss:$16 sps:$4 sm:$0xff]  }
 0x7f1   : > { %9370 = vmatprep.subr.bf16.mxu0 %v13035_v11  ;;  %6824 = vmatpush1.bf16.msra.mxu1 %v9874_v8 }
 0x7f2   : > { %6825 = vmatprep.subr.bf16.mxu1 %v9882_v28  ;;  %v12781_v28 = vld [vmem:[%s12931_s6 + $0x2e8] ss:$16 sps:$4 sm:$0xff]  }
 0x7f4   : > { %9371 = vmatpush3.bf16.msra.mxu0 %v9848_v41 }
 0x7f5   : > { %9372 = vmatprep.subr.bf16.mxu0 %v13035_v11  ;;  %6826 = vmatpush1.bf16.msra.mxu1 %v9880_v63 }
 0x7f6   : > { %6827 = vmatprep.subr.bf16.mxu1 %v9888_v2 }
 0x7f8   : > { %9373 = vmatpush3.bf16.msra.mxu0 %v9849_v38 }
 0x7fb   : > { %9375 = vmatmul.mubr.bf16.vlgmr.msra.gmra.mrb[216].mxu0 %v6448_v27 }
 0x7fc   : > { %9378 = vmatprep.mubr.msk.bf16.mxu0 %vm9985_vm6, %v13035_v11 }
 0x803   : > { %9379 = vmatmul.mubr.bf16.gmra.mrb[220].mxu0 %v12358_v52  ;;  %v12650_v52 = vld [vmem:[%s12931_s6 + $0x208] ss:$16 sps:$4 sm:$0xff]  }
 0x804   : > { %9382 = vmatprep.mubr.msk.bf16.mxu0 %vm9985_vm6, %v13035_v11  ;;  %v12655_v11 = vld [vmem:[%s12931_s6 + $0x20c] ss:$16 sps:$4 sm:$0xff]  }
 0x805   : > { %6878 = vmatprep.subr.bf16.mxu0 %v12655_v11 }
 0x806   : > { %6879 = vmatpush1.bf16.msra.mxu0 %v12650_v52 }
 0x807   : > { %6880 = vmatprep.subr.bf16.mxu0 %v12673_v1 }
 0x80a   : > { %6881 = vmatpush1.bf16.msra.mxu0 %v12668_v37 }
 0x80b   : > { %9383 = vmatmul.mubr.bf16.gmra.mrb[224].mxu0 %v6461_v23  ;;  %6882 = vmatprep.subr.bf16.mxu0 %v12691_v31  ;;  %v9886_v23 = vld [vmem:[%s12931_s6 + $0x2c0] ss:$16 sps:$4 sm:$0xff]  }
 0x80c   : > { %6910 = vmatprep.mubr.bf16.mxu0 %v12623_v39  ;;  %6828 = vmatpush1.bf16.msra.mxu1 %v9886_v23 }
 0x80d   : > { %6829 = vmatprep.subr.bf16.mxu1 %v9894_v9 }
 0x80e   : > { %6883 = vmatpush1.bf16.msra.mxu0 %v12686_v30 }
 0x80f   : > { %6884 = vmatprep.subr.bf16.mxu0 %v12709_v60 }
 0x810   : > { %6830 = vmatpush1.bf16.msra.mxu1 %v9892_v12 }
 0x811   : > { %9386 = vmatprep.subr.bf16.mxu1 %v12655_v11 }
 0x812   : > { %6885 = vmatpush1.bf16.msra.mxu0 %v12704_v51 }
 0x813   : > { %6886 = vmatprep.subr.bf16.mxu0 %v12717_v21 }
 0x816   : > { %6887 = vmatpush1.bf16.msra.mxu0 %v12727_v25 }
 0x817   : > { %6888 = vmatprep.subr.bf16.mxu0 %v12736_v33 }
 0x81a   : > { %6889 = vmatpush1.bf16.msra.mxu0 %v12745_v29 }
 0x81b   : > { %6890 = vmatprep.subr.bf16.mxu0 %v12763_v32 }
 0x81e   : > { %6891 = vmatpush1.bf16.msra.mxu0 %v12758_v55 }
 0x81f   : > { %6892 = vmatprep.subr.bf16.mxu0 %v12775_v0 }
 0x822   : > { %6893 = vmatpush1.bf16.msra.mxu0 %v12781_v28 }
 0x84c   : > { %v5353_v6 = vpop.f32.mrb[168].mxu0 }
 0x84d   : > { %v9152_v41 = vpop.f32.mrb[169].mxu0 }
 0x84e   : > { %v5356_v49 = vpop.f32.mrb[170].mxu0 }
 0x84f   : > { %v9153_v18 = vpop.f32.mrb[171].mxu0 }
 0x851   : > { %v5496_v38 = vpop.f32.mrb[168].mxu1 }
 0x852   : > { %v5497_v15 = vadd.f32 %v5496_v38, %v5353_v6  ;;  %v9180_v27 = vpop.f32.mrb[169].mxu1 }
 0x853   : > { %v5499_v20 = vpop.f32.mrb[170].mxu1 }
 0x854   : > { %v5500_v10 = vadd.f32 %v5499_v20, %v5356_v49  ;;  %v9181_v46 = vpop.f32.mrb[171].mxu1 }
 0x855   : > { %v5361_v44 = vpop.f32.mrb[172].mxu0 }
 0x856   : > { %v9156_v42 = vpop.f32.mrb[173].mxu0 }
 0x857   : > { %v5364_v36 = vpop.f32.mrb[174].mxu0 }
 0x858   : > { %v9157_v53 = vpop.f32.mrb[175].mxu0 }
 0x85a   : > { %v5504_v56 = vpop.f32.mrb[172].mxu1 }
 0x85b   : > { %v5505_v14 = vadd.f32 %v5504_v56, %v5361_v44  ;;  %v9184_v8 = vpop.f32.mrb[173].mxu1 }
 0x85c   : > { %v5507_v63 = vpop.f32.mrb[174].mxu1 }
 0x85d   : > { %v5508_v6 = vadd.f32 %v5507_v63, %v5364_v36  ;;  %v9185_v41 = vpop.f32.mrb[175].mxu1 }
 0x866   : > { %v5369_v49 = vpop.f32.mrb[176].mxu0 }
 0x867   : > { %v9160_v18 = vpop.f32.mrb[177].mxu0 }
 0x868   : > { %v5372_v38 = vpop.f32.mrb[178].mxu0 }
 0x869   : > { %v9161_v27 = vpop.f32.mrb[179].mxu0 }
 0x86a   : > { %v5512_v20 = vpop.f32.mrb[176].mxu1 }
 0x86b   : > { %v5513_v46 = vadd.f32 %v5512_v20, %v5369_v49  ;;  %v9188_v44 = vpop.f32.mrb[177].mxu1 }
 0x86c   : > { %v5515_v2 = vpop.f32.mrb[178].mxu1 }
 0x86d   : > { %v5516_v42 = vadd.f32 %v5515_v2, %v5372_v38  ;;  %v9189_v23 = vpop.f32.mrb[179].mxu1 }
 0x86e   : > { %v5647_v53 = vpop.f32.mrb[180].mxu0 }
 0x86f   : > { %v5670_v9 = vadd.f32 %v5647_v53, %v5497_v15  ;;  %v9208_v56 = vpop.f32.mrb[181].mxu0 }
 0x870   : > { %v5650_v36 = vpop.f32.mrb[182].mxu0 }
 0x871   : > { %v5671_v8 = vadd.f32 %v5650_v36, %v5500_v10  ;;  %v9209_v12 = vpop.f32.mrb[183].mxu0 }
 0x872   : > { %v5798_v63 = vpop.f32.mrb[180].mxu1 }
 0x873   : > { %v5821_v11 = vadd.f32 %v5798_v63, %v5670_v9  ;;  %v9236_v41 = vpop.f32.mrb[181].mxu1 }
 0x874   : > { %v5801_v47 = vpop.f32.mrb[182].mxu1 }
 0x875   : > { %v5822_v54 = vadd.f32 %v5801_v47, %v5671_v8  ;;  %v9237_v18 = vpop.f32.mrb[183].mxu1 }
 0x876   : > { %v5655_v17 = vpop.f32.mrb[184].mxu0 }
 0x877   : > { %v5672_v27 = vadd.f32 %v5655_v17, %v5505_v14  ;;  %v9212_v24 = vpop.f32.mrb[185].mxu0 }
 0x878   : > { %v5658_v49 = vpop.f32.mrb[186].mxu0 }
 0x879   : > { %v5673_v20 = vadd.f32 %v5658_v49, %v5508_v6  ;;  %v9213_v44 = vpop.f32.mrb[187].mxu0 }
 0x87a   : > { %v5806_v38 = vpop.f32.mrb[184].mxu1 }
 0x87b   : > { %v5823_v2 = vadd.f32 %v5806_v38, %v5672_v27  ;;  %v9240_v23 = vpop.f32.mrb[185].mxu1 }
 0x87c   : > { %v5809_v15 = vpop.f32.mrb[186].mxu1 }
 0x87d   : > { %v5824_v53 = vadd.f32 %v5809_v15, %v5673_v20  ;;  %v9241_v56 = vpop.f32.mrb[187].mxu1 }
 0x87e   : > { %v5663_v10 = vpop.f32.mrb[188].mxu0 }
 0x87f   : > { %v5674_v36 = vadd.f32 %v5663_v10, %v5513_v46  ;;  %v9216_v12 = vpop.f32.mrb[189].mxu0 }
 0x880   : > { %v5666_v9 = vpop.f32.mrb[190].mxu0 }
 0x881   : > { %v5675_v63 = vadd.f32 %v5666_v9, %v5516_v42  ;;  %v9217_v41 = vpop.f32.mrb[191].mxu0 }
 0x882   : > { %v5814_v47 = vpop.f32.mrb[188].mxu1 }
 0x883   : > { %v5825_v8 = vadd.f32 %v5814_v47, %v5674_v36  ;;  %v9244_v18 = vpop.f32.mrb[189].mxu1 }
 0x884   : > { %v5817_v17 = vpop.f32.mrb[190].mxu1 }
 0x885   : > { %v5826_v24 = vadd.f32 %v5817_v17, %v5675_v63  ;;  %v9245_v14 = vpop.f32.mrb[191].mxu1 }
 0x88e   : > { %v5926_v6 = vpop.f32.mrb[192].mxu0 }
 0x88f   : > { %v5949_v49 = vadd.f32 %v5926_v6, %v5821_v11  ;;  %v9264_v44 = vpop.f32.mrb[193].mxu0 }
 0x890   : > { %v5929_v27 = vpop.f32.mrb[194].mxu0 }
 0x891   : > { %v5950_v38 = vadd.f32 %v5929_v27, %v5822_v54  ;;  %v9265_v23 = vpop.f32.mrb[195].mxu0 }
 0x892   : > { %v6089_v20 = vpop.f32.mrb[192].mxu1 }
 0x893   : > { %v6112_v15 = vadd.f32 %v6089_v20, %v5949_v49  ;;  %v9292_v56 = vpop.f32.mrb[193].mxu1 }
 0x894   : > { %v6092_v46 = vpop.f32.mrb[194].mxu1 }
 0x895   : > { %v6113_v10 = vadd.f32 %v6092_v46, %v5950_v38  ;;  %v9293_v12 = vpop.f32.mrb[195].mxu1 }
 0x896   : > { %v5934_v42 = vpop.f32.mrb[196].mxu0 }
 0x897   : > { %v5951_v9 = vadd.f32 %v5934_v42, %v5823_v2  ;;  %v9268_v41 = vpop.f32.mrb[197].mxu0 }
 0x898   : > { %v5937_v36 = vpop.f32.mrb[198].mxu0 }
 0x899   : > { %v5952_v47 = vadd.f32 %v5937_v36, %v5824_v53  ;;  %v9269_v18 = vpop.f32.mrb[199].mxu0 }
 0x89a   : > { %v6097_v63 = vpop.f32.mrb[196].mxu1 }
 0x89b   : > { %v6114_v17 = vadd.f32 %v6097_v63, %v5951_v9  ;;  %v9296_v14 = vpop.f32.mrb[197].mxu1 }
 0x89c   : > { %v6100_v11 = vpop.f32.mrb[198].mxu1 }
 0x89d   : > { %v6115_v6 = vadd.f32 %v6100_v11, %v5952_v47  ;;  %v9297_v44 = vpop.f32.mrb[199].mxu1 }
 0x89e   : > { %v5942_v54 = vpop.f32.mrb[200].mxu0 }
 0x89f   : > { %v5953_v27 = vadd.f32 %v5942_v54, %v5825_v8  ;;  %v9272_v23 = vpop.f32.mrb[201].mxu0 }
 0x8a0   : > { %v5945_v49 = vpop.f32.mrb[202].mxu0 }
 0x8a1   : > { %v5954_v20 = vadd.f32 %v5945_v49, %v5826_v24  ;;  %v9273_v56 = vpop.f32.mrb[203].mxu0 }
 0x8a2   : > { %v6105_v38 = vpop.f32.mrb[200].mxu1 }
 0x8a3   : > { %v6116_v46 = vadd.f32 %v6105_v38, %v5953_v27  ;;  %v9300_v12 = vpop.f32.mrb[201].mxu1 }
 0x8a4   : > { %v6108_v2 = vpop.f32.mrb[202].mxu1 }
 0x8a5   : > { %v6117_v42 = vadd.f32 %v6108_v2, %v5954_v20  ;;  %v9301_v41 = vpop.f32.mrb[203].mxu1 }
 0x8ae   : > { %v6247_v53 = vpop.f32.mrb[204].mxu0 }
 0x8af   : > { %v6270_v36 = vadd.f32 %v6247_v53, %v6112_v15  ;;  %v9320_v18 = vpop.f32.mrb[205].mxu0 }
 0x8b0   : > { %v6250_v9 = vpop.f32.mrb[206].mxu0 }
 0x8b1   : > { %v6271_v63 = vadd.f32 %v6250_v9, %v6113_v10  ;;  %v9321_v14 = vpop.f32.mrb[207].mxu0 }
 0x8b2   : > { %v6390_v47 = vpop.f32.mrb[204].mxu1 }
 0x8b3   : > { %v6413_v11 = vadd.f32 %v6390_v47, %v6270_v36  ;;  %v9348_v44 = vpop.f32.mrb[205].mxu1 }
 0x8b4   : > { %v6393_v8 = vpop.f32.mrb[206].mxu1 }
 0x8b5   : > { %v6414_v54 = vadd.f32 %v6393_v8, %v6271_v63  ;;  %v9349_v23 = vpop.f32.mrb[207].mxu1 }
 0x8b6   : > { %v6255_v24 = vpop.f32.mrb[208].mxu0 }
 0x8b7   : > { %v6272_v49 = vadd.f32 %v6255_v24, %v6114_v17  ;;  %v9324_v56 = vpop.f32.mrb[209].mxu0 }
 0x8b8   : > { %v6258_v27 = vpop.f32.mrb[210].mxu0 }
 0x8b9   : > { %v6273_v38 = vadd.f32 %v6258_v27, %v6115_v6  ;;  %v9325_v12 = vpop.f32.mrb[211].mxu0  ;;  %v8061_v27 = vld [vmem:[#allocation3 + $0x2] ss:$0 sm:$0xff] }
 0x8ba   : > { %v6398_v20 = vpop.f32.mrb[208].mxu1 }
 0x8bb   : > { %v6415_v2 = vadd.f32 %v6398_v20, %v6272_v49  ;;  %v9352_v41 = vpop.f32.mrb[209].mxu1 }
 0x8bc   : > { %v6401_v15 = vpop.f32.mrb[210].mxu1 }
 0x8bd   : > { %v6416_v53 = vadd.f32 %v6401_v15, %v6273_v38  ;;  %v9353_v18 = vpop.f32.mrb[211].mxu1 }
 0x8be   : > { %v6263_v10 = vpop.f32.mrb[212].mxu0 }
 0x8bf   : > { %v6274_v9 = vadd.f32 %v6263_v10, %v6116_v46  ;;  %v9328_v14 = vpop.f32.mrb[213].mxu0 }
 0x8c0   : > { %v6266_v36 = vpop.f32.mrb[214].mxu0 }
 0x8c1   : > { %v6275_v47 = vadd.f32 %v6266_v36, %v6117_v42  ;;  %v9329_v44 = vpop.f32.mrb[215].mxu0 }
 0x8c2   : > { %v6406_v63 = vpop.f32.mrb[212].mxu1 }
 0x8c3   : > { %v6417_v8 = vadd.f32 %v6406_v63, %v6274_v9  ;;  %v9356_v23 = vpop.f32.mrb[213].mxu1 }
 0x8c4   : > { %v6409_v17 = vpop.f32.mrb[214].mxu1 }
 0x8c5   : > { %v6418_v24 = vadd.f32 %v6409_v17, %v6275_v47  ;;  %v9357_v56 = vpop.f32.mrb[215].mxu1 }
 0x8ce   : > { %v6547_v6 = vpop.f32.mrb[216].mxu0 }
 0x8cf   : > { %v6570_v12 = vadd.f32 %v6547_v6, %v6413_v11  ;;  %v9376_v49 = vpop.f32.mrb[217].mxu0 }
 0x8d0   : > { %v6550_v20 = vpop.f32.mrb[218].mxu0 }
 0x8d1   : > { %v6584_v41 = vadd.f32 %v8061_v27, %v6570_v12  ;;  %v6571_v38 = vadd.f32 %v6550_v20, %v6414_v54  ;;  %v9377_v15 = vpop.f32.mrb[219].mxu0 }
 0x8d3   : > { %v6585_v18 = vadd.f32 %v8061_v27, %v6571_v38  ;;  %v6590_v46 = vmax.f32 %v6584_v41, 0.0 }
 0x8d5   : > { %v6591_v10 = vmax.f32 %v6585_v18, 0.0 }
 0x8d6   : > { %v6555_v14 = vpop.f32.mrb[220].mxu0 }
 0x8d7   : > { %v6596_v42 = vpack.c.bf16 %v6591_v10, %v6590_v46  ;;  %v6572_v36 = vadd.f32 %v6555_v14, %v6415_v2  ;;  %v9380_v44 = vpop.f32.mrb[221].mxu0  ;;  %v13091_v10 = vmax.f32 %v11947_v58, 0.0  ;;  %v13092_v14 = vmax.f32 %v11951_v59, 0.0 }
 0x8d8   : > { %v6558_v9 = vpop.f32.mrb[222].mxu0  ;;  %v13094_v58 = vmax.f32 %v11965_v48, 0.0  ;;  %v13095_v59 = vmax.f32 %v11969_v50, 0.0 }
 0x8d9   : > { %v6586_v63 = vadd.f32 %v8061_v27, %v6572_v36  ;;  %v6573_v23 = vadd.f32 %v6558_v9, %v6416_v53  ;;  %v9381_v47 = vpop.f32.mrb[223].mxu0  ;;  %6848 = vmatmul.mubr.bf16.vlgmr.msra.gmra.mrb[216].mxu1 %v6596_v42  ;;  %6911 = vmatmul.mubr.bf16.vlgmr.msra.gmra.mrb[228].mxu0 %v6596_v42 }
 0x8da   : > { %9394 = vmatpush1.bf16.msra.mxu1 %v12650_v52  ;;  %6857 = vmatprep.mubr.bf16.mxu1 %v12623_v39 }
 0x8db   : > { %v6587_v11 = vadd.f32 %v8061_v27, %v6573_v23  ;;  %9387 = vmatprep.subr.bf16.mxu1 %v12673_v1  ;;  %v6592_v54 = vmax.f32 %v6586_v63, 0.0  ;;  %v13093_v63 = vmax.f32 %v11961_v7, 0.0 }
 0x8dd   : > { %v6593_v17 = vmax.f32 %v6587_v11, 0.0 }
 0x8de   : > { %9395 = vmatpush1.bf16.msra.mxu1 %v12668_v37  ;;  %v6563_v56 = vpop.f32.mrb[224].mxu0 }
 0x8df   : > { %v6574_v2 = vadd.f32 %v6563_v56, %v6417_v8  ;;  %v9384_v6 = vpop.f32.mrb[225].mxu0  ;;  %9388 = vmatprep.subr.bf16.mxu1 %v12691_v31  ;;  %v6597_v53 = vpack.c.bf16 %v6593_v17, %v6592_v54  ;;  %v13096_v56 = vmax.f32 %v11973_v13, 0.0 }
 0x8e0   : > { %v6566_v12 = vpop.f32.mrb[226].mxu0 }
 0x8e1   : > { %v6588_v49 = vadd.f32 %v8061_v27, %v6574_v2  ;;  %v6575_v20 = vadd.f32 %v6566_v12, %v6418_v24  ;;  %v9385_v41 = vpop.f32.mrb[227].mxu0  ;;  %6858 = vmatmul.mubr.bf16.gmra.mrb[220].mxu1 %v6597_v53 }
 0x8e2   : > { %9396 = vmatpush1.bf16.msra.mxu1 %v12686_v30  ;;  %6867 = vmatprep.mubr.bf16.mxu1 %v12623_v39  ;;  %v8094_v30 = vld [vmem:[%s12932_s7 + $0x8] sm:$0xf]  ;;  %v13097_v41 = vmax.f32 %v12008_v34, 0.0 }
 0x8e3   : > { %v6589_v52 = vadd.f32 %v8061_v27, %v6575_v20  ;;  %9389 = vmatprep.subr.bf16.mxu1 %v12709_v60  ;;  %v6594_v1 = vmax.f32 %v6588_v49, 0.0  ;;  %v12812_v60 = vrot.slane %v8094_v30, %v10999_v22 }
 0x8e5   : > { %v6595_v37 = vmax.f32 %v6589_v52, 0.0 }
 0x8e6   : > { %9397 = vmatpush1.bf16.msra.mxu1 %v12704_v51  ;;  %v12809_v51 = vrot.slane %v8094_v30, %v10997_v19 }
 0x8e7   : > { %9390 = vmatprep.subr.bf16.mxu1 %v12717_v21  ;;  %v6598_v31 = vpack.c.bf16 %v6595_v37, %v6594_v1  ;;  %v12815_v21 = vrot.slane %v8094_v30, %v11004_v3  ;;  %v13089_v3 = vmax.f32 %v11941_v26, 0.0 }
 0x8e9   : > { %6868 = vmatmul.mubr.bf16.gmra.mrb[224].mxu1 %v6598_v31 }
 0x8ea   : > { %9398 = vmatpush1.bf16.msra.mxu1 %v12727_v25  ;;  %6920 = vmatprep.mubr.bf16.mxu1 %v12623_v39  ;;  %v12818_v25 = vrot.slane %v8094_v30, %v11006_v16  ;;  %v13090_v16 = vmax.f32 %v11957_v5, 0.0 }
 0x8eb   : > { %9391 = vmatprep.subr.bf16.mxu1 %v12736_v33 }
 0x8ee   : > { %9399 = vmatpush1.bf16.msra.mxu1 %v12745_v29 }
 0x8ef   : > { %9392 = vmatprep.subr.bf16.mxu1 %v12763_v32 }
 0x8f2   : > { %9400 = vmatpush1.bf16.msra.mxu1 %v12758_v55 }
 0x8f3   : > { %9393 = vmatprep.subr.bf16.mxu1 %v12775_v0 }
 0x8f6   : > { %9401 = vmatpush1.bf16.msra.mxu1 %v12781_v28 }
 0x8f9   : > { %6921 = vmatmul.mubr.bf16.vlgmr.msra.gmra.mrb[228].mxu1 %v6597_v53 }
 0x8fa   : > { %6930 = vmatprep.mubr.bf16.mxu1 %v12623_v39 }
 0x901   : > { %6931 = vmatmul.mubr.bf16.gmra.mrb[232].mxu1 %v6598_v31  ;;  %v13098_v31 = vmax.f32 %v12017_v61, 0.0 }
 0x9ac   : > { %v6849_v33 = vpop.f32.mrb[216].mxu1  ;;  %v6912_v39 = vpop.f32.mrb[228].mxu0 }
 0x9ad   : > { %v6850_v29 = vadd.f32 %v6849_v33, %v12809_v51  ;;  %v6913_v55 = vadd.f32 %v6912_v39, %v12812_v60  ;;  %v6851_v32 = vpop.f32.mrb[217].mxu1  ;;  %v6914_v0 = vpop.f32.mrb[229].mxu0 }
 0x9ae   : > { %v6852_v19 = vadd.f32 %v6851_v32, %v12815_v21  ;;  %v6915_v22 = vadd.f32 %v6914_v0, %v12818_v25  ;;  %v6853_v28 = vpop.f32.mrb[218].mxu1  ;;  %v6916_v8 = vpop.f32.mrb[230].mxu0  ;;  %v13100_v0 = vmax.f32 %v12039_v62, 0.0  ;;  %v13101_v62 = vmax.f32 %v12093_v35, 0.0 }
 0x9af   : > { %v6941_v24 = vadd.f32 %v6850_v29, %v13089_v3  ;;  %v6943_v27 = vadd.f32 %v6913_v55, %v13090_v16  ;;  %v6854_v38 = vadd.f32 %v6853_v28, %v12809_v51  ;;  %v6917_v15 = vadd.f32 %v6916_v8, %v12812_v60  ;;  %v6855_v18 = vpop.f32.mrb[219].mxu1  ;;  %v6918_v46 = vpop.f32.mrb[231].mxu0 }
 0x9b0   : > { %v6942_v26 = vadd.f32 %v6852_v19, %v13091_v10  ;;  %v6944_v5 = vadd.f32 %v6915_v22, %v13092_v14  ;;  %v6856_v42 = vadd.f32 %v6855_v18, %v12815_v21  ;;  %v6919_v36 = vadd.f32 %v6918_v46, %v12818_v25 }
 0x9b1   : > { %v6965_v44 = vmax.f32 %v6941_v24, 0.0  ;;  %v6967_v9 = vmax.f32 %v6943_v27, 0.0  ;;  %v6945_v23 = vadd.f32 %v6854_v38, %v13093_v63  ;;  %v6947_v47 = vadd.f32 %v6917_v15, %v13094_v58  ;;  %v13106_v58 = vld [vmem:[#allocation15_spill] sm:$0xff] }
 0x9b2   : > { %v6966_v11 = vmax.f32 %v6942_v26, 0.0  ;;  %v6968_v54 = vmax.f32 %v6944_v5, 0.0  ;;  %v6946_v17 = vadd.f32 %v6856_v42, %v13095_v59  ;;  %v6948_v2 = vadd.f32 %v6919_v36, %v13096_v56 }
 0x9b3   : > { %6989 = vst [vmem:[%s12834_s24] sm:$0xff] %v6965_v44  ;;  %6991 = vst [vmem:[%s12834_s24 + $0x10] sm:$0xff] %v6967_v9  ;;  %v6969_v6 = vmax.f32 %v6945_v23, 0.0  ;;  %v6971_v7 = vmax.f32 %v6947_v47, 0.0  ;;  %v13099_v29 = vmax.f32 %v12031_v57, 0.0  ;;  %v13102_v38 = vmax.f32 %v12083_v40, 0.0 }
 0x9b4   : > { %6990 = vst [vmem:[%s12834_s24 + $0x8] sm:$0xff] %v6966_v11  ;;  %6992 = vst [vmem:[%s12834_s24 + $0x18] sm:$0xff] %v6968_v54  ;;  %v6970_v53 = vmax.f32 %v6946_v17, 0.0  ;;  %v6972_v48 = vmax.f32 %v6948_v2, 0.0  ;;  %v6859_v12 = vpop.f32.mrb[220].mxu1  ;;  %v13103_v10 = vmax.f32 %v12097_v43, 0.0 }
 0x9b5   : > { %6993 = vst [vmem:[%s12834_s24 + $0x20] sm:$0xff] %v6969_v6  ;;  %6995 = vst [vmem:[%s12834_s24 + $0x30] sm:$0xff] %v6971_v7  ;;  %v6860_v50 = vadd.f32 %v6859_v12, %v12809_v51  ;;  %v6861_v49 = vpop.f32.mrb[221].mxu1  ;;  %v13104_v5 = vmax.f32 %v12109_v4, 0.0  ;;  %v13105_v9 = vmax.f32 %v12027_v45, 0.0  ;;  %v13107_v47 = vmax.f32 %v13106_v58, 0.0 }
 0x9b6   : > { %6994 = vst [vmem:[%s12834_s24 + $0x28] sm:$0xff] %v6970_v53  ;;  %6996 = vst [vmem:[%s12834_s24 + $0x38] sm:$0xff] %v6972_v48  ;;  %v6862_v13 = vadd.f32 %v6861_v49, %v12815_v21  ;;  %v6863_v20 = vpop.f32.mrb[222].mxu1  ;;  %v13108_v17 = vld [vmem:[#allocation16_spill] sm:$0xff]  ;;  %v13110_v7 = vld [vmem:[#allocation17_spill] sm:$0xff] }
 0x9b7   : > { %v6949_v52 = vadd.f32 %v6860_v50, %v13097_v41  ;;  %v6864_v1 = vadd.f32 %v6863_v20, %v12809_v51  ;;  %v6865_v37 = vpop.f32.mrb[223].mxu1  ;;  %v13109_v56 = vmax.f32 %v13108_v17, 0.0  ;;  %v13111_v53 = vmax.f32 %v13110_v7, 0.0 }
 0x9b8   : > { %v6950_v30 = vadd.f32 %v6862_v13, %v13098_v31  ;;  %v6866_v33 = vadd.f32 %v6865_v37, %v12815_v21 }
 0x9b9   : > { %v6973_v39 = vmax.f32 %v6949_v52, 0.0  ;;  %v6953_v55 = vadd.f32 %v6864_v1, %v13099_v29  ;;  %v13112_v52 = vld [vmem:[#allocation12_spill] sm:$0xff] }
 0x9ba   : > { %v6974_v32 = vmax.f32 %v6950_v30, 0.0  ;;  %v6954_v19 = vadd.f32 %v6866_v33, %v13100_v0  ;;  %v13113_v1 = vmax.f32 %v13112_v52, 0.0  ;;  %v13114_v33 = vld [vmem:[#allocation18_spill] sm:$0xff]  ;;  %v13116_v0 = vld [vmem:[#allocation19_spill] sm:$0xff] }
 0x9bb   : > { %6997 = vst [vmem:[%s12834_s24 + $0x40] sm:$0xff] %v6973_v39  ;;  %v6977_v34 = vmax.f32 %v6953_v55, 0.0  ;;  %v13115_v39 = vmax.f32 %v13114_v33, 0.0 }
 0x9bc   : > { %6998 = vst [vmem:[%s12834_s24 + $0x48] sm:$0xff] %v6974_v32  ;;  %v6978_v22 = vmax.f32 %v6954_v19, 0.0  ;;  %v6869_v28 = vpop.f32.mrb[224].mxu1  ;;  %v13117_v19 = vmax.f32 %v13116_v0, 0.0 }
 0x9bd   : > { %7001 = vst [vmem:[%s12834_s24 + $0x60] sm:$0xff] %v6977_v34  ;;  %v6870_v61 = vadd.f32 %v6869_v28, %v12809_v51  ;;  %v6871_v8 = vpop.f32.mrb[225].mxu1  ;;  %v13118_v28 = vld [vmem:[#allocation13_spill] sm:$0xff] }
 0x9be   : > { %7002 = vst [vmem:[%s12834_s24 + $0x68] sm:$0xff] %v6978_v22  ;;  %v6872_v57 = vadd.f32 %v6871_v8, %v12815_v21  ;;  %v6873_v3 = vpop.f32.mrb[226].mxu1 }
 0x9bf   : > { %v6957_v24 = vadd.f32 %v6870_v61, %v13101_v62  ;;  %v6874_v16 = vadd.f32 %v6873_v3, %v12809_v51  ;;  %v6875_v27 = vpop.f32.mrb[227].mxu1  ;;  %v13119_v61 = vmax.f32 %v13118_v28, 0.0 }
 0x9c0   : > { %v6958_v15 = vadd.f32 %v6872_v57, %v13102_v38  ;;  %v6876_v18 = vadd.f32 %v6875_v27, %v12815_v21 }
 0x9c1   : > { %v6981_v46 = vmax.f32 %v6957_v24, 0.0  ;;  %v6961_v26 = vadd.f32 %v6874_v16, %v13103_v10 }
 0x9c2   : > { %v6982_v14 = vmax.f32 %v6958_v15, 0.0  ;;  %v6962_v42 = vadd.f32 %v6876_v18, %v13104_v5 }
 0x9c3   : > { %7005 = vst [vmem:[%s12834_s24 + $0x80] sm:$0xff] %v6981_v46  ;;  %v6985_v36 = vmax.f32 %v6961_v26, 0.0 }
 0x9c4   : > { %7006 = vst [vmem:[%s12834_s24 + $0x88] sm:$0xff] %v6982_v14  ;;  %v6986_v35 = vmax.f32 %v6962_v42, 0.0 }
 0x9c5   : > { %7009 = vst [vmem:[%s12834_s24 + $0xa0] sm:$0xff] %v6985_v36 }
 0x9c6   : > { %7010 = vst [vmem:[%s12834_s24 + $0xa8] sm:$0xff] %v6986_v35 }
 0x9cc   : > { %v6922_v51 = vpop.f32.mrb[228].mxu1 }
 0x9cd   : > { %v6923_v40 = vadd.f32 %v6922_v51, %v12812_v60  ;;  %v6924_v21 = vpop.f32.mrb[229].mxu1 }
 0x9ce   : > { %v6925_v44 = vadd.f32 %v6924_v21, %v12818_v25  ;;  %v6926_v43 = vpop.f32.mrb[230].mxu1 }
 0x9cf   : > { %v6951_v4 = vadd.f32 %v6923_v40, %v13105_v9  ;;  %v6927_v63 = vadd.f32 %v6926_v43, %v12812_v60  ;;  %v6928_v23 = vpop.f32.mrb[231].mxu1 }
 0x9d0   : > { %v6952_v11 = vadd.f32 %v6925_v44, %v13107_v47  ;;  %v6929_v54 = vadd.f32 %v6928_v23, %v12818_v25 }
 0x9d1   : > { %v6975_v59 = vmax.f32 %v6951_v4, 0.0  ;;  %v6955_v2 = vadd.f32 %v6927_v63, %v13109_v56 }
 0x9d2   : > { %v6976_v6 = vmax.f32 %v6952_v11, 0.0  ;;  %v6956_v48 = vadd.f32 %v6929_v54, %v13111_v53 }
 0x9d3   : > { %6999 = vst [vmem:[%s12834_s24 + $0x50] sm:$0xff] %v6975_v59  ;;  %v6979_v45 = vmax.f32 %v6955_v2, 0.0 }
 0x9d4   : > { %7000 = vst [vmem:[%s12834_s24 + $0x58] sm:$0xff] %v6976_v6  ;;  %v6980_v12 = vmax.f32 %v6956_v48, 0.0  ;;  %v6932_v50 = vpop.f32.mrb[232].mxu1 }
 0x9d5   : > { %7003 = vst [vmem:[%s12834_s24 + $0x70] sm:$0xff] %v6979_v45  ;;  %v6933_v49 = vadd.f32 %v6932_v50, %v12812_v60  ;;  %v6934_v13 = vpop.f32.mrb[233].mxu1 }
 0x9d6   : > { %7004 = vst [vmem:[%s12834_s24 + $0x78] sm:$0xff] %v6980_v12  ;;  %v6935_v20 = vadd.f32 %v6934_v13, %v12818_v25  ;;  %v6936_v41 = vpop.f32.mrb[234].mxu1 }
 0x9d7   : > { %v6959_v37 = vadd.f32 %v6933_v49, %v13113_v1  ;;  %v6937_v31 = vadd.f32 %v6936_v41, %v12812_v60  ;;  %v6938_v30 = vpop.f32.mrb[235].mxu1 }
 0x9d8   : > { %v6960_v29 = vadd.f32 %v6935_v20, %v13115_v39  ;;  %v6939_v55 = vadd.f32 %v6938_v30, %v12818_v25 }
 0x9d9   : > { %v6983_v32 = vmax.f32 %v6959_v37, 0.0  ;;  %v6963_v34 = vadd.f32 %v6937_v31, %v13117_v19 }
 0x9da   : > { %v6984_v22 = vmax.f32 %v6960_v29, 0.0  ;;  %v6964_v8 = vadd.f32 %v6939_v55, %v13119_v61 }
 0x9db   : > { %7007 = vst [vmem:[%s12834_s24 + $0x90] sm:$0xff] %v6983_v32  ;;  %v6987_v57 = vmax.f32 %v6963_v34, 0.0 }
 0x9dc   : > { %7008 = vst [vmem:[%s12834_s24 + $0x98] sm:$0xff] %v6984_v22  ;;  %v6988_v3 = vmax.f32 %v6964_v8, 0.0 }
 0x9dd   : > { %7011 = vst [vmem:[%s12834_s24 + $0xb0] sm:$0xff] %v6987_v57 }
 0x9de   : > { %7012 = vst [vmem:[%s12834_s24 + $0xb8] sm:$0xff] %v6988_v3 }
 0x9df PF: > { %s19_s27 = sadd.s32 1, %s9978_s27  }
 0x9e0   : > { %p16_p3 = scmp.ge.s32.totalorder %s19_s27, 4  }
 0x9e2   :  { %18 = sbr.rel (!%p16_p3) target bundleno = 1 (0x1), region = 123 }
 0x9e9   :  { %7034 = vsyncpa [#allocation4], 1 }
 0x9ea   :  { %7036 = vsyncpa [#allocation4 + $0x1], 1 }

</bundles_post_ra>
